<compile_context>
chip_gen: v5e
topology: v5e:2x2
jax: 0.10.0
libtpu: 0.0.40
codegen_flags: <defaults>
</compile_context>

<pallas_src>
import jax
import jax.numpy as jnp
from jax.experimental import pallas as pl
from jax.experimental.pallas import tpu as pltpu

PADM = 2  # max padding used by any conv in the module (the 5x5 convs)


def _round_up(x, m):
    return ((x + m - 1) // m) * m


# ------------------------------ fused kernel ---------------------------------

def _make_fused_kernel(C, Cr, R, H, W, L, layout):
    HP, WP = H + 2 * PADM, W + 2 * PADM
    HPWP = HP * WP
    assert L >= HPWP and L % 128 == 0
    # Roll wrap-around safety: min interior flat index is PADM*WP + PADM and the
    # largest |tap offset| is PADM*WP + PADM, so interior reads stay in [0, HPWP).
    assert all(abs(dh * WP + dw) <= PADM * WP + PADM
               for dh in range(-PADM, PADM + 1) for dw in range(-PADM, PADM + 1))

    def shift(v, dh, dw):
        off = dh * WP + dw
        if off == 0:
            return v
        # s[:, i] == v[:, i + off] for every interior flat index i; wrap-around
        # only pollutes halo / lane padding, which the mask re-zeroes.
        return jnp.roll(v, -off, axis=-1)  # static lane rotation

    def kernel(x_ref, mask_ref, w_ref, o_ref):
        def getw(name):
            off, r, c = layout[name]
            return w_ref[0:r, off:off + c]

        x = x_ref[0]          # (C, L); halo and lane padding are exactly zero
        mask = mask_ref[...]  # (1, L); 1 on the HxW interior, else 0

        # --- LightweightMultiScaleFeatureFusion: one pass over 25 taps -------
        g5w, g3w, g1w = getw('g5_w'), getw('g3_w'), getw('g1_w')
        P5 = [jnp.zeros((R, L), jnp.float32) for _ in range(Cr)]
        P3 = [jnp.zeros((R, L), jnp.float32) for _ in range(Cr)]
        P1 = [jnp.zeros((R, L), jnp.float32) for _ in range(Cr)]
        for dh in range(-PADM, PADM + 1):
            for dw in range(-PADM, PADM + 1):
                sh = shift(x, dh, dw)                      # shared by all branches
                t5 = (dh + 2) * 5 + (dw + 2)
                in3 = abs(dh) <= 1 and abs(dw) <= 1
                t3 = (dh + 1) * 3 + (dw + 1) if in3 else 0
                for g in range(Cr):
                    rows = sh[g * R:(g + 1) * R, :]        # group g's input chans
                    P5[g] = P5[g] + g5w[g * R:(g + 1) * R, t5:t5 + 1] * rows
                    if in3:
                        P3[g] = P3[g] + g3w[g * R:(g + 1) * R, t3:t3 + 1] * rows
                    if dh == 0 and dw == 0:
                        P1[g] = P1[g] + g1w[g * R:(g + 1) * R, 0:1] * rows

        def branch(P, gb_name, qw_name, qb_name):
            gb, qw, qb = getw(gb_name), getw(qw_name), getw(qb_name)
            acc = jnp.zeros((C, L), jnp.float32) + qb
            for g in range(Cr):
                s = P[g][0:1, :]
                for r in range(1, R):                      # VALU row-sum, no XLU
                    s = s + P[g][r:r + 1, :]
                m_g = jnp.maximum(gb[g:g + 1, 0:1] + s, 0.0)
                acc = acc + qw[:, g:g + 1] * m_g
            return acc

        xf = (branch(P1, 'g1_b', 'q1_w', 'q1_b')
              + branch(P3, 'g3_b', 'q3_w', 'q3_b')
              + branch(P5, 'g5_b', 'q5_w', 'q5_b')) * mask  # zero halo downstream

        # --- conv helpers for the predict_a chain ----------------------------
        def dwconv(xin, wname, bname, k):
            w, b = getw(wname), getw(bname)                # (C, k*k), (C, 1)
            p = (k - 1) // 2
            acc = jnp.zeros((C, L), jnp.float32) + b
            for dh in range(-p, p + 1):
                for dw in range(-p, p + 1):
                    t = (dh + p) * k + (dw + p)
                    acc = acc + w[:, t:t + 1] * shift(xin, dh, dw)
            return acc

        def full_conv(xin, wname, bname, k, relu=False):
            # dense KxK conv C -> C (the module's "pointwise" conv is a full
            # KxK conv).  w: (C, C*k*k) laid out [ci*k*k + t].
            w, b = getw(wname), getw(bname)
            p = (k - 1) // 2
            kk = k * k
            acc = jnp.zeros((C, L), jnp.float32) + b
            for dh in range(-p, p + 1):
                for dw in range(-p, p + 1):
                    t = (dh + p) * k + (dw + p)
                    sh = shift(xin, dh, dw)
                    for ci in range(C):
                        acc = acc + w[:, ci * kk + t:ci * kk + t + 1] * sh[ci:ci + 1, :]
            if relu:
                acc = jnp.maximum(acc, 0.0)
            return acc

        def conv1x1(xin, wname, bname, cin, cout):
            w, b = getw(wname), getw(bname)                # (cout, cin), (cout, 1)
            acc = jnp.zeros((cout, L), jnp.float32) + b
            for ci in range(cin):
                acc = acc + w[:, ci:ci + 1] * xin[ci:ci + 1, :]
            return acc

        # --- predict_a: DSC(5) -> relu -> DSC(3) -> relu -> 1x1 -> sigmoid ---
        d1 = dwconv(xf, 'd5_w', 'd5_b', 5) * mask
        p1 = full_conv(d1, 'p5_w', 'p5_b', 5, relu=True) * mask
        d2 = dwconv(p1, 'd3_w', 'd3_b', 3) * mask
        # p2 / a stay unmasked on purpose: xc below is exactly zero on halo /
        # lane padding, so halo garbage in `a` never reaches the output.
        p2 = full_conv(d2, 'p3_w', 'p3_b', 3, relu=True)
        a = jax.nn.sigmoid(conv1x1(p2, 'pa_w', 'pa_b', C, 3))   # (3, L)

        # --- curve adjustment (pure VPU, lane-dense) -------------------------
        xc = jnp.maximum(xf, 0.0) - jnp.maximum(xf - 1.0, 0.0)  # clamp to [0, 1]
        for i in range(3):
            ai = a[i:i + 1, :]
            xc = xc + ai * xc * (1.0 - xc)

        o_ref[...] = xc[None]   # single unmasked lane-dense store per grid step

    return kernel


# -------------------------- parameters (torch layout) -------------------------

def init_params(key, channel, reduction=4):
    """Deterministic synthetic parameters matching CurveCALayerrh(channel) shapes."""
    C = channel
    assert C % reduction == 0, "channel must be divisible by reduction"
    Cr = C // reduction
    assert C % Cr == 0, "channel must be divisible by channel // reduction"
    R = C // Cr
    keys = iter(jax.random.split(key, 32))

    def rnd(shape, scale=0.1):
        return scale * jax.random.normal(next(keys), shape, jnp.float32)

    p = {}
    for k in (1, 3, 5):
        p[f'f{k}g_w'] = rnd((Cr, R, k, k))      # grouped conv weight (O, I/G, kh, kw)
        p[f'f{k}g_b'] = rnd((Cr,))
        p[f'f{k}p_w'] = rnd((C, Cr, 1, 1))      # 1x1 conv
        p[f'f{k}p_b'] = rnd((C,))
    for k in (5, 3):
        p[f'd{k}_w'] = rnd((C, 1, k, k))        # depthwise
        p[f'd{k}_b'] = rnd((C,))
        p[f'p{k}_w'] = rnd((C, C, k, k))        # "pointwise" (actually full KxK)
        p[f'p{k}_b'] = rnd((C,))
    p['pa_w'] = rnd((3, C, 1, 1))
    p['pa_b'] = rnd((3,))
    return p


def _pack_weights(p, C, Cr, R):
    """Pack every weight/bias into ONE (8, lanes) f32 slab; each tensor gets its
    own 128-lane-aligned tile.  Returns (slab, {name: (col_off, rows, cols)})."""
    def r2(x, shape):
        return jnp.asarray(x, jnp.float32).reshape(shape)

    entries = []
    for k in (1, 3, 5):
        entries += [(f'g{k}_w', r2(p[f'f{k}g_w'], (Cr * R, k * k))),
                    (f'g{k}_b', r2(p[f'f{k}g_b'], (Cr, 1))),
                    (f'q{k}_w', r2(p[f'f{k}p_w'], (C, Cr))),
                    (f'q{k}_b', r2(p[f'f{k}p_b'], (C, 1)))]
    for k in (5, 3):
        entries += [(f'd{k}_w', r2(p[f'd{k}_w'], (C, k * k))),
                    (f'd{k}_b', r2(p[f'd{k}_b'], (C, 1))),
                    (f'p{k}_w', r2(p[f'p{k}_w'], (C, C * k * k))),
                    (f'p{k}_b', r2(p[f'p{k}_b'], (C, 1)))]
    entries += [('pa_w', r2(p['pa_w'], (3, C))), ('pa_b', r2(p['pa_b'], (3, 1)))]

    layout = {}
    col = 0
    for name, a in entries:
        rows, cols = a.shape
        assert rows <= 8, "weight-slab packing assumes channel count <= 8"
        layout[name] = (col, rows, cols)
        col += _round_up(cols, 128)
    slab = jnp.zeros((8, col), jnp.float32)
    for name, a in entries:
        o, rows, cols = layout[name]
        slab = slab.at[0:rows, o:o + cols].set(a)
    return slab, layout


# ------------------------------ Pallas forward --------------------------------

def curve_ca_forward_pallas(x_nchw, p):
    N, C, H, W = x_nchw.shape
    Cr = p['f1g_w'].shape[0]
    R = C // Cr
    HP, WP = H + 2 * PADM, W + 2 * PADM
    HPWP = HP * WP
    L = _round_up(HPWP, 128)        # lane-dense: 400 -> 512

    slab, layout = _pack_weights(p, C, Cr, R)
    kernel = _make_fused_kernel(C, Cr, R, H, W, L, layout)

    # One max-halo pad for the whole fused forward; flatten spatial so the
    # 128-lane axis carries HP*WP, then pad lanes to a multiple of 128.
    xp = jnp.pad(x_nchw, ((0, 0), (0, 0), (PADM, PADM), (PADM, PADM)))
    xp = jnp.pad(xp.reshape(N, C, HPWP), ((0, 0), (0, 0), (0, L - HPWP)))

    row = jnp.arange(HP)[:, None]
    col = jnp.arange(WP)[None, :]
    mask = (((row >= PADM) & (row < PADM + H) & (col >= PADM) & (col < PADM + W))
            .astype(jnp.float32).reshape(1, HPWP))
    mask = jnp.pad(mask, ((0, 0), (0, L - HPWP)))

    flops_per_pix = 2 * (Cr * R * (1 + 9 + 25) + 3 * Cr * C
                         + C * 25 + C * C * 25 + C * 9 + C * C * 9 + 3 * C) + 20 * C
    cost = pl.CostEstimate(flops=int(N * L * flops_per_pix),
                           transcendentals=int(N * L * 3),
                           bytes_accessed=int(4 * (2 * N * C * L + slab.size + L)))

    out = pl.pallas_call(
        kernel,
        out_shape=jax.ShapeDtypeStruct((N, C, L), jnp.float32),
        grid=(N,),
        in_specs=[pl.BlockSpec((1, C, L), lambda n: (n, 0, 0)),
                  pl.BlockSpec((1, L), lambda n: (0, 0)),
                  pl.BlockSpec(slab.shape, lambda n: (0, 0))],
        out_specs=pl.BlockSpec((1, C, L), lambda n: (n, 0, 0)),
        compiler_params=pltpu.CompilerParams(
            dimension_semantics=("parallel",)),
        cost_estimate=cost,
    )(xp, mask, slab)

    # layout plumbing only: drop lane padding, un-flatten, crop the halo
    return (out[:, :, :HPWP].reshape(N, C, HP, WP)
            [:, :, PADM:PADM + H, PADM:PADM + W])


# -------------------- pure-JAX reference (same params) ------------------------

def _conv_ref(x, w, b, pad, groups=1, act='none'):
    out = jax.lax.conv_general_dilated(
        x, w, (1, 1), [(pad, pad), (pad, pad)],
        dimension_numbers=('NCHW', 'OIHW', 'NCHW'),
        feature_group_count=groups,
        precision=jax.lax.Precision.HIGHEST)
    out = out + b[None, :, None, None]
    if act == 'relu':
        out = jnp.maximum(out, 0.0)
    elif act == 'sigmoid':
        out = jax.nn.sigmoid(out)
    return out


def curve_ca_forward_ref(x, p):
    C = x.shape[1]
    Cr = p['f1g_w'].shape[0]

    def branch(k, pad):
        m = _conv_ref(x, p[f'f{k}g_w'], p[f'f{k}g_b'], pad, groups=Cr, act='relu')
        return _conv_ref(m, p[f'f{k}p_w'], p[f'f{k}p_b'], 0)

    xf = branch(1, 0) + branch(3, 1) + branch(5, 2)
    d1 = _conv_ref(xf, p['d5_w'], p['d5_b'], 2, groups=C)
    p1 = _conv_ref(d1, p['p5_w'], p['p5_b'], 2, act='relu')
    d2 = _conv_ref(p1, p['d3_w'], p['d3_b'], 1, groups=C)
    p2 = _conv_ref(d2, p['p3_w'], p['p3_b'], 1, act='relu')
    a = _conv_ref(p2, p['pa_w'], p['pa_b'], 0, act='sigmoid')

    xc = jnp.maximum(xf, 0.0) - jnp.maximum(xf - 1.0, 0.0)
    for i in range(3):
        xc = xc + a[:, i:i + 1] * xc * (1.0 - xc)
    return xc


# ----------------------------------- main --------------------------------------

if __name__ == "__main__":
    key = jax.random.PRNGKey(0)
    kx, kp = jax.random.split(key)
    N, C, H, W = 2, 4, 16, 16
    x = jax.random.normal(kx, (N, C, H, W), jnp.float32)
    params = init_params(kp, C)

    out = jax.jit(curve_ca_forward_pallas)(x, params)
    out = jax.block_until_ready(out)
    assert out.shape == (N, C, H, W)

    ref = curve_ca_forward_ref(x, params)
    max_err = float(jnp.max(jnp.abs(out - ref)))
    assert max_err < 1e-4, f"max abs err vs reference: {max_err}"

    print("KERNEL_OK")
</pallas_src>

<mosaic_0001>
module attributes {stable_mosaic.version = 11 : i64} {
  func.func @kernel(%arg0: i32, %arg1: memref<1x4x512xf32, #tpu.memory_space<vmem>>, %arg2: memref<1x512xf32, #tpu.memory_space<vmem>>, %arg3: memref<8x2816xf32, #tpu.memory_space<vmem>>, %arg4: memref<1x4x512xf32, #tpu.memory_space<vmem>>) attributes {dimension_semantics = [#tpu.dimension_semantics<parallel>], iteration_bounds = array<i64: 2>, scalar_prefetch = 0 : i64, scratch_operands = 0 : i64, tpu.core_type = #tpu.core_type<tc>, window_params = [{transform_indices = @transform_0, window_bounds = array<i64: 1, 4, 512>}, {pipeline_mode = #tpu.pipeline_mode<synchronous>, transform_indices = @transform_1, window_bounds = array<i64: 1, 512>}, {pipeline_mode = #tpu.pipeline_mode<synchronous>, transform_indices = @transform_2, window_bounds = array<i64: 8, 2816>}, {transform_indices = @transform_3, window_bounds = array<i64: 1, 4, 512>}]} {
    %c0 = arith.constant 0 : index
    %c0_0 = arith.constant 0 : index
    %c0_1 = arith.constant 0 : index
    %0 = vector.load %arg1[%c0, %c0_0, %c0_1] : memref<1x4x512xf32, #tpu.memory_space<vmem>>, vector<1x4x512xf32>
    %1 = vector.shape_cast %0 : vector<1x4x512xf32> to vector<4x512xf32>
    %c0_2 = arith.constant 0 : index
    %c0_3 = arith.constant 0 : index
    %2 = vector.load %arg2[%c0_2, %c0_3] : memref<1x512xf32, #tpu.memory_space<vmem>>, vector<1x512xf32>
    %c0_4 = arith.constant 0 : index
    %c1024 = arith.constant 1024 : index
    %3 = vector.load %arg3[%c0_4, %c1024] : memref<8x2816xf32, #tpu.memory_space<vmem>>, vector<4x25xf32>
    %c0_5 = arith.constant 0 : index
    %c512 = arith.constant 512 : index
    %4 = vector.load %arg3[%c0_5, %c512] : memref<8x2816xf32, #tpu.memory_space<vmem>>, vector<4x9xf32>
    %c0_6 = arith.constant 0 : index
    %c0_7 = arith.constant 0 : index
    %5 = vector.load %arg3[%c0_6, %c0_7] : memref<8x2816xf32, #tpu.memory_space<vmem>>, vector<4x1xf32>
    %cst = arith.constant 0.000000e+00 : f32
    %6 = vector.broadcast %cst : f32 to vector<4x512xf32>
    %cst_8 = arith.constant 0.000000e+00 : f32
    %7 = vector.broadcast %cst_8 : f32 to vector<4x512xf32>
    %cst_9 = arith.constant 0.000000e+00 : f32
    %8 = vector.broadcast %cst_9 : f32 to vector<4x512xf32>
    %9 = vector.extract_strided_slice %1 {offsets = [0, 470], sizes = [4, 42], strides = [1, 1]} : vector<4x512xf32> to vector<4x42xf32>
    %10 = vector.extract_strided_slice %1 {offsets = [0, 0], sizes = [4, 470], strides = [1, 1]} : vector<4x512xf32> to vector<4x470xf32>
    %11 = tpu.concatenate %9, %10 in 1 : vector<4x42xf32>, vector<4x470xf32> -> vector<4x512xf32>
    %12 = vector.extract_strided_slice %3 {offsets = [0, 0], sizes = [4, 1], strides = [1, 1]} : vector<4x25xf32> to vector<4x1xf32>
    %13 = vector.broadcast %12 : vector<4x1xf32> to vector<4x512xf32>
    %14 = arith.mulf %13, %11 : vector<4x512xf32>
    %15 = arith.addf %6, %14 : vector<4x512xf32>
    %16 = vector.extract_strided_slice %1 {offsets = [0, 471], sizes = [4, 41], strides = [1, 1]} : vector<4x512xf32> to vector<4x41xf32>
    %17 = vector.extract_strided_slice %1 {offsets = [0, 0], sizes = [4, 471], strides = [1, 1]} : vector<4x512xf32> to vector<4x471xf32>
    %18 = tpu.concatenate %16, %17 in 1 : vector<4x41xf32>, vector<4x471xf32> -> vector<4x512xf32>
    %19 = vector.extract_strided_slice %3 {offsets = [0, 1], sizes = [4, 1], strides = [1, 1]} : vector<4x25xf32> to vector<4x1xf32>
    %20 = vector.broadcast %19 : vector<4x1xf32> to vector<4x512xf32>
    %21 = arith.mulf %20, %18 : vector<4x512xf32>
    %22 = arith.addf %15, %21 : vector<4x512xf32>
    %23 = vector.extract_strided_slice %1 {offsets = [0, 472], sizes = [4, 40], strides = [1, 1]} : vector<4x512xf32> to vector<4x40xf32>
    %24 = vector.extract_strided_slice %1 {offsets = [0, 0], sizes = [4, 472], strides = [1, 1]} : vector<4x512xf32> to vector<4x472xf32>
    %25 = tpu.concatenate %23, %24 in 1 : vector<4x40xf32>, vector<4x472xf32> -> vector<4x512xf32>
    %26 = vector.extract_strided_slice %3 {offsets = [0, 2], sizes = [4, 1], strides = [1, 1]} : vector<4x25xf32> to vector<4x1xf32>
    %27 = vector.broadcast %26 : vector<4x1xf32> to vector<4x512xf32>
    %28 = arith.mulf %27, %25 : vector<4x512xf32>
    %29 = arith.addf %22, %28 : vector<4x512xf32>
    %30 = vector.extract_strided_slice %1 {offsets = [0, 473], sizes = [4, 39], strides = [1, 1]} : vector<4x512xf32> to vector<4x39xf32>
    %31 = vector.extract_strided_slice %1 {offsets = [0, 0], sizes = [4, 473], strides = [1, 1]} : vector<4x512xf32> to vector<4x473xf32>
    %32 = tpu.concatenate %30, %31 in 1 : vector<4x39xf32>, vector<4x473xf32> -> vector<4x512xf32>
    %33 = vector.extract_strided_slice %3 {offsets = [0, 3], sizes = [4, 1], strides = [1, 1]} : vector<4x25xf32> to vector<4x1xf32>
    %34 = vector.broadcast %33 : vector<4x1xf32> to vector<4x512xf32>
    %35 = arith.mulf %34, %32 : vector<4x512xf32>
    %36 = arith.addf %29, %35 : vector<4x512xf32>
    %37 = vector.extract_strided_slice %1 {offsets = [0, 474], sizes = [4, 38], strides = [1, 1]} : vector<4x512xf32> to vector<4x38xf32>
    %38 = vector.extract_strided_slice %1 {offsets = [0, 0], sizes = [4, 474], strides = [1, 1]} : vector<4x512xf32> to vector<4x474xf32>
    %39 = tpu.concatenate %37, %38 in 1 : vector<4x38xf32>, vector<4x474xf32> -> vector<4x512xf32>
    %40 = vector.extract_strided_slice %3 {offsets = [0, 4], sizes = [4, 1], strides = [1, 1]} : vector<4x25xf32> to vector<4x1xf32>
    %41 = vector.broadcast %40 : vector<4x1xf32> to vector<4x512xf32>
    %42 = arith.mulf %41, %39 : vector<4x512xf32>
    %43 = arith.addf %36, %42 : vector<4x512xf32>
    %44 = vector.extract_strided_slice %1 {offsets = [0, 490], sizes = [4, 22], strides = [1, 1]} : vector<4x512xf32> to vector<4x22xf32>
    %45 = vector.extract_strided_slice %1 {offsets = [0, 0], sizes = [4, 490], strides = [1, 1]} : vector<4x512xf32> to vector<4x490xf32>
    %46 = tpu.concatenate %44, %45 in 1 : vector<4x22xf32>, vector<4x490xf32> -> vector<4x512xf32>
    %47 = vector.extract_strided_slice %3 {offsets = [0, 5], sizes = [4, 1], strides = [1, 1]} : vector<4x25xf32> to vector<4x1xf32>
    %48 = vector.broadcast %47 : vector<4x1xf32> to vector<4x512xf32>
    %49 = arith.mulf %48, %46 : vector<4x512xf32>
    %50 = arith.addf %43, %49 : vector<4x512xf32>
    %51 = vector.extract_strided_slice %1 {offsets = [0, 491], sizes = [4, 21], strides = [1, 1]} : vector<4x512xf32> to vector<4x21xf32>
    %52 = vector.extract_strided_slice %1 {offsets = [0, 0], sizes = [4, 491], strides = [1, 1]} : vector<4x512xf32> to vector<4x491xf32>
    %53 = tpu.concatenate %51, %52 in 1 : vector<4x21xf32>, vector<4x491xf32> -> vector<4x512xf32>
    %54 = vector.extract_strided_slice %3 {offsets = [0, 6], sizes = [4, 1], strides = [1, 1]} : vector<4x25xf32> to vector<4x1xf32>
    %55 = vector.broadcast %54 : vector<4x1xf32> to vector<4x512xf32>
    %56 = arith.mulf %55, %53 : vector<4x512xf32>
    %57 = arith.addf %50, %56 : vector<4x512xf32>
    %58 = vector.extract_strided_slice %4 {offsets = [0, 0], sizes = [4, 1], strides = [1, 1]} : vector<4x9xf32> to vector<4x1xf32>
    %59 = vector.broadcast %58 : vector<4x1xf32> to vector<4x512xf32>
    %60 = arith.mulf %59, %53 : vector<4x512xf32>
    %61 = arith.addf %7, %60 : vector<4x512xf32>
    %62 = vector.extract_strided_slice %1 {offsets = [0, 492], sizes = [4, 20], strides = [1, 1]} : vector<4x512xf32> to vector<4x20xf32>
    %63 = vector.extract_strided_slice %1 {offsets = [0, 0], sizes = [4, 492], strides = [1, 1]} : vector<4x512xf32> to vector<4x492xf32>
    %64 = tpu.concatenate %62, %63 in 1 : vector<4x20xf32>, vector<4x492xf32> -> vector<4x512xf32>
    %65 = vector.extract_strided_slice %3 {offsets = [0, 7], sizes = [4, 1], strides = [1, 1]} : vector<4x25xf32> to vector<4x1xf32>
    %66 = vector.broadcast %65 : vector<4x1xf32> to vector<4x512xf32>
    %67 = arith.mulf %66, %64 : vector<4x512xf32>
    %68 = arith.addf %57, %67 : vector<4x512xf32>
    %69 = vector.extract_strided_slice %4 {offsets = [0, 1], sizes = [4, 1], strides = [1, 1]} : vector<4x9xf32> to vector<4x1xf32>
    %70 = vector.broadcast %69 : vector<4x1xf32> to vector<4x512xf32>
    %71 = arith.mulf %70, %64 : vector<4x512xf32>
    %72 = arith.addf %61, %71 : vector<4x512xf32>
    %73 = vector.extract_strided_slice %1 {offsets = [0, 493], sizes = [4, 19], strides = [1, 1]} : vector<4x512xf32> to vector<4x19xf32>
    %74 = vector.extract_strided_slice %1 {offsets = [0, 0], sizes = [4, 493], strides = [1, 1]} : vector<4x512xf32> to vector<4x493xf32>
    %75 = tpu.concatenate %73, %74 in 1 : vector<4x19xf32>, vector<4x493xf32> -> vector<4x512xf32>
    %76 = vector.extract_strided_slice %3 {offsets = [0, 8], sizes = [4, 1], strides = [1, 1]} : vector<4x25xf32> to vector<4x1xf32>
    %77 = vector.broadcast %76 : vector<4x1xf32> to vector<4x512xf32>
    %78 = arith.mulf %77, %75 : vector<4x512xf32>
    %79 = arith.addf %68, %78 : vector<4x512xf32>
    %80 = vector.extract_strided_slice %4 {offsets = [0, 2], sizes = [4, 1], strides = [1, 1]} : vector<4x9xf32> to vector<4x1xf32>
    %81 = vector.broadcast %80 : vector<4x1xf32> to vector<4x512xf32>
    %82 = arith.mulf %81, %75 : vector<4x512xf32>
    %83 = arith.addf %72, %82 : vector<4x512xf32>
    %84 = vector.extract_strided_slice %1 {offsets = [0, 494], sizes = [4, 18], strides = [1, 1]} : vector<4x512xf32> to vector<4x18xf32>
    %85 = vector.extract_strided_slice %1 {offsets = [0, 0], sizes = [4, 494], strides = [1, 1]} : vector<4x512xf32> to vector<4x494xf32>
    %86 = tpu.concatenate %84, %85 in 1 : vector<4x18xf32>, vector<4x494xf32> -> vector<4x512xf32>
    %87 = vector.extract_strided_slice %3 {offsets = [0, 9], sizes = [4, 1], strides = [1, 1]} : vector<4x25xf32> to vector<4x1xf32>
    %88 = vector.broadcast %87 : vector<4x1xf32> to vector<4x512xf32>
    %89 = arith.mulf %88, %86 : vector<4x512xf32>
    %90 = arith.addf %79, %89 : vector<4x512xf32>
    %91 = vector.extract_strided_slice %1 {offsets = [0, 510], sizes = [4, 2], strides = [1, 1]} : vector<4x512xf32> to vector<4x2xf32>
    %92 = vector.extract_strided_slice %1 {offsets = [0, 0], sizes = [4, 510], strides = [1, 1]} : vector<4x512xf32> to vector<4x510xf32>
    %93 = tpu.concatenate %91, %92 in 1 : vector<4x2xf32>, vector<4x510xf32> -> vector<4x512xf32>
    %94 = vector.extract_strided_slice %3 {offsets = [0, 10], sizes = [4, 1], strides = [1, 1]} : vector<4x25xf32> to vector<4x1xf32>
    %95 = vector.broadcast %94 : vector<4x1xf32> to vector<4x512xf32>
    %96 = arith.mulf %95, %93 : vector<4x512xf32>
    %97 = arith.addf %90, %96 : vector<4x512xf32>
    %98 = vector.extract_strided_slice %1 {offsets = [0, 511], sizes = [4, 1], strides = [1, 1]} : vector<4x512xf32> to vector<4x1xf32>
    %99 = vector.extract_strided_slice %1 {offsets = [0, 0], sizes = [4, 511], strides = [1, 1]} : vector<4x512xf32> to vector<4x511xf32>
    %100 = tpu.concatenate %98, %99 in 1 : vector<4x1xf32>, vector<4x511xf32> -> vector<4x512xf32>
    %101 = vector.extract_strided_slice %3 {offsets = [0, 11], sizes = [4, 1], strides = [1, 1]} : vector<4x25xf32> to vector<4x1xf32>
    %102 = vector.broadcast %101 : vector<4x1xf32> to vector<4x512xf32>
    %103 = arith.mulf %102, %100 : vector<4x512xf32>
    %104 = arith.addf %97, %103 : vector<4x512xf32>
    %105 = vector.extract_strided_slice %4 {offsets = [0, 3], sizes = [4, 1], strides = [1, 1]} : vector<4x9xf32> to vector<4x1xf32>
    %106 = vector.broadcast %105 : vector<4x1xf32> to vector<4x512xf32>
    %107 = arith.mulf %106, %100 : vector<4x512xf32>
    %108 = arith.addf %83, %107 : vector<4x512xf32>
    %109 = vector.extract_strided_slice %3 {offsets = [0, 12], sizes = [4, 1], strides = [1, 1]} : vector<4x25xf32> to vector<4x1xf32>
    %110 = vector.broadcast %109 : vector<4x1xf32> to vector<4x512xf32>
    %111 = arith.mulf %110, %1 : vector<4x512xf32>
    %112 = arith.addf %104, %111 : vector<4x512xf32>
    %113 = vector.extract_strided_slice %4 {offsets = [0, 4], sizes = [4, 1], strides = [1, 1]} : vector<4x9xf32> to vector<4x1xf32>
    %114 = vector.broadcast %113 : vector<4x1xf32> to vector<4x512xf32>
    %115 = arith.mulf %114, %1 : vector<4x512xf32>
    %116 = arith.addf %108, %115 : vector<4x512xf32>
    %117 = vector.broadcast %5 : vector<4x1xf32> to vector<4x512xf32>
    %118 = arith.mulf %117, %1 : vector<4x512xf32>
    %119 = arith.addf %8, %118 : vector<4x512xf32>
    %120 = vector.extract_strided_slice %1 {offsets = [0, 1], sizes = [4, 511], strides = [1, 1]} : vector<4x512xf32> to vector<4x511xf32>
    %121 = vector.extract_strided_slice %1 {offsets = [0, 0], sizes = [4, 1], strides = [1, 1]} : vector<4x512xf32> to vector<4x1xf32>
    %122 = tpu.concatenate %120, %121 in 1 : vector<4x511xf32>, vector<4x1xf32> -> vector<4x512xf32>
    %123 = vector.extract_strided_slice %3 {offsets = [0, 13], sizes = [4, 1], strides = [1, 1]} : vector<4x25xf32> to vector<4x1xf32>
    %124 = vector.broadcast %123 : vector<4x1xf32> to vector<4x512xf32>
    %125 = arith.mulf %124, %122 : vector<4x512xf32>
    %126 = arith.addf %112, %125 : vector<4x512xf32>
    %127 = vector.extract_strided_slice %4 {offsets = [0, 5], sizes = [4, 1], strides = [1, 1]} : vector<4x9xf32> to vector<4x1xf32>
    %128 = vector.broadcast %127 : vector<4x1xf32> to vector<4x512xf32>
    %129 = arith.mulf %128, %122 : vector<4x512xf32>
    %130 = arith.addf %116, %129 : vector<4x512xf32>
    %131 = vector.extract_strided_slice %1 {offsets = [0, 2], sizes = [4, 510], strides = [1, 1]} : vector<4x512xf32> to vector<4x510xf32>
    %132 = vector.extract_strided_slice %1 {offsets = [0, 0], sizes = [4, 2], strides = [1, 1]} : vector<4x512xf32> to vector<4x2xf32>
    %133 = tpu.concatenate %131, %132 in 1 : vector<4x510xf32>, vector<4x2xf32> -> vector<4x512xf32>
    %134 = vector.extract_strided_slice %3 {offsets = [0, 14], sizes = [4, 1], strides = [1, 1]} : vector<4x25xf32> to vector<4x1xf32>
    %135 = vector.broadcast %134 : vector<4x1xf32> to vector<4x512xf32>
    %136 = arith.mulf %135, %133 : vector<4x512xf32>
    %137 = arith.addf %126, %136 : vector<4x512xf32>
    %138 = vector.extract_strided_slice %1 {offsets = [0, 18], sizes = [4, 494], strides = [1, 1]} : vector<4x512xf32> to vector<4x494xf32>
    %139 = vector.extract_strided_slice %1 {offsets = [0, 0], sizes = [4, 18], strides = [1, 1]} : vector<4x512xf32> to vector<4x18xf32>
    %140 = tpu.concatenate %138, %139 in 1 : vector<4x494xf32>, vector<4x18xf32> -> vector<4x512xf32>
    %141 = vector.extract_strided_slice %3 {offsets = [0, 15], sizes = [4, 1], strides = [1, 1]} : vector<4x25xf32> to vector<4x1xf32>
    %142 = vector.broadcast %141 : vector<4x1xf32> to vector<4x512xf32>
    %143 = arith.mulf %142, %140 : vector<4x512xf32>
    %144 = arith.addf %137, %143 : vector<4x512xf32>
    %145 = vector.extract_strided_slice %1 {offsets = [0, 19], sizes = [4, 493], strides = [1, 1]} : vector<4x512xf32> to vector<4x493xf32>
    %146 = vector.extract_strided_slice %1 {offsets = [0, 0], sizes = [4, 19], strides = [1, 1]} : vector<4x512xf32> to vector<4x19xf32>
    %147 = tpu.concatenate %145, %146 in 1 : vector<4x493xf32>, vector<4x19xf32> -> vector<4x512xf32>
    %148 = vector.extract_strided_slice %3 {offsets = [0, 16], sizes = [4, 1], strides = [1, 1]} : vector<4x25xf32> to vector<4x1xf32>
    %149 = vector.broadcast %148 : vector<4x1xf32> to vector<4x512xf32>
    %150 = arith.mulf %149, %147 : vector<4x512xf32>
    %151 = arith.addf %144, %150 : vector<4x512xf32>
    %152 = vector.extract_strided_slice %4 {offsets = [0, 6], sizes = [4, 1], strides = [1, 1]} : vector<4x9xf32> to vector<4x1xf32>
    %153 = vector.broadcast %152 : vector<4x1xf32> to vector<4x512xf32>
    %154 = arith.mulf %153, %147 : vector<4x512xf32>
    %155 = arith.addf %130, %154 : vector<4x512xf32>
    %156 = vector.extract_strided_slice %1 {offsets = [0, 20], sizes = [4, 492], strides = [1, 1]} : vector<4x512xf32> to vector<4x492xf32>
    %157 = vector.extract_strided_slice %1 {offsets = [0, 0], sizes = [4, 20], strides = [1, 1]} : vector<4x512xf32> to vector<4x20xf32>
    %158 = tpu.concatenate %156, %157 in 1 : vector<4x492xf32>, vector<4x20xf32> -> vector<4x512xf32>
    %159 = vector.extract_strided_slice %3 {offsets = [0, 17], sizes = [4, 1], strides = [1, 1]} : vector<4x25xf32> to vector<4x1xf32>
    %160 = vector.broadcast %159 : vector<4x1xf32> to vector<4x512xf32>
    %161 = arith.mulf %160, %158 : vector<4x512xf32>
    %162 = arith.addf %151, %161 : vector<4x512xf32>
    %163 = vector.extract_strided_slice %4 {offsets = [0, 7], sizes = [4, 1], strides = [1, 1]} : vector<4x9xf32> to vector<4x1xf32>
    %164 = vector.broadcast %163 : vector<4x1xf32> to vector<4x512xf32>
    %165 = arith.mulf %164, %158 : vector<4x512xf32>
    %166 = arith.addf %155, %165 : vector<4x512xf32>
    %167 = vector.extract_strided_slice %1 {offsets = [0, 21], sizes = [4, 491], strides = [1, 1]} : vector<4x512xf32> to vector<4x491xf32>
    %168 = vector.extract_strided_slice %1 {offsets = [0, 0], sizes = [4, 21], strides = [1, 1]} : vector<4x512xf32> to vector<4x21xf32>
    %169 = tpu.concatenate %167, %168 in 1 : vector<4x491xf32>, vector<4x21xf32> -> vector<4x512xf32>
    %170 = vector.extract_strided_slice %3 {offsets = [0, 18], sizes = [4, 1], strides = [1, 1]} : vector<4x25xf32> to vector<4x1xf32>
    %171 = vector.broadcast %170 : vector<4x1xf32> to vector<4x512xf32>
    %172 = arith.mulf %171, %169 : vector<4x512xf32>
    %173 = arith.addf %162, %172 : vector<4x512xf32>
    %174 = vector.extract_strided_slice %4 {offsets = [0, 8], sizes = [4, 1], strides = [1, 1]} : vector<4x9xf32> to vector<4x1xf32>
    %175 = vector.broadcast %174 : vector<4x1xf32> to vector<4x512xf32>
    %176 = arith.mulf %175, %169 : vector<4x512xf32>
    %177 = arith.addf %166, %176 : vector<4x512xf32>
    %178 = vector.extract_strided_slice %1 {offsets = [0, 22], sizes = [4, 490], strides = [1, 1]} : vector<4x512xf32> to vector<4x490xf32>
    %179 = vector.extract_strided_slice %1 {offsets = [0, 0], sizes = [4, 22], strides = [1, 1]} : vector<4x512xf32> to vector<4x22xf32>
    %180 = tpu.concatenate %178, %179 in 1 : vector<4x490xf32>, vector<4x22xf32> -> vector<4x512xf32>
    %181 = vector.extract_strided_slice %3 {offsets = [0, 19], sizes = [4, 1], strides = [1, 1]} : vector<4x25xf32> to vector<4x1xf32>
    %182 = vector.broadcast %181 : vector<4x1xf32> to vector<4x512xf32>
    %183 = arith.mulf %182, %180 : vector<4x512xf32>
    %184 = arith.addf %173, %183 : vector<4x512xf32>
    %185 = vector.extract_strided_slice %1 {offsets = [0, 38], sizes = [4, 474], strides = [1, 1]} : vector<4x512xf32> to vector<4x474xf32>
    %186 = vector.extract_strided_slice %1 {offsets = [0, 0], sizes = [4, 38], strides = [1, 1]} : vector<4x512xf32> to vector<4x38xf32>
    %187 = tpu.concatenate %185, %186 in 1 : vector<4x474xf32>, vector<4x38xf32> -> vector<4x512xf32>
    %188 = vector.extract_strided_slice %3 {offsets = [0, 20], sizes = [4, 1], strides = [1, 1]} : vector<4x25xf32> to vector<4x1xf32>
    %189 = vector.broadcast %188 : vector<4x1xf32> to vector<4x512xf32>
    %190 = arith.mulf %189, %187 : vector<4x512xf32>
    %191 = arith.addf %184, %190 : vector<4x512xf32>
    %192 = vector.extract_strided_slice %1 {offsets = [0, 39], sizes = [4, 473], strides = [1, 1]} : vector<4x512xf32> to vector<4x473xf32>
    %193 = vector.extract_strided_slice %1 {offsets = [0, 0], sizes = [4, 39], strides = [1, 1]} : vector<4x512xf32> to vector<4x39xf32>
    %194 = tpu.concatenate %192, %193 in 1 : vector<4x473xf32>, vector<4x39xf32> -> vector<4x512xf32>
    %195 = vector.extract_strided_slice %3 {offsets = [0, 21], sizes = [4, 1], strides = [1, 1]} : vector<4x25xf32> to vector<4x1xf32>
    %196 = vector.broadcast %195 : vector<4x1xf32> to vector<4x512xf32>
    %197 = arith.mulf %196, %194 : vector<4x512xf32>
    %198 = arith.addf %191, %197 : vector<4x512xf32>
    %199 = vector.extract_strided_slice %1 {offsets = [0, 40], sizes = [4, 472], strides = [1, 1]} : vector<4x512xf32> to vector<4x472xf32>
    %200 = vector.extract_strided_slice %1 {offsets = [0, 0], sizes = [4, 40], strides = [1, 1]} : vector<4x512xf32> to vector<4x40xf32>
    %201 = tpu.concatenate %199, %200 in 1 : vector<4x472xf32>, vector<4x40xf32> -> vector<4x512xf32>
    %202 = vector.extract_strided_slice %3 {offsets = [0, 22], sizes = [4, 1], strides = [1, 1]} : vector<4x25xf32> to vector<4x1xf32>
    %203 = vector.broadcast %202 : vector<4x1xf32> to vector<4x512xf32>
    %204 = arith.mulf %203, %201 : vector<4x512xf32>
    %205 = arith.addf %198, %204 : vector<4x512xf32>
    %206 = vector.extract_strided_slice %1 {offsets = [0, 41], sizes = [4, 471], strides = [1, 1]} : vector<4x512xf32> to vector<4x471xf32>
    %207 = vector.extract_strided_slice %1 {offsets = [0, 0], sizes = [4, 41], strides = [1, 1]} : vector<4x512xf32> to vector<4x41xf32>
    %208 = tpu.concatenate %206, %207 in 1 : vector<4x471xf32>, vector<4x41xf32> -> vector<4x512xf32>
    %209 = vector.extract_strided_slice %3 {offsets = [0, 23], sizes = [4, 1], strides = [1, 1]} : vector<4x25xf32> to vector<4x1xf32>
    %210 = vector.broadcast %209 : vector<4x1xf32> to vector<4x512xf32>
    %211 = arith.mulf %210, %208 : vector<4x512xf32>
    %212 = arith.addf %205, %211 : vector<4x512xf32>
    %213 = vector.extract_strided_slice %1 {offsets = [0, 42], sizes = [4, 470], strides = [1, 1]} : vector<4x512xf32> to vector<4x470xf32>
    %214 = vector.extract_strided_slice %1 {offsets = [0, 0], sizes = [4, 42], strides = [1, 1]} : vector<4x512xf32> to vector<4x42xf32>
    %215 = tpu.concatenate %213, %214 in 1 : vector<4x470xf32>, vector<4x42xf32> -> vector<4x512xf32>
    %216 = vector.extract_strided_slice %3 {offsets = [0, 24], sizes = [4, 1], strides = [1, 1]} : vector<4x25xf32> to vector<4x1xf32>
    %217 = vector.broadcast %216 : vector<4x1xf32> to vector<4x512xf32>
    %218 = arith.mulf %217, %215 : vector<4x512xf32>
    %219 = arith.addf %212, %218 : vector<4x512xf32>
    %c0_10 = arith.constant 0 : index
    %c128 = arith.constant 128 : index
    %220 = vector.load %arg3[%c0_10, %c128] : memref<8x2816xf32, #tpu.memory_space<vmem>>, vector<1x1xf32>
    %c0_11 = arith.constant 0 : index
    %c256 = arith.constant 256 : index
    %221 = vector.load %arg3[%c0_11, %c256] : memref<8x2816xf32, #tpu.memory_space<vmem>>, vector<4x1xf32>
    %c0_12 = arith.constant 0 : index
    %c384 = arith.constant 384 : index
    %222 = vector.load %arg3[%c0_12, %c384] : memref<8x2816xf32, #tpu.memory_space<vmem>>, vector<4x1xf32>
    %cst_13 = arith.constant 0.000000e+00 : f32
    %223 = vector.broadcast %cst_13 : f32 to vector<4x512xf32>
    %224 = vector.broadcast %222 : vector<4x1xf32> to vector<4x512xf32>
    %225 = arith.addf %223, %224 : vector<4x512xf32>
    %226 = vector.extract_strided_slice %119 {offsets = [0, 0], sizes = [1, 512], strides = [1, 1]} : vector<4x512xf32> to vector<1x512xf32>
    %227 = vector.extract_strided_slice %119 {offsets = [1, 0], sizes = [1, 512], strides = [1, 1]} : vector<4x512xf32> to vector<1x512xf32>
    %228 = arith.addf %226, %227 : vector<1x512xf32>
    %229 = vector.extract_strided_slice %119 {offsets = [2, 0], sizes = [1, 512], strides = [1, 1]} : vector<4x512xf32> to vector<1x512xf32>
    %230 = arith.addf %228, %229 : vector<1x512xf32>
    %231 = vector.extract_strided_slice %119 {offsets = [3, 0], sizes = [1, 512], strides = [1, 1]} : vector<4x512xf32> to vector<1x512xf32>
    %232 = arith.addf %230, %231 : vector<1x512xf32>
    %233 = vector.broadcast %220 : vector<1x1xf32> to vector<1x512xf32>
    %234 = arith.addf %233, %232 : vector<1x512xf32>
    %cst_14 = arith.constant 0.000000e+00 : f32
    %235 = vector.broadcast %cst_14 : f32 to vector<1x512xf32>
    %236 = arith.maximumf %234, %235 : vector<1x512xf32>
    %237 = vector.broadcast %221 : vector<4x1xf32> to vector<4x512xf32>
    %238 = vector.broadcast %236 : vector<1x512xf32> to vector<4x512xf32>
    %239 = arith.mulf %237, %238 : vector<4x512xf32>
    %240 = arith.addf %225, %239 : vector<4x512xf32>
    %c0_15 = arith.constant 0 : index
    %c640 = arith.constant 640 : index
    %241 = vector.load %arg3[%c0_15, %c640] : memref<8x2816xf32, #tpu.memory_space<vmem>>, vector<1x1xf32>
    %c0_16 = arith.constant 0 : index
    %c768 = arith.constant 768 : index
    %242 = vector.load %arg3[%c0_16, %c768] : memref<8x2816xf32, #tpu.memory_space<vmem>>, vector<4x1xf32>
    %c0_17 = arith.constant 0 : index
    %c896 = arith.constant 896 : index
    %243 = vector.load %arg3[%c0_17, %c896] : memref<8x2816xf32, #tpu.memory_space<vmem>>, vector<4x1xf32>
    %cst_18 = arith.constant 0.000000e+00 : f32
    %244 = vector.broadcast %cst_18 : f32 to vector<4x512xf32>
    %245 = vector.broadcast %243 : vector<4x1xf32> to vector<4x512xf32>
    %246 = arith.addf %244, %245 : vector<4x512xf32>
    %247 = vector.extract_strided_slice %177 {offsets = [0, 0], sizes = [1, 512], strides = [1, 1]} : vector<4x512xf32> to vector<1x512xf32>
    %248 = vector.extract_strided_slice %177 {offsets = [1, 0], sizes = [1, 512], strides = [1, 1]} : vector<4x512xf32> to vector<1x512xf32>
    %249 = arith.addf %247, %248 : vector<1x512xf32>
    %250 = vector.extract_strided_slice %177 {offsets = [2, 0], sizes = [1, 512], strides = [1, 1]} : vector<4x512xf32> to vector<1x512xf32>
    %251 = arith.addf %249, %250 : vector<1x512xf32>
    %252 = vector.extract_strided_slice %177 {offsets = [3, 0], sizes = [1, 512], strides = [1, 1]} : vector<4x512xf32> to vector<1x512xf32>
    %253 = arith.addf %251, %252 : vector<1x512xf32>
    %254 = vector.broadcast %241 : vector<1x1xf32> to vector<1x512xf32>
    %255 = arith.addf %254, %253 : vector<1x512xf32>
    %cst_19 = arith.constant 0.000000e+00 : f32
    %256 = vector.broadcast %cst_19 : f32 to vector<1x512xf32>
    %257 = arith.maximumf %255, %256 : vector<1x512xf32>
    %258 = vector.broadcast %242 : vector<4x1xf32> to vector<4x512xf32>
    %259 = vector.broadcast %257 : vector<1x512xf32> to vector<4x512xf32>
    %260 = arith.mulf %258, %259 : vector<4x512xf32>
    %261 = arith.addf %246, %260 : vector<4x512xf32>
    %262 = arith.addf %240, %261 : vector<4x512xf32>
    %c0_20 = arith.constant 0 : index
    %c1152 = arith.constant 1152 : index
    %263 = vector.load %arg3[%c0_20, %c1152] : memref<8x2816xf32, #tpu.memory_space<vmem>>, vector<1x1xf32>
    %c0_21 = arith.constant 0 : index
    %c1280 = arith.constant 1280 : index
    %264 = vector.load %arg3[%c0_21, %c1280] : memref<8x2816xf32, #tpu.memory_space<vmem>>, vector<4x1xf32>
    %c0_22 = arith.constant 0 : index
    %c1408 = arith.constant 1408 : index
    %265 = vector.load %arg3[%c0_22, %c1408] : memref<8x2816xf32, #tpu.memory_space<vmem>>, vector<4x1xf32>
    %cst_23 = arith.constant 0.000000e+00 : f32
    %266 = vector.broadcast %cst_23 : f32 to vector<4x512xf32>
    %267 = vector.broadcast %265 : vector<4x1xf32> to vector<4x512xf32>
    %268 = arith.addf %266, %267 : vector<4x512xf32>
    %269 = vector.extract_strided_slice %219 {offsets = [0, 0], sizes = [1, 512], strides = [1, 1]} : vector<4x512xf32> to vector<1x512xf32>
    %270 = vector.extract_strided_slice %219 {offsets = [1, 0], sizes = [1, 512], strides = [1, 1]} : vector<4x512xf32> to vector<1x512xf32>
    %271 = arith.addf %269, %270 : vector<1x512xf32>
    %272 = vector.extract_strided_slice %219 {offsets = [2, 0], sizes = [1, 512], strides = [1, 1]} : vector<4x512xf32> to vector<1x512xf32>
    %273 = arith.addf %271, %272 : vector<1x512xf32>
    %274 = vector.extract_strided_slice %219 {offsets = [3, 0], sizes = [1, 512], strides = [1, 1]} : vector<4x512xf32> to vector<1x512xf32>
    %275 = arith.addf %273, %274 : vector<1x512xf32>
    %276 = vector.broadcast %263 : vector<1x1xf32> to vector<1x512xf32>
    %277 = arith.addf %276, %275 : vector<1x512xf32>
    %cst_24 = arith.constant 0.000000e+00 : f32
    %278 = vector.broadcast %cst_24 : f32 to vector<1x512xf32>
    %279 = arith.maximumf %277, %278 : vector<1x512xf32>
    %280 = vector.broadcast %264 : vector<4x1xf32> to vector<4x512xf32>
    %281 = vector.broadcast %279 : vector<1x512xf32> to vector<4x512xf32>
    %282 = arith.mulf %280, %281 : vector<4x512xf32>
    %283 = arith.addf %268, %282 : vector<4x512xf32>
    %284 = arith.addf %262, %283 : vector<4x512xf32>
    %285 = vector.broadcast %2 : vector<1x512xf32> to vector<4x512xf32>
    %286 = arith.mulf %284, %285 : vector<4x512xf32>
    %c0_25 = arith.constant 0 : index
    %c1536 = arith.constant 1536 : index
    %287 = vector.load %arg3[%c0_25, %c1536] : memref<8x2816xf32, #tpu.memory_space<vmem>>, vector<4x25xf32>
    %c0_26 = arith.constant 0 : index
    %c1664 = arith.constant 1664 : index
    %288 = vector.load %arg3[%c0_26, %c1664] : memref<8x2816xf32, #tpu.memory_space<vmem>>, vector<4x1xf32>
    %cst_27 = arith.constant 0.000000e+00 : f32
    %289 = vector.broadcast %cst_27 : f32 to vector<4x512xf32>
    %290 = vector.broadcast %288 : vector<4x1xf32> to vector<4x512xf32>
    %291 = arith.addf %289, %290 : vector<4x512xf32>
    %292 = vector.extract_strided_slice %287 {offsets = [0, 0], sizes = [4, 1], strides = [1, 1]} : vector<4x25xf32> to vector<4x1xf32>
    %293 = vector.extract_strided_slice %286 {offsets = [0, 470], sizes = [4, 42], strides = [1, 1]} : vector<4x512xf32> to vector<4x42xf32>
    %294 = vector.extract_strided_slice %286 {offsets = [0, 0], sizes = [4, 470], strides = [1, 1]} : vector<4x512xf32> to vector<4x470xf32>
    %295 = tpu.concatenate %293, %294 in 1 : vector<4x42xf32>, vector<4x470xf32> -> vector<4x512xf32>
    %296 = vector.broadcast %292 : vector<4x1xf32> to vector<4x512xf32>
    %297 = arith.mulf %296, %295 : vector<4x512xf32>
    %298 = arith.addf %291, %297 : vector<4x512xf32>
    %299 = vector.extract_strided_slice %287 {offsets = [0, 1], sizes = [4, 1], strides = [1, 1]} : vector<4x25xf32> to vector<4x1xf32>
    %300 = vector.extract_strided_slice %286 {offsets = [0, 471], sizes = [4, 41], strides = [1, 1]} : vector<4x512xf32> to vector<4x41xf32>
    %301 = vector.extract_strided_slice %286 {offsets = [0, 0], sizes = [4, 471], strides = [1, 1]} : vector<4x512xf32> to vector<4x471xf32>
    %302 = tpu.concatenate %300, %301 in 1 : vector<4x41xf32>, vector<4x471xf32> -> vector<4x512xf32>
    %303 = vector.broadcast %299 : vector<4x1xf32> to vector<4x512xf32>
    %304 = arith.mulf %303, %302 : vector<4x512xf32>
    %305 = arith.addf %298, %304 : vector<4x512xf32>
    %306 = vector.extract_strided_slice %287 {offsets = [0, 2], sizes = [4, 1], strides = [1, 1]} : vector<4x25xf32> to vector<4x1xf32>
    %307 = vector.extract_strided_slice %286 {offsets = [0, 472], sizes = [4, 40], strides = [1, 1]} : vector<4x512xf32> to vector<4x40xf32>
    %308 = vector.extract_strided_slice %286 {offsets = [0, 0], sizes = [4, 472], strides = [1, 1]} : vector<4x512xf32> to vector<4x472xf32>
    %309 = tpu.concatenate %307, %308 in 1 : vector<4x40xf32>, vector<4x472xf32> -> vector<4x512xf32>
    %310 = vector.broadcast %306 : vector<4x1xf32> to vector<4x512xf32>
    %311 = arith.mulf %310, %309 : vector<4x512xf32>
    %312 = arith.addf %305, %311 : vector<4x512xf32>
    %313 = vector.extract_strided_slice %287 {offsets = [0, 3], sizes = [4, 1], strides = [1, 1]} : vector<4x25xf32> to vector<4x1xf32>
    %314 = vector.extract_strided_slice %286 {offsets = [0, 473], sizes = [4, 39], strides = [1, 1]} : vector<4x512xf32> to vector<4x39xf32>
    %315 = vector.extract_strided_slice %286 {offsets = [0, 0], sizes = [4, 473], strides = [1, 1]} : vector<4x512xf32> to vector<4x473xf32>
    %316 = tpu.concatenate %314, %315 in 1 : vector<4x39xf32>, vector<4x473xf32> -> vector<4x512xf32>
    %317 = vector.broadcast %313 : vector<4x1xf32> to vector<4x512xf32>
    %318 = arith.mulf %317, %316 : vector<4x512xf32>
    %319 = arith.addf %312, %318 : vector<4x512xf32>
    %320 = vector.extract_strided_slice %287 {offsets = [0, 4], sizes = [4, 1], strides = [1, 1]} : vector<4x25xf32> to vector<4x1xf32>
    %321 = vector.extract_strided_slice %286 {offsets = [0, 474], sizes = [4, 38], strides = [1, 1]} : vector<4x512xf32> to vector<4x38xf32>
    %322 = vector.extract_strided_slice %286 {offsets = [0, 0], sizes = [4, 474], strides = [1, 1]} : vector<4x512xf32> to vector<4x474xf32>
    %323 = tpu.concatenate %321, %322 in 1 : vector<4x38xf32>, vector<4x474xf32> -> vector<4x512xf32>
    %324 = vector.broadcast %320 : vector<4x1xf32> to vector<4x512xf32>
    %325 = arith.mulf %324, %323 : vector<4x512xf32>
    %326 = arith.addf %319, %325 : vector<4x512xf32>
    %327 = vector.extract_strided_slice %287 {offsets = [0, 5], sizes = [4, 1], strides = [1, 1]} : vector<4x25xf32> to vector<4x1xf32>
    %328 = vector.extract_strided_slice %286 {offsets = [0, 490], sizes = [4, 22], strides = [1, 1]} : vector<4x512xf32> to vector<4x22xf32>
    %329 = vector.extract_strided_slice %286 {offsets = [0, 0], sizes = [4, 490], strides = [1, 1]} : vector<4x512xf32> to vector<4x490xf32>
    %330 = tpu.concatenate %328, %329 in 1 : vector<4x22xf32>, vector<4x490xf32> -> vector<4x512xf32>
    %331 = vector.broadcast %327 : vector<4x1xf32> to vector<4x512xf32>
    %332 = arith.mulf %331, %330 : vector<4x512xf32>
    %333 = arith.addf %326, %332 : vector<4x512xf32>
    %334 = vector.extract_strided_slice %287 {offsets = [0, 6], sizes = [4, 1], strides = [1, 1]} : vector<4x25xf32> to vector<4x1xf32>
    %335 = vector.extract_strided_slice %286 {offsets = [0, 491], sizes = [4, 21], strides = [1, 1]} : vector<4x512xf32> to vector<4x21xf32>
    %336 = vector.extract_strided_slice %286 {offsets = [0, 0], sizes = [4, 491], strides = [1, 1]} : vector<4x512xf32> to vector<4x491xf32>
    %337 = tpu.concatenate %335, %336 in 1 : vector<4x21xf32>, vector<4x491xf32> -> vector<4x512xf32>
    %338 = vector.broadcast %334 : vector<4x1xf32> to vector<4x512xf32>
    %339 = arith.mulf %338, %337 : vector<4x512xf32>
    %340 = arith.addf %333, %339 : vector<4x512xf32>
    %341 = vector.extract_strided_slice %287 {offsets = [0, 7], sizes = [4, 1], strides = [1, 1]} : vector<4x25xf32> to vector<4x1xf32>
    %342 = vector.extract_strided_slice %286 {offsets = [0, 492], sizes = [4, 20], strides = [1, 1]} : vector<4x512xf32> to vector<4x20xf32>
    %343 = vector.extract_strided_slice %286 {offsets = [0, 0], sizes = [4, 492], strides = [1, 1]} : vector<4x512xf32> to vector<4x492xf32>
    %344 = tpu.concatenate %342, %343 in 1 : vector<4x20xf32>, vector<4x492xf32> -> vector<4x512xf32>
    %345 = vector.broadcast %341 : vector<4x1xf32> to vector<4x512xf32>
    %346 = arith.mulf %345, %344 : vector<4x512xf32>
    %347 = arith.addf %340, %346 : vector<4x512xf32>
    %348 = vector.extract_strided_slice %287 {offsets = [0, 8], sizes = [4, 1], strides = [1, 1]} : vector<4x25xf32> to vector<4x1xf32>
    %349 = vector.extract_strided_slice %286 {offsets = [0, 493], sizes = [4, 19], strides = [1, 1]} : vector<4x512xf32> to vector<4x19xf32>
    %350 = vector.extract_strided_slice %286 {offsets = [0, 0], sizes = [4, 493], strides = [1, 1]} : vector<4x512xf32> to vector<4x493xf32>
    %351 = tpu.concatenate %349, %350 in 1 : vector<4x19xf32>, vector<4x493xf32> -> vector<4x512xf32>
    %352 = vector.broadcast %348 : vector<4x1xf32> to vector<4x512xf32>
    %353 = arith.mulf %352, %351 : vector<4x512xf32>
    %354 = arith.addf %347, %353 : vector<4x512xf32>
    %355 = vector.extract_strided_slice %287 {offsets = [0, 9], sizes = [4, 1], strides = [1, 1]} : vector<4x25xf32> to vector<4x1xf32>
    %356 = vector.extract_strided_slice %286 {offsets = [0, 494], sizes = [4, 18], strides = [1, 1]} : vector<4x512xf32> to vector<4x18xf32>
    %357 = vector.extract_strided_slice %286 {offsets = [0, 0], sizes = [4, 494], strides = [1, 1]} : vector<4x512xf32> to vector<4x494xf32>
    %358 = tpu.concatenate %356, %357 in 1 : vector<4x18xf32>, vector<4x494xf32> -> vector<4x512xf32>
    %359 = vector.broadcast %355 : vector<4x1xf32> to vector<4x512xf32>
    %360 = arith.mulf %359, %358 : vector<4x512xf32>
    %361 = arith.addf %354, %360 : vector<4x512xf32>
    %362 = vector.extract_strided_slice %287 {offsets = [0, 10], sizes = [4, 1], strides = [1, 1]} : vector<4x25xf32> to vector<4x1xf32>
    %363 = vector.extract_strided_slice %286 {offsets = [0, 510], sizes = [4, 2], strides = [1, 1]} : vector<4x512xf32> to vector<4x2xf32>
    %364 = vector.extract_strided_slice %286 {offsets = [0, 0], sizes = [4, 510], strides = [1, 1]} : vector<4x512xf32> to vector<4x510xf32>
    %365 = tpu.concatenate %363, %364 in 1 : vector<4x2xf32>, vector<4x510xf32> -> vector<4x512xf32>
    %366 = vector.broadcast %362 : vector<4x1xf32> to vector<4x512xf32>
    %367 = arith.mulf %366, %365 : vector<4x512xf32>
    %368 = arith.addf %361, %367 : vector<4x512xf32>
    %369 = vector.extract_strided_slice %287 {offsets = [0, 11], sizes = [4, 1], strides = [1, 1]} : vector<4x25xf32> to vector<4x1xf32>
    %370 = vector.extract_strided_slice %286 {offsets = [0, 511], sizes = [4, 1], strides = [1, 1]} : vector<4x512xf32> to vector<4x1xf32>
    %371 = vector.extract_strided_slice %286 {offsets = [0, 0], sizes = [4, 511], strides = [1, 1]} : vector<4x512xf32> to vector<4x511xf32>
    %372 = tpu.concatenate %370, %371 in 1 : vector<4x1xf32>, vector<4x511xf32> -> vector<4x512xf32>
    %373 = vector.broadcast %369 : vector<4x1xf32> to vector<4x512xf32>
    %374 = arith.mulf %373, %372 : vector<4x512xf32>
    %375 = arith.addf %368, %374 : vector<4x512xf32>
    %376 = vector.extract_strided_slice %287 {offsets = [0, 12], sizes = [4, 1], strides = [1, 1]} : vector<4x25xf32> to vector<4x1xf32>
    %377 = vector.broadcast %376 : vector<4x1xf32> to vector<4x512xf32>
    %378 = arith.mulf %377, %286 : vector<4x512xf32>
    %379 = arith.addf %375, %378 : vector<4x512xf32>
    %380 = vector.extract_strided_slice %287 {offsets = [0, 13], sizes = [4, 1], strides = [1, 1]} : vector<4x25xf32> to vector<4x1xf32>
    %381 = vector.extract_strided_slice %286 {offsets = [0, 1], sizes = [4, 511], strides = [1, 1]} : vector<4x512xf32> to vector<4x511xf32>
    %382 = vector.extract_strided_slice %286 {offsets = [0, 0], sizes = [4, 1], strides = [1, 1]} : vector<4x512xf32> to vector<4x1xf32>
    %383 = tpu.concatenate %381, %382 in 1 : vector<4x511xf32>, vector<4x1xf32> -> vector<4x512xf32>
    %384 = vector.broadcast %380 : vector<4x1xf32> to vector<4x512xf32>
    %385 = arith.mulf %384, %383 : vector<4x512xf32>
    %386 = arith.addf %379, %385 : vector<4x512xf32>
    %387 = vector.extract_strided_slice %287 {offsets = [0, 14], sizes = [4, 1], strides = [1, 1]} : vector<4x25xf32> to vector<4x1xf32>
    %388 = vector.extract_strided_slice %286 {offsets = [0, 2], sizes = [4, 510], strides = [1, 1]} : vector<4x512xf32> to vector<4x510xf32>
    %389 = vector.extract_strided_slice %286 {offsets = [0, 0], sizes = [4, 2], strides = [1, 1]} : vector<4x512xf32> to vector<4x2xf32>
    %390 = tpu.concatenate %388, %389 in 1 : vector<4x510xf32>, vector<4x2xf32> -> vector<4x512xf32>
    %391 = vector.broadcast %387 : vector<4x1xf32> to vector<4x512xf32>
    %392 = arith.mulf %391, %390 : vector<4x512xf32>
    %393 = arith.addf %386, %392 : vector<4x512xf32>
    %394 = vector.extract_strided_slice %287 {offsets = [0, 15], sizes = [4, 1], strides = [1, 1]} : vector<4x25xf32> to vector<4x1xf32>
    %395 = vector.extract_strided_slice %286 {offsets = [0, 18], sizes = [4, 494], strides = [1, 1]} : vector<4x512xf32> to vector<4x494xf32>
    %396 = vector.extract_strided_slice %286 {offsets = [0, 0], sizes = [4, 18], strides = [1, 1]} : vector<4x512xf32> to vector<4x18xf32>
    %397 = tpu.concatenate %395, %396 in 1 : vector<4x494xf32>, vector<4x18xf32> -> vector<4x512xf32>
    %398 = vector.broadcast %394 : vector<4x1xf32> to vector<4x512xf32>
    %399 = arith.mulf %398, %397 : vector<4x512xf32>
    %400 = arith.addf %393, %399 : vector<4x512xf32>
    %401 = vector.extract_strided_slice %287 {offsets = [0, 16], sizes = [4, 1], strides = [1, 1]} : vector<4x25xf32> to vector<4x1xf32>
    %402 = vector.extract_strided_slice %286 {offsets = [0, 19], sizes = [4, 493], strides = [1, 1]} : vector<4x512xf32> to vector<4x493xf32>
    %403 = vector.extract_strided_slice %286 {offsets = [0, 0], sizes = [4, 19], strides = [1, 1]} : vector<4x512xf32> to vector<4x19xf32>
    %404 = tpu.concatenate %402, %403 in 1 : vector<4x493xf32>, vector<4x19xf32> -> vector<4x512xf32>
    %405 = vector.broadcast %401 : vector<4x1xf32> to vector<4x512xf32>
    %406 = arith.mulf %405, %404 : vector<4x512xf32>
    %407 = arith.addf %400, %406 : vector<4x512xf32>
    %408 = vector.extract_strided_slice %287 {offsets = [0, 17], sizes = [4, 1], strides = [1, 1]} : vector<4x25xf32> to vector<4x1xf32>
    %409 = vector.extract_strided_slice %286 {offsets = [0, 20], sizes = [4, 492], strides = [1, 1]} : vector<4x512xf32> to vector<4x492xf32>
    %410 = vector.extract_strided_slice %286 {offsets = [0, 0], sizes = [4, 20], strides = [1, 1]} : vector<4x512xf32> to vector<4x20xf32>
    %411 = tpu.concatenate %409, %410 in 1 : vector<4x492xf32>, vector<4x20xf32> -> vector<4x512xf32>
    %412 = vector.broadcast %408 : vector<4x1xf32> to vector<4x512xf32>
    %413 = arith.mulf %412, %411 : vector<4x512xf32>
    %414 = arith.addf %407, %413 : vector<4x512xf32>
    %415 = vector.extract_strided_slice %287 {offsets = [0, 18], sizes = [4, 1], strides = [1, 1]} : vector<4x25xf32> to vector<4x1xf32>
    %416 = vector.extract_strided_slice %286 {offsets = [0, 21], sizes = [4, 491], strides = [1, 1]} : vector<4x512xf32> to vector<4x491xf32>
    %417 = vector.extract_strided_slice %286 {offsets = [0, 0], sizes = [4, 21], strides = [1, 1]} : vector<4x512xf32> to vector<4x21xf32>
    %418 = tpu.concatenate %416, %417 in 1 : vector<4x491xf32>, vector<4x21xf32> -> vector<4x512xf32>
    %419 = vector.broadcast %415 : vector<4x1xf32> to vector<4x512xf32>
    %420 = arith.mulf %419, %418 : vector<4x512xf32>
    %421 = arith.addf %414, %420 : vector<4x512xf32>
    %422 = vector.extract_strided_slice %287 {offsets = [0, 19], sizes = [4, 1], strides = [1, 1]} : vector<4x25xf32> to vector<4x1xf32>
    %423 = vector.extract_strided_slice %286 {offsets = [0, 22], sizes = [4, 490], strides = [1, 1]} : vector<4x512xf32> to vector<4x490xf32>
    %424 = vector.extract_strided_slice %286 {offsets = [0, 0], sizes = [4, 22], strides = [1, 1]} : vector<4x512xf32> to vector<4x22xf32>
    %425 = tpu.concatenate %423, %424 in 1 : vector<4x490xf32>, vector<4x22xf32> -> vector<4x512xf32>
    %426 = vector.broadcast %422 : vector<4x1xf32> to vector<4x512xf32>
    %427 = arith.mulf %426, %425 : vector<4x512xf32>
    %428 = arith.addf %421, %427 : vector<4x512xf32>
    %429 = vector.extract_strided_slice %287 {offsets = [0, 20], sizes = [4, 1], strides = [1, 1]} : vector<4x25xf32> to vector<4x1xf32>
    %430 = vector.extract_strided_slice %286 {offsets = [0, 38], sizes = [4, 474], strides = [1, 1]} : vector<4x512xf32> to vector<4x474xf32>
    %431 = vector.extract_strided_slice %286 {offsets = [0, 0], sizes = [4, 38], strides = [1, 1]} : vector<4x512xf32> to vector<4x38xf32>
    %432 = tpu.concatenate %430, %431 in 1 : vector<4x474xf32>, vector<4x38xf32> -> vector<4x512xf32>
    %433 = vector.broadcast %429 : vector<4x1xf32> to vector<4x512xf32>
    %434 = arith.mulf %433, %432 : vector<4x512xf32>
    %435 = arith.addf %428, %434 : vector<4x512xf32>
    %436 = vector.extract_strided_slice %287 {offsets = [0, 21], sizes = [4, 1], strides = [1, 1]} : vector<4x25xf32> to vector<4x1xf32>
    %437 = vector.extract_strided_slice %286 {offsets = [0, 39], sizes = [4, 473], strides = [1, 1]} : vector<4x512xf32> to vector<4x473xf32>
    %438 = vector.extract_strided_slice %286 {offsets = [0, 0], sizes = [4, 39], strides = [1, 1]} : vector<4x512xf32> to vector<4x39xf32>
    %439 = tpu.concatenate %437, %438 in 1 : vector<4x473xf32>, vector<4x39xf32> -> vector<4x512xf32>
    %440 = vector.broadcast %436 : vector<4x1xf32> to vector<4x512xf32>
    %441 = arith.mulf %440, %439 : vector<4x512xf32>
    %442 = arith.addf %435, %441 : vector<4x512xf32>
    %443 = vector.extract_strided_slice %287 {offsets = [0, 22], sizes = [4, 1], strides = [1, 1]} : vector<4x25xf32> to vector<4x1xf32>
    %444 = vector.extract_strided_slice %286 {offsets = [0, 40], sizes = [4, 472], strides = [1, 1]} : vector<4x512xf32> to vector<4x472xf32>
    %445 = vector.extract_strided_slice %286 {offsets = [0, 0], sizes = [4, 40], strides = [1, 1]} : vector<4x512xf32> to vector<4x40xf32>
    %446 = tpu.concatenate %444, %445 in 1 : vector<4x472xf32>, vector<4x40xf32> -> vector<4x512xf32>
    %447 = vector.broadcast %443 : vector<4x1xf32> to vector<4x512xf32>
    %448 = arith.mulf %447, %446 : vector<4x512xf32>
    %449 = arith.addf %442, %448 : vector<4x512xf32>
    %450 = vector.extract_strided_slice %287 {offsets = [0, 23], sizes = [4, 1], strides = [1, 1]} : vector<4x25xf32> to vector<4x1xf32>
    %451 = vector.extract_strided_slice %286 {offsets = [0, 41], sizes = [4, 471], strides = [1, 1]} : vector<4x512xf32> to vector<4x471xf32>
    %452 = vector.extract_strided_slice %286 {offsets = [0, 0], sizes = [4, 41], strides = [1, 1]} : vector<4x512xf32> to vector<4x41xf32>
    %453 = tpu.concatenate %451, %452 in 1 : vector<4x471xf32>, vector<4x41xf32> -> vector<4x512xf32>
    %454 = vector.broadcast %450 : vector<4x1xf32> to vector<4x512xf32>
    %455 = arith.mulf %454, %453 : vector<4x512xf32>
    %456 = arith.addf %449, %455 : vector<4x512xf32>
    %457 = vector.extract_strided_slice %287 {offsets = [0, 24], sizes = [4, 1], strides = [1, 1]} : vector<4x25xf32> to vector<4x1xf32>
    %458 = vector.extract_strided_slice %286 {offsets = [0, 42], sizes = [4, 470], strides = [1, 1]} : vector<4x512xf32> to vector<4x470xf32>
    %459 = vector.extract_strided_slice %286 {offsets = [0, 0], sizes = [4, 42], strides = [1, 1]} : vector<4x512xf32> to vector<4x42xf32>
    %460 = tpu.concatenate %458, %459 in 1 : vector<4x470xf32>, vector<4x42xf32> -> vector<4x512xf32>
    %461 = vector.broadcast %457 : vector<4x1xf32> to vector<4x512xf32>
    %462 = arith.mulf %461, %460 : vector<4x512xf32>
    %463 = arith.addf %456, %462 : vector<4x512xf32>
    %464 = vector.broadcast %2 : vector<1x512xf32> to vector<4x512xf32>
    %465 = arith.mulf %463, %464 : vector<4x512xf32>
    %c0_28 = arith.constant 0 : index
    %c1792 = arith.constant 1792 : index
    %466 = vector.load %arg3[%c0_28, %c1792] : memref<8x2816xf32, #tpu.memory_space<vmem>>, vector<4x100xf32>
    %c0_29 = arith.constant 0 : index
    %c1920 = arith.constant 1920 : index
    %467 = vector.load %arg3[%c0_29, %c1920] : memref<8x2816xf32, #tpu.memory_space<vmem>>, vector<4x1xf32>
    %cst_30 = arith.constant 0.000000e+00 : f32
    %468 = vector.broadcast %cst_30 : f32 to vector<4x512xf32>
    %469 = vector.broadcast %467 : vector<4x1xf32> to vector<4x512xf32>
    %470 = arith.addf %468, %469 : vector<4x512xf32>
    %471 = vector.extract_strided_slice %465 {offsets = [0, 470], sizes = [4, 42], strides = [1, 1]} : vector<4x512xf32> to vector<4x42xf32>
    %472 = vector.extract_strided_slice %465 {offsets = [0, 0], sizes = [4, 470], strides = [1, 1]} : vector<4x512xf32> to vector<4x470xf32>
    %473 = tpu.concatenate %471, %472 in 1 : vector<4x42xf32>, vector<4x470xf32> -> vector<4x512xf32>
    %474 = vector.extract_strided_slice %466 {offsets = [0, 0], sizes = [4, 1], strides = [1, 1]} : vector<4x100xf32> to vector<4x1xf32>
    %475 = vector.extract_strided_slice %473 {offsets = [0, 0], sizes = [1, 512], strides = [1, 1]} : vector<4x512xf32> to vector<1x512xf32>
    %476 = vector.broadcast %474 : vector<4x1xf32> to vector<4x512xf32>
    %477 = vector.broadcast %475 : vector<1x512xf32> to vector<4x512xf32>
    %478 = arith.mulf %476, %477 : vector<4x512xf32>
    %479 = arith.addf %470, %478 : vector<4x512xf32>
    %480 = vector.extract_strided_slice %466 {offsets = [0, 25], sizes = [4, 1], strides = [1, 1]} : vector<4x100xf32> to vector<4x1xf32>
    %481 = vector.extract_strided_slice %473 {offsets = [1, 0], sizes = [1, 512], strides = [1, 1]} : vector<4x512xf32> to vector<1x512xf32>
    %482 = vector.broadcast %480 : vector<4x1xf32> to vector<4x512xf32>
    %483 = vector.broadcast %481 : vector<1x512xf32> to vector<4x512xf32>
    %484 = arith.mulf %482, %483 : vector<4x512xf32>
    %485 = arith.addf %479, %484 : vector<4x512xf32>
    %486 = vector.extract_strided_slice %466 {offsets = [0, 50], sizes = [4, 1], strides = [1, 1]} : vector<4x100xf32> to vector<4x1xf32>
    %487 = vector.extract_strided_slice %473 {offsets = [2, 0], sizes = [1, 512], strides = [1, 1]} : vector<4x512xf32> to vector<1x512xf32>
    %488 = vector.broadcast %486 : vector<4x1xf32> to vector<4x512xf32>
    %489 = vector.broadcast %487 : vector<1x512xf32> to vector<4x512xf32>
    %490 = arith.mulf %488, %489 : vector<4x512xf32>
    %491 = arith.addf %485, %490 : vector<4x512xf32>
    %492 = vector.extract_strided_slice %466 {offsets = [0, 75], sizes = [4, 1], strides = [1, 1]} : vector<4x100xf32> to vector<4x1xf32>
    %493 = vector.extract_strided_slice %473 {offsets = [3, 0], sizes = [1, 512], strides = [1, 1]} : vector<4x512xf32> to vector<1x512xf32>
    %494 = vector.broadcast %492 : vector<4x1xf32> to vector<4x512xf32>
    %495 = vector.broadcast %493 : vector<1x512xf32> to vector<4x512xf32>
    %496 = arith.mulf %494, %495 : vector<4x512xf32>
    %497 = arith.addf %491, %496 : vector<4x512xf32>
    %498 = vector.extract_strided_slice %465 {offsets = [0, 471], sizes = [4, 41], strides = [1, 1]} : vector<4x512xf32> to vector<4x41xf32>
    %499 = vector.extract_strided_slice %465 {offsets = [0, 0], sizes = [4, 471], strides = [1, 1]} : vector<4x512xf32> to vector<4x471xf32>
    %500 = tpu.concatenate %498, %499 in 1 : vector<4x41xf32>, vector<4x471xf32> -> vector<4x512xf32>
    %501 = vector.extract_strided_slice %466 {offsets = [0, 1], sizes = [4, 1], strides = [1, 1]} : vector<4x100xf32> to vector<4x1xf32>
    %502 = vector.extract_strided_slice %500 {offsets = [0, 0], sizes = [1, 512], strides = [1, 1]} : vector<4x512xf32> to vector<1x512xf32>
    %503 = vector.broadcast %501 : vector<4x1xf32> to vector<4x512xf32>
    %504 = vector.broadcast %502 : vector<1x512xf32> to vector<4x512xf32>
    %505 = arith.mulf %503, %504 : vector<4x512xf32>
    %506 = arith.addf %497, %505 : vector<4x512xf32>
    %507 = vector.extract_strided_slice %466 {offsets = [0, 26], sizes = [4, 1], strides = [1, 1]} : vector<4x100xf32> to vector<4x1xf32>
    %508 = vector.extract_strided_slice %500 {offsets = [1, 0], sizes = [1, 512], strides = [1, 1]} : vector<4x512xf32> to vector<1x512xf32>
    %509 = vector.broadcast %507 : vector<4x1xf32> to vector<4x512xf32>
    %510 = vector.broadcast %508 : vector<1x512xf32> to vector<4x512xf32>
    %511 = arith.mulf %509, %510 : vector<4x512xf32>
    %512 = arith.addf %506, %511 : vector<4x512xf32>
    %513 = vector.extract_strided_slice %466 {offsets = [0, 51], sizes = [4, 1], strides = [1, 1]} : vector<4x100xf32> to vector<4x1xf32>
    %514 = vector.extract_strided_slice %500 {offsets = [2, 0], sizes = [1, 512], strides = [1, 1]} : vector<4x512xf32> to vector<1x512xf32>
    %515 = vector.broadcast %513 : vector<4x1xf32> to vector<4x512xf32>
    %516 = vector.broadcast %514 : vector<1x512xf32> to vector<4x512xf32>
    %517 = arith.mulf %515, %516 : vector<4x512xf32>
    %518 = arith.addf %512, %517 : vector<4x512xf32>
    %519 = vector.extract_strided_slice %466 {offsets = [0, 76], sizes = [4, 1], strides = [1, 1]} : vector<4x100xf32> to vector<4x1xf32>
    %520 = vector.extract_strided_slice %500 {offsets = [3, 0], sizes = [1, 512], strides = [1, 1]} : vector<4x512xf32> to vector<1x512xf32>
    %521 = vector.broadcast %519 : vector<4x1xf32> to vector<4x512xf32>
    %522 = vector.broadcast %520 : vector<1x512xf32> to vector<4x512xf32>
    %523 = arith.mulf %521, %522 : vector<4x512xf32>
    %524 = arith.addf %518, %523 : vector<4x512xf32>
    %525 = vector.extract_strided_slice %465 {offsets = [0, 472], sizes = [4, 40], strides = [1, 1]} : vector<4x512xf32> to vector<4x40xf32>
    %526 = vector.extract_strided_slice %465 {offsets = [0, 0], sizes = [4, 472], strides = [1, 1]} : vector<4x512xf32> to vector<4x472xf32>
    %527 = tpu.concatenate %525, %526 in 1 : vector<4x40xf32>, vector<4x472xf32> -> vector<4x512xf32>
    %528 = vector.extract_strided_slice %466 {offsets = [0, 2], sizes = [4, 1], strides = [1, 1]} : vector<4x100xf32> to vector<4x1xf32>
    %529 = vector.extract_strided_slice %527 {offsets = [0, 0], sizes = [1, 512], strides = [1, 1]} : vector<4x512xf32> to vector<1x512xf32>
    %530 = vector.broadcast %528 : vector<4x1xf32> to vector<4x512xf32>
    %531 = vector.broadcast %529 : vector<1x512xf32> to vector<4x512xf32>
    %532 = arith.mulf %530, %531 : vector<4x512xf32>
    %533 = arith.addf %524, %532 : vector<4x512xf32>
    %534 = vector.extract_strided_slice %466 {offsets = [0, 27], sizes = [4, 1], strides = [1, 1]} : vector<4x100xf32> to vector<4x1xf32>
    %535 = vector.extract_strided_slice %527 {offsets = [1, 0], sizes = [1, 512], strides = [1, 1]} : vector<4x512xf32> to vector<1x512xf32>
    %536 = vector.broadcast %534 : vector<4x1xf32> to vector<4x512xf32>
    %537 = vector.broadcast %535 : vector<1x512xf32> to vector<4x512xf32>
    %538 = arith.mulf %536, %537 : vector<4x512xf32>
    %539 = arith.addf %533, %538 : vector<4x512xf32>
    %540 = vector.extract_strided_slice %466 {offsets = [0, 52], sizes = [4, 1], strides = [1, 1]} : vector<4x100xf32> to vector<4x1xf32>
    %541 = vector.extract_strided_slice %527 {offsets = [2, 0], sizes = [1, 512], strides = [1, 1]} : vector<4x512xf32> to vector<1x512xf32>
    %542 = vector.broadcast %540 : vector<4x1xf32> to vector<4x512xf32>
    %543 = vector.broadcast %541 : vector<1x512xf32> to vector<4x512xf32>
    %544 = arith.mulf %542, %543 : vector<4x512xf32>
    %545 = arith.addf %539, %544 : vector<4x512xf32>
    %546 = vector.extract_strided_slice %466 {offsets = [0, 77], sizes = [4, 1], strides = [1, 1]} : vector<4x100xf32> to vector<4x1xf32>
    %547 = vector.extract_strided_slice %527 {offsets = [3, 0], sizes = [1, 512], strides = [1, 1]} : vector<4x512xf32> to vector<1x512xf32>
    %548 = vector.broadcast %546 : vector<4x1xf32> to vector<4x512xf32>
    %549 = vector.broadcast %547 : vector<1x512xf32> to vector<4x512xf32>
    %550 = arith.mulf %548, %549 : vector<4x512xf32>
    %551 = arith.addf %545, %550 : vector<4x512xf32>
    %552 = vector.extract_strided_slice %465 {offsets = [0, 473], sizes = [4, 39], strides = [1, 1]} : vector<4x512xf32> to vector<4x39xf32>
    %553 = vector.extract_strided_slice %465 {offsets = [0, 0], sizes = [4, 473], strides = [1, 1]} : vector<4x512xf32> to vector<4x473xf32>
    %554 = tpu.concatenate %552, %553 in 1 : vector<4x39xf32>, vector<4x473xf32> -> vector<4x512xf32>
    %555 = vector.extract_strided_slice %466 {offsets = [0, 3], sizes = [4, 1], strides = [1, 1]} : vector<4x100xf32> to vector<4x1xf32>
    %556 = vector.extract_strided_slice %554 {offsets = [0, 0], sizes = [1, 512], strides = [1, 1]} : vector<4x512xf32> to vector<1x512xf32>
    %557 = vector.broadcast %555 : vector<4x1xf32> to vector<4x512xf32>
    %558 = vector.broadcast %556 : vector<1x512xf32> to vector<4x512xf32>
    %559 = arith.mulf %557, %558 : vector<4x512xf32>
    %560 = arith.addf %551, %559 : vector<4x512xf32>
    %561 = vector.extract_strided_slice %466 {offsets = [0, 28], sizes = [4, 1], strides = [1, 1]} : vector<4x100xf32> to vector<4x1xf32>
    %562 = vector.extract_strided_slice %554 {offsets = [1, 0], sizes = [1, 512], strides = [1, 1]} : vector<4x512xf32> to vector<1x512xf32>
    %563 = vector.broadcast %561 : vector<4x1xf32> to vector<4x512xf32>
    %564 = vector.broadcast %562 : vector<1x512xf32> to vector<4x512xf32>
    %565 = arith.mulf %563, %564 : vector<4x512xf32>
    %566 = arith.addf %560, %565 : vector<4x512xf32>
    %567 = vector.extract_strided_slice %466 {offsets = [0, 53], sizes = [4, 1], strides = [1, 1]} : vector<4x100xf32> to vector<4x1xf32>
    %568 = vector.extract_strided_slice %554 {offsets = [2, 0], sizes = [1, 512], strides = [1, 1]} : vector<4x512xf32> to vector<1x512xf32>
    %569 = vector.broadcast %567 : vector<4x1xf32> to vector<4x512xf32>
    %570 = vector.broadcast %568 : vector<1x512xf32> to vector<4x512xf32>
    %571 = arith.mulf %569, %570 : vector<4x512xf32>
    %572 = arith.addf %566, %571 : vector<4x512xf32>
    %573 = vector.extract_strided_slice %466 {offsets = [0, 78], sizes = [4, 1], strides = [1, 1]} : vector<4x100xf32> to vector<4x1xf32>
    %574 = vector.extract_strided_slice %554 {offsets = [3, 0], sizes = [1, 512], strides = [1, 1]} : vector<4x512xf32> to vector<1x512xf32>
    %575 = vector.broadcast %573 : vector<4x1xf32> to vector<4x512xf32>
    %576 = vector.broadcast %574 : vector<1x512xf32> to vector<4x512xf32>
    %577 = arith.mulf %575, %576 : vector<4x512xf32>
    %578 = arith.addf %572, %577 : vector<4x512xf32>
    %579 = vector.extract_strided_slice %465 {offsets = [0, 474], sizes = [4, 38], strides = [1, 1]} : vector<4x512xf32> to vector<4x38xf32>
    %580 = vector.extract_strided_slice %465 {offsets = [0, 0], sizes = [4, 474], strides = [1, 1]} : vector<4x512xf32> to vector<4x474xf32>
    %581 = tpu.concatenate %579, %580 in 1 : vector<4x38xf32>, vector<4x474xf32> -> vector<4x512xf32>
    %582 = vector.extract_strided_slice %466 {offsets = [0, 4], sizes = [4, 1], strides = [1, 1]} : vector<4x100xf32> to vector<4x1xf32>
    %583 = vector.extract_strided_slice %581 {offsets = [0, 0], sizes = [1, 512], strides = [1, 1]} : vector<4x512xf32> to vector<1x512xf32>
    %584 = vector.broadcast %582 : vector<4x1xf32> to vector<4x512xf32>
    %585 = vector.broadcast %583 : vector<1x512xf32> to vector<4x512xf32>
    %586 = arith.mulf %584, %585 : vector<4x512xf32>
    %587 = arith.addf %578, %586 : vector<4x512xf32>
    %588 = vector.extract_strided_slice %466 {offsets = [0, 29], sizes = [4, 1], strides = [1, 1]} : vector<4x100xf32> to vector<4x1xf32>
    %589 = vector.extract_strided_slice %581 {offsets = [1, 0], sizes = [1, 512], strides = [1, 1]} : vector<4x512xf32> to vector<1x512xf32>
    %590 = vector.broadcast %588 : vector<4x1xf32> to vector<4x512xf32>
    %591 = vector.broadcast %589 : vector<1x512xf32> to vector<4x512xf32>
    %592 = arith.mulf %590, %591 : vector<4x512xf32>
    %593 = arith.addf %587, %592 : vector<4x512xf32>
    %594 = vector.extract_strided_slice %466 {offsets = [0, 54], sizes = [4, 1], strides = [1, 1]} : vector<4x100xf32> to vector<4x1xf32>
    %595 = vector.extract_strided_slice %581 {offsets = [2, 0], sizes = [1, 512], strides = [1, 1]} : vector<4x512xf32> to vector<1x512xf32>
    %596 = vector.broadcast %594 : vector<4x1xf32> to vector<4x512xf32>
    %597 = vector.broadcast %595 : vector<1x512xf32> to vector<4x512xf32>
    %598 = arith.mulf %596, %597 : vector<4x512xf32>
    %599 = arith.addf %593, %598 : vector<4x512xf32>
    %600 = vector.extract_strided_slice %466 {offsets = [0, 79], sizes = [4, 1], strides = [1, 1]} : vector<4x100xf32> to vector<4x1xf32>
    %601 = vector.extract_strided_slice %581 {offsets = [3, 0], sizes = [1, 512], strides = [1, 1]} : vector<4x512xf32> to vector<1x512xf32>
    %602 = vector.broadcast %600 : vector<4x1xf32> to vector<4x512xf32>
    %603 = vector.broadcast %601 : vector<1x512xf32> to vector<4x512xf32>
    %604 = arith.mulf %602, %603 : vector<4x512xf32>
    %605 = arith.addf %599, %604 : vector<4x512xf32>
    %606 = vector.extract_strided_slice %465 {offsets = [0, 490], sizes = [4, 22], strides = [1, 1]} : vector<4x512xf32> to vector<4x22xf32>
    %607 = vector.extract_strided_slice %465 {offsets = [0, 0], sizes = [4, 490], strides = [1, 1]} : vector<4x512xf32> to vector<4x490xf32>
    %608 = tpu.concatenate %606, %607 in 1 : vector<4x22xf32>, vector<4x490xf32> -> vector<4x512xf32>
    %609 = vector.extract_strided_slice %466 {offsets = [0, 5], sizes = [4, 1], strides = [1, 1]} : vector<4x100xf32> to vector<4x1xf32>
    %610 = vector.extract_strided_slice %608 {offsets = [0, 0], sizes = [1, 512], strides = [1, 1]} : vector<4x512xf32> to vector<1x512xf32>
    %611 = vector.broadcast %609 : vector<4x1xf32> to vector<4x512xf32>
    %612 = vector.broadcast %610 : vector<1x512xf32> to vector<4x512xf32>
    %613 = arith.mulf %611, %612 : vector<4x512xf32>
    %614 = arith.addf %605, %613 : vector<4x512xf32>
    %615 = vector.extract_strided_slice %466 {offsets = [0, 30], sizes = [4, 1], strides = [1, 1]} : vector<4x100xf32> to vector<4x1xf32>
    %616 = vector.extract_strided_slice %608 {offsets = [1, 0], sizes = [1, 512], strides = [1, 1]} : vector<4x512xf32> to vector<1x512xf32>
    %617 = vector.broadcast %615 : vector<4x1xf32> to vector<4x512xf32>
    %618 = vector.broadcast %616 : vector<1x512xf32> to vector<4x512xf32>
    %619 = arith.mulf %617, %618 : vector<4x512xf32>
    %620 = arith.addf %614, %619 : vector<4x512xf32>
    %621 = vector.extract_strided_slice %466 {offsets = [0, 55], sizes = [4, 1], strides = [1, 1]} : vector<4x100xf32> to vector<4x1xf32>
    %622 = vector.extract_strided_slice %608 {offsets = [2, 0], sizes = [1, 512], strides = [1, 1]} : vector<4x512xf32> to vector<1x512xf32>
    %623 = vector.broadcast %621 : vector<4x1xf32> to vector<4x512xf32>
    %624 = vector.broadcast %622 : vector<1x512xf32> to vector<4x512xf32>
    %625 = arith.mulf %623, %624 : vector<4x512xf32>
    %626 = arith.addf %620, %625 : vector<4x512xf32>
    %627 = vector.extract_strided_slice %466 {offsets = [0, 80], sizes = [4, 1], strides = [1, 1]} : vector<4x100xf32> to vector<4x1xf32>
    %628 = vector.extract_strided_slice %608 {offsets = [3, 0], sizes = [1, 512], strides = [1, 1]} : vector<4x512xf32> to vector<1x512xf32>
    %629 = vector.broadcast %627 : vector<4x1xf32> to vector<4x512xf32>
    %630 = vector.broadcast %628 : vector<1x512xf32> to vector<4x512xf32>
    %631 = arith.mulf %629, %630 : vector<4x512xf32>
    %632 = arith.addf %626, %631 : vector<4x512xf32>
    %633 = vector.extract_strided_slice %465 {offsets = [0, 491], sizes = [4, 21], strides = [1, 1]} : vector<4x512xf32> to vector<4x21xf32>
    %634 = vector.extract_strided_slice %465 {offsets = [0, 0], sizes = [4, 491], strides = [1, 1]} : vector<4x512xf32> to vector<4x491xf32>
    %635 = tpu.concatenate %633, %634 in 1 : vector<4x21xf32>, vector<4x491xf32> -> vector<4x512xf32>
    %636 = vector.extract_strided_slice %466 {offsets = [0, 6], sizes = [4, 1], strides = [1, 1]} : vector<4x100xf32> to vector<4x1xf32>
    %637 = vector.extract_strided_slice %635 {offsets = [0, 0], sizes = [1, 512], strides = [1, 1]} : vector<4x512xf32> to vector<1x512xf32>
    %638 = vector.broadcast %636 : vector<4x1xf32> to vector<4x512xf32>
    %639 = vector.broadcast %637 : vector<1x512xf32> to vector<4x512xf32>
    %640 = arith.mulf %638, %639 : vector<4x512xf32>
    %641 = arith.addf %632, %640 : vector<4x512xf32>
    %642 = vector.extract_strided_slice %466 {offsets = [0, 31], sizes = [4, 1], strides = [1, 1]} : vector<4x100xf32> to vector<4x1xf32>
    %643 = vector.extract_strided_slice %635 {offsets = [1, 0], sizes = [1, 512], strides = [1, 1]} : vector<4x512xf32> to vector<1x512xf32>
    %644 = vector.broadcast %642 : vector<4x1xf32> to vector<4x512xf32>
    %645 = vector.broadcast %643 : vector<1x512xf32> to vector<4x512xf32>
    %646 = arith.mulf %644, %645 : vector<4x512xf32>
    %647 = arith.addf %641, %646 : vector<4x512xf32>
    %648 = vector.extract_strided_slice %466 {offsets = [0, 56], sizes = [4, 1], strides = [1, 1]} : vector<4x100xf32> to vector<4x1xf32>
    %649 = vector.extract_strided_slice %635 {offsets = [2, 0], sizes = [1, 512], strides = [1, 1]} : vector<4x512xf32> to vector<1x512xf32>
    %650 = vector.broadcast %648 : vector<4x1xf32> to vector<4x512xf32>
    %651 = vector.broadcast %649 : vector<1x512xf32> to vector<4x512xf32>
    %652 = arith.mulf %650, %651 : vector<4x512xf32>
    %653 = arith.addf %647, %652 : vector<4x512xf32>
    %654 = vector.extract_strided_slice %466 {offsets = [0, 81], sizes = [4, 1], strides = [1, 1]} : vector<4x100xf32> to vector<4x1xf32>
    %655 = vector.extract_strided_slice %635 {offsets = [3, 0], sizes = [1, 512], strides = [1, 1]} : vector<4x512xf32> to vector<1x512xf32>
    %656 = vector.broadcast %654 : vector<4x1xf32> to vector<4x512xf32>
    %657 = vector.broadcast %655 : vector<1x512xf32> to vector<4x512xf32>
    %658 = arith.mulf %656, %657 : vector<4x512xf32>
    %659 = arith.addf %653, %658 : vector<4x512xf32>
    %660 = vector.extract_strided_slice %465 {offsets = [0, 492], sizes = [4, 20], strides = [1, 1]} : vector<4x512xf32> to vector<4x20xf32>
    %661 = vector.extract_strided_slice %465 {offsets = [0, 0], sizes = [4, 492], strides = [1, 1]} : vector<4x512xf32> to vector<4x492xf32>
    %662 = tpu.concatenate %660, %661 in 1 : vector<4x20xf32>, vector<4x492xf32> -> vector<4x512xf32>
    %663 = vector.extract_strided_slice %466 {offsets = [0, 7], sizes = [4, 1], strides = [1, 1]} : vector<4x100xf32> to vector<4x1xf32>
    %664 = vector.extract_strided_slice %662 {offsets = [0, 0], sizes = [1, 512], strides = [1, 1]} : vector<4x512xf32> to vector<1x512xf32>
    %665 = vector.broadcast %663 : vector<4x1xf32> to vector<4x512xf32>
    %666 = vector.broadcast %664 : vector<1x512xf32> to vector<4x512xf32>
    %667 = arith.mulf %665, %666 : vector<4x512xf32>
    %668 = arith.addf %659, %667 : vector<4x512xf32>
    %669 = vector.extract_strided_slice %466 {offsets = [0, 32], sizes = [4, 1], strides = [1, 1]} : vector<4x100xf32> to vector<4x1xf32>
    %670 = vector.extract_strided_slice %662 {offsets = [1, 0], sizes = [1, 512], strides = [1, 1]} : vector<4x512xf32> to vector<1x512xf32>
    %671 = vector.broadcast %669 : vector<4x1xf32> to vector<4x512xf32>
    %672 = vector.broadcast %670 : vector<1x512xf32> to vector<4x512xf32>
    %673 = arith.mulf %671, %672 : vector<4x512xf32>
    %674 = arith.addf %668, %673 : vector<4x512xf32>
    %675 = vector.extract_strided_slice %466 {offsets = [0, 57], sizes = [4, 1], strides = [1, 1]} : vector<4x100xf32> to vector<4x1xf32>
    %676 = vector.extract_strided_slice %662 {offsets = [2, 0], sizes = [1, 512], strides = [1, 1]} : vector<4x512xf32> to vector<1x512xf32>
    %677 = vector.broadcast %675 : vector<4x1xf32> to vector<4x512xf32>
    %678 = vector.broadcast %676 : vector<1x512xf32> to vector<4x512xf32>
    %679 = arith.mulf %677, %678 : vector<4x512xf32>
    %680 = arith.addf %674, %679 : vector<4x512xf32>
    %681 = vector.extract_strided_slice %466 {offsets = [0, 82], sizes = [4, 1], strides = [1, 1]} : vector<4x100xf32> to vector<4x1xf32>
    %682 = vector.extract_strided_slice %662 {offsets = [3, 0], sizes = [1, 512], strides = [1, 1]} : vector<4x512xf32> to vector<1x512xf32>
    %683 = vector.broadcast %681 : vector<4x1xf32> to vector<4x512xf32>
    %684 = vector.broadcast %682 : vector<1x512xf32> to vector<4x512xf32>
    %685 = arith.mulf %683, %684 : vector<4x512xf32>
    %686 = arith.addf %680, %685 : vector<4x512xf32>
    %687 = vector.extract_strided_slice %465 {offsets = [0, 493], sizes = [4, 19], strides = [1, 1]} : vector<4x512xf32> to vector<4x19xf32>
    %688 = vector.extract_strided_slice %465 {offsets = [0, 0], sizes = [4, 493], strides = [1, 1]} : vector<4x512xf32> to vector<4x493xf32>
    %689 = tpu.concatenate %687, %688 in 1 : vector<4x19xf32>, vector<4x493xf32> -> vector<4x512xf32>
    %690 = vector.extract_strided_slice %466 {offsets = [0, 8], sizes = [4, 1], strides = [1, 1]} : vector<4x100xf32> to vector<4x1xf32>
    %691 = vector.extract_strided_slice %689 {offsets = [0, 0], sizes = [1, 512], strides = [1, 1]} : vector<4x512xf32> to vector<1x512xf32>
    %692 = vector.broadcast %690 : vector<4x1xf32> to vector<4x512xf32>
    %693 = vector.broadcast %691 : vector<1x512xf32> to vector<4x512xf32>
    %694 = arith.mulf %692, %693 : vector<4x512xf32>
    %695 = arith.addf %686, %694 : vector<4x512xf32>
    %696 = vector.extract_strided_slice %466 {offsets = [0, 33], sizes = [4, 1], strides = [1, 1]} : vector<4x100xf32> to vector<4x1xf32>
    %697 = vector.extract_strided_slice %689 {offsets = [1, 0], sizes = [1, 512], strides = [1, 1]} : vector<4x512xf32> to vector<1x512xf32>
    %698 = vector.broadcast %696 : vector<4x1xf32> to vector<4x512xf32>
    %699 = vector.broadcast %697 : vector<1x512xf32> to vector<4x512xf32>
    %700 = arith.mulf %698, %699 : vector<4x512xf32>
    %701 = arith.addf %695, %700 : vector<4x512xf32>
    %702 = vector.extract_strided_slice %466 {offsets = [0, 58], sizes = [4, 1], strides = [1, 1]} : vector<4x100xf32> to vector<4x1xf32>
    %703 = vector.extract_strided_slice %689 {offsets = [2, 0], sizes = [1, 512], strides = [1, 1]} : vector<4x512xf32> to vector<1x512xf32>
    %704 = vector.broadcast %702 : vector<4x1xf32> to vector<4x512xf32>
    %705 = vector.broadcast %703 : vector<1x512xf32> to vector<4x512xf32>
    %706 = arith.mulf %704, %705 : vector<4x512xf32>
    %707 = arith.addf %701, %706 : vector<4x512xf32>
    %708 = vector.extract_strided_slice %466 {offsets = [0, 83], sizes = [4, 1], strides = [1, 1]} : vector<4x100xf32> to vector<4x1xf32>
    %709 = vector.extract_strided_slice %689 {offsets = [3, 0], sizes = [1, 512], strides = [1, 1]} : vector<4x512xf32> to vector<1x512xf32>
    %710 = vector.broadcast %708 : vector<4x1xf32> to vector<4x512xf32>
    %711 = vector.broadcast %709 : vector<1x512xf32> to vector<4x512xf32>
    %712 = arith.mulf %710, %711 : vector<4x512xf32>
    %713 = arith.addf %707, %712 : vector<4x512xf32>
    %714 = vector.extract_strided_slice %465 {offsets = [0, 494], sizes = [4, 18], strides = [1, 1]} : vector<4x512xf32> to vector<4x18xf32>
    %715 = vector.extract_strided_slice %465 {offsets = [0, 0], sizes = [4, 494], strides = [1, 1]} : vector<4x512xf32> to vector<4x494xf32>
    %716 = tpu.concatenate %714, %715 in 1 : vector<4x18xf32>, vector<4x494xf32> -> vector<4x512xf32>
    %717 = vector.extract_strided_slice %466 {offsets = [0, 9], sizes = [4, 1], strides = [1, 1]} : vector<4x100xf32> to vector<4x1xf32>
    %718 = vector.extract_strided_slice %716 {offsets = [0, 0], sizes = [1, 512], strides = [1, 1]} : vector<4x512xf32> to vector<1x512xf32>
    %719 = vector.broadcast %717 : vector<4x1xf32> to vector<4x512xf32>
    %720 = vector.broadcast %718 : vector<1x512xf32> to vector<4x512xf32>
    %721 = arith.mulf %719, %720 : vector<4x512xf32>
    %722 = arith.addf %713, %721 : vector<4x512xf32>
    %723 = vector.extract_strided_slice %466 {offsets = [0, 34], sizes = [4, 1], strides = [1, 1]} : vector<4x100xf32> to vector<4x1xf32>
    %724 = vector.extract_strided_slice %716 {offsets = [1, 0], sizes = [1, 512], strides = [1, 1]} : vector<4x512xf32> to vector<1x512xf32>
    %725 = vector.broadcast %723 : vector<4x1xf32> to vector<4x512xf32>
    %726 = vector.broadcast %724 : vector<1x512xf32> to vector<4x512xf32>
    %727 = arith.mulf %725, %726 : vector<4x512xf32>
    %728 = arith.addf %722, %727 : vector<4x512xf32>
    %729 = vector.extract_strided_slice %466 {offsets = [0, 59], sizes = [4, 1], strides = [1, 1]} : vector<4x100xf32> to vector<4x1xf32>
    %730 = vector.extract_strided_slice %716 {offsets = [2, 0], sizes = [1, 512], strides = [1, 1]} : vector<4x512xf32> to vector<1x512xf32>
    %731 = vector.broadcast %729 : vector<4x1xf32> to vector<4x512xf32>
    %732 = vector.broadcast %730 : vector<1x512xf32> to vector<4x512xf32>
    %733 = arith.mulf %731, %732 : vector<4x512xf32>
    %734 = arith.addf %728, %733 : vector<4x512xf32>
    %735 = vector.extract_strided_slice %466 {offsets = [0, 84], sizes = [4, 1], strides = [1, 1]} : vector<4x100xf32> to vector<4x1xf32>
    %736 = vector.extract_strided_slice %716 {offsets = [3, 0], sizes = [1, 512], strides = [1, 1]} : vector<4x512xf32> to vector<1x512xf32>
    %737 = vector.broadcast %735 : vector<4x1xf32> to vector<4x512xf32>
    %738 = vector.broadcast %736 : vector<1x512xf32> to vector<4x512xf32>
    %739 = arith.mulf %737, %738 : vector<4x512xf32>
    %740 = arith.addf %734, %739 : vector<4x512xf32>
    %741 = vector.extract_strided_slice %465 {offsets = [0, 510], sizes = [4, 2], strides = [1, 1]} : vector<4x512xf32> to vector<4x2xf32>
    %742 = vector.extract_strided_slice %465 {offsets = [0, 0], sizes = [4, 510], strides = [1, 1]} : vector<4x512xf32> to vector<4x510xf32>
    %743 = tpu.concatenate %741, %742 in 1 : vector<4x2xf32>, vector<4x510xf32> -> vector<4x512xf32>
    %744 = vector.extract_strided_slice %466 {offsets = [0, 10], sizes = [4, 1], strides = [1, 1]} : vector<4x100xf32> to vector<4x1xf32>
    %745 = vector.extract_strided_slice %743 {offsets = [0, 0], sizes = [1, 512], strides = [1, 1]} : vector<4x512xf32> to vector<1x512xf32>
    %746 = vector.broadcast %744 : vector<4x1xf32> to vector<4x512xf32>
    %747 = vector.broadcast %745 : vector<1x512xf32> to vector<4x512xf32>
    %748 = arith.mulf %746, %747 : vector<4x512xf32>
    %749 = arith.addf %740, %748 : vector<4x512xf32>
    %750 = vector.extract_strided_slice %466 {offsets = [0, 35], sizes = [4, 1], strides = [1, 1]} : vector<4x100xf32> to vector<4x1xf32>
    %751 = vector.extract_strided_slice %743 {offsets = [1, 0], sizes = [1, 512], strides = [1, 1]} : vector<4x512xf32> to vector<1x512xf32>
    %752 = vector.broadcast %750 : vector<4x1xf32> to vector<4x512xf32>
    %753 = vector.broadcast %751 : vector<1x512xf32> to vector<4x512xf32>
    %754 = arith.mulf %752, %753 : vector<4x512xf32>
    %755 = arith.addf %749, %754 : vector<4x512xf32>
    %756 = vector.extract_strided_slice %466 {offsets = [0, 60], sizes = [4, 1], strides = [1, 1]} : vector<4x100xf32> to vector<4x1xf32>
    %757 = vector.extract_strided_slice %743 {offsets = [2, 0], sizes = [1, 512], strides = [1, 1]} : vector<4x512xf32> to vector<1x512xf32>
    %758 = vector.broadcast %756 : vector<4x1xf32> to vector<4x512xf32>
    %759 = vector.broadcast %757 : vector<1x512xf32> to vector<4x512xf32>
    %760 = arith.mulf %758, %759 : vector<4x512xf32>
    %761 = arith.addf %755, %760 : vector<4x512xf32>
    %762 = vector.extract_strided_slice %466 {offsets = [0, 85], sizes = [4, 1], strides = [1, 1]} : vector<4x100xf32> to vector<4x1xf32>
    %763 = vector.extract_strided_slice %743 {offsets = [3, 0], sizes = [1, 512], strides = [1, 1]} : vector<4x512xf32> to vector<1x512xf32>
    %764 = vector.broadcast %762 : vector<4x1xf32> to vector<4x512xf32>
    %765 = vector.broadcast %763 : vector<1x512xf32> to vector<4x512xf32>
    %766 = arith.mulf %764, %765 : vector<4x512xf32>
    %767 = arith.addf %761, %766 : vector<4x512xf32>
    %768 = vector.extract_strided_slice %465 {offsets = [0, 511], sizes = [4, 1], strides = [1, 1]} : vector<4x512xf32> to vector<4x1xf32>
    %769 = vector.extract_strided_slice %465 {offsets = [0, 0], sizes = [4, 511], strides = [1, 1]} : vector<4x512xf32> to vector<4x511xf32>
    %770 = tpu.concatenate %768, %769 in 1 : vector<4x1xf32>, vector<4x511xf32> -> vector<4x512xf32>
    %771 = vector.extract_strided_slice %466 {offsets = [0, 11], sizes = [4, 1], strides = [1, 1]} : vector<4x100xf32> to vector<4x1xf32>
    %772 = vector.extract_strided_slice %770 {offsets = [0, 0], sizes = [1, 512], strides = [1, 1]} : vector<4x512xf32> to vector<1x512xf32>
    %773 = vector.broadcast %771 : vector<4x1xf32> to vector<4x512xf32>
    %774 = vector.broadcast %772 : vector<1x512xf32> to vector<4x512xf32>
    %775 = arith.mulf %773, %774 : vector<4x512xf32>
    %776 = arith.addf %767, %775 : vector<4x512xf32>
    %777 = vector.extract_strided_slice %466 {offsets = [0, 36], sizes = [4, 1], strides = [1, 1]} : vector<4x100xf32> to vector<4x1xf32>
    %778 = vector.extract_strided_slice %770 {offsets = [1, 0], sizes = [1, 512], strides = [1, 1]} : vector<4x512xf32> to vector<1x512xf32>
    %779 = vector.broadcast %777 : vector<4x1xf32> to vector<4x512xf32>
    %780 = vector.broadcast %778 : vector<1x512xf32> to vector<4x512xf32>
    %781 = arith.mulf %779, %780 : vector<4x512xf32>
    %782 = arith.addf %776, %781 : vector<4x512xf32>
    %783 = vector.extract_strided_slice %466 {offsets = [0, 61], sizes = [4, 1], strides = [1, 1]} : vector<4x100xf32> to vector<4x1xf32>
    %784 = vector.extract_strided_slice %770 {offsets = [2, 0], sizes = [1, 512], strides = [1, 1]} : vector<4x512xf32> to vector<1x512xf32>
    %785 = vector.broadcast %783 : vector<4x1xf32> to vector<4x512xf32>
    %786 = vector.broadcast %784 : vector<1x512xf32> to vector<4x512xf32>
    %787 = arith.mulf %785, %786 : vector<4x512xf32>
    %788 = arith.addf %782, %787 : vector<4x512xf32>
    %789 = vector.extract_strided_slice %466 {offsets = [0, 86], sizes = [4, 1], strides = [1, 1]} : vector<4x100xf32> to vector<4x1xf32>
    %790 = vector.extract_strided_slice %770 {offsets = [3, 0], sizes = [1, 512], strides = [1, 1]} : vector<4x512xf32> to vector<1x512xf32>
    %791 = vector.broadcast %789 : vector<4x1xf32> to vector<4x512xf32>
    %792 = vector.broadcast %790 : vector<1x512xf32> to vector<4x512xf32>
    %793 = arith.mulf %791, %792 : vector<4x512xf32>
    %794 = arith.addf %788, %793 : vector<4x512xf32>
    %795 = vector.extract_strided_slice %466 {offsets = [0, 12], sizes = [4, 1], strides = [1, 1]} : vector<4x100xf32> to vector<4x1xf32>
    %796 = vector.extract_strided_slice %465 {offsets = [0, 0], sizes = [1, 512], strides = [1, 1]} : vector<4x512xf32> to vector<1x512xf32>
    %797 = vector.broadcast %795 : vector<4x1xf32> to vector<4x512xf32>
    %798 = vector.broadcast %796 : vector<1x512xf32> to vector<4x512xf32>
    %799 = arith.mulf %797, %798 : vector<4x512xf32>
    %800 = arith.addf %794, %799 : vector<4x512xf32>
    %801 = vector.extract_strided_slice %466 {offsets = [0, 37], sizes = [4, 1], strides = [1, 1]} : vector<4x100xf32> to vector<4x1xf32>
    %802 = vector.extract_strided_slice %465 {offsets = [1, 0], sizes = [1, 512], strides = [1, 1]} : vector<4x512xf32> to vector<1x512xf32>
    %803 = vector.broadcast %801 : vector<4x1xf32> to vector<4x512xf32>
    %804 = vector.broadcast %802 : vector<1x512xf32> to vector<4x512xf32>
    %805 = arith.mulf %803, %804 : vector<4x512xf32>
    %806 = arith.addf %800, %805 : vector<4x512xf32>
    %807 = vector.extract_strided_slice %466 {offsets = [0, 62], sizes = [4, 1], strides = [1, 1]} : vector<4x100xf32> to vector<4x1xf32>
    %808 = vector.extract_strided_slice %465 {offsets = [2, 0], sizes = [1, 512], strides = [1, 1]} : vector<4x512xf32> to vector<1x512xf32>
    %809 = vector.broadcast %807 : vector<4x1xf32> to vector<4x512xf32>
    %810 = vector.broadcast %808 : vector<1x512xf32> to vector<4x512xf32>
    %811 = arith.mulf %809, %810 : vector<4x512xf32>
    %812 = arith.addf %806, %811 : vector<4x512xf32>
    %813 = vector.extract_strided_slice %466 {offsets = [0, 87], sizes = [4, 1], strides = [1, 1]} : vector<4x100xf32> to vector<4x1xf32>
    %814 = vector.extract_strided_slice %465 {offsets = [3, 0], sizes = [1, 512], strides = [1, 1]} : vector<4x512xf32> to vector<1x512xf32>
    %815 = vector.broadcast %813 : vector<4x1xf32> to vector<4x512xf32>
    %816 = vector.broadcast %814 : vector<1x512xf32> to vector<4x512xf32>
    %817 = arith.mulf %815, %816 : vector<4x512xf32>
    %818 = arith.addf %812, %817 : vector<4x512xf32>
    %819 = vector.extract_strided_slice %465 {offsets = [0, 1], sizes = [4, 511], strides = [1, 1]} : vector<4x512xf32> to vector<4x511xf32>
    %820 = vector.extract_strided_slice %465 {offsets = [0, 0], sizes = [4, 1], strides = [1, 1]} : vector<4x512xf32> to vector<4x1xf32>
    %821 = tpu.concatenate %819, %820 in 1 : vector<4x511xf32>, vector<4x1xf32> -> vector<4x512xf32>
    %822 = vector.extract_strided_slice %466 {offsets = [0, 13], sizes = [4, 1], strides = [1, 1]} : vector<4x100xf32> to vector<4x1xf32>
    %823 = vector.extract_strided_slice %821 {offsets = [0, 0], sizes = [1, 512], strides = [1, 1]} : vector<4x512xf32> to vector<1x512xf32>
    %824 = vector.broadcast %822 : vector<4x1xf32> to vector<4x512xf32>
    %825 = vector.broadcast %823 : vector<1x512xf32> to vector<4x512xf32>
    %826 = arith.mulf %824, %825 : vector<4x512xf32>
    %827 = arith.addf %818, %826 : vector<4x512xf32>
    %828 = vector.extract_strided_slice %466 {offsets = [0, 38], sizes = [4, 1], strides = [1, 1]} : vector<4x100xf32> to vector<4x1xf32>
    %829 = vector.extract_strided_slice %821 {offsets = [1, 0], sizes = [1, 512], strides = [1, 1]} : vector<4x512xf32> to vector<1x512xf32>
    %830 = vector.broadcast %828 : vector<4x1xf32> to vector<4x512xf32>
    %831 = vector.broadcast %829 : vector<1x512xf32> to vector<4x512xf32>
    %832 = arith.mulf %830, %831 : vector<4x512xf32>
    %833 = arith.addf %827, %832 : vector<4x512xf32>
    %834 = vector.extract_strided_slice %466 {offsets = [0, 63], sizes = [4, 1], strides = [1, 1]} : vector<4x100xf32> to vector<4x1xf32>
    %835 = vector.extract_strided_slice %821 {offsets = [2, 0], sizes = [1, 512], strides = [1, 1]} : vector<4x512xf32> to vector<1x512xf32>
    %836 = vector.broadcast %834 : vector<4x1xf32> to vector<4x512xf32>
    %837 = vector.broadcast %835 : vector<1x512xf32> to vector<4x512xf32>
    %838 = arith.mulf %836, %837 : vector<4x512xf32>
    %839 = arith.addf %833, %838 : vector<4x512xf32>
    %840 = vector.extract_strided_slice %466 {offsets = [0, 88], sizes = [4, 1], strides = [1, 1]} : vector<4x100xf32> to vector<4x1xf32>
    %841 = vector.extract_strided_slice %821 {offsets = [3, 0], sizes = [1, 512], strides = [1, 1]} : vector<4x512xf32> to vector<1x512xf32>
    %842 = vector.broadcast %840 : vector<4x1xf32> to vector<4x512xf32>
    %843 = vector.broadcast %841 : vector<1x512xf32> to vector<4x512xf32>
    %844 = arith.mulf %842, %843 : vector<4x512xf32>
    %845 = arith.addf %839, %844 : vector<4x512xf32>
    %846 = vector.extract_strided_slice %465 {offsets = [0, 2], sizes = [4, 510], strides = [1, 1]} : vector<4x512xf32> to vector<4x510xf32>
    %847 = vector.extract_strided_slice %465 {offsets = [0, 0], sizes = [4, 2], strides = [1, 1]} : vector<4x512xf32> to vector<4x2xf32>
    %848 = tpu.concatenate %846, %847 in 1 : vector<4x510xf32>, vector<4x2xf32> -> vector<4x512xf32>
    %849 = vector.extract_strided_slice %466 {offsets = [0, 14], sizes = [4, 1], strides = [1, 1]} : vector<4x100xf32> to vector<4x1xf32>
    %850 = vector.extract_strided_slice %848 {offsets = [0, 0], sizes = [1, 512], strides = [1, 1]} : vector<4x512xf32> to vector<1x512xf32>
    %851 = vector.broadcast %849 : vector<4x1xf32> to vector<4x512xf32>
    %852 = vector.broadcast %850 : vector<1x512xf32> to vector<4x512xf32>
    %853 = arith.mulf %851, %852 : vector<4x512xf32>
    %854 = arith.addf %845, %853 : vector<4x512xf32>
    %855 = vector.extract_strided_slice %466 {offsets = [0, 39], sizes = [4, 1], strides = [1, 1]} : vector<4x100xf32> to vector<4x1xf32>
    %856 = vector.extract_strided_slice %848 {offsets = [1, 0], sizes = [1, 512], strides = [1, 1]} : vector<4x512xf32> to vector<1x512xf32>
    %857 = vector.broadcast %855 : vector<4x1xf32> to vector<4x512xf32>
    %858 = vector.broadcast %856 : vector<1x512xf32> to vector<4x512xf32>
    %859 = arith.mulf %857, %858 : vector<4x512xf32>
    %860 = arith.addf %854, %859 : vector<4x512xf32>
    %861 = vector.extract_strided_slice %466 {offsets = [0, 64], sizes = [4, 1], strides = [1, 1]} : vector<4x100xf32> to vector<4x1xf32>
    %862 = vector.extract_strided_slice %848 {offsets = [2, 0], sizes = [1, 512], strides = [1, 1]} : vector<4x512xf32> to vector<1x512xf32>
    %863 = vector.broadcast %861 : vector<4x1xf32> to vector<4x512xf32>
    %864 = vector.broadcast %862 : vector<1x512xf32> to vector<4x512xf32>
    %865 = arith.mulf %863, %864 : vector<4x512xf32>
    %866 = arith.addf %860, %865 : vector<4x512xf32>
    %867 = vector.extract_strided_slice %466 {offsets = [0, 89], sizes = [4, 1], strides = [1, 1]} : vector<4x100xf32> to vector<4x1xf32>
    %868 = vector.extract_strided_slice %848 {offsets = [3, 0], sizes = [1, 512], strides = [1, 1]} : vector<4x512xf32> to vector<1x512xf32>
    %869 = vector.broadcast %867 : vector<4x1xf32> to vector<4x512xf32>
    %870 = vector.broadcast %868 : vector<1x512xf32> to vector<4x512xf32>
    %871 = arith.mulf %869, %870 : vector<4x512xf32>
    %872 = arith.addf %866, %871 : vector<4x512xf32>
    %873 = vector.extract_strided_slice %465 {offsets = [0, 18], sizes = [4, 494], strides = [1, 1]} : vector<4x512xf32> to vector<4x494xf32>
    %874 = vector.extract_strided_slice %465 {offsets = [0, 0], sizes = [4, 18], strides = [1, 1]} : vector<4x512xf32> to vector<4x18xf32>
    %875 = tpu.concatenate %873, %874 in 1 : vector<4x494xf32>, vector<4x18xf32> -> vector<4x512xf32>
    %876 = vector.extract_strided_slice %466 {offsets = [0, 15], sizes = [4, 1], strides = [1, 1]} : vector<4x100xf32> to vector<4x1xf32>
    %877 = vector.extract_strided_slice %875 {offsets = [0, 0], sizes = [1, 512], strides = [1, 1]} : vector<4x512xf32> to vector<1x512xf32>
    %878 = vector.broadcast %876 : vector<4x1xf32> to vector<4x512xf32>
    %879 = vector.broadcast %877 : vector<1x512xf32> to vector<4x512xf32>
    %880 = arith.mulf %878, %879 : vector<4x512xf32>
    %881 = arith.addf %872, %880 : vector<4x512xf32>
    %882 = vector.extract_strided_slice %466 {offsets = [0, 40], sizes = [4, 1], strides = [1, 1]} : vector<4x100xf32> to vector<4x1xf32>
    %883 = vector.extract_strided_slice %875 {offsets = [1, 0], sizes = [1, 512], strides = [1, 1]} : vector<4x512xf32> to vector<1x512xf32>
    %884 = vector.broadcast %882 : vector<4x1xf32> to vector<4x512xf32>
    %885 = vector.broadcast %883 : vector<1x512xf32> to vector<4x512xf32>
    %886 = arith.mulf %884, %885 : vector<4x512xf32>
    %887 = arith.addf %881, %886 : vector<4x512xf32>
    %888 = vector.extract_strided_slice %466 {offsets = [0, 65], sizes = [4, 1], strides = [1, 1]} : vector<4x100xf32> to vector<4x1xf32>
    %889 = vector.extract_strided_slice %875 {offsets = [2, 0], sizes = [1, 512], strides = [1, 1]} : vector<4x512xf32> to vector<1x512xf32>
    %890 = vector.broadcast %888 : vector<4x1xf32> to vector<4x512xf32>
    %891 = vector.broadcast %889 : vector<1x512xf32> to vector<4x512xf32>
    %892 = arith.mulf %890, %891 : vector<4x512xf32>
    %893 = arith.addf %887, %892 : vector<4x512xf32>
    %894 = vector.extract_strided_slice %466 {offsets = [0, 90], sizes = [4, 1], strides = [1, 1]} : vector<4x100xf32> to vector<4x1xf32>
    %895 = vector.extract_strided_slice %875 {offsets = [3, 0], sizes = [1, 512], strides = [1, 1]} : vector<4x512xf32> to vector<1x512xf32>
    %896 = vector.broadcast %894 : vector<4x1xf32> to vector<4x512xf32>
    %897 = vector.broadcast %895 : vector<1x512xf32> to vector<4x512xf32>
    %898 = arith.mulf %896, %897 : vector<4x512xf32>
    %899 = arith.addf %893, %898 : vector<4x512xf32>
    %900 = vector.extract_strided_slice %465 {offsets = [0, 19], sizes = [4, 493], strides = [1, 1]} : vector<4x512xf32> to vector<4x493xf32>
    %901 = vector.extract_strided_slice %465 {offsets = [0, 0], sizes = [4, 19], strides = [1, 1]} : vector<4x512xf32> to vector<4x19xf32>
    %902 = tpu.concatenate %900, %901 in 1 : vector<4x493xf32>, vector<4x19xf32> -> vector<4x512xf32>
    %903 = vector.extract_strided_slice %466 {offsets = [0, 16], sizes = [4, 1], strides = [1, 1]} : vector<4x100xf32> to vector<4x1xf32>
    %904 = vector.extract_strided_slice %902 {offsets = [0, 0], sizes = [1, 512], strides = [1, 1]} : vector<4x512xf32> to vector<1x512xf32>
    %905 = vector.broadcast %903 : vector<4x1xf32> to vector<4x512xf32>
    %906 = vector.broadcast %904 : vector<1x512xf32> to vector<4x512xf32>
    %907 = arith.mulf %905, %906 : vector<4x512xf32>
    %908 = arith.addf %899, %907 : vector<4x512xf32>
    %909 = vector.extract_strided_slice %466 {offsets = [0, 41], sizes = [4, 1], strides = [1, 1]} : vector<4x100xf32> to vector<4x1xf32>
    %910 = vector.extract_strided_slice %902 {offsets = [1, 0], sizes = [1, 512], strides = [1, 1]} : vector<4x512xf32> to vector<1x512xf32>
    %911 = vector.broadcast %909 : vector<4x1xf32> to vector<4x512xf32>
    %912 = vector.broadcast %910 : vector<1x512xf32> to vector<4x512xf32>
    %913 = arith.mulf %911, %912 : vector<4x512xf32>
    %914 = arith.addf %908, %913 : vector<4x512xf32>
    %915 = vector.extract_strided_slice %466 {offsets = [0, 66], sizes = [4, 1], strides = [1, 1]} : vector<4x100xf32> to vector<4x1xf32>
    %916 = vector.extract_strided_slice %902 {offsets = [2, 0], sizes = [1, 512], strides = [1, 1]} : vector<4x512xf32> to vector<1x512xf32>
    %917 = vector.broadcast %915 : vector<4x1xf32> to vector<4x512xf32>
    %918 = vector.broadcast %916 : vector<1x512xf32> to vector<4x512xf32>
    %919 = arith.mulf %917, %918 : vector<4x512xf32>
    %920 = arith.addf %914, %919 : vector<4x512xf32>
    %921 = vector.extract_strided_slice %466 {offsets = [0, 91], sizes = [4, 1], strides = [1, 1]} : vector<4x100xf32> to vector<4x1xf32>
    %922 = vector.extract_strided_slice %902 {offsets = [3, 0], sizes = [1, 512], strides = [1, 1]} : vector<4x512xf32> to vector<1x512xf32>
    %923 = vector.broadcast %921 : vector<4x1xf32> to vector<4x512xf32>
    %924 = vector.broadcast %922 : vector<1x512xf32> to vector<4x512xf32>
    %925 = arith.mulf %923, %924 : vector<4x512xf32>
    %926 = arith.addf %920, %925 : vector<4x512xf32>
    %927 = vector.extract_strided_slice %465 {offsets = [0, 20], sizes = [4, 492], strides = [1, 1]} : vector<4x512xf32> to vector<4x492xf32>
    %928 = vector.extract_strided_slice %465 {offsets = [0, 0], sizes = [4, 20], strides = [1, 1]} : vector<4x512xf32> to vector<4x20xf32>
    %929 = tpu.concatenate %927, %928 in 1 : vector<4x492xf32>, vector<4x20xf32> -> vector<4x512xf32>
    %930 = vector.extract_strided_slice %466 {offsets = [0, 17], sizes = [4, 1], strides = [1, 1]} : vector<4x100xf32> to vector<4x1xf32>
    %931 = vector.extract_strided_slice %929 {offsets = [0, 0], sizes = [1, 512], strides = [1, 1]} : vector<4x512xf32> to vector<1x512xf32>
    %932 = vector.broadcast %930 : vector<4x1xf32> to vector<4x512xf32>
    %933 = vector.broadcast %931 : vector<1x512xf32> to vector<4x512xf32>
    %934 = arith.mulf %932, %933 : vector<4x512xf32>
    %935 = arith.addf %926, %934 : vector<4x512xf32>
    %936 = vector.extract_strided_slice %466 {offsets = [0, 42], sizes = [4, 1], strides = [1, 1]} : vector<4x100xf32> to vector<4x1xf32>
    %937 = vector.extract_strided_slice %929 {offsets = [1, 0], sizes = [1, 512], strides = [1, 1]} : vector<4x512xf32> to vector<1x512xf32>
    %938 = vector.broadcast %936 : vector<4x1xf32> to vector<4x512xf32>
    %939 = vector.broadcast %937 : vector<1x512xf32> to vector<4x512xf32>
    %940 = arith.mulf %938, %939 : vector<4x512xf32>
    %941 = arith.addf %935, %940 : vector<4x512xf32>
    %942 = vector.extract_strided_slice %466 {offsets = [0, 67], sizes = [4, 1], strides = [1, 1]} : vector<4x100xf32> to vector<4x1xf32>
    %943 = vector.extract_strided_slice %929 {offsets = [2, 0], sizes = [1, 512], strides = [1, 1]} : vector<4x512xf32> to vector<1x512xf32>
    %944 = vector.broadcast %942 : vector<4x1xf32> to vector<4x512xf32>
    %945 = vector.broadcast %943 : vector<1x512xf32> to vector<4x512xf32>
    %946 = arith.mulf %944, %945 : vector<4x512xf32>
    %947 = arith.addf %941, %946 : vector<4x512xf32>
    %948 = vector.extract_strided_slice %466 {offsets = [0, 92], sizes = [4, 1], strides = [1, 1]} : vector<4x100xf32> to vector<4x1xf32>
    %949 = vector.extract_strided_slice %929 {offsets = [3, 0], sizes = [1, 512], strides = [1, 1]} : vector<4x512xf32> to vector<1x512xf32>
    %950 = vector.broadcast %948 : vector<4x1xf32> to vector<4x512xf32>
    %951 = vector.broadcast %949 : vector<1x512xf32> to vector<4x512xf32>
    %952 = arith.mulf %950, %951 : vector<4x512xf32>
    %953 = arith.addf %947, %952 : vector<4x512xf32>
    %954 = vector.extract_strided_slice %465 {offsets = [0, 21], sizes = [4, 491], strides = [1, 1]} : vector<4x512xf32> to vector<4x491xf32>
    %955 = vector.extract_strided_slice %465 {offsets = [0, 0], sizes = [4, 21], strides = [1, 1]} : vector<4x512xf32> to vector<4x21xf32>
    %956 = tpu.concatenate %954, %955 in 1 : vector<4x491xf32>, vector<4x21xf32> -> vector<4x512xf32>
    %957 = vector.extract_strided_slice %466 {offsets = [0, 18], sizes = [4, 1], strides = [1, 1]} : vector<4x100xf32> to vector<4x1xf32>
    %958 = vector.extract_strided_slice %956 {offsets = [0, 0], sizes = [1, 512], strides = [1, 1]} : vector<4x512xf32> to vector<1x512xf32>
    %959 = vector.broadcast %957 : vector<4x1xf32> to vector<4x512xf32>
    %960 = vector.broadcast %958 : vector<1x512xf32> to vector<4x512xf32>
    %961 = arith.mulf %959, %960 : vector<4x512xf32>
    %962 = arith.addf %953, %961 : vector<4x512xf32>
    %963 = vector.extract_strided_slice %466 {offsets = [0, 43], sizes = [4, 1], strides = [1, 1]} : vector<4x100xf32> to vector<4x1xf32>
    %964 = vector.extract_strided_slice %956 {offsets = [1, 0], sizes = [1, 512], strides = [1, 1]} : vector<4x512xf32> to vector<1x512xf32>
    %965 = vector.broadcast %963 : vector<4x1xf32> to vector<4x512xf32>
    %966 = vector.broadcast %964 : vector<1x512xf32> to vector<4x512xf32>
    %967 = arith.mulf %965, %966 : vector<4x512xf32>
    %968 = arith.addf %962, %967 : vector<4x512xf32>
    %969 = vector.extract_strided_slice %466 {offsets = [0, 68], sizes = [4, 1], strides = [1, 1]} : vector<4x100xf32> to vector<4x1xf32>
    %970 = vector.extract_strided_slice %956 {offsets = [2, 0], sizes = [1, 512], strides = [1, 1]} : vector<4x512xf32> to vector<1x512xf32>
    %971 = vector.broadcast %969 : vector<4x1xf32> to vector<4x512xf32>
    %972 = vector.broadcast %970 : vector<1x512xf32> to vector<4x512xf32>
    %973 = arith.mulf %971, %972 : vector<4x512xf32>
    %974 = arith.addf %968, %973 : vector<4x512xf32>
    %975 = vector.extract_strided_slice %466 {offsets = [0, 93], sizes = [4, 1], strides = [1, 1]} : vector<4x100xf32> to vector<4x1xf32>
    %976 = vector.extract_strided_slice %956 {offsets = [3, 0], sizes = [1, 512], strides = [1, 1]} : vector<4x512xf32> to vector<1x512xf32>
    %977 = vector.broadcast %975 : vector<4x1xf32> to vector<4x512xf32>
    %978 = vector.broadcast %976 : vector<1x512xf32> to vector<4x512xf32>
    %979 = arith.mulf %977, %978 : vector<4x512xf32>
    %980 = arith.addf %974, %979 : vector<4x512xf32>
    %981 = vector.extract_strided_slice %465 {offsets = [0, 22], sizes = [4, 490], strides = [1, 1]} : vector<4x512xf32> to vector<4x490xf32>
    %982 = vector.extract_strided_slice %465 {offsets = [0, 0], sizes = [4, 22], strides = [1, 1]} : vector<4x512xf32> to vector<4x22xf32>
    %983 = tpu.concatenate %981, %982 in 1 : vector<4x490xf32>, vector<4x22xf32> -> vector<4x512xf32>
    %984 = vector.extract_strided_slice %466 {offsets = [0, 19], sizes = [4, 1], strides = [1, 1]} : vector<4x100xf32> to vector<4x1xf32>
    %985 = vector.extract_strided_slice %983 {offsets = [0, 0], sizes = [1, 512], strides = [1, 1]} : vector<4x512xf32> to vector<1x512xf32>
    %986 = vector.broadcast %984 : vector<4x1xf32> to vector<4x512xf32>
    %987 = vector.broadcast %985 : vector<1x512xf32> to vector<4x512xf32>
    %988 = arith.mulf %986, %987 : vector<4x512xf32>
    %989 = arith.addf %980, %988 : vector<4x512xf32>
    %990 = vector.extract_strided_slice %466 {offsets = [0, 44], sizes = [4, 1], strides = [1, 1]} : vector<4x100xf32> to vector<4x1xf32>
    %991 = vector.extract_strided_slice %983 {offsets = [1, 0], sizes = [1, 512], strides = [1, 1]} : vector<4x512xf32> to vector<1x512xf32>
    %992 = vector.broadcast %990 : vector<4x1xf32> to vector<4x512xf32>
    %993 = vector.broadcast %991 : vector<1x512xf32> to vector<4x512xf32>
    %994 = arith.mulf %992, %993 : vector<4x512xf32>
    %995 = arith.addf %989, %994 : vector<4x512xf32>
    %996 = vector.extract_strided_slice %466 {offsets = [0, 69], sizes = [4, 1], strides = [1, 1]} : vector<4x100xf32> to vector<4x1xf32>
    %997 = vector.extract_strided_slice %983 {offsets = [2, 0], sizes = [1, 512], strides = [1, 1]} : vector<4x512xf32> to vector<1x512xf32>
    %998 = vector.broadcast %996 : vector<4x1xf32> to vector<4x512xf32>
    %999 = vector.broadcast %997 : vector<1x512xf32> to vector<4x512xf32>
    %1000 = arith.mulf %998, %999 : vector<4x512xf32>
    %1001 = arith.addf %995, %1000 : vector<4x512xf32>
    %1002 = vector.extract_strided_slice %466 {offsets = [0, 94], sizes = [4, 1], strides = [1, 1]} : vector<4x100xf32> to vector<4x1xf32>
    %1003 = vector.extract_strided_slice %983 {offsets = [3, 0], sizes = [1, 512], strides = [1, 1]} : vector<4x512xf32> to vector<1x512xf32>
    %1004 = vector.broadcast %1002 : vector<4x1xf32> to vector<4x512xf32>
    %1005 = vector.broadcast %1003 : vector<1x512xf32> to vector<4x512xf32>
    %1006 = arith.mulf %1004, %1005 : vector<4x512xf32>
    %1007 = arith.addf %1001, %1006 : vector<4x512xf32>
    %1008 = vector.extract_strided_slice %465 {offsets = [0, 38], sizes = [4, 474], strides = [1, 1]} : vector<4x512xf32> to vector<4x474xf32>
    %1009 = vector.extract_strided_slice %465 {offsets = [0, 0], sizes = [4, 38], strides = [1, 1]} : vector<4x512xf32> to vector<4x38xf32>
    %1010 = tpu.concatenate %1008, %1009 in 1 : vector<4x474xf32>, vector<4x38xf32> -> vector<4x512xf32>
    %1011 = vector.extract_strided_slice %466 {offsets = [0, 20], sizes = [4, 1], strides = [1, 1]} : vector<4x100xf32> to vector<4x1xf32>
    %1012 = vector.extract_strided_slice %1010 {offsets = [0, 0], sizes = [1, 512], strides = [1, 1]} : vector<4x512xf32> to vector<1x512xf32>
    %1013 = vector.broadcast %1011 : vector<4x1xf32> to vector<4x512xf32>
    %1014 = vector.broadcast %1012 : vector<1x512xf32> to vector<4x512xf32>
    %1015 = arith.mulf %1013, %1014 : vector<4x512xf32>
    %1016 = arith.addf %1007, %1015 : vector<4x512xf32>
    %1017 = vector.extract_strided_slice %466 {offsets = [0, 45], sizes = [4, 1], strides = [1, 1]} : vector<4x100xf32> to vector<4x1xf32>
    %1018 = vector.extract_strided_slice %1010 {offsets = [1, 0], sizes = [1, 512], strides = [1, 1]} : vector<4x512xf32> to vector<1x512xf32>
    %1019 = vector.broadcast %1017 : vector<4x1xf32> to vector<4x512xf32>
    %1020 = vector.broadcast %1018 : vector<1x512xf32> to vector<4x512xf32>
    %1021 = arith.mulf %1019, %1020 : vector<4x512xf32>
    %1022 = arith.addf %1016, %1021 : vector<4x512xf32>
    %1023 = vector.extract_strided_slice %466 {offsets = [0, 70], sizes = [4, 1], strides = [1, 1]} : vector<4x100xf32> to vector<4x1xf32>
    %1024 = vector.extract_strided_slice %1010 {offsets = [2, 0], sizes = [1, 512], strides = [1, 1]} : vector<4x512xf32> to vector<1x512xf32>
    %1025 = vector.broadcast %1023 : vector<4x1xf32> to vector<4x512xf32>
    %1026 = vector.broadcast %1024 : vector<1x512xf32> to vector<4x512xf32>
    %1027 = arith.mulf %1025, %1026 : vector<4x512xf32>
    %1028 = arith.addf %1022, %1027 : vector<4x512xf32>
    %1029 = vector.extract_strided_slice %466 {offsets = [0, 95], sizes = [4, 1], strides = [1, 1]} : vector<4x100xf32> to vector<4x1xf32>
    %1030 = vector.extract_strided_slice %1010 {offsets = [3, 0], sizes = [1, 512], strides = [1, 1]} : vector<4x512xf32> to vector<1x512xf32>
    %1031 = vector.broadcast %1029 : vector<4x1xf32> to vector<4x512xf32>
    %1032 = vector.broadcast %1030 : vector<1x512xf32> to vector<4x512xf32>
    %1033 = arith.mulf %1031, %1032 : vector<4x512xf32>
    %1034 = arith.addf %1028, %1033 : vector<4x512xf32>
    %1035 = vector.extract_strided_slice %465 {offsets = [0, 39], sizes = [4, 473], strides = [1, 1]} : vector<4x512xf32> to vector<4x473xf32>
    %1036 = vector.extract_strided_slice %465 {offsets = [0, 0], sizes = [4, 39], strides = [1, 1]} : vector<4x512xf32> to vector<4x39xf32>
    %1037 = tpu.concatenate %1035, %1036 in 1 : vector<4x473xf32>, vector<4x39xf32> -> vector<4x512xf32>
    %1038 = vector.extract_strided_slice %466 {offsets = [0, 21], sizes = [4, 1], strides = [1, 1]} : vector<4x100xf32> to vector<4x1xf32>
    %1039 = vector.extract_strided_slice %1037 {offsets = [0, 0], sizes = [1, 512], strides = [1, 1]} : vector<4x512xf32> to vector<1x512xf32>
    %1040 = vector.broadcast %1038 : vector<4x1xf32> to vector<4x512xf32>
    %1041 = vector.broadcast %1039 : vector<1x512xf32> to vector<4x512xf32>
    %1042 = arith.mulf %1040, %1041 : vector<4x512xf32>
    %1043 = arith.addf %1034, %1042 : vector<4x512xf32>
    %1044 = vector.extract_strided_slice %466 {offsets = [0, 46], sizes = [4, 1], strides = [1, 1]} : vector<4x100xf32> to vector<4x1xf32>
    %1045 = vector.extract_strided_slice %1037 {offsets = [1, 0], sizes = [1, 512], strides = [1, 1]} : vector<4x512xf32> to vector<1x512xf32>
    %1046 = vector.broadcast %1044 : vector<4x1xf32> to vector<4x512xf32>
    %1047 = vector.broadcast %1045 : vector<1x512xf32> to vector<4x512xf32>
    %1048 = arith.mulf %1046, %1047 : vector<4x512xf32>
    %1049 = arith.addf %1043, %1048 : vector<4x512xf32>
    %1050 = vector.extract_strided_slice %466 {offsets = [0, 71], sizes = [4, 1], strides = [1, 1]} : vector<4x100xf32> to vector<4x1xf32>
    %1051 = vector.extract_strided_slice %1037 {offsets = [2, 0], sizes = [1, 512], strides = [1, 1]} : vector<4x512xf32> to vector<1x512xf32>
    %1052 = vector.broadcast %1050 : vector<4x1xf32> to vector<4x512xf32>
    %1053 = vector.broadcast %1051 : vector<1x512xf32> to vector<4x512xf32>
    %1054 = arith.mulf %1052, %1053 : vector<4x512xf32>
    %1055 = arith.addf %1049, %1054 : vector<4x512xf32>
    %1056 = vector.extract_strided_slice %466 {offsets = [0, 96], sizes = [4, 1], strides = [1, 1]} : vector<4x100xf32> to vector<4x1xf32>
    %1057 = vector.extract_strided_slice %1037 {offsets = [3, 0], sizes = [1, 512], strides = [1, 1]} : vector<4x512xf32> to vector<1x512xf32>
    %1058 = vector.broadcast %1056 : vector<4x1xf32> to vector<4x512xf32>
    %1059 = vector.broadcast %1057 : vector<1x512xf32> to vector<4x512xf32>
    %1060 = arith.mulf %1058, %1059 : vector<4x512xf32>
    %1061 = arith.addf %1055, %1060 : vector<4x512xf32>
    %1062 = vector.extract_strided_slice %465 {offsets = [0, 40], sizes = [4, 472], strides = [1, 1]} : vector<4x512xf32> to vector<4x472xf32>
    %1063 = vector.extract_strided_slice %465 {offsets = [0, 0], sizes = [4, 40], strides = [1, 1]} : vector<4x512xf32> to vector<4x40xf32>
    %1064 = tpu.concatenate %1062, %1063 in 1 : vector<4x472xf32>, vector<4x40xf32> -> vector<4x512xf32>
    %1065 = vector.extract_strided_slice %466 {offsets = [0, 22], sizes = [4, 1], strides = [1, 1]} : vector<4x100xf32> to vector<4x1xf32>
    %1066 = vector.extract_strided_slice %1064 {offsets = [0, 0], sizes = [1, 512], strides = [1, 1]} : vector<4x512xf32> to vector<1x512xf32>
    %1067 = vector.broadcast %1065 : vector<4x1xf32> to vector<4x512xf32>
    %1068 = vector.broadcast %1066 : vector<1x512xf32> to vector<4x512xf32>
    %1069 = arith.mulf %1067, %1068 : vector<4x512xf32>
    %1070 = arith.addf %1061, %1069 : vector<4x512xf32>
    %1071 = vector.extract_strided_slice %466 {offsets = [0, 47], sizes = [4, 1], strides = [1, 1]} : vector<4x100xf32> to vector<4x1xf32>
    %1072 = vector.extract_strided_slice %1064 {offsets = [1, 0], sizes = [1, 512], strides = [1, 1]} : vector<4x512xf32> to vector<1x512xf32>
    %1073 = vector.broadcast %1071 : vector<4x1xf32> to vector<4x512xf32>
    %1074 = vector.broadcast %1072 : vector<1x512xf32> to vector<4x512xf32>
    %1075 = arith.mulf %1073, %1074 : vector<4x512xf32>
    %1076 = arith.addf %1070, %1075 : vector<4x512xf32>
    %1077 = vector.extract_strided_slice %466 {offsets = [0, 72], sizes = [4, 1], strides = [1, 1]} : vector<4x100xf32> to vector<4x1xf32>
    %1078 = vector.extract_strided_slice %1064 {offsets = [2, 0], sizes = [1, 512], strides = [1, 1]} : vector<4x512xf32> to vector<1x512xf32>
    %1079 = vector.broadcast %1077 : vector<4x1xf32> to vector<4x512xf32>
    %1080 = vector.broadcast %1078 : vector<1x512xf32> to vector<4x512xf32>
    %1081 = arith.mulf %1079, %1080 : vector<4x512xf32>
    %1082 = arith.addf %1076, %1081 : vector<4x512xf32>
    %1083 = vector.extract_strided_slice %466 {offsets = [0, 97], sizes = [4, 1], strides = [1, 1]} : vector<4x100xf32> to vector<4x1xf32>
    %1084 = vector.extract_strided_slice %1064 {offsets = [3, 0], sizes = [1, 512], strides = [1, 1]} : vector<4x512xf32> to vector<1x512xf32>
    %1085 = vector.broadcast %1083 : vector<4x1xf32> to vector<4x512xf32>
    %1086 = vector.broadcast %1084 : vector<1x512xf32> to vector<4x512xf32>
    %1087 = arith.mulf %1085, %1086 : vector<4x512xf32>
    %1088 = arith.addf %1082, %1087 : vector<4x512xf32>
    %1089 = vector.extract_strided_slice %465 {offsets = [0, 41], sizes = [4, 471], strides = [1, 1]} : vector<4x512xf32> to vector<4x471xf32>
    %1090 = vector.extract_strided_slice %465 {offsets = [0, 0], sizes = [4, 41], strides = [1, 1]} : vector<4x512xf32> to vector<4x41xf32>
    %1091 = tpu.concatenate %1089, %1090 in 1 : vector<4x471xf32>, vector<4x41xf32> -> vector<4x512xf32>
    %1092 = vector.extract_strided_slice %466 {offsets = [0, 23], sizes = [4, 1], strides = [1, 1]} : vector<4x100xf32> to vector<4x1xf32>
    %1093 = vector.extract_strided_slice %1091 {offsets = [0, 0], sizes = [1, 512], strides = [1, 1]} : vector<4x512xf32> to vector<1x512xf32>
    %1094 = vector.broadcast %1092 : vector<4x1xf32> to vector<4x512xf32>
    %1095 = vector.broadcast %1093 : vector<1x512xf32> to vector<4x512xf32>
    %1096 = arith.mulf %1094, %1095 : vector<4x512xf32>
    %1097 = arith.addf %1088, %1096 : vector<4x512xf32>
    %1098 = vector.extract_strided_slice %466 {offsets = [0, 48], sizes = [4, 1], strides = [1, 1]} : vector<4x100xf32> to vector<4x1xf32>
    %1099 = vector.extract_strided_slice %1091 {offsets = [1, 0], sizes = [1, 512], strides = [1, 1]} : vector<4x512xf32> to vector<1x512xf32>
    %1100 = vector.broadcast %1098 : vector<4x1xf32> to vector<4x512xf32>
    %1101 = vector.broadcast %1099 : vector<1x512xf32> to vector<4x512xf32>
    %1102 = arith.mulf %1100, %1101 : vector<4x512xf32>
    %1103 = arith.addf %1097, %1102 : vector<4x512xf32>
    %1104 = vector.extract_strided_slice %466 {offsets = [0, 73], sizes = [4, 1], strides = [1, 1]} : vector<4x100xf32> to vector<4x1xf32>
    %1105 = vector.extract_strided_slice %1091 {offsets = [2, 0], sizes = [1, 512], strides = [1, 1]} : vector<4x512xf32> to vector<1x512xf32>
    %1106 = vector.broadcast %1104 : vector<4x1xf32> to vector<4x512xf32>
    %1107 = vector.broadcast %1105 : vector<1x512xf32> to vector<4x512xf32>
    %1108 = arith.mulf %1106, %1107 : vector<4x512xf32>
    %1109 = arith.addf %1103, %1108 : vector<4x512xf32>
    %1110 = vector.extract_strided_slice %466 {offsets = [0, 98], sizes = [4, 1], strides = [1, 1]} : vector<4x100xf32> to vector<4x1xf32>
    %1111 = vector.extract_strided_slice %1091 {offsets = [3, 0], sizes = [1, 512], strides = [1, 1]} : vector<4x512xf32> to vector<1x512xf32>
    %1112 = vector.broadcast %1110 : vector<4x1xf32> to vector<4x512xf32>
    %1113 = vector.broadcast %1111 : vector<1x512xf32> to vector<4x512xf32>
    %1114 = arith.mulf %1112, %1113 : vector<4x512xf32>
    %1115 = arith.addf %1109, %1114 : vector<4x512xf32>
    %1116 = vector.extract_strided_slice %465 {offsets = [0, 42], sizes = [4, 470], strides = [1, 1]} : vector<4x512xf32> to vector<4x470xf32>
    %1117 = vector.extract_strided_slice %465 {offsets = [0, 0], sizes = [4, 42], strides = [1, 1]} : vector<4x512xf32> to vector<4x42xf32>
    %1118 = tpu.concatenate %1116, %1117 in 1 : vector<4x470xf32>, vector<4x42xf32> -> vector<4x512xf32>
    %1119 = vector.extract_strided_slice %466 {offsets = [0, 24], sizes = [4, 1], strides = [1, 1]} : vector<4x100xf32> to vector<4x1xf32>
    %1120 = vector.extract_strided_slice %1118 {offsets = [0, 0], sizes = [1, 512], strides = [1, 1]} : vector<4x512xf32> to vector<1x512xf32>
    %1121 = vector.broadcast %1119 : vector<4x1xf32> to vector<4x512xf32>
    %1122 = vector.broadcast %1120 : vector<1x512xf32> to vector<4x512xf32>
    %1123 = arith.mulf %1121, %1122 : vector<4x512xf32>
    %1124 = arith.addf %1115, %1123 : vector<4x512xf32>
    %1125 = vector.extract_strided_slice %466 {offsets = [0, 49], sizes = [4, 1], strides = [1, 1]} : vector<4x100xf32> to vector<4x1xf32>
    %1126 = vector.extract_strided_slice %1118 {offsets = [1, 0], sizes = [1, 512], strides = [1, 1]} : vector<4x512xf32> to vector<1x512xf32>
    %1127 = vector.broadcast %1125 : vector<4x1xf32> to vector<4x512xf32>
    %1128 = vector.broadcast %1126 : vector<1x512xf32> to vector<4x512xf32>
    %1129 = arith.mulf %1127, %1128 : vector<4x512xf32>
    %1130 = arith.addf %1124, %1129 : vector<4x512xf32>
    %1131 = vector.extract_strided_slice %466 {offsets = [0, 74], sizes = [4, 1], strides = [1, 1]} : vector<4x100xf32> to vector<4x1xf32>
    %1132 = vector.extract_strided_slice %1118 {offsets = [2, 0], sizes = [1, 512], strides = [1, 1]} : vector<4x512xf32> to vector<1x512xf32>
    %1133 = vector.broadcast %1131 : vector<4x1xf32> to vector<4x512xf32>
    %1134 = vector.broadcast %1132 : vector<1x512xf32> to vector<4x512xf32>
    %1135 = arith.mulf %1133, %1134 : vector<4x512xf32>
    %1136 = arith.addf %1130, %1135 : vector<4x512xf32>
    %1137 = vector.extract_strided_slice %466 {offsets = [0, 99], sizes = [4, 1], strides = [1, 1]} : vector<4x100xf32> to vector<4x1xf32>
    %1138 = vector.extract_strided_slice %1118 {offsets = [3, 0], sizes = [1, 512], strides = [1, 1]} : vector<4x512xf32> to vector<1x512xf32>
    %1139 = vector.broadcast %1137 : vector<4x1xf32> to vector<4x512xf32>
    %1140 = vector.broadcast %1138 : vector<1x512xf32> to vector<4x512xf32>
    %1141 = arith.mulf %1139, %1140 : vector<4x512xf32>
    %1142 = arith.addf %1136, %1141 : vector<4x512xf32>
    %cst_31 = arith.constant 0.000000e+00 : f32
    %1143 = vector.broadcast %cst_31 : f32 to vector<4x512xf32>
    %1144 = arith.maximumf %1142, %1143 : vector<4x512xf32>
    %1145 = vector.broadcast %2 : vector<1x512xf32> to vector<4x512xf32>
    %1146 = arith.mulf %1144, %1145 : vector<4x512xf32>
    %c0_32 = arith.constant 0 : index
    %c2048 = arith.constant 2048 : index
    %1147 = vector.load %arg3[%c0_32, %c2048] : memref<8x2816xf32, #tpu.memory_space<vmem>>, vector<4x9xf32>
    %c0_33 = arith.constant 0 : index
    %c2176 = arith.constant 2176 : index
    %1148 = vector.load %arg3[%c0_33, %c2176] : memref<8x2816xf32, #tpu.memory_space<vmem>>, vector<4x1xf32>
    %cst_34 = arith.constant 0.000000e+00 : f32
    %1149 = vector.broadcast %cst_34 : f32 to vector<4x512xf32>
    %1150 = vector.broadcast %1148 : vector<4x1xf32> to vector<4x512xf32>
    %1151 = arith.addf %1149, %1150 : vector<4x512xf32>
    %1152 = vector.extract_strided_slice %1147 {offsets = [0, 0], sizes = [4, 1], strides = [1, 1]} : vector<4x9xf32> to vector<4x1xf32>
    %1153 = vector.extract_strided_slice %1146 {offsets = [0, 491], sizes = [4, 21], strides = [1, 1]} : vector<4x512xf32> to vector<4x21xf32>
    %1154 = vector.extract_strided_slice %1146 {offsets = [0, 0], sizes = [4, 491], strides = [1, 1]} : vector<4x512xf32> to vector<4x491xf32>
    %1155 = tpu.concatenate %1153, %1154 in 1 : vector<4x21xf32>, vector<4x491xf32> -> vector<4x512xf32>
    %1156 = vector.broadcast %1152 : vector<4x1xf32> to vector<4x512xf32>
    %1157 = arith.mulf %1156, %1155 : vector<4x512xf32>
    %1158 = arith.addf %1151, %1157 : vector<4x512xf32>
    %1159 = vector.extract_strided_slice %1147 {offsets = [0, 1], sizes = [4, 1], strides = [1, 1]} : vector<4x9xf32> to vector<4x1xf32>
    %1160 = vector.extract_strided_slice %1146 {offsets = [0, 492], sizes = [4, 20], strides = [1, 1]} : vector<4x512xf32> to vector<4x20xf32>
    %1161 = vector.extract_strided_slice %1146 {offsets = [0, 0], sizes = [4, 492], strides = [1, 1]} : vector<4x512xf32> to vector<4x492xf32>
    %1162 = tpu.concatenate %1160, %1161 in 1 : vector<4x20xf32>, vector<4x492xf32> -> vector<4x512xf32>
    %1163 = vector.broadcast %1159 : vector<4x1xf32> to vector<4x512xf32>
    %1164 = arith.mulf %1163, %1162 : vector<4x512xf32>
    %1165 = arith.addf %1158, %1164 : vector<4x512xf32>
    %1166 = vector.extract_strided_slice %1147 {offsets = [0, 2], sizes = [4, 1], strides = [1, 1]} : vector<4x9xf32> to vector<4x1xf32>
    %1167 = vector.extract_strided_slice %1146 {offsets = [0, 493], sizes = [4, 19], strides = [1, 1]} : vector<4x512xf32> to vector<4x19xf32>
    %1168 = vector.extract_strided_slice %1146 {offsets = [0, 0], sizes = [4, 493], strides = [1, 1]} : vector<4x512xf32> to vector<4x493xf32>
    %1169 = tpu.concatenate %1167, %1168 in 1 : vector<4x19xf32>, vector<4x493xf32> -> vector<4x512xf32>
    %1170 = vector.broadcast %1166 : vector<4x1xf32> to vector<4x512xf32>
    %1171 = arith.mulf %1170, %1169 : vector<4x512xf32>
    %1172 = arith.addf %1165, %1171 : vector<4x512xf32>
    %1173 = vector.extract_strided_slice %1147 {offsets = [0, 3], sizes = [4, 1], strides = [1, 1]} : vector<4x9xf32> to vector<4x1xf32>
    %1174 = vector.extract_strided_slice %1146 {offsets = [0, 511], sizes = [4, 1], strides = [1, 1]} : vector<4x512xf32> to vector<4x1xf32>
    %1175 = vector.extract_strided_slice %1146 {offsets = [0, 0], sizes = [4, 511], strides = [1, 1]} : vector<4x512xf32> to vector<4x511xf32>
    %1176 = tpu.concatenate %1174, %1175 in 1 : vector<4x1xf32>, vector<4x511xf32> -> vector<4x512xf32>
    %1177 = vector.broadcast %1173 : vector<4x1xf32> to vector<4x512xf32>
    %1178 = arith.mulf %1177, %1176 : vector<4x512xf32>
    %1179 = arith.addf %1172, %1178 : vector<4x512xf32>
    %1180 = vector.extract_strided_slice %1147 {offsets = [0, 4], sizes = [4, 1], strides = [1, 1]} : vector<4x9xf32> to vector<4x1xf32>
    %1181 = vector.broadcast %1180 : vector<4x1xf32> to vector<4x512xf32>
    %1182 = arith.mulf %1181, %1146 : vector<4x512xf32>
    %1183 = arith.addf %1179, %1182 : vector<4x512xf32>
    %1184 = vector.extract_strided_slice %1147 {offsets = [0, 5], sizes = [4, 1], strides = [1, 1]} : vector<4x9xf32> to vector<4x1xf32>
    %1185 = vector.extract_strided_slice %1146 {offsets = [0, 1], sizes = [4, 511], strides = [1, 1]} : vector<4x512xf32> to vector<4x511xf32>
    %1186 = vector.extract_strided_slice %1146 {offsets = [0, 0], sizes = [4, 1], strides = [1, 1]} : vector<4x512xf32> to vector<4x1xf32>
    %1187 = tpu.concatenate %1185, %1186 in 1 : vector<4x511xf32>, vector<4x1xf32> -> vector<4x512xf32>
    %1188 = vector.broadcast %1184 : vector<4x1xf32> to vector<4x512xf32>
    %1189 = arith.mulf %1188, %1187 : vector<4x512xf32>
    %1190 = arith.addf %1183, %1189 : vector<4x512xf32>
    %1191 = vector.extract_strided_slice %1147 {offsets = [0, 6], sizes = [4, 1], strides = [1, 1]} : vector<4x9xf32> to vector<4x1xf32>
    %1192 = vector.extract_strided_slice %1146 {offsets = [0, 19], sizes = [4, 493], strides = [1, 1]} : vector<4x512xf32> to vector<4x493xf32>
    %1193 = vector.extract_strided_slice %1146 {offsets = [0, 0], sizes = [4, 19], strides = [1, 1]} : vector<4x512xf32> to vector<4x19xf32>
    %1194 = tpu.concatenate %1192, %1193 in 1 : vector<4x493xf32>, vector<4x19xf32> -> vector<4x512xf32>
    %1195 = vector.broadcast %1191 : vector<4x1xf32> to vector<4x512xf32>
    %1196 = arith.mulf %1195, %1194 : vector<4x512xf32>
    %1197 = arith.addf %1190, %1196 : vector<4x512xf32>
    %1198 = vector.extract_strided_slice %1147 {offsets = [0, 7], sizes = [4, 1], strides = [1, 1]} : vector<4x9xf32> to vector<4x1xf32>
    %1199 = vector.extract_strided_slice %1146 {offsets = [0, 20], sizes = [4, 492], strides = [1, 1]} : vector<4x512xf32> to vector<4x492xf32>
    %1200 = vector.extract_strided_slice %1146 {offsets = [0, 0], sizes = [4, 20], strides = [1, 1]} : vector<4x512xf32> to vector<4x20xf32>
    %1201 = tpu.concatenate %1199, %1200 in 1 : vector<4x492xf32>, vector<4x20xf32> -> vector<4x512xf32>
    %1202 = vector.broadcast %1198 : vector<4x1xf32> to vector<4x512xf32>
    %1203 = arith.mulf %1202, %1201 : vector<4x512xf32>
    %1204 = arith.addf %1197, %1203 : vector<4x512xf32>
    %1205 = vector.extract_strided_slice %1147 {offsets = [0, 8], sizes = [4, 1], strides = [1, 1]} : vector<4x9xf32> to vector<4x1xf32>
    %1206 = vector.extract_strided_slice %1146 {offsets = [0, 21], sizes = [4, 491], strides = [1, 1]} : vector<4x512xf32> to vector<4x491xf32>
    %1207 = vector.extract_strided_slice %1146 {offsets = [0, 0], sizes = [4, 21], strides = [1, 1]} : vector<4x512xf32> to vector<4x21xf32>
    %1208 = tpu.concatenate %1206, %1207 in 1 : vector<4x491xf32>, vector<4x21xf32> -> vector<4x512xf32>
    %1209 = vector.broadcast %1205 : vector<4x1xf32> to vector<4x512xf32>
    %1210 = arith.mulf %1209, %1208 : vector<4x512xf32>
    %1211 = arith.addf %1204, %1210 : vector<4x512xf32>
    %1212 = vector.broadcast %2 : vector<1x512xf32> to vector<4x512xf32>
    %1213 = arith.mulf %1211, %1212 : vector<4x512xf32>
    %c0_35 = arith.constant 0 : index
    %c2304 = arith.constant 2304 : index
    %1214 = vector.load %arg3[%c0_35, %c2304] : memref<8x2816xf32, #tpu.memory_space<vmem>>, vector<4x36xf32>
    %c0_36 = arith.constant 0 : index
    %c2432 = arith.constant 2432 : index
    %1215 = vector.load %arg3[%c0_36, %c2432] : memref<8x2816xf32, #tpu.memory_space<vmem>>, vector<4x1xf32>
    %cst_37 = arith.constant 0.000000e+00 : f32
    %1216 = vector.broadcast %cst_37 : f32 to vector<4x512xf32>
    %1217 = vector.broadcast %1215 : vector<4x1xf32> to vector<4x512xf32>
    %1218 = arith.addf %1216, %1217 : vector<4x512xf32>
    %1219 = vector.extract_strided_slice %1213 {offsets = [0, 491], sizes = [4, 21], strides = [1, 1]} : vector<4x512xf32> to vector<4x21xf32>
    %1220 = vector.extract_strided_slice %1213 {offsets = [0, 0], sizes = [4, 491], strides = [1, 1]} : vector<4x512xf32> to vector<4x491xf32>
    %1221 = tpu.concatenate %1219, %1220 in 1 : vector<4x21xf32>, vector<4x491xf32> -> vector<4x512xf32>
    %1222 = vector.extract_strided_slice %1214 {offsets = [0, 0], sizes = [4, 1], strides = [1, 1]} : vector<4x36xf32> to vector<4x1xf32>
    %1223 = vector.extract_strided_slice %1221 {offsets = [0, 0], sizes = [1, 512], strides = [1, 1]} : vector<4x512xf32> to vector<1x512xf32>
    %1224 = vector.broadcast %1222 : vector<4x1xf32> to vector<4x512xf32>
    %1225 = vector.broadcast %1223 : vector<1x512xf32> to vector<4x512xf32>
    %1226 = arith.mulf %1224, %1225 : vector<4x512xf32>
    %1227 = arith.addf %1218, %1226 : vector<4x512xf32>
    %1228 = vector.extract_strided_slice %1214 {offsets = [0, 9], sizes = [4, 1], strides = [1, 1]} : vector<4x36xf32> to vector<4x1xf32>
    %1229 = vector.extract_strided_slice %1221 {offsets = [1, 0], sizes = [1, 512], strides = [1, 1]} : vector<4x512xf32> to vector<1x512xf32>
    %1230 = vector.broadcast %1228 : vector<4x1xf32> to vector<4x512xf32>
    %1231 = vector.broadcast %1229 : vector<1x512xf32> to vector<4x512xf32>
    %1232 = arith.mulf %1230, %1231 : vector<4x512xf32>
    %1233 = arith.addf %1227, %1232 : vector<4x512xf32>
    %1234 = vector.extract_strided_slice %1214 {offsets = [0, 18], sizes = [4, 1], strides = [1, 1]} : vector<4x36xf32> to vector<4x1xf32>
    %1235 = vector.extract_strided_slice %1221 {offsets = [2, 0], sizes = [1, 512], strides = [1, 1]} : vector<4x512xf32> to vector<1x512xf32>
    %1236 = vector.broadcast %1234 : vector<4x1xf32> to vector<4x512xf32>
    %1237 = vector.broadcast %1235 : vector<1x512xf32> to vector<4x512xf32>
    %1238 = arith.mulf %1236, %1237 : vector<4x512xf32>
    %1239 = arith.addf %1233, %1238 : vector<4x512xf32>
    %1240 = vector.extract_strided_slice %1214 {offsets = [0, 27], sizes = [4, 1], strides = [1, 1]} : vector<4x36xf32> to vector<4x1xf32>
    %1241 = vector.extract_strided_slice %1221 {offsets = [3, 0], sizes = [1, 512], strides = [1, 1]} : vector<4x512xf32> to vector<1x512xf32>
    %1242 = vector.broadcast %1240 : vector<4x1xf32> to vector<4x512xf32>
    %1243 = vector.broadcast %1241 : vector<1x512xf32> to vector<4x512xf32>
    %1244 = arith.mulf %1242, %1243 : vector<4x512xf32>
    %1245 = arith.addf %1239, %1244 : vector<4x512xf32>
    %1246 = vector.extract_strided_slice %1213 {offsets = [0, 492], sizes = [4, 20], strides = [1, 1]} : vector<4x512xf32> to vector<4x20xf32>
    %1247 = vector.extract_strided_slice %1213 {offsets = [0, 0], sizes = [4, 492], strides = [1, 1]} : vector<4x512xf32> to vector<4x492xf32>
    %1248 = tpu.concatenate %1246, %1247 in 1 : vector<4x20xf32>, vector<4x492xf32> -> vector<4x512xf32>
    %1249 = vector.extract_strided_slice %1214 {offsets = [0, 1], sizes = [4, 1], strides = [1, 1]} : vector<4x36xf32> to vector<4x1xf32>
    %1250 = vector.extract_strided_slice %1248 {offsets = [0, 0], sizes = [1, 512], strides = [1, 1]} : vector<4x512xf32> to vector<1x512xf32>
    %1251 = vector.broadcast %1249 : vector<4x1xf32> to vector<4x512xf32>
    %1252 = vector.broadcast %1250 : vector<1x512xf32> to vector<4x512xf32>
    %1253 = arith.mulf %1251, %1252 : vector<4x512xf32>
    %1254 = arith.addf %1245, %1253 : vector<4x512xf32>
    %1255 = vector.extract_strided_slice %1214 {offsets = [0, 10], sizes = [4, 1], strides = [1, 1]} : vector<4x36xf32> to vector<4x1xf32>
    %1256 = vector.extract_strided_slice %1248 {offsets = [1, 0], sizes = [1, 512], strides = [1, 1]} : vector<4x512xf32> to vector<1x512xf32>
    %1257 = vector.broadcast %1255 : vector<4x1xf32> to vector<4x512xf32>
    %1258 = vector.broadcast %1256 : vector<1x512xf32> to vector<4x512xf32>
    %1259 = arith.mulf %1257, %1258 : vector<4x512xf32>
    %1260 = arith.addf %1254, %1259 : vector<4x512xf32>
    %1261 = vector.extract_strided_slice %1214 {offsets = [0, 19], sizes = [4, 1], strides = [1, 1]} : vector<4x36xf32> to vector<4x1xf32>
    %1262 = vector.extract_strided_slice %1248 {offsets = [2, 0], sizes = [1, 512], strides = [1, 1]} : vector<4x512xf32> to vector<1x512xf32>
    %1263 = vector.broadcast %1261 : vector<4x1xf32> to vector<4x512xf32>
    %1264 = vector.broadcast %1262 : vector<1x512xf32> to vector<4x512xf32>
    %1265 = arith.mulf %1263, %1264 : vector<4x512xf32>
    %1266 = arith.addf %1260, %1265 : vector<4x512xf32>
    %1267 = vector.extract_strided_slice %1214 {offsets = [0, 28], sizes = [4, 1], strides = [1, 1]} : vector<4x36xf32> to vector<4x1xf32>
    %1268 = vector.extract_strided_slice %1248 {offsets = [3, 0], sizes = [1, 512], strides = [1, 1]} : vector<4x512xf32> to vector<1x512xf32>
    %1269 = vector.broadcast %1267 : vector<4x1xf32> to vector<4x512xf32>
    %1270 = vector.broadcast %1268 : vector<1x512xf32> to vector<4x512xf32>
    %1271 = arith.mulf %1269, %1270 : vector<4x512xf32>
    %1272 = arith.addf %1266, %1271 : vector<4x512xf32>
    %1273 = vector.extract_strided_slice %1213 {offsets = [0, 493], sizes = [4, 19], strides = [1, 1]} : vector<4x512xf32> to vector<4x19xf32>
    %1274 = vector.extract_strided_slice %1213 {offsets = [0, 0], sizes = [4, 493], strides = [1, 1]} : vector<4x512xf32> to vector<4x493xf32>
    %1275 = tpu.concatenate %1273, %1274 in 1 : vector<4x19xf32>, vector<4x493xf32> -> vector<4x512xf32>
    %1276 = vector.extract_strided_slice %1214 {offsets = [0, 2], sizes = [4, 1], strides = [1, 1]} : vector<4x36xf32> to vector<4x1xf32>
    %1277 = vector.extract_strided_slice %1275 {offsets = [0, 0], sizes = [1, 512], strides = [1, 1]} : vector<4x512xf32> to vector<1x512xf32>
    %1278 = vector.broadcast %1276 : vector<4x1xf32> to vector<4x512xf32>
    %1279 = vector.broadcast %1277 : vector<1x512xf32> to vector<4x512xf32>
    %1280 = arith.mulf %1278, %1279 : vector<4x512xf32>
    %1281 = arith.addf %1272, %1280 : vector<4x512xf32>
    %1282 = vector.extract_strided_slice %1214 {offsets = [0, 11], sizes = [4, 1], strides = [1, 1]} : vector<4x36xf32> to vector<4x1xf32>
    %1283 = vector.extract_strided_slice %1275 {offsets = [1, 0], sizes = [1, 512], strides = [1, 1]} : vector<4x512xf32> to vector<1x512xf32>
    %1284 = vector.broadcast %1282 : vector<4x1xf32> to vector<4x512xf32>
    %1285 = vector.broadcast %1283 : vector<1x512xf32> to vector<4x512xf32>
    %1286 = arith.mulf %1284, %1285 : vector<4x512xf32>
    %1287 = arith.addf %1281, %1286 : vector<4x512xf32>
    %1288 = vector.extract_strided_slice %1214 {offsets = [0, 20], sizes = [4, 1], strides = [1, 1]} : vector<4x36xf32> to vector<4x1xf32>
    %1289 = vector.extract_strided_slice %1275 {offsets = [2, 0], sizes = [1, 512], strides = [1, 1]} : vector<4x512xf32> to vector<1x512xf32>
    %1290 = vector.broadcast %1288 : vector<4x1xf32> to vector<4x512xf32>
    %1291 = vector.broadcast %1289 : vector<1x512xf32> to vector<4x512xf32>
    %1292 = arith.mulf %1290, %1291 : vector<4x512xf32>
    %1293 = arith.addf %1287, %1292 : vector<4x512xf32>
    %1294 = vector.extract_strided_slice %1214 {offsets = [0, 29], sizes = [4, 1], strides = [1, 1]} : vector<4x36xf32> to vector<4x1xf32>
    %1295 = vector.extract_strided_slice %1275 {offsets = [3, 0], sizes = [1, 512], strides = [1, 1]} : vector<4x512xf32> to vector<1x512xf32>
    %1296 = vector.broadcast %1294 : vector<4x1xf32> to vector<4x512xf32>
    %1297 = vector.broadcast %1295 : vector<1x512xf32> to vector<4x512xf32>
    %1298 = arith.mulf %1296, %1297 : vector<4x512xf32>
    %1299 = arith.addf %1293, %1298 : vector<4x512xf32>
    %1300 = vector.extract_strided_slice %1213 {offsets = [0, 511], sizes = [4, 1], strides = [1, 1]} : vector<4x512xf32> to vector<4x1xf32>
    %1301 = vector.extract_strided_slice %1213 {offsets = [0, 0], sizes = [4, 511], strides = [1, 1]} : vector<4x512xf32> to vector<4x511xf32>
    %1302 = tpu.concatenate %1300, %1301 in 1 : vector<4x1xf32>, vector<4x511xf32> -> vector<4x512xf32>
    %1303 = vector.extract_strided_slice %1214 {offsets = [0, 3], sizes = [4, 1], strides = [1, 1]} : vector<4x36xf32> to vector<4x1xf32>
    %1304 = vector.extract_strided_slice %1302 {offsets = [0, 0], sizes = [1, 512], strides = [1, 1]} : vector<4x512xf32> to vector<1x512xf32>
    %1305 = vector.broadcast %1303 : vector<4x1xf32> to vector<4x512xf32>
    %1306 = vector.broadcast %1304 : vector<1x512xf32> to vector<4x512xf32>
    %1307 = arith.mulf %1305, %1306 : vector<4x512xf32>
    %1308 = arith.addf %1299, %1307 : vector<4x512xf32>
    %1309 = vector.extract_strided_slice %1214 {offsets = [0, 12], sizes = [4, 1], strides = [1, 1]} : vector<4x36xf32> to vector<4x1xf32>
    %1310 = vector.extract_strided_slice %1302 {offsets = [1, 0], sizes = [1, 512], strides = [1, 1]} : vector<4x512xf32> to vector<1x512xf32>
    %1311 = vector.broadcast %1309 : vector<4x1xf32> to vector<4x512xf32>
    %1312 = vector.broadcast %1310 : vector<1x512xf32> to vector<4x512xf32>
    %1313 = arith.mulf %1311, %1312 : vector<4x512xf32>
    %1314 = arith.addf %1308, %1313 : vector<4x512xf32>
    %1315 = vector.extract_strided_slice %1214 {offsets = [0, 21], sizes = [4, 1], strides = [1, 1]} : vector<4x36xf32> to vector<4x1xf32>
    %1316 = vector.extract_strided_slice %1302 {offsets = [2, 0], sizes = [1, 512], strides = [1, 1]} : vector<4x512xf32> to vector<1x512xf32>
    %1317 = vector.broadcast %1315 : vector<4x1xf32> to vector<4x512xf32>
    %1318 = vector.broadcast %1316 : vector<1x512xf32> to vector<4x512xf32>
    %1319 = arith.mulf %1317, %1318 : vector<4x512xf32>
    %1320 = arith.addf %1314, %1319 : vector<4x512xf32>
    %1321 = vector.extract_strided_slice %1214 {offsets = [0, 30], sizes = [4, 1], strides = [1, 1]} : vector<4x36xf32> to vector<4x1xf32>
    %1322 = vector.extract_strided_slice %1302 {offsets = [3, 0], sizes = [1, 512], strides = [1, 1]} : vector<4x512xf32> to vector<1x512xf32>
    %1323 = vector.broadcast %1321 : vector<4x1xf32> to vector<4x512xf32>
    %1324 = vector.broadcast %1322 : vector<1x512xf32> to vector<4x512xf32>
    %1325 = arith.mulf %1323, %1324 : vector<4x512xf32>
    %1326 = arith.addf %1320, %1325 : vector<4x512xf32>
    %1327 = vector.extract_strided_slice %1214 {offsets = [0, 4], sizes = [4, 1], strides = [1, 1]} : vector<4x36xf32> to vector<4x1xf32>
    %1328 = vector.extract_strided_slice %1213 {offsets = [0, 0], sizes = [1, 512], strides = [1, 1]} : vector<4x512xf32> to vector<1x512xf32>
    %1329 = vector.broadcast %1327 : vector<4x1xf32> to vector<4x512xf32>
    %1330 = vector.broadcast %1328 : vector<1x512xf32> to vector<4x512xf32>
    %1331 = arith.mulf %1329, %1330 : vector<4x512xf32>
    %1332 = arith.addf %1326, %1331 : vector<4x512xf32>
    %1333 = vector.extract_strided_slice %1214 {offsets = [0, 13], sizes = [4, 1], strides = [1, 1]} : vector<4x36xf32> to vector<4x1xf32>
    %1334 = vector.extract_strided_slice %1213 {offsets = [1, 0], sizes = [1, 512], strides = [1, 1]} : vector<4x512xf32> to vector<1x512xf32>
    %1335 = vector.broadcast %1333 : vector<4x1xf32> to vector<4x512xf32>
    %1336 = vector.broadcast %1334 : vector<1x512xf32> to vector<4x512xf32>
    %1337 = arith.mulf %1335, %1336 : vector<4x512xf32>
    %1338 = arith.addf %1332, %1337 : vector<4x512xf32>
    %1339 = vector.extract_strided_slice %1214 {offsets = [0, 22], sizes = [4, 1], strides = [1, 1]} : vector<4x36xf32> to vector<4x1xf32>
    %1340 = vector.extract_strided_slice %1213 {offsets = [2, 0], sizes = [1, 512], strides = [1, 1]} : vector<4x512xf32> to vector<1x512xf32>
    %1341 = vector.broadcast %1339 : vector<4x1xf32> to vector<4x512xf32>
    %1342 = vector.broadcast %1340 : vector<1x512xf32> to vector<4x512xf32>
    %1343 = arith.mulf %1341, %1342 : vector<4x512xf32>
    %1344 = arith.addf %1338, %1343 : vector<4x512xf32>
    %1345 = vector.extract_strided_slice %1214 {offsets = [0, 31], sizes = [4, 1], strides = [1, 1]} : vector<4x36xf32> to vector<4x1xf32>
    %1346 = vector.extract_strided_slice %1213 {offsets = [3, 0], sizes = [1, 512], strides = [1, 1]} : vector<4x512xf32> to vector<1x512xf32>
    %1347 = vector.broadcast %1345 : vector<4x1xf32> to vector<4x512xf32>
    %1348 = vector.broadcast %1346 : vector<1x512xf32> to vector<4x512xf32>
    %1349 = arith.mulf %1347, %1348 : vector<4x512xf32>
    %1350 = arith.addf %1344, %1349 : vector<4x512xf32>
    %1351 = vector.extract_strided_slice %1213 {offsets = [0, 1], sizes = [4, 511], strides = [1, 1]} : vector<4x512xf32> to vector<4x511xf32>
    %1352 = vector.extract_strided_slice %1213 {offsets = [0, 0], sizes = [4, 1], strides = [1, 1]} : vector<4x512xf32> to vector<4x1xf32>
    %1353 = tpu.concatenate %1351, %1352 in 1 : vector<4x511xf32>, vector<4x1xf32> -> vector<4x512xf32>
    %1354 = vector.extract_strided_slice %1214 {offsets = [0, 5], sizes = [4, 1], strides = [1, 1]} : vector<4x36xf32> to vector<4x1xf32>
    %1355 = vector.extract_strided_slice %1353 {offsets = [0, 0], sizes = [1, 512], strides = [1, 1]} : vector<4x512xf32> to vector<1x512xf32>
    %1356 = vector.broadcast %1354 : vector<4x1xf32> to vector<4x512xf32>
    %1357 = vector.broadcast %1355 : vector<1x512xf32> to vector<4x512xf32>
    %1358 = arith.mulf %1356, %1357 : vector<4x512xf32>
    %1359 = arith.addf %1350, %1358 : vector<4x512xf32>
    %1360 = vector.extract_strided_slice %1214 {offsets = [0, 14], sizes = [4, 1], strides = [1, 1]} : vector<4x36xf32> to vector<4x1xf32>
    %1361 = vector.extract_strided_slice %1353 {offsets = [1, 0], sizes = [1, 512], strides = [1, 1]} : vector<4x512xf32> to vector<1x512xf32>
    %1362 = vector.broadcast %1360 : vector<4x1xf32> to vector<4x512xf32>
    %1363 = vector.broadcast %1361 : vector<1x512xf32> to vector<4x512xf32>
    %1364 = arith.mulf %1362, %1363 : vector<4x512xf32>
    %1365 = arith.addf %1359, %1364 : vector<4x512xf32>
    %1366 = vector.extract_strided_slice %1214 {offsets = [0, 23], sizes = [4, 1], strides = [1, 1]} : vector<4x36xf32> to vector<4x1xf32>
    %1367 = vector.extract_strided_slice %1353 {offsets = [2, 0], sizes = [1, 512], strides = [1, 1]} : vector<4x512xf32> to vector<1x512xf32>
    %1368 = vector.broadcast %1366 : vector<4x1xf32> to vector<4x512xf32>
    %1369 = vector.broadcast %1367 : vector<1x512xf32> to vector<4x512xf32>
    %1370 = arith.mulf %1368, %1369 : vector<4x512xf32>
    %1371 = arith.addf %1365, %1370 : vector<4x512xf32>
    %1372 = vector.extract_strided_slice %1214 {offsets = [0, 32], sizes = [4, 1], strides = [1, 1]} : vector<4x36xf32> to vector<4x1xf32>
    %1373 = vector.extract_strided_slice %1353 {offsets = [3, 0], sizes = [1, 512], strides = [1, 1]} : vector<4x512xf32> to vector<1x512xf32>
    %1374 = vector.broadcast %1372 : vector<4x1xf32> to vector<4x512xf32>
    %1375 = vector.broadcast %1373 : vector<1x512xf32> to vector<4x512xf32>
    %1376 = arith.mulf %1374, %1375 : vector<4x512xf32>
    %1377 = arith.addf %1371, %1376 : vector<4x512xf32>
    %1378 = vector.extract_strided_slice %1213 {offsets = [0, 19], sizes = [4, 493], strides = [1, 1]} : vector<4x512xf32> to vector<4x493xf32>
    %1379 = vector.extract_strided_slice %1213 {offsets = [0, 0], sizes = [4, 19], strides = [1, 1]} : vector<4x512xf32> to vector<4x19xf32>
    %1380 = tpu.concatenate %1378, %1379 in 1 : vector<4x493xf32>, vector<4x19xf32> -> vector<4x512xf32>
    %1381 = vector.extract_strided_slice %1214 {offsets = [0, 6], sizes = [4, 1], strides = [1, 1]} : vector<4x36xf32> to vector<4x1xf32>
    %1382 = vector.extract_strided_slice %1380 {offsets = [0, 0], sizes = [1, 512], strides = [1, 1]} : vector<4x512xf32> to vector<1x512xf32>
    %1383 = vector.broadcast %1381 : vector<4x1xf32> to vector<4x512xf32>
    %1384 = vector.broadcast %1382 : vector<1x512xf32> to vector<4x512xf32>
    %1385 = arith.mulf %1383, %1384 : vector<4x512xf32>
    %1386 = arith.addf %1377, %1385 : vector<4x512xf32>
    %1387 = vector.extract_strided_slice %1214 {offsets = [0, 15], sizes = [4, 1], strides = [1, 1]} : vector<4x36xf32> to vector<4x1xf32>
    %1388 = vector.extract_strided_slice %1380 {offsets = [1, 0], sizes = [1, 512], strides = [1, 1]} : vector<4x512xf32> to vector<1x512xf32>
    %1389 = vector.broadcast %1387 : vector<4x1xf32> to vector<4x512xf32>
    %1390 = vector.broadcast %1388 : vector<1x512xf32> to vector<4x512xf32>
    %1391 = arith.mulf %1389, %1390 : vector<4x512xf32>
    %1392 = arith.addf %1386, %1391 : vector<4x512xf32>
    %1393 = vector.extract_strided_slice %1214 {offsets = [0, 24], sizes = [4, 1], strides = [1, 1]} : vector<4x36xf32> to vector<4x1xf32>
    %1394 = vector.extract_strided_slice %1380 {offsets = [2, 0], sizes = [1, 512], strides = [1, 1]} : vector<4x512xf32> to vector<1x512xf32>
    %1395 = vector.broadcast %1393 : vector<4x1xf32> to vector<4x512xf32>
    %1396 = vector.broadcast %1394 : vector<1x512xf32> to vector<4x512xf32>
    %1397 = arith.mulf %1395, %1396 : vector<4x512xf32>
    %1398 = arith.addf %1392, %1397 : vector<4x512xf32>
    %1399 = vector.extract_strided_slice %1214 {offsets = [0, 33], sizes = [4, 1], strides = [1, 1]} : vector<4x36xf32> to vector<4x1xf32>
    %1400 = vector.extract_strided_slice %1380 {offsets = [3, 0], sizes = [1, 512], strides = [1, 1]} : vector<4x512xf32> to vector<1x512xf32>
    %1401 = vector.broadcast %1399 : vector<4x1xf32> to vector<4x512xf32>
    %1402 = vector.broadcast %1400 : vector<1x512xf32> to vector<4x512xf32>
    %1403 = arith.mulf %1401, %1402 : vector<4x512xf32>
    %1404 = arith.addf %1398, %1403 : vector<4x512xf32>
    %1405 = vector.extract_strided_slice %1213 {offsets = [0, 20], sizes = [4, 492], strides = [1, 1]} : vector<4x512xf32> to vector<4x492xf32>
    %1406 = vector.extract_strided_slice %1213 {offsets = [0, 0], sizes = [4, 20], strides = [1, 1]} : vector<4x512xf32> to vector<4x20xf32>
    %1407 = tpu.concatenate %1405, %1406 in 1 : vector<4x492xf32>, vector<4x20xf32> -> vector<4x512xf32>
    %1408 = vector.extract_strided_slice %1214 {offsets = [0, 7], sizes = [4, 1], strides = [1, 1]} : vector<4x36xf32> to vector<4x1xf32>
    %1409 = vector.extract_strided_slice %1407 {offsets = [0, 0], sizes = [1, 512], strides = [1, 1]} : vector<4x512xf32> to vector<1x512xf32>
    %1410 = vector.broadcast %1408 : vector<4x1xf32> to vector<4x512xf32>
    %1411 = vector.broadcast %1409 : vector<1x512xf32> to vector<4x512xf32>
    %1412 = arith.mulf %1410, %1411 : vector<4x512xf32>
    %1413 = arith.addf %1404, %1412 : vector<4x512xf32>
    %1414 = vector.extract_strided_slice %1214 {offsets = [0, 16], sizes = [4, 1], strides = [1, 1]} : vector<4x36xf32> to vector<4x1xf32>
    %1415 = vector.extract_strided_slice %1407 {offsets = [1, 0], sizes = [1, 512], strides = [1, 1]} : vector<4x512xf32> to vector<1x512xf32>
    %1416 = vector.broadcast %1414 : vector<4x1xf32> to vector<4x512xf32>
    %1417 = vector.broadcast %1415 : vector<1x512xf32> to vector<4x512xf32>
    %1418 = arith.mulf %1416, %1417 : vector<4x512xf32>
    %1419 = arith.addf %1413, %1418 : vector<4x512xf32>
    %1420 = vector.extract_strided_slice %1214 {offsets = [0, 25], sizes = [4, 1], strides = [1, 1]} : vector<4x36xf32> to vector<4x1xf32>
    %1421 = vector.extract_strided_slice %1407 {offsets = [2, 0], sizes = [1, 512], strides = [1, 1]} : vector<4x512xf32> to vector<1x512xf32>
    %1422 = vector.broadcast %1420 : vector<4x1xf32> to vector<4x512xf32>
    %1423 = vector.broadcast %1421 : vector<1x512xf32> to vector<4x512xf32>
    %1424 = arith.mulf %1422, %1423 : vector<4x512xf32>
    %1425 = arith.addf %1419, %1424 : vector<4x512xf32>
    %1426 = vector.extract_strided_slice %1214 {offsets = [0, 34], sizes = [4, 1], strides = [1, 1]} : vector<4x36xf32> to vector<4x1xf32>
    %1427 = vector.extract_strided_slice %1407 {offsets = [3, 0], sizes = [1, 512], strides = [1, 1]} : vector<4x512xf32> to vector<1x512xf32>
    %1428 = vector.broadcast %1426 : vector<4x1xf32> to vector<4x512xf32>
    %1429 = vector.broadcast %1427 : vector<1x512xf32> to vector<4x512xf32>
    %1430 = arith.mulf %1428, %1429 : vector<4x512xf32>
    %1431 = arith.addf %1425, %1430 : vector<4x512xf32>
    %1432 = vector.extract_strided_slice %1213 {offsets = [0, 21], sizes = [4, 491], strides = [1, 1]} : vector<4x512xf32> to vector<4x491xf32>
    %1433 = vector.extract_strided_slice %1213 {offsets = [0, 0], sizes = [4, 21], strides = [1, 1]} : vector<4x512xf32> to vector<4x21xf32>
    %1434 = tpu.concatenate %1432, %1433 in 1 : vector<4x491xf32>, vector<4x21xf32> -> vector<4x512xf32>
    %1435 = vector.extract_strided_slice %1214 {offsets = [0, 8], sizes = [4, 1], strides = [1, 1]} : vector<4x36xf32> to vector<4x1xf32>
    %1436 = vector.extract_strided_slice %1434 {offsets = [0, 0], sizes = [1, 512], strides = [1, 1]} : vector<4x512xf32> to vector<1x512xf32>
    %1437 = vector.broadcast %1435 : vector<4x1xf32> to vector<4x512xf32>
    %1438 = vector.broadcast %1436 : vector<1x512xf32> to vector<4x512xf32>
    %1439 = arith.mulf %1437, %1438 : vector<4x512xf32>
    %1440 = arith.addf %1431, %1439 : vector<4x512xf32>
    %1441 = vector.extract_strided_slice %1214 {offsets = [0, 17], sizes = [4, 1], strides = [1, 1]} : vector<4x36xf32> to vector<4x1xf32>
    %1442 = vector.extract_strided_slice %1434 {offsets = [1, 0], sizes = [1, 512], strides = [1, 1]} : vector<4x512xf32> to vector<1x512xf32>
    %1443 = vector.broadcast %1441 : vector<4x1xf32> to vector<4x512xf32>
    %1444 = vector.broadcast %1442 : vector<1x512xf32> to vector<4x512xf32>
    %1445 = arith.mulf %1443, %1444 : vector<4x512xf32>
    %1446 = arith.addf %1440, %1445 : vector<4x512xf32>
    %1447 = vector.extract_strided_slice %1214 {offsets = [0, 26], sizes = [4, 1], strides = [1, 1]} : vector<4x36xf32> to vector<4x1xf32>
    %1448 = vector.extract_strided_slice %1434 {offsets = [2, 0], sizes = [1, 512], strides = [1, 1]} : vector<4x512xf32> to vector<1x512xf32>
    %1449 = vector.broadcast %1447 : vector<4x1xf32> to vector<4x512xf32>
    %1450 = vector.broadcast %1448 : vector<1x512xf32> to vector<4x512xf32>
    %1451 = arith.mulf %1449, %1450 : vector<4x512xf32>
    %1452 = arith.addf %1446, %1451 : vector<4x512xf32>
    %1453 = vector.extract_strided_slice %1214 {offsets = [0, 35], sizes = [4, 1], strides = [1, 1]} : vector<4x36xf32> to vector<4x1xf32>
    %1454 = vector.extract_strided_slice %1434 {offsets = [3, 0], sizes = [1, 512], strides = [1, 1]} : vector<4x512xf32> to vector<1x512xf32>
    %1455 = vector.broadcast %1453 : vector<4x1xf32> to vector<4x512xf32>
    %1456 = vector.broadcast %1454 : vector<1x512xf32> to vector<4x512xf32>
    %1457 = arith.mulf %1455, %1456 : vector<4x512xf32>
    %1458 = arith.addf %1452, %1457 : vector<4x512xf32>
    %cst_38 = arith.constant 0.000000e+00 : f32
    %1459 = vector.broadcast %cst_38 : f32 to vector<4x512xf32>
    %1460 = arith.maximumf %1458, %1459 : vector<4x512xf32>
    %c0_39 = arith.constant 0 : index
    %c2560 = arith.constant 2560 : index
    %1461 = vector.load %arg3[%c0_39, %c2560] : memref<8x2816xf32, #tpu.memory_space<vmem>>, vector<3x4xf32>
    %c0_40 = arith.constant 0 : index
    %c2688 = arith.constant 2688 : index
    %1462 = vector.load %arg3[%c0_40, %c2688] : memref<8x2816xf32, #tpu.memory_space<vmem>>, vector<3x1xf32>
    %cst_41 = arith.constant 0.000000e+00 : f32
    %1463 = vector.broadcast %cst_41 : f32 to vector<3x512xf32>
    %1464 = vector.broadcast %1462 : vector<3x1xf32> to vector<3x512xf32>
    %1465 = arith.addf %1463, %1464 : vector<3x512xf32>
    %1466 = vector.extract_strided_slice %1461 {offsets = [0, 0], sizes = [3, 1], strides = [1, 1]} : vector<3x4xf32> to vector<3x1xf32>
    %1467 = vector.extract_strided_slice %1460 {offsets = [0, 0], sizes = [1, 512], strides = [1, 1]} : vector<4x512xf32> to vector<1x512xf32>
    %1468 = vector.broadcast %1466 : vector<3x1xf32> to vector<3x512xf32>
    %1469 = vector.broadcast %1467 : vector<1x512xf32> to vector<3x512xf32>
    %1470 = arith.mulf %1468, %1469 : vector<3x512xf32>
    %1471 = arith.addf %1465, %1470 : vector<3x512xf32>
    %1472 = vector.extract_strided_slice %1461 {offsets = [0, 1], sizes = [3, 1], strides = [1, 1]} : vector<3x4xf32> to vector<3x1xf32>
    %1473 = vector.extract_strided_slice %1460 {offsets = [1, 0], sizes = [1, 512], strides = [1, 1]} : vector<4x512xf32> to vector<1x512xf32>
    %1474 = vector.broadcast %1472 : vector<3x1xf32> to vector<3x512xf32>
    %1475 = vector.broadcast %1473 : vector<1x512xf32> to vector<3x512xf32>
    %1476 = arith.mulf %1474, %1475 : vector<3x512xf32>
    %1477 = arith.addf %1471, %1476 : vector<3x512xf32>
    %1478 = vector.extract_strided_slice %1461 {offsets = [0, 2], sizes = [3, 1], strides = [1, 1]} : vector<3x4xf32> to vector<3x1xf32>
    %1479 = vector.extract_strided_slice %1460 {offsets = [2, 0], sizes = [1, 512], strides = [1, 1]} : vector<4x512xf32> to vector<1x512xf32>
    %1480 = vector.broadcast %1478 : vector<3x1xf32> to vector<3x512xf32>
    %1481 = vector.broadcast %1479 : vector<1x512xf32> to vector<3x512xf32>
    %1482 = arith.mulf %1480, %1481 : vector<3x512xf32>
    %1483 = arith.addf %1477, %1482 : vector<3x512xf32>
    %1484 = vector.extract_strided_slice %1461 {offsets = [0, 3], sizes = [3, 1], strides = [1, 1]} : vector<3x4xf32> to vector<3x1xf32>
    %1485 = vector.extract_strided_slice %1460 {offsets = [3, 0], sizes = [1, 512], strides = [1, 1]} : vector<4x512xf32> to vector<1x512xf32>
    %1486 = vector.broadcast %1484 : vector<3x1xf32> to vector<3x512xf32>
    %1487 = vector.broadcast %1485 : vector<1x512xf32> to vector<3x512xf32>
    %1488 = arith.mulf %1486, %1487 : vector<3x512xf32>
    %1489 = arith.addf %1483, %1488 : vector<3x512xf32>
    %1490 = arith.negf %1489 : vector<3x512xf32>
    %1491 = math.exp %1490 : vector<3x512xf32>
    %cst_42 = arith.constant 1.000000e+00 : f32
    %1492 = vector.broadcast %cst_42 : f32 to vector<3x512xf32>
    %1493 = arith.addf %1492, %1491 : vector<3x512xf32>
    %1494 = arith.divf %1492, %1493 : vector<3x512xf32>
    %cst_43 = arith.constant 0.000000e+00 : f32
    %1495 = vector.broadcast %cst_43 : f32 to vector<4x512xf32>
    %1496 = arith.maximumf %286, %1495 : vector<4x512xf32>
    %cst_44 = arith.constant 1.000000e+00 : f32
    %1497 = vector.broadcast %cst_44 : f32 to vector<4x512xf32>
    %1498 = arith.subf %286, %1497 : vector<4x512xf32>
    %cst_45 = arith.constant 0.000000e+00 : f32
    %1499 = vector.broadcast %cst_45 : f32 to vector<4x512xf32>
    %1500 = arith.maximumf %1498, %1499 : vector<4x512xf32>
    %1501 = arith.subf %1496, %1500 : vector<4x512xf32>
    %1502 = vector.extract_strided_slice %1494 {offsets = [0, 0], sizes = [1, 512], strides = [1, 1]} : vector<3x512xf32> to vector<1x512xf32>
    %1503 = vector.broadcast %1502 : vector<1x512xf32> to vector<4x512xf32>
    %1504 = arith.mulf %1503, %1501 : vector<4x512xf32>
    %cst_46 = arith.constant 1.000000e+00 : f32
    %1505 = vector.broadcast %cst_46 : f32 to vector<4x512xf32>
    %1506 = arith.subf %1505, %1501 : vector<4x512xf32>
    %1507 = arith.mulf %1504, %1506 : vector<4x512xf32>
    %1508 = arith.addf %1501, %1507 : vector<4x512xf32>
    %1509 = vector.extract_strided_slice %1494 {offsets = [1, 0], sizes = [1, 512], strides = [1, 1]} : vector<3x512xf32> to vector<1x512xf32>
    %1510 = vector.broadcast %1509 : vector<1x512xf32> to vector<4x512xf32>
    %1511 = arith.mulf %1510, %1508 : vector<4x512xf32>
    %cst_47 = arith.constant 1.000000e+00 : f32
    %1512 = vector.broadcast %cst_47 : f32 to vector<4x512xf32>
    %1513 = arith.subf %1512, %1508 : vector<4x512xf32>
    %1514 = arith.mulf %1511, %1513 : vector<4x512xf32>
    %1515 = arith.addf %1508, %1514 : vector<4x512xf32>
    %1516 = vector.extract_strided_slice %1494 {offsets = [2, 0], sizes = [1, 512], strides = [1, 1]} : vector<3x512xf32> to vector<1x512xf32>
    %1517 = vector.broadcast %1516 : vector<1x512xf32> to vector<4x512xf32>
    %1518 = arith.mulf %1517, %1515 : vector<4x512xf32>
    %cst_48 = arith.constant 1.000000e+00 : f32
    %1519 = vector.broadcast %cst_48 : f32 to vector<4x512xf32>
    %1520 = arith.subf %1519, %1515 : vector<4x512xf32>
    %1521 = arith.mulf %1518, %1520 : vector<4x512xf32>
    %1522 = arith.addf %1515, %1521 : vector<4x512xf32>
    %1523 = vector.shape_cast %1522 : vector<4x512xf32> to vector<1x4x512xf32>
    %c0_49 = arith.constant 0 : index
    %c0_50 = arith.constant 0 : index
    %c0_51 = arith.constant 0 : index
    %1524 = vector.load %arg4[%c0_49, %c0_50, %c0_51] : memref<1x4x512xf32, #tpu.memory_space<vmem>>, vector<1x4x512xf32>
    tpu.vector_store %arg4[%c0_49, %c0_50, %c0_51], %1523 {strides = array<i32>} : memref<1x4x512xf32, #tpu.memory_space<vmem>>, vector<1x4x512xf32>,
    return
  }
  func.func @transform_0(%arg0: i32) -> (i32, i32, i32) {
    %c0_i32 = arith.constant 0 : i32
    %c0_i32_0 = arith.constant 0 : i32
    %c0_i32_1 = arith.constant 0 : i32
    return %arg0, %c0_i32, %c0_i32_0 : i32, i32, i32
  }
  func.func @transform_1(%arg0: i32) -> (i32, i32) {
    %c0_i32 = arith.constant 0 : i32
    %c0_i32_0 = arith.constant 0 : i32
    %c0_i32_1 = arith.constant 0 : i32
    return %c0_i32, %c0_i32_0 : i32, i32
  }
  func.func @transform_2(%arg0: i32) -> (i32, i32) {
    %c0_i32 = arith.constant 0 : i32
    %c0_i32_0 = arith.constant 0 : i32
    %c0_i32_1 = arith.constant 0 : i32
    return %c0_i32, %c0_i32_0 : i32, i32
  }
  func.func @transform_3(%arg0: i32) -> (i32, i32, i32) {
    %c0_i32 = arith.constant 0 : i32
    %c0_i32_0 = arith.constant 0 : i32
    %c0_i32_1 = arith.constant 0 : i32
    return %arg0, %c0_i32, %c0_i32_0 : i32, i32, i32
  }
}

</mosaic_0001>

<bundles_post_ra>
// kernel: curve_ca_forward_pallas.1
= control target key start
LH: loop header
LB: loop body
LE: loop exit
PB: predicated region body
PF: predicated region fallthrough
CT: control target
= control target key end

     0   :  { %s6163_s12 = smov 0   ;;  %s11210_s0 = inlined_call_operand.vmem [shape: f32[2,4,512], index: 0, kind: input, shape index: {}]   ;;  %s11211_s1 = inlined_call_operand.vmem [shape: f32[1,512], index: 1, kind: input, shape index: {}]   ;;  %s11212_s2 = inlined_call_operand.vmem [shape: f32[8,2816], index: 2, kind: input, shape index: {}]   ;;  %s11213_s3 = inlined_call_operand.vmem [shape: f32[2,4,512], index: 3, kind: output, shape index: {}]  }
   0x1 LB: > { %s5626_s13 = sadd.s32 4294967295, %s6017_s12   ;;  %p5630_p0 = scmp.ge.s32.totalorder %s6017_s12, 1  ;;  %s6017_s12 = sphi %s6163_s12, %s13_s12  }
   0x2   : > { %p137_p1 = scmp.lt.s32.totalorder %s6017_s12, 3 }
   0x4   : > { %p138_p2 = pnand %p5630_p0, %p137_p1 }
   0x6   : > { %141 = sbr.rel (%p138_p2) target bundleno = 2470 (0x9a6), region = 32 }
   0xb   : > { %v6174_v0 = vld [vmem:[%s11212_s2 + $0x40] sm:$0xf]  ;;  %p161_p3 = scmp.lt.s32.totalorder %s5626_s13, 1  ;;  %v11240_v1 = vmov 0   ;;  %v11222_v3 = vmov 1   ;;  %s6021_s20 = smov 42  }
   0xc   : > { %5779 = vset.pattern.permute.xlu2 %v11240_v1  ;;  %v11224_v12 = vmov 2   ;;  %s6023_s21 = smov 41   ;;  %s6024_s22 = smov 40   ;;  %v11220_v20 = vmov 3   ;;  %v11236_v26 = vmov 4   ;;  %v11232_v34 = vmov 5  }
   0xd   : > { %210 = vperm.xlu2 %5779, %v6174_v0   ;;  %s12282_s13 = smov (!%p161_p3, %s5626_s13), 1  ;;  %s6026_s23 = smov 39   ;;  %v11228_v36 = vmov 7   ;;  %v11234_v39 = vmov 6   ;;  %v6276_v54 = vld [vmem:[%s11212_s2 + $0x20] sm:$0xf] }
   0xe   : > { %s11291_s16 = sshll.u32 %s12282_s13, 4  ;;  %s6028_s24 = smov 38   ;;  %5786 = vset.pattern.permute.xlu1 %v11228_v36  ;;  %vm11427_vm0 = vcmask 343040   ;;  %vm11426_vm1 = vcmask 334848   ;;  %vm11428_vm2 = vcmask 326656   ;;  %vm323_vm3 = vcmask 318464  }
   0xf   : > { %s165_s19 = scalar_lea.vmem %s11210_s0, %s11291_s16  ;;  %s6031_s25 = smov 22   ;;  %vm11357_vm4 = vcmask 310272   ;;  %vm11354_vm5 = vcmask 179200   ;;  %vm11352_vm6 = vcmask 171008   ;;  %vm11344_vm7 = vcmask 162816  }
  0x10   : > { %v6186_v2 = vld [vmem:[%s165_s19 + $0x8] sm:$0xff]  ;;  %v6191_v4 = vld [vmem:[%s165_s19] sm:$0xff]  ;;  %s6033_s26 = smov 21   ;;  %s6034_s27 = smov 20   ;;  %vm11343_vm8 = vcmask 154624   ;;  %vm11342_vm9 = vcmask 146432  }
  0x11   : > { %186 = vst [vmem:[#allocation1 + $0x10] ss:$2 sm:$0xff] %v6186_v2  ;;  %s6035_s30 = smov 19   ;;  %s6038_s4 = smov 18   ;;  %vm11338_vm10 = vcmask 15360   ;;  %vm11336_vm11 = vcmask 7168  }
  0x12   : > { %178 = vst [vmem:[#allocation1] ss:$2 sm:$0xff] %v6186_v2  ;;  %s6039_s5 = smov 2   ;;  %s6041_s6 = smov 1   ;;  %vm806_vm12 = vcmask 1039360   ;;  %vm859_vm13 = vcmask 1031168  }
  0x13   : > { %s11430_s9 = smov 127   ;;  %s6046_s10 = smov 126   ;;  %vm900_vm14 = vcmask 900096   ;;  %vm941_vm15 = vcmask 891904  }
  0x14   : > { %s6048_s11 = smov 110   ;;  %s6049_s14 = smov 109  }
  0x15   : > { %5780 = vset.pattern.permute.xlu2 %v11222_v3  ;;  %s6053_s15 = smov 108   ;;  %s6054_s17 = smov 107  }
  0x16   : > { %s11313_s18 = smov 106   ;;  %s11308_s19 = smov 90  }
  0x17   : > { %s11303_s28 = smov 89   ;;  %s11301_s29 = smov 88  }
  0x18   : > { %v190_v5 = vld.sshfl [vmem:[#allocation1 + $0x18] sm:$0xff pattern:$0x75316420]  ;;  %v189_v6 = vld.sshfl [vmem:[#allocation1 + $0x10] sm:$0xff pattern:$0x75316420] }
  0x19   : > { %197 = vrot.lane.b32.xlu2 %v190_v5, %s6021_s20  ;;  %195 = vrot.lane.b32.xlu1 %v189_v6, %s6021_s20  ;;  %228 = vst [vmem:[#allocation1 + $0x10] ss:$2 sm:$0xff] %v6186_v2  ;;  %v179_v7 = vld.sshfl [vmem:[#allocation1 + $0x8] sm:$0xff pattern:$0x75316420]  ;;  %v11230_v6 = vmov 8  }
  0x1a   : > { %180 = vrot.lane.b32.xlu0 %v179_v7, %s6021_s20  ;;  %184 = vst [vmem:[#allocation1] ss:$2 sm:$0xff] %v6191_v4  ;;  %s11299_s16 = smov 87   ;;  %s11311_s7 = smov 86  }
  0x1b   : > { %s11825_s8 = smov 90  }
  0x20   : > { %v232_v8 = vld.sshfl [vmem:[#allocation1 + $0x18] sm:$0xff pattern:$0x75316420]  ;;  %v231_v9 = vld.sshfl [vmem:[#allocation1 + $0x10] sm:$0xff pattern:$0x75316420] }
  0x21   : > { %251 = vperm.xlu2 %5780, %v6174_v0   ;;  %v188_v10 = vld.sshfl [vmem:[#allocation1 + $0x8] sm:$0xff pattern:$0x75316420]  ;;  %v187_v11 = vld.sshfl [vmem:[#allocation1] sm:$0xff pattern:$0x75316420] }
  0x22   : > { %193 = vrot.lane.b32.xlu1 %v188_v10, %s6021_s20  ;;  %191 = vrot.lane.b32.xlu0 %v187_v11, %s6021_s20  ;;  %221 = vst [vmem:[#allocation1] ss:$2 sm:$0xff] %v6186_v2 }
  0x23   : > { %269 = vst [vmem:[#allocation1 + $0x10] ss:$2 sm:$0xff] %v6186_v2 }
  0x29   : > { %5781 = vset.pattern.permute.xlu2 %v11224_v12  ;;  %v222_v13 = vld.sshfl [vmem:[#allocation1 + $0x8] sm:$0xff pattern:$0x75316420] }
  0x2a   : > { %239 = vrot.lane.b32.xlu1 %v232_v8, %s6023_s21  ;;  %237 = vrot.lane.b32.xlu0 %v231_v9, %s6023_s21  ;;  %226 = vst [vmem:[#allocation1] ss:$2 sm:$0xff] %v6191_v4  ;;  %v273_v14 = vld.sshfl [vmem:[#allocation1 + $0x18] sm:$0xff pattern:$0x75316420] }
  0x2b   : > { %292 = vperm.xlu2 %5781, %v6174_v0   ;;  %v272_v15 = vld.sshfl [vmem:[#allocation1 + $0x10] sm:$0xff pattern:$0x75316420] }
  0x2c   : > { %310 = vst [vmem:[#allocation1 + $0x10] ss:$2 sm:$0xff] %v6186_v2 }
  0x31   : > { %v230_v16 = vld.sshfl [vmem:[#allocation1 + $0x8] sm:$0xff pattern:$0x75316420]  ;;  %v229_v17 = vld.sshfl [vmem:[#allocation1] sm:$0xff pattern:$0x75316420] }
  0x32   : > { %280 = vrot.lane.b32.xlu1 %v273_v14, %s6024_s22  ;;  %223 = vrot.lane.b32.xlu0 %v222_v13, %s6023_s21  ;;  %262 = vst [vmem:[#allocation1] ss:$2 sm:$0xff] %v6186_v2 }
  0x33   : > { %235 = vrot.lane.b32.xlu2 %v230_v16, %s6023_s21  ;;  %v314_v18 = vld.sshfl [vmem:[#allocation1 + $0x18] sm:$0xff pattern:$0x75316420]  ;;  %v313_v19 = vld.sshfl [vmem:[#allocation1 + $0x10] sm:$0xff pattern:$0x75316420] }
  0x34   : > { %5782 = vset.pattern.permute.xlu2 %v11220_v20  ;;  %351 = vst [vmem:[#allocation1 + $0x10] ss:$2 sm:$0xff] %v6186_v2 }
  0x39   : > { %v263_v21 = vld.sshfl [vmem:[#allocation1 + $0x8] sm:$0xff pattern:$0x75316420] }
  0x3a   : > { %278 = vrot.lane.b32.xlu0 %v272_v15, %s6024_s22  ;;  %233 = vrot.lane.b32.xlu1 %v229_v17, %s6023_s21  ;;  %267 = vst [vmem:[#allocation1] ss:$2 sm:$0xff] %v6191_v4  ;;  %v11216_v17 = vmov 9  }
  0x3b   : > { %333 = vperm.xlu2 %5782, %v6174_v0   ;;  %v355_v22 = vld.sshfl [vmem:[#allocation1 + $0x18] sm:$0xff pattern:$0x75316420]  ;;  %v354_v23 = vld.sshfl [vmem:[#allocation1 + $0x10] sm:$0xff pattern:$0x75316420] }
  0x3c   : > { %392 = vst [vmem:[#allocation1 + $0x10] ss:$2 sm:$0xff] %v6186_v2 }
  0x41   : > { %v271_v24 = vld.sshfl [vmem:[#allocation1 + $0x8] sm:$0xff pattern:$0x75316420]  ;;  %v270_v25 = vld.sshfl [vmem:[#allocation1] sm:$0xff pattern:$0x75316420] }
  0x42   : > { %321 = vrot.lane.b32.xlu1 %v314_v18, %s6026_s23  ;;  %264 = vrot.lane.b32.xlu0 %v263_v21, %s6024_s22  ;;  %303 = vst [vmem:[#allocation1] ss:$2 sm:$0xff] %v6186_v2 }
  0x43   : > { %276 = vrot.lane.b32.xlu2 %v271_v24, %s6024_s22  ;;  %v396_v27 = vld.sshfl [vmem:[#allocation1 + $0x18] sm:$0xff pattern:$0x75316420]  ;;  %v395_v28 = vld.sshfl [vmem:[#allocation1 + $0x10] sm:$0xff pattern:$0x75316420] }
  0x44   : > { %5783 = vset.pattern.permute.xlu2 %v11236_v26  ;;  %433 = vst [vmem:[#allocation1 + $0x10] ss:$2 sm:$0xff] %v6186_v2 }
  0x49   : > { %v304_v29 = vld.sshfl [vmem:[#allocation1 + $0x8] sm:$0xff pattern:$0x75316420] }
  0x4a   : > { %319 = vrot.lane.b32.xlu0 %v313_v19, %s6026_s23  ;;  %274 = vrot.lane.b32.xlu1 %v270_v25, %s6024_s22  ;;  %308 = vst [vmem:[#allocation1] ss:$2 sm:$0xff] %v6191_v4 }
  0x4b   : > { %374 = vperm.xlu2 %5783, %v6174_v0   ;;  %v437_v30 = vld.sshfl [vmem:[#allocation1 + $0x18] sm:$0xff pattern:$0x75316420]  ;;  %v436_v33 = vld.sshfl [vmem:[#allocation1 + $0x10] sm:$0xff pattern:$0x75316420] }
  0x4c   : > { %487 = vst [vmem:[#allocation1 + $0x10] ss:$2 sm:$0xff] %v6186_v2 }
  0x51   : > { %v312_v31 = vld.sshfl [vmem:[#allocation1 + $0x8] sm:$0xff pattern:$0x75316420]  ;;  %v311_v32 = vld.sshfl [vmem:[#allocation1] sm:$0xff pattern:$0x75316420] }
  0x52   : > { %362 = vrot.lane.b32.xlu1 %v355_v22, %s6028_s24  ;;  %305 = vrot.lane.b32.xlu0 %v304_v29, %s6026_s23  ;;  %344 = vst [vmem:[#allocation1] ss:$2 sm:$0xff] %v6186_v2 }
  0x53   : > { %317 = vrot.lane.b32.xlu2 %v312_v31, %s6026_s23  ;;  %v490_v40 = vld.sshfl [vmem:[#allocation1 + $0x10] sm:$0xff pattern:$0x75316420]  ;;  %v491_v41 = vld.sshfl [vmem:[#allocation1 + $0x18] sm:$0xff pattern:$0x75316420] }
  0x54   : > { %5784 = vset.pattern.permute.xlu2 %v11232_v34  ;;  %540 = vst [vmem:[#allocation1 + $0x10] ss:$2 sm:$0xff] %v6186_v2 }
  0x59   : > { %v345_v35 = vld.sshfl [vmem:[#allocation1 + $0x8] sm:$0xff pattern:$0x75316420] }
  0x5a   : > { %360 = vrot.lane.b32.xlu0 %v354_v23, %s6028_s24  ;;  %315 = vrot.lane.b32.xlu1 %v311_v32, %s6026_s23  ;;  %349 = vst [vmem:[#allocation1] ss:$2 sm:$0xff] %v6191_v4 }
  0x5b   : > { %415 = vperm.xlu2 %5784, %v6174_v0   ;;  %v544_v49 = vld.sshfl [vmem:[#allocation1 + $0x18] sm:$0xff pattern:$0x75316420]  ;;  %v543_v52 = vld.sshfl [vmem:[#allocation1 + $0x10] sm:$0xff pattern:$0x75316420] }
  0x5c   : > { %593 = vst [vmem:[#allocation1 + $0x10] ss:$2 sm:$0xff] %v6186_v2 }
  0x61   : > { %v353_v37 = vld.sshfl [vmem:[#allocation1 + $0x8] sm:$0xff pattern:$0x75316420]  ;;  %v352_v38 = vld.sshfl [vmem:[#allocation1] sm:$0xff pattern:$0x75316420] }
  0x62   : > { %403 = vrot.lane.b32.xlu1 %v396_v27, %s6031_s25  ;;  %346 = vrot.lane.b32.xlu0 %v345_v35, %s6028_s24  ;;  %385 = vst [vmem:[#allocation1] ss:$2 sm:$0xff] %v6186_v2 }
  0x63   : > { %358 = vrot.lane.b32.xlu2 %v353_v37, %s6028_s24  ;;  %v597_v59 = vld.sshfl [vmem:[#allocation1 + $0x18] sm:$0xff pattern:$0x75316420]  ;;  %v596_v62 = vld.sshfl [vmem:[#allocation1 + $0x10] sm:$0xff pattern:$0x75316420] }
  0x64   : > { %5785 = vset.pattern.permute.xlu2 %v11234_v39  ;;  %634 = vst [vmem:[#allocation1 + $0x10] ss:$2 sm:$0xff] %v6186_v2 }
  0x67   : > { %v6247_v42 = vpop.permute.xlu2 %210 }
  0x69   : > { %v386_v43 = vld.sshfl [vmem:[#allocation1 + $0x8] sm:$0xff pattern:$0x75316420] }
  0x6a   : > { %401 = vrot.lane.b32.xlu0 %v395_v28, %s6031_s25  ;;  %356 = vrot.lane.b32.xlu1 %v352_v38, %s6028_s24  ;;  %390 = vst [vmem:[#allocation1] ss:$2 sm:$0xff] %v6191_v4 }
  0x6b   : > { %456 = vperm.xlu2 %5785, %v6174_v0   ;;  %v638_v9 = vld.sshfl [vmem:[#allocation1 + $0x18] sm:$0xff pattern:$0x75316420]  ;;  %v637_v10 = vld.sshfl [vmem:[#allocation1 + $0x10] sm:$0xff pattern:$0x75316420] }
  0x6c   : > { %675 = vst [vmem:[#allocation1 + $0x10] ss:$2 sm:$0xff] %v6186_v2 }
  0x71   : > { %v394_v44 = vld.sshfl [vmem:[#allocation1 + $0x8] sm:$0xff pattern:$0x75316420]  ;;  %v393_v45 = vld.sshfl [vmem:[#allocation1] sm:$0xff pattern:$0x75316420] }
  0x72   : > { %444 = vrot.lane.b32.xlu1 %v437_v30, %s6033_s26  ;;  %387 = vrot.lane.b32.xlu0 %v386_v43, %s6031_s25  ;;  %426 = vst [vmem:[#allocation1] ss:$2 sm:$0xff] %v6186_v2 }
  0x73   : > { %399 = vrot.lane.b32.xlu2 %v394_v44, %s6031_s25  ;;  %v6257_v46 = vpop.permute.xlu2 %197  ;;  %v679_v18 = vld.sshfl [vmem:[#allocation1 + $0x18] sm:$0xff pattern:$0x75316420]  ;;  %v6316_v19 = vld.sshfl [vmem:[#allocation1 + $0x10] sm:$0xff pattern:$0x75316420] }
  0x74   : > { %5787 = vset.pattern.permute.xlu2 %v11222_v3  ;;  %727 = vst [vmem:[#allocation1 + $0x10] ss:$2 sm:$0xff] %v6186_v2 }
  0x79   : > { %v427_v47 = vld.sshfl [vmem:[#allocation1 + $0x8] sm:$0xff pattern:$0x75316420] }
  0x7a   : > { %442 = vrot.lane.b32.xlu0 %v436_v33, %s6033_s26  ;;  %397 = vrot.lane.b32.xlu1 %v393_v45, %s6031_s25  ;;  %431 = vst [vmem:[#allocation1] ss:$2 sm:$0xff] %v6191_v4 }
  0x7b   : > { %496 = vrot.lane.b32.xlu2 %v490_v40, %s6034_s27  ;;  %v6264_v48 = vpop.permute.xlu2 %251  ;;  %v6330_v25 = vld.sshfl [vmem:[#allocation1 + $0x10] sm:$0xff pattern:$0x75316420]  ;;  %v6336_v29 = vld.sshfl [vmem:[#allocation1 + $0x18] sm:$0xff pattern:$0x75316420] }
  0x7c   : > { %11516 = vst [vmem:[#allocation2_spill] sm:$0xff] %v6330_v25 }
  0x7d   : > { %11517 = vst [vmem:[#allocation3_spill] sm:$0xff] %v6336_v29 }
  0x7e   : > { %750 = vst [vmem:[#allocation1 + $0x10] ss:$2 sm:$0xff] %v6186_v2 }
  0x81   : > { %v435_v50 = vld.sshfl [vmem:[#allocation1 + $0x8] sm:$0xff pattern:$0x75316420]  ;;  %v434_v51 = vld.sshfl [vmem:[#allocation1] sm:$0xff pattern:$0x75316420] }
  0x82   : > { %510 = vperm.xlu1 %5786, %v6174_v0   ;;  %428 = vrot.lane.b32.xlu0 %v427_v47, %s6033_s26  ;;  %480 = vst [vmem:[#allocation1] ss:$2 sm:$0xff] %v6186_v2 }
  0x83   : > { %440 = vrot.lane.b32.xlu2 %v435_v50, %s6033_s26 }
  0x85   : > { %v6271_v53 = vpop.permute.xlu2 %292  ;;  %v6348_v37 = vld.sshfl [vmem:[#allocation1 + $0x10] sm:$0xff pattern:$0x75316420]  ;;  %v6350_v38 = vld.sshfl [vmem:[#allocation1 + $0x18] sm:$0xff pattern:$0x75316420] }
  0x86   : > { %11518 = vst [vmem:[#allocation4_spill] sm:$0xff] %v6348_v37  ;;  %v11531_v37 = vmov 6  }
  0x87   : > { %11519 = vst [vmem:[#allocation5_spill] sm:$0xff] %v6350_v38 }
  0x88   : > { %774 = vst [vmem:[#allocation1 + $0x10] ss:$2 sm:$0xff] %v6186_v2 }
  0x89   : > { %v481_v55 = vld.sshfl [vmem:[#allocation1 + $0x8] sm:$0xff pattern:$0x75316420] }
  0x8a   : > { %498 = vrot.lane.b32.xlu0 %v491_v41, %s6034_s27  ;;  %438 = vrot.lane.b32.xlu1 %v434_v51, %s6033_s26  ;;  %485 = vst [vmem:[#allocation1] ss:$2 sm:$0xff] %v6191_v4  ;;  %v11218_v41 = vmov 12  }
  0x8b   : > { %522 = vperm.xlu2 %5787, %v6276_v54   ;;  %v6282_v56 = vpop.permute.xlu1 %195  ;;  %5789 = vset.pattern.permute.xlu1 %v11216_v17 }
  0x8c   : > { %v6284_v57 = vpop.permute.xlu0 %180  ;;  %5793 = vset.pattern.permute.xlu0 %v11218_v41  ;;  %v176_v41 = vld [vmem:[%s11212_s2] sm:$0xf] }
  0x8d   : > { %v6286_v58 = vpop.permute.xlu2 %235 }
  0x8f   : > { %v6361_v45 = vld.sshfl [vmem:[#allocation1 + $0x10] sm:$0xff pattern:$0x75316420]  ;;  %v6363_v47 = vld.sshfl [vmem:[#allocation1 + $0x18] sm:$0xff pattern:$0x75316420] }
  0x90   : > { %11520 = vst [vmem:[#allocation6_spill] sm:$0xff] %v6361_v45 }
  0x91   : > { %v488_v60 = vld.sshfl [vmem:[#allocation1] sm:$0xff pattern:$0x75316420]  ;;  %v489_v61 = vld.sshfl [vmem:[#allocation1 + $0x8] sm:$0xff pattern:$0x75316420] }
  0x92   : > { %482 = vrot.lane.b32.xlu1 %v481_v55, %s6034_s27  ;;  %533 = vst [vmem:[#allocation1] ss:$2 sm:$0xff] %v6186_v2  ;;  %549 = vrot.lane.b32.xlu0 %v543_v52, %s6035_s30 }
  0x93   : > { %492 = vrot.lane.b32.xlu2 %v488_v60, %s6034_s27  ;;  %11521 = vst [vmem:[#allocation7_spill] sm:$0xff] %v6363_v47  ;;  %v11529_v47 = vmov 4  }
  0x94   : > { %v6293_v63 = vpop.permute.xlu1 %193  ;;  %v6295_v5 = vpop.permute.xlu0 %191  ;;  %5788 = vset.pattern.permute.xlu2 %v11230_v6  ;;  %793 = vst [vmem:[#allocation1 + $0x10] ss:$2 sm:$0xff] %v6186_v2 }
  0x95   : > { %v6298_v7 = vpop.permute.xlu2 %333 }
  0x99   : > { %v534_v8 = vld.sshfl [vmem:[#allocation1 + $0x8] sm:$0xff pattern:$0x75316420] }
  0x9a   : > { %494 = vrot.lane.b32.xlu1 %v489_v61, %s6034_s27  ;;  %538 = vst [vmem:[#allocation1] ss:$2 sm:$0xff] %v6191_v4  ;;  %535 = vrot.lane.b32.xlu0 %v534_v8, %s6035_s30 }
  0x9b   : > { %563 = vperm.xlu2 %5788, %v6174_v0   ;;  %v6376_v60 = vld.sshfl [vmem:[#allocation1 + $0x18] sm:$0xff pattern:$0x75316420] }
  0x9c   : > { %v6304_v11 = vpop.permute.xlu1 %239  ;;  %v6306_v13 = vpop.permute.xlu0 %237 }
  0x9d   : > { %v6309_v14 = vpop.permute.xlu2 %276 }
  0xa1   : > { %v542_v15 = vld.sshfl [vmem:[#allocation1 + $0x8] sm:$0xff pattern:$0x75316420]  ;;  %v541_v16 = vld.sshfl [vmem:[#allocation1] sm:$0xff pattern:$0x75316420] }
  0xa2   : > { %551 = vrot.lane.b32.xlu1 %v544_v49, %s6035_s30  ;;  %586 = vst [vmem:[#allocation1] ss:$2 sm:$0xff] %v6186_v2  ;;  %604 = vrot.lane.b32.xlu0 %v597_v59, %s6038_s4  ;;  %v796_v59 = vld.sshfl [vmem:[#allocation1 + $0x10] sm:$0xff pattern:$0x75316420] }
  0xa3   : > { %547 = vrot.lane.b32.xlu2 %v542_v15, %s6035_s30  ;;  %846 = vst [vmem:[#allocation1 + $0x10] ss:$2 sm:$0xff] %v6186_v2 }
  0xa4   : > { %v6318_v21 = vpop.permute.xlu1 %280  ;;  %v6320_v22 = vpop.permute.xlu0 %223  ;;  %5792 = vset.pattern.permute.xlu2 %v11220_v20 }
  0xa5   : > { %v6324_v23 = vpop.permute.xlu2 %374 }
  0xa9   : > { %v587_v24 = vld.sshfl [vmem:[#allocation1 + $0x8] sm:$0xff pattern:$0x75316420] }
  0xaa   : > { %545 = vrot.lane.b32.xlu1 %v541_v16, %s6035_s30  ;;  %591 = vst [vmem:[#allocation1] ss:$2 sm:$0xff] %v6191_v4  ;;  %645 = vrot.lane.b32.xlu0 %v638_v9, %s6039_s5  ;;  %v11214_v9 = vmov 10  }
  0xab   : > { %602 = vrot.lane.b32.xlu2 %v596_v62, %s6038_s4 }
  0xac   : > { %v6332_v27 = vpop.permute.xlu0 %278  ;;  %v6334_v28 = vpop.permute.xlu1 %233 }
  0xad   : > { %v6338_v30 = vpop.permute.xlu2 %317 }
  0xb1   : > { %v594_v31 = vld.sshfl [vmem:[#allocation1] sm:$0xff pattern:$0x75316420]  ;;  %v595_v32 = vld.sshfl [vmem:[#allocation1 + $0x8] sm:$0xff pattern:$0x75316420] }
  0xb2   : > { %588 = vrot.lane.b32.xlu1 %v587_v24, %s6038_s4  ;;  %627 = vst [vmem:[#allocation1] ss:$2 sm:$0xff] %v6186_v2 }
  0xb3   : > { %598 = vrot.lane.b32.xlu2 %v594_v31, %s6038_s4 }
  0xb4   : > { %v6344_v33 = vpop.permute.xlu1 %321  ;;  %v6346_v35 = vpop.permute.xlu0 %264 }
  0xb5   : > { %v6352_v40 = vpop.permute.xlu2 %415 }
  0xb9   : > { %v628_v43 = vld.sshfl [vmem:[#allocation1 + $0x8] sm:$0xff pattern:$0x75316420] }
  0xba   : > { %600 = vrot.lane.b32.xlu1 %v595_v32, %s6038_s4  ;;  %632 = vst [vmem:[#allocation1] ss:$2 sm:$0xff] %v6191_v4  ;;  %v849_v32 = vld.sshfl [vmem:[#allocation1 + $0x10] sm:$0xff pattern:$0x75316420] }
  0xbb   : > { %629 = vrot.lane.b32.xlu2 %v628_v43, %s6039_s5  ;;  %v850_v43 = vld.sshfl [vmem:[#allocation1 + $0x18] sm:$0xff pattern:$0x75316420] }
  0xbc   : > { %v6359_v44 = vpop.permute.xlu1 %274  ;;  %v6368_v50 = vpop.permute.xlu0 %319  ;;  %887 = vst [vmem:[#allocation1 + $0x10] ss:$2 sm:$0xff] %v6186_v2 }
  0xbd   : > { %v6365_v49 = vpop.permute.xlu2 %358 }
  0xc1   : > { %v635_v51 = vld.sshfl [vmem:[#allocation1] sm:$0xff pattern:$0x75316420]  ;;  %v636_v52 = vld.sshfl [vmem:[#allocation1 + $0x8] sm:$0xff pattern:$0x75316420] }
  0xc2   : > { %616 = vperm.xlu1 %5789, %v6174_v0   ;;  %639 = vrot.lane.b32.xlu0 %v635_v51, %s6039_s5  ;;  %668 = vst [vmem:[#allocation1] ss:$2 sm:$0xff] %v6186_v2 }
  0xc3   : > { %643 = vrot.lane.b32.xlu2 %v637_v10, %s6039_s5  ;;  %v891_v20 = vld.sshfl [vmem:[#allocation1 + $0x18] sm:$0xff pattern:$0x75316420] }
  0xc4   : > { %v6374_v55 = vpop.permute.xlu1 %362  ;;  %v6381_v62 = vpop.permute.xlu0 %305 }
  0xc5   : > { %v6378_v61 = vpop.permute.xlu2 %456 }
  0xc9   : > { %v669_v8 = vld.sshfl [vmem:[#allocation1 + $0x8] sm:$0xff pattern:$0x75316420] }
  0xca   : > { %641 = vrot.lane.b32.xlu1 %v636_v52, %s6039_s5  ;;  %686 = vrot.lane.b32.xlu0 %v679_v18, %s6041_s6  ;;  %673 = vst [vmem:[#allocation1] ss:$2 sm:$0xff] %v6191_v4 }
  0xcb   : > { %670 = vrot.lane.b32.xlu2 %v669_v8, %s6041_s6  ;;  %5790 = vset.pattern.permute.xlu1 %v11214_v9 }
  0xcc   : > { %v6388_v10 = vpop.permute.xlu1 %315  ;;  %v6392_v31 = vpop.permute.xlu0 %360 }
  0xcd   : > { %v6390_v15 = vpop.permute.xlu2 %399 }
  0xd1   : > { %v676_v16 = vld.sshfl [vmem:[#allocation1] sm:$0xff pattern:$0x75316420]  ;;  %v677_v24 = vld.sshfl [vmem:[#allocation1 + $0x8] sm:$0xff pattern:$0x75316420] }
  0xd2   : > { %657 = vperm.xlu1 %5790, %v6174_v0   ;;  %680 = vrot.lane.b32.xlu0 %v676_v16, %s6041_s6  ;;  %725 = vst [vmem:[#allocation1] ss:$2 sm:$0xff] %v6191_v4 }
  0xd3   : > { %684 = vrot.lane.b32.xlu2 %v6316_v19, %s6041_s6  ;;  %v11226_v19 = vmov 11  }
  0xd4   : > { %v6399_v18 = vpop.permute.xlu1 %403  ;;  %v6413_v16 = vpop.permute.xlu0 %346 }
  0xd5   : > { %v6401_v51 = vpop.permute.xlu2 %496 }
  0xd9   : > { %v6404_v52 = vld.sshfl [vmem:[#allocation1] sm:$0xff pattern:$0x75316420]  ;;  %v6406_v8 = vld.sshfl [vmem:[#allocation1 + $0x8] sm:$0xff pattern:$0x75316420] }
  0xda   : > { %11522 = vst [vmem:[#allocation8_spill] sm:$0xff] %v6404_v52  ;;  %682 = vrot.lane.b32.xlu1 %v677_v24, %s6041_s6  ;;  %722 = vperm.xlu0 %5793, %v6174_v0   ;;  %v6422_v24 = vld.sshfl [vmem:[#allocation1 + $0x10] sm:$0xff pattern:$0x75316420] }
  0xdb   : > { %11523 = vst [vmem:[#allocation9_spill] sm:$0xff] %v6406_v8  ;;  %710 = vperm.xlu2 %5792, %v6276_v54   ;;  %5791 = vset.pattern.permute.xlu1 %v11226_v19  ;;  %v11238_v19 = vmov 13  }
  0xdc   : > { %748 = vst [vmem:[#allocation1] ss:$2 sm:$0xff] %v6191_v4  ;;  %v6415_v9 = vpop.permute.xlu1 %356  ;;  %v6438_v34 = vpop.permute.xlu0 %401 }
  0xdd   : > { %v6417_v17 = vpop.permute.xlu2 %440  ;;  %928 = vst [vmem:[#allocation1 + $0x10] ss:$2 sm:$0xff] %v6186_v2 }
  0xe2   : > { %698 = vperm.xlu1 %5791, %v6174_v0   ;;  %802 = vrot.lane.b32.xlu0 %v796_v59, %s11430_s9 }
  0xe3   : > { %v6424_v3 = vld.sshfl [vmem:[#allocation1] sm:$0xff pattern:$0x75316420]  ;;  %v6426_v12 = vld.sshfl [vmem:[#allocation1 + $0x8] sm:$0xff pattern:$0x75316420]  ;;  %5795 = vset.pattern.permute.xlu2 %v11240_v1  ;;  %5796 = vset.pattern.permute.xlu0 %v11238_v19 }
  0xe4   : > { %11524 = vst [vmem:[#allocation10_spill] sm:$0xff] %v6424_v3  ;;  %v6434_v36 = vpop.permute.xlu1 %444  ;;  %769 = vperm.xlu2 %5795, %v176_v41   ;;  %v11242_v19 = vmov 14   ;;  %v6454_v1 = vpop.permute.xlu0 %387  ;;  %v931_v8 = vld.sshfl [vmem:[#allocation1 + $0x10] sm:$0xff pattern:$0x75316420] }
  0xe5   : > { %11525 = vst [vmem:[#allocation11_spill] sm:$0xff] %v6426_v12  ;;  %v6436_v6 = vpop.permute.xlu2 %522 }
  0xe6   : > { %772 = vst [vmem:[#allocation1] ss:$2 sm:$0xff] %v6191_v4 }
  0xe7   : > { %11526 = vst [vmem:[#allocation12_spill] sm:$0xff] %v6436_v6 }
  0xea   : > { %5794 = vset.pattern.permute.xlu1 %v11529_v47  ;;  %821 = vperm.xlu0 %5796, %v6174_v0  }
  0xeb   : > { %745 = vperm.xlu1 %5794, %v6276_v54  }
  0xec   : > { %v6448_v59 = vpop.permute.xlu1 %397  ;;  %855 = vrot.lane.b32.xlu2 %v849_v32, %s6046_s10  ;;  %v11533_v32 = vmov 5   ;;  %v6467_v29 = vpop.permute.xlu0 %442 }
  0xed   : > { %v6440_v39 = vld.sshfl [vmem:[#allocation1] sm:$0xff pattern:$0x75316420]  ;;  %v6442_v26 = vld.sshfl [vmem:[#allocation1 + $0x8] sm:$0xff pattern:$0x75316420]  ;;  %v6451_v41 = vpop.permute.xlu2 %492  ;;  %5798 = vset.pattern.permute.xlu2 %v11242_v19 }
  0xee   : > { %11527 = vst [vmem:[#allocation13_spill] sm:$0xff] %v6440_v39  ;;  %v11539_v39 = vmov 8  }
  0xef   : > { %11528 = vst [vmem:[#allocation14_spill] sm:$0xff] %v6442_v26 }
  0xf0   : > { %791 = vst [vmem:[#allocation1] ss:$2 sm:$0xff] %v6191_v4 }
  0xf1   : > { %11530 = vst [vmem:[#allocation15_spill] sm:$0xff] %v6451_v41 }
  0xf2   : > { %857 = vrot.lane.b32.xlu0 %v850_v43, %s6046_s10 }
  0xf3   : > { %804 = vrot.lane.b32.xlu1 %v6376_v60, %s11430_s9  ;;  %5801 = vset.pattern.permute.xlu0 %v11531_v37 }
  0xf4   : > { %v6461_v12 = vpop.permute.xlu1 %510  ;;  %5797 = vset.pattern.permute.xlu1 %v11533_v32 }
  0xf5   : > { %11532 = vst [vmem:[#allocation16_spill] sm:$0xff] %v6461_v12  ;;  %v6465_v19 = vpop.permute.xlu2 %563 }
  0xf6   : > { %11534 = vst [vmem:[#allocation17_spill] sm:$0xff] %v6465_v19 }
  0xf7   : > { %v795_v38 = vld.sshfl [vmem:[#allocation1 + $0x8] sm:$0xff pattern:$0x75316420]  ;;  %v794_v47 = vld.sshfl [vmem:[#allocation1] sm:$0xff pattern:$0x75316420] }
  0xf8   : > { %814 = vst [vmem:[#allocation1] ss:$2 sm:$0xff] %v6191_v4  ;;  %800 = vrot.lane.b32.xlu2 %v795_v38, %s11430_s9  ;;  %v932_v38 = vld.sshfl [vmem:[#allocation1 + $0x18] sm:$0xff pattern:$0x75316420] }
  0xf9   : > { %981 = vst [vmem:[#allocation1 + $0x10] ss:$2 sm:$0xff] %v6186_v2 }
  0xfa   : > { %898 = vrot.lane.b32.xlu0 %v891_v20, %s6048_s11  ;;  %v6480_v20 = vpop.permute.xlu0 %428 }
  0xfb   : > { %798 = vrot.lane.b32.xlu1 %v794_v47, %s11430_s9 }
  0xfc   : > { %v6472_v60 = vpop.permute.xlu1 %438 }
  0xfd   : > { %v6475_v43 = vpop.permute.xlu2 %547 }
  0xfe   : > { %11535 = vst [vmem:[#allocation18_spill] sm:$0xff] %v6475_v43 }
  0xff   : > { %v815_v3 = vld.sshfl [vmem:[#allocation1] sm:$0xff pattern:$0x75316420] }
 0x100   : > { %844 = vst [vmem:[#allocation1] ss:$2 sm:$0xff] %v6191_v4  ;;  %816 = vrot.lane.b32.xlu2 %v815_v3, %s11430_s9 }
 0x102   : > { %939 = vrot.lane.b32.xlu0 %v932_v38, %s6049_s14  ;;  %v6496_v45 = vpop.permute.xlu0 %498 }
 0x103   : > { %833 = vperm.xlu1 %5797, %v6276_v54  }
 0x104   : > { %v6482_v47 = vpop.permute.xlu1 %482 }
 0x105   : > { %11536 = vst [vmem:[#allocation19_spill] sm:$0xff] %v6482_v47  ;;  %v6486_v3 = vpop.permute.xlu2 %602 }
 0x106   : > { %11537 = vst [vmem:[#allocation20_spill] sm:$0xff] %v6486_v3 }
 0x107   : > { %v847_v37 = vld.sshfl [vmem:[#allocation1] sm:$0xff pattern:$0x75316420]  ;;  %v848_v32 = vld.sshfl [vmem:[#allocation1 + $0x8] sm:$0xff pattern:$0x75316420] }
 0x108   : > { %867 = vst [vmem:[#allocation1] ss:$2 sm:$0xff] %v6191_v4  ;;  %851 = vrot.lane.b32.xlu2 %v847_v37, %s6046_s10 }
 0x10a   : > { %968 = vperm.xlu0 %5801, %v6276_v54   ;;  %v6509_v19 = vpop.permute.xlu0 %549 }
 0x10b   : > { %853 = vrot.lane.b32.xlu1 %v848_v32, %s6046_s10  ;;  %11542 = vst [vmem:[#allocation24_spill] sm:$0xff] %v6509_v19 }
 0x10c   : > { %v6491_v38 = vpop.permute.xlu1 %494 }
 0x10d   : > { %v6494_v25 = vpop.permute.xlu2 %598 }
 0x10e   : > { %11538 = vst [vmem:[#allocation21_spill] sm:$0xff] %v6494_v25  ;;  %v11248_v25 = vmov 15  }
 0x10f   : > { %v868_v52 = vld.sshfl [vmem:[#allocation1] sm:$0xff pattern:$0x75316420] }
 0x110   : > { %885 = vst [vmem:[#allocation1] ss:$2 sm:$0xff] %v6191_v4  ;;  %874 = vperm.xlu2 %5798, %v6174_v0  }
 0x112   : > { %5805 = vset.pattern.permute.xlu0 %v11539_v39  ;;  %v6518_v39 = vpop.permute.xlu0 %535 }
 0x113   : > { %869 = vrot.lane.b32.xlu1 %v868_v52, %s6046_s10  ;;  %11545 = vst [vmem:[#allocation27_spill] sm:$0xff] %v6518_v39 }
 0x114   : > { %v6502_v3 = vpop.permute.xlu1 %551 }
 0x115   : > { %11540 = vst [vmem:[#allocation22_spill] sm:$0xff] %v6502_v3  ;;  %v6506_v32 = vpop.permute.xlu2 %629  ;;  %v985_v3 = vld.sshfl [vmem:[#allocation1 + $0x18] sm:$0xff pattern:$0x75316420] }
 0x116   : > { %11541 = vst [vmem:[#allocation23_spill] sm:$0xff] %v6506_v32 }
 0x117   : > { %v889_v37 = vld.sshfl [vmem:[#allocation1 + $0x8] sm:$0xff pattern:$0x75316420]  ;;  %v888_v26 = vld.sshfl [vmem:[#allocation1] sm:$0xff pattern:$0x75316420] }
 0x118   : > { %892 = vrot.lane.b32.xlu0 %v888_v26, %s6048_s11  ;;  %908 = vst [vmem:[#allocation1] ss:$2 sm:$0xff] %v6191_v4  ;;  %896 = vrot.lane.b32.xlu2 %v6422_v24, %s6048_s11 }
 0x119   : > { %5799 = vset.pattern.permute.xlu2 %v11248_v25  ;;  %v984_v25 = vld.sshfl [vmem:[#allocation1 + $0x10] sm:$0xff pattern:$0x75316420] }
 0x11a   : > { %1034 = vst [vmem:[#allocation1 + $0x10] ss:$2 sm:$0xff] %v6186_v2  ;;  %v6530_v39 = vpop.permute.xlu0 %604 }
 0x11b   : > { %894 = vrot.lane.b32.xlu1 %v889_v37, %s6048_s11  ;;  %11548 = vst [vmem:[#allocation30_spill] sm:$0xff] %v6530_v39 }
 0x11c   : > { %v6513_v26 = vpop.permute.xlu1 %545 }
 0x11d   : > { %11543 = vst [vmem:[#allocation25_spill] sm:$0xff] %v6513_v26  ;;  %v6516_v52 = vpop.permute.xlu2 %643  ;;  %v11256_v26 = vmov 17  }
 0x11e   : > { %11544 = vst [vmem:[#allocation26_spill] sm:$0xff] %v6516_v52  ;;  %v11254_v52 = vmov 16   ;;  %5802 = vset.pattern.permute.xlu1 %v11256_v26  ;;  %v11554_v26 = vmov 7  }
 0x11f   : > { %v909_v6 = vld.sshfl [vmem:[#allocation1] sm:$0xff pattern:$0x75316420] }
 0x120   : > { %926 = vst [vmem:[#allocation1] ss:$2 sm:$0xff] %v6191_v4  ;;  %915 = vperm.xlu2 %5799, %v6174_v0  }
 0x121   : > { %v1038_v39 = vld.sshfl [vmem:[#allocation1 + $0x18] sm:$0xff pattern:$0x75316420] }
 0x122   : > { %v6540_v19 = vpop.permute.xlu0 %645 }
 0x123   : > { %910 = vrot.lane.b32.xlu1 %v909_v6, %s6048_s11  ;;  %11551 = vst [vmem:[#allocation33_spill] sm:$0xff] %v6540_v19 }
 0x124   : > { %v6523_v43 = vpop.permute.xlu1 %588 }
 0x125   : > { %11546 = vst [vmem:[#allocation28_spill] sm:$0xff] %v6523_v43  ;;  %v6527_v37 = vpop.permute.xlu2 %670 }
 0x126   : > { %11547 = vst [vmem:[#allocation29_spill] sm:$0xff] %v6527_v37 }
 0x127   : > { %v930_v24 = vld.sshfl [vmem:[#allocation1 + $0x8] sm:$0xff pattern:$0x75316420]  ;;  %v929_v32 = vld.sshfl [vmem:[#allocation1] sm:$0xff pattern:$0x75316420] }
 0x128   : > { %933 = vrot.lane.b32.xlu0 %v929_v32, %s6049_s14  ;;  %949 = vst [vmem:[#allocation1] ss:$2 sm:$0xff] %v6191_v4  ;;  %937 = vrot.lane.b32.xlu2 %v931_v8, %s6049_s14 }
 0x129   : > { %5800 = vset.pattern.permute.xlu2 %v11254_v52 }
 0x12b   : > { %935 = vrot.lane.b32.xlu1 %v930_v24, %s6049_s14 }
 0x12c   : > { %v6535_v6 = vpop.permute.xlu1 %600 }
 0x12d   : > { %11549 = vst [vmem:[#allocation31_spill] sm:$0xff] %v6535_v6  ;;  %v6538_v8 = vpop.permute.xlu2 %684 }
 0x12e   : > { %11550 = vst [vmem:[#allocation32_spill] sm:$0xff] %v6538_v8  ;;  %v1037_v8 = vld.sshfl [vmem:[#allocation1 + $0x10] sm:$0xff pattern:$0x75316420] }
 0x12f   : > { %v950_v32 = vld.sshfl [vmem:[#allocation1] sm:$0xff pattern:$0x75316420]  ;;  %1087 = vst [vmem:[#allocation1 + $0x10] ss:$2 sm:$0xff] %v6186_v2 }
 0x130   : > { %979 = vst [vmem:[#allocation1] ss:$2 sm:$0xff] %v6191_v4  ;;  %956 = vperm.xlu2 %5800, %v6174_v0  }
 0x133   : > { %951 = vrot.lane.b32.xlu1 %v950_v32, %s6049_s14 }
 0x134   : > { %v6544_v52 = vpop.permute.xlu1 %616  ;;  %v6554_v32 = vpop.permute.xlu0 %639 }
 0x135   : > { %11552 = vst [vmem:[#allocation34_spill] sm:$0xff] %v6544_v52  ;;  %v6547_v24 = vpop.permute.xlu2 %710  ;;  %v11567_v52 = vmov 0  }
 0x136   : > { %11553 = vst [vmem:[#allocation35_spill] sm:$0xff] %v6547_v24 }
 0x137   : > { %v982_v37 = vld.sshfl [vmem:[#allocation1] sm:$0xff pattern:$0x75316420]  ;;  %v983_v43 = vld.sshfl [vmem:[#allocation1 + $0x8] sm:$0xff pattern:$0x75316420] }
 0x138   : > { %1002 = vst [vmem:[#allocation1] ss:$2 sm:$0xff] %v6191_v4  ;;  %988 = vrot.lane.b32.xlu2 %v983_v43, %s6053_s15 }
 0x139   : > { %5803 = vset.pattern.permute.xlu2 %v11554_v26  ;;  %11555 = vst [vmem:[#allocation36_spill] sm:$0xff] %v6554_v32 }
 0x13b   : > { %986 = vrot.lane.b32.xlu1 %v982_v37, %s6053_s15 }
 0x13c   : > { %v6556_v19 = vpop.permute.xlu1 %641 }
 0x13d   : > { %11556 = vst [vmem:[#allocation37_spill] sm:$0xff] %v6556_v19 }
 0x13e   : > { %v6559_v43 = vpop.permute.xlu2 %769 }
 0x13f   : > { %v1003_v6 = vld.sshfl [vmem:[#allocation1] sm:$0xff pattern:$0x75316420]  ;;  %11557 = vst [vmem:[#allocation38_spill] sm:$0xff] %v6559_v43 }
 0x140   : > { %1004 = vrot.lane.b32.xlu0 %v1003_v6, %s6053_s15  ;;  %1032 = vst [vmem:[#allocation1] ss:$2 sm:$0xff] %v6191_v4  ;;  %992 = vrot.lane.b32.xlu2 %v985_v3, %s6053_s15  ;;  %v6567_v6 = vpop.permute.xlu0 %686 }
 0x141   : > { %11559 = vst [vmem:[#allocation40_spill] sm:$0xff] %v6567_v6  ;;  %v1090_v6 = vld.sshfl [vmem:[#allocation1 + $0x10] sm:$0xff pattern:$0x75316420] }
 0x143   : > { %990 = vrot.lane.b32.xlu1 %v984_v25, %s6053_s15  ;;  %v11266_v25 = vmov 18  }
 0x144   : > { %v6564_v37 = vpop.permute.xlu1 %657 }
 0x145   : > { %11558 = vst [vmem:[#allocation39_spill] sm:$0xff] %v6564_v37 }
 0x146   : > { %v6569_v32 = vpop.permute.xlu2 %855 }
 0x147   : > { %v1035_v26 = vld.sshfl [vmem:[#allocation1] sm:$0xff pattern:$0x75316420]  ;;  %v1036_v24 = vld.sshfl [vmem:[#allocation1 + $0x8] sm:$0xff pattern:$0x75316420] }
 0x148   : > { %1039 = vrot.lane.b32.xlu0 %v1035_v26, %s6054_s17  ;;  %1055 = vst [vmem:[#allocation1] ss:$2 sm:$0xff] %v6191_v4  ;;  %1021 = vperm.xlu2 %5803, %v6276_v54   ;;  %v6578_v43 = vpop.permute.xlu0 %680 }
 0x149   : > { %11560 = vst [vmem:[#allocation41_spill] sm:$0xff] %v6569_v32 }
 0x14a   : > { %11562 = vst [vmem:[#allocation43_spill] sm:$0xff] %v6578_v43 }
 0x14b   : > { %1009 = vperm.xlu1 %5802, %v6174_v0  }
 0x14c   : > { %v6574_v26 = vpop.permute.xlu1 %682 }
 0x14d   : > { %11561 = vst [vmem:[#allocation42_spill] sm:$0xff] %v6574_v26 }
 0x14f   : > { %v1056_v3 = vld.sshfl [vmem:[#allocation1] sm:$0xff pattern:$0x75316420] }
 0x150   : > { %1045 = vrot.lane.b32.xlu0 %v1038_v39, %s6054_s17  ;;  %1085 = vst [vmem:[#allocation1] ss:$2 sm:$0xff] %v6191_v4  ;;  %1043 = vrot.lane.b32.xlu2 %v1037_v8, %s6054_s17  ;;  %v1091_v39 = vld.sshfl [vmem:[#allocation1 + $0x18] sm:$0xff pattern:$0x75316420]  ;;  %v6590_v43 = vpop.permute.xlu0 %722 }
 0x151   : > { %5804 = vset.pattern.permute.xlu2 %v11266_v25  ;;  %1128 = vst [vmem:[#allocation1 + $0x10] ss:$2 sm:$0xff] %v6186_v2  ;;  %v11273_v25 = vmov 19  }
 0x152   : > { %v6580_v37 = vpop.permute.xlu2 %800  ;;  %11565 = vst [vmem:[#allocation46_spill] sm:$0xff] %v6590_v43 }
 0x153   : > { %11563 = vst [vmem:[#allocation44_spill] sm:$0xff] %v6580_v37  ;;  %1041 = vrot.lane.b32.xlu1 %v1036_v24, %s6054_s17 }
 0x154   : > { %v6586_v8 = vpop.permute.xlu1 %698  ;;  %5807 = vset.pattern.permute.xlu1 %v11273_v25 }
 0x155   : > { %11564 = vst [vmem:[#allocation45_spill] sm:$0xff] %v6586_v8 }
 0x157   : > { %v1088_v32 = vld.sshfl [vmem:[#allocation1] sm:$0xff pattern:$0x75316420]  ;;  %v1089_v19 = vld.sshfl [vmem:[#allocation1 + $0x8] sm:$0xff pattern:$0x75316420] }
 0x158   : > { %1074 = vperm.xlu0 %5805, %v6276_v54   ;;  %1108 = vst [vmem:[#allocation1] ss:$2 sm:$0xff] %v6191_v4  ;;  %1062 = vperm.xlu2 %5804, %v6174_v0   ;;  %v1131_v24 = vld.sshfl [vmem:[#allocation1 + $0x10] sm:$0xff pattern:$0x75316420] }
 0x159   : > { %v1132_v8 = vld.sshfl [vmem:[#allocation1 + $0x18] sm:$0xff pattern:$0x75316420] }
 0x15a   : > { %v6592_v26 = vpop.permute.xlu2 %816  ;;  %1169 = vst [vmem:[#allocation1 + $0x10] ss:$2 sm:$0xff] %v6186_v2 }
 0x15b   : > { %11566 = vst [vmem:[#allocation47_spill] sm:$0xff] %v6592_v26  ;;  %1057 = vrot.lane.b32.xlu1 %v1056_v3, %s6054_s17  ;;  %v6606_v3 = vpop.permute.xlu0 %802 }
 0x15c   : > { %11569 = vst [vmem:[#allocation49_spill] sm:$0xff] %v6606_v3 }
 0x15d   : > { %v6600_v25 = vpop.permute.xlu1 %745 }
 0x15e   : > { %11568 = vst [vmem:[#allocation48_spill] sm:$0xff] %v6600_v25 }
 0x15f   : > { %v1109_v37 = vld.sshfl [vmem:[#allocation1] sm:$0xff pattern:$0x75316420] }
 0x160   : > { %5806 = vset.pattern.permute.xlu0 %v11567_v52  ;;  %1126 = vst [vmem:[#allocation1] ss:$2 sm:$0xff] %v6191_v4  ;;  %1094 = vrot.lane.b32.xlu2 %v1089_v19, %s11313_s18 }
 0x161   : > { %469 = vperm.xlu0 %5806, %v6276_v54   ;;  %5813 = vset.pattern.permute.xlu2 %v11567_v52  ;;  %v1172_v25 = vld.sshfl [vmem:[#allocation1 + $0x10] sm:$0xff pattern:$0x75316420]  ;;  %v1173_v12 = vld.sshfl [vmem:[#allocation1 + $0x18] sm:$0xff pattern:$0x75316420] }
 0x162   : > { %v6608_v47 = vpop.permute.xlu2 %851  ;;  %1210 = vst [vmem:[#allocation1 + $0x10] ss:$2 sm:$0xff] %v6186_v2 }
 0x163   : > { %1092 = vrot.lane.b32.xlu1 %v1088_v32, %s11313_s18  ;;  %11570 = vst [vmem:[#allocation50_spill] sm:$0xff] %v6608_v47 }
 0x165   : > { %v6611_v19 = vpop.permute.xlu1 %804 }
 0x166   : > { %11571 = vst [vmem:[#allocation51_spill] sm:$0xff] %v6611_v19 }
 0x167   : > { %v1130_v26 = vld.sshfl [vmem:[#allocation1 + $0x8] sm:$0xff pattern:$0x75316420]  ;;  %v1129_v43 = vld.sshfl [vmem:[#allocation1] sm:$0xff pattern:$0x75316420] }
 0x168   : > { %1149 = vst [vmem:[#allocation1] ss:$2 sm:$0xff] %v6191_v4  ;;  %1098 = vrot.lane.b32.xlu2 %v1091_v39, %s11313_s18 }
 0x169   : > { %1110 = vrot.lane.b32.xlu0 %v1109_v37, %s11313_s18  ;;  %v6620_v37 = vpop.permute.xlu0 %821 }
 0x16a   : > { %11573 = vst [vmem:[#allocation53_spill] sm:$0xff] %v6620_v37  ;;  %v6622_v39 = vpop.permute.xlu2 %874  ;;  %v1213_v37 = vld.sshfl [vmem:[#allocation1 + $0x10] sm:$0xff pattern:$0x75316420] }
 0x16b   : > { %1096 = vrot.lane.b32.xlu1 %v1090_v6, %s11313_s18  ;;  %11574 = vst [vmem:[#allocation54_spill] sm:$0xff] %v6622_v39  ;;  %v1214_v39 = vld.sshfl [vmem:[#allocation1 + $0x18] sm:$0xff pattern:$0x75316420]  ;;  %s11840_s18 = smov 87  }
 0x16c   : > { %1251 = vst [vmem:[#allocation1 + $0x10] ss:$2 sm:$0xff] %v6186_v2 }
 0x16d   : > { %v6618_v32 = vpop.permute.xlu1 %798 }
 0x16e   : > { %11572 = vst [vmem:[#allocation52_spill] sm:$0xff] %v6618_v32 }
 0x16f   : > { %v1150_v41 = vld.sshfl [vmem:[#allocation1] sm:$0xff pattern:$0x75316420] }
 0x170   : > { %1167 = vst [vmem:[#allocation1] ss:$2 sm:$0xff] %v6191_v4  ;;  %1133 = vrot.lane.b32.xlu2 %v1129_v43, %s11308_s19 }
 0x171   : > { %1135 = vrot.lane.b32.xlu0 %v1130_v26, %s11308_s19  ;;  %v6630_v26 = vpop.permute.xlu0 %857 }
 0x172   : > { %11576 = vst [vmem:[#allocation56_spill] sm:$0xff] %v6630_v26  ;;  %v6632_v43 = vpop.permute.xlu2 %896 }
 0x173   : > { %1115 = vperm.xlu1 %5807, %v6174_v0   ;;  %11577 = vst [vmem:[#allocation57_spill] sm:$0xff] %v6632_v43 }
 0x175   : > { %v6628_v6 = vpop.permute.xlu1 %833 }
 0x176   : > { %11575 = vst [vmem:[#allocation55_spill] sm:$0xff] %v6628_v6 }
 0x177   : > { %v1171_v47 = vld.sshfl [vmem:[#allocation1 + $0x8] sm:$0xff pattern:$0x75316420]  ;;  %v1170_v3 = vld.sshfl [vmem:[#allocation1] sm:$0xff pattern:$0x75316420] }
 0x178   : > { %1190 = vst [vmem:[#allocation1] ss:$2 sm:$0xff] %v6191_v4  ;;  %1139 = vrot.lane.b32.xlu2 %v1132_v8, %s11308_s19 }
 0x179   : > { %1151 = vrot.lane.b32.xlu0 %v1150_v41, %s11308_s19  ;;  %v11286_v41 = vmov 20   ;;  %v6642_v6 = vpop.permute.xlu0 %898 }
 0x17a   : > { %11579 = vst [vmem:[#allocation59_spill] sm:$0xff] %v6642_v6  ;;  %v6644_v19 = vpop.permute.xlu2 %915 }
 0x17b   : > { %1137 = vrot.lane.b32.xlu1 %v1131_v24, %s11308_s19  ;;  %11580 = vst [vmem:[#allocation60_spill] sm:$0xff] %v6644_v19 }
 0x17c   : > { %5808 = vset.pattern.permute.xlu1 %v11286_v41  ;;  %v1254_v41 = vld.sshfl [vmem:[#allocation1 + $0x10] sm:$0xff pattern:$0x75316420] }
 0x17d   : > { %v6640_v8 = vpop.permute.xlu1 %853 }
 0x17e   : > { %11578 = vst [vmem:[#allocation58_spill] sm:$0xff] %v6640_v8  ;;  %v1255_v8 = vld.sshfl [vmem:[#allocation1 + $0x18] sm:$0xff pattern:$0x75316420] }
 0x17f   : > { %v1191_v32 = vld.sshfl [vmem:[#allocation1] sm:$0xff pattern:$0x75316420]  ;;  %1292 = vst [vmem:[#allocation1 + $0x10] ss:$2 sm:$0xff] %v6186_v2 }
 0x180   : > { %1208 = vst [vmem:[#allocation1] ss:$2 sm:$0xff] %v6191_v4  ;;  %1174 = vrot.lane.b32.xlu2 %v1170_v3, %s11303_s28 }
 0x181   : > { %1176 = vrot.lane.b32.xlu0 %v1171_v47, %s11303_s28  ;;  %v6652_v24 = vpop.permute.xlu0 %939 }
 0x182   : > { %11582 = vst [vmem:[#allocation62_spill] sm:$0xff] %v6652_v24 }
 0x183   : > { %1156 = vperm.xlu1 %5808, %v6174_v0   ;;  %v6658_v0 = vpop.permute.xlu2 %937 }
 0x185   : > { %v6650_v47 = vpop.permute.xlu1 %869 }
 0x186   : > { %11581 = vst [vmem:[#allocation61_spill] sm:$0xff] %v6650_v47 }
 0x187   : > { %v1212_v43 = vld.sshfl [vmem:[#allocation1 + $0x8] sm:$0xff pattern:$0x75316420]  ;;  %v1211_v26 = vld.sshfl [vmem:[#allocation1] sm:$0xff pattern:$0x75316420] }
 0x188   : > { %1231 = vst [vmem:[#allocation1] ss:$2 sm:$0xff] %v6191_v4  ;;  %1180 = vrot.lane.b32.xlu2 %v1173_v12, %s11303_s28 }
 0x189   : > { %1192 = vrot.lane.b32.xlu0 %v1191_v32, %s11303_s28  ;;  %v11292_v32 = vmov 21   ;;  %v6664_v24 = vpop.permute.xlu0 %968 }
 0x18a   : > { %11584 = vst [vmem:[#allocation64_spill] sm:$0xff] %v6664_v24  ;;  %v11296_v24 = vmov 22  }
 0x18b   : > { %1178 = vrot.lane.b32.xlu1 %v1172_v25, %s11303_s28  ;;  %v6007_v25 = vld [vmem:[%s11212_s2 + $0x40] sm:$0xf]  ;;  %s11835_s28 = smov 88  }
 0x18c   : > { %5809 = vset.pattern.permute.xlu1 %v11292_v32 }
 0x18d   : > { %v6662_v12 = vpop.permute.xlu1 %894 }
 0x18e   : > { %11583 = vst [vmem:[#allocation63_spill] sm:$0xff] %v6662_v12 }
 0x18f   : > { %v1232_v3 = vld.sshfl [vmem:[#allocation1] sm:$0xff pattern:$0x75316420] }
 0x190   : > { %1249 = vst [vmem:[#allocation1] ss:$2 sm:$0xff] %v6191_v4  ;;  %1215 = vrot.lane.b32.xlu2 %v1211_v26, %s11301_s29  ;;  %v6674_v26 = vpop.permute.xlu2 %956 }
 0x191   : > { %1217 = vrot.lane.b32.xlu0 %v1212_v43, %s11301_s29  ;;  %v6679_v32 = vpop.permute.xlu0 %892 }
 0x192   : > { %11586 = vst [vmem:[#allocation66_spill] sm:$0xff] %v6679_v32  ;;  %v11604_v32 = vmov 2  }
 0x193   : > { %1197 = vperm.xlu1 %5809, %v6007_v25  }
 0x195   : > { %v6672_v2 = vpop.permute.xlu1 %910 }
 0x196   : > { %11585 = vst [vmem:[#allocation65_spill] sm:$0xff] %v6672_v2 }
 0x197   : > { %v1253_v47 = vld.sshfl [vmem:[#allocation1 + $0x8] sm:$0xff pattern:$0x75316420]  ;;  %v1252_v19 = vld.sshfl [vmem:[#allocation1] sm:$0xff pattern:$0x75316420] }
 0x198   : > { %1272 = vst [vmem:[#allocation1] ss:$2 sm:$0xff] %v6191_v4  ;;  %1221 = vrot.lane.b32.xlu2 %v1214_v39, %s11301_s29 }
 0x199   : > { %1233 = vrot.lane.b32.xlu0 %v1232_v3, %s11301_s29  ;;  %v6685_v3 = vpop.permute.xlu2 %988 }
 0x19a   : > { %11588 = vst [vmem:[#allocation68_spill] sm:$0xff] %v6685_v3  ;;  %v11305_v3 = vmov 23  }
 0x19b   : > { %1219 = vrot.lane.b32.xlu1 %v1213_v37, %s11301_s29  ;;  %v6689_v37 = vpop.permute.xlu0 %933  ;;  %s11845_s29 = smov 86  }
 0x19c   : > { %5810 = vset.pattern.permute.xlu1 %v11296_v24  ;;  %11589 = vst [vmem:[#allocation69_spill] sm:$0xff] %v6689_v37 }
 0x19d   : > { %v6683_v39 = vpop.permute.xlu1 %935 }
 0x19e   : > { %11587 = vst [vmem:[#allocation67_spill] sm:$0xff] %v6683_v39 }
 0x19f   : > { %v1273_v43 = vld.sshfl [vmem:[#allocation1] sm:$0xff pattern:$0x75316420] }
 0x1a0   : > { %1290 = vst [vmem:[#allocation1] ss:$2 sm:$0xff] %v6191_v4  ;;  %1256 = vrot.lane.b32.xlu2 %v1252_v19, %s11299_s16 }
 0x1a1   : > { %1258 = vrot.lane.b32.xlu0 %v1253_v47, %s11299_s16  ;;  %v6694_v24 = vpop.permute.xlu2 %992 }
 0x1a2   : > { %11591 = vst [vmem:[#allocation71_spill] sm:$0xff] %v6694_v24 }
 0x1a3   : > { %1238 = vperm.xlu1 %5810, %v6007_v25  }
 0x1a5   : > { %v6692_v47 = vpop.permute.xlu1 %951 }
 0x1a6   : > { %11590 = vst [vmem:[#allocation70_spill] sm:$0xff] %v6692_v47 }
 0x1a7   : > { %v1294_v2 = vld.sshfl [vmem:[#allocation1 + $0x8] sm:$0xff pattern:$0x75316420]  ;;  %v1293_v12 = vld.sshfl [vmem:[#allocation1] sm:$0xff pattern:$0x75316420] }
 0x1a8   : > { %1313 = vst [vmem:[#allocation1] ss:$2 sm:$0xff] %v6191_v4  ;;  %1262 = vrot.lane.b32.xlu2 %v1255_v8, %s11299_s16  ;;  %v1296_v8 = vld.sshfl [vmem:[#allocation1 + $0x18] sm:$0xff pattern:$0x75316420] }
 0x1a9   : > { %1274 = vrot.lane.b32.xlu0 %v1273_v43, %s11299_s16  ;;  %v6704_v37 = vpop.permute.xlu2 %1021 }
 0x1aa   : > { %11594 = vst [vmem:[#allocation74_spill] sm:$0xff] %v6704_v37  ;;  %v11315_v37 = vmov 24  }
 0x1ab   : > { %1260 = vrot.lane.b32.xlu1 %v1254_v41, %s11299_s16  ;;  %s11820_s16 = smov 106  }
 0x1ac   : > { %5811 = vset.pattern.permute.xlu1 %v11305_v3  ;;  %v1333_v3 = vld [vmem:[%s11212_s2 + $0x18] sm:$0xf] }
 0x1ad   : > { %v6702_v4 = vpop.permute.xlu1 %986 }
 0x1ae   : > { %11593 = vst [vmem:[#allocation73_spill] sm:$0xff] %v6702_v4  ;;  %v1412_v4 = vld [vmem:[%s11212_s2 + $0x38] sm:$0xf] }
 0x1af   : > { %v1314_v43 = vld.sshfl [vmem:[#allocation1] sm:$0xff pattern:$0x75316420] }
 0x1b0   : > { %1297 = vrot.lane.b32.xlu2 %v1293_v12, %s11311_s7  ;;  %v1331_v12 = vld [vmem:[%s11212_s2 + $0x8] ss:$0 sm:$0xff] }
 0x1b1   : > { %1299 = vrot.lane.b32.xlu0 %v1294_v2, %s11311_s7  ;;  %v6719_v47 = vpop.permute.xlu2 %1043 }
 0x1b2   : > { %v6698_v19 = vpop.permute.xlu0 %1004 }
 0x1b3   : > { %11592 = vst [vmem:[#allocation72_spill] sm:$0xff] %v6698_v19  ;;  %1279 = vperm.xlu1 %5811, %v6007_v25   ;;  %v1295_v19 = vld.sshfl [vmem:[#allocation1 + $0x10] sm:$0xff pattern:$0x75316420] }
 0x1b5   : > { %v6710_v2 = vpop.permute.xlu1 %990 }
 0x1b8   : > { %1303 = vrot.lane.b32.xlu2 %v1296_v8, %s11311_s7 }
 0x1b9   : > { %1315 = vrot.lane.b32.xlu0 %v1314_v43, %s11311_s7  ;;  %v6736_v39 = vpop.permute.xlu2 %1062 }
 0x1ba   : > { %v6707_v41 = vpop.permute.xlu0 %1039  ;;  %11600 = vst [vmem:[#allocation80_spill] sm:$0xff] %v6736_v39  ;;  %v1494_v39 = vld [vmem:[%s11212_s2 + $0x50] sm:$0xf] }
 0x1bb   : > { %11595 = vst [vmem:[#allocation75_spill] sm:$0xff] %v6707_v41  ;;  %1301 = vrot.lane.b32.xlu1 %v1295_v19, %s11311_s7  ;;  %v1495_v41 = vld [vmem:[%s11212_s2 + $0x58] sm:$0xf]  ;;  %s11830_s7 = smov 89  }
 0x1bc   : > { %5812 = vset.pattern.permute.xlu1 %v11315_v37  ;;  %v1332_v37 = vld [vmem:[%s11212_s2 + $0x10] sm:$0xf] }
 0x1bd   : > { %v6724_v8 = vpop.permute.xlu1 %1009 }
 0x1be   : > { %11597 = vst [vmem:[#allocation77_spill] sm:$0xff] %v6724_v8 }
 0x1c0   : > { %1336 = vperm.xlu2 %5813, %v1333_v3   ;;  %v1590_v3 = vld [vmem:[%s11212_s2 + $0x68] sm:$0xf] }
 0x1c1   : > { %1382 = vperm.xlu0 %5806, %v1331_v12  }
 0x1c2   : > { %v6721_v43 = vpop.permute.xlu0 %1045 }
 0x1c3   : > { %11596 = vst [vmem:[#allocation76_spill] sm:$0xff] %v6721_v43  ;;  %1320 = vperm.xlu1 %5812, %v6007_v25   ;;  %v1411_v25 = vld [vmem:[%s11212_s2 + $0x30] sm:$0xf] }
 0x1c5   : > { %v6734_v12 = vpop.permute.xlu1 %1041 }
 0x1c6   : > { %11599 = vst [vmem:[#allocation79_spill] sm:$0xff] %v6734_v12  ;;  %v1410_v12 = vld [vmem:[%s11212_s2 + $0x28] ss:$0 sm:$0xff] }
 0x1c8   : > { %1415 = vperm.xlu2 %5813, %v1412_v4  }
 0x1c9   : > { %1498 = vperm.xlu0 %5806, %v1495_v41  }
 0x1ca   : > { %v6732_v19 = vpop.permute.xlu0 %1074 }
 0x1cb   : > { %11598 = vst [vmem:[#allocation78_spill] sm:$0xff] %v6732_v19  ;;  %5814 = vset.pattern.permute.xlu1 %v11567_v52  ;;  %v6752_v19 = vpop.permute.xlu2 %1094  ;;  %v1493_v52 = vld [vmem:[%s11212_s2 + $0x48] ss:$0 sm:$0xff] }
 0x1cc   : > { %1395 = vperm.xlu1 %5814, %v1332_v37   ;;  %11603 = vst [vmem:[#allocation83_spill] sm:$0xff] %v6752_v19 }
 0x1cd   : > { %v6750_v41 = vpop.permute.xlu1 %1057 }
 0x1ce   : > { %11602 = vst [vmem:[#allocation82_spill] sm:$0xff] %v6750_v41  ;;  %v1589_v41 = vld [vmem:[%s11212_s2 + $0x60] sm:$0xf] }
 0x1d0   : > { %1474 = vperm.xlu2 %5813, %v1411_v25  }
 0x1d1   : > { %1593 = vperm.xlu0 %5806, %v1590_v3  }
 0x1d3   : > { %v6748_v4 = vpop.permute.xlu0 %469  ;;  %v6766_v25 = vpop.permute.xlu2 %1098 }
 0x1d4   : > { %11601 = vst [vmem:[#allocation81_spill] sm:$0xff] %v6748_v4  ;;  %1461 = vperm.xlu1 %5814, %v1410_v12  }
 0x1d5   : > { %v6762_v37 = vpop.permute.xlu1 %1092  ;;  %11607 = vst [vmem:[#allocation86_spill] sm:$0xff] %v6766_v25 }
 0x1d6   : > { %11605 = vst [vmem:[#allocation84_spill] sm:$0xff] %v6762_v37 }
 0x1d8   : > { %1557 = vperm.xlu2 %5813, %v1494_v39  }
 0x1d9   : > { %5815 = vset.pattern.permute.xlu0 %v11604_v32 }
 0x1da   : > { %575 = vperm.xlu0 %5815, %v6276_v54  }
 0x1db   : > { %v6764_v3 = vpop.permute.xlu0 %1110  ;;  %v6778_v54 = vpop.permute.xlu2 %1133 }
 0x1dc   : > { %11606 = vst [vmem:[#allocation85_spill] sm:$0xff] %v6764_v3  ;;  %1544 = vperm.xlu1 %5814, %v1493_v52   ;;  %v11611_v3 = vmov 1  }
 0x1dd   : > { %v6774_v32 = vpop.permute.xlu1 %1096  ;;  %11610 = vst [vmem:[#allocation89_spill] sm:$0xff] %v6778_v54 }
 0x1de   : > { %11608 = vst [vmem:[#allocation87_spill] sm:$0xff] %v6774_v32 }
 0x1e0   : > { %1620 = vperm.xlu2 %5813, %v1589_v41  }
 0x1e3   : > { %v6776_v12 = vpop.permute.xlu0 %1135  ;;  %v6785_v19 = vpop.permute.xlu2 %1139 }
 0x1e4   : > { %11609 = vst [vmem:[#allocation88_spill] sm:$0xff] %v6776_v12  ;;  %5816 = vset.pattern.permute.xlu1 %v11611_v3 }
 0x1e5   : > { %v6781_v39 = vpop.permute.xlu1 %1115  ;;  %11614 = vst [vmem:[#allocation92_spill] sm:$0xff] %v6785_v19 }
 0x1e6   : > { %11612 = vst [vmem:[#allocation90_spill] sm:$0xff] %v6781_v39 }
 0x1eb   : > { %v6783_v37 = vpop.permute.xlu0 %1151  ;;  %v6795_v12 = vpop.permute.xlu2 %1174 }
 0x1ec   : > { %11613 = vst [vmem:[#allocation91_spill] sm:$0xff] %v6783_v37  ;;  %v202_v37 = vsel %vm11427_vm0, %v6282_v56, %v6257_v46 }
 0x1ed   : > { %v6787_v4 = vpop.permute.xlu1 %1137  ;;  %11618 = vst [vmem:[#allocation96_spill] sm:$0xff] %v6795_v12  ;;  %v244_v12 = vsel %vm11426_vm1, %v6306_v13, %v6304_v11  ;;  %v216_v46 = vmul.f32 %v6247_v42, %v202_v37  ;;  %v284_v11 = vsel %vm11428_vm2, %v6309_v14, %v6332_v27  ;;  %v200_v37 = vsel %vm11427_vm0, %v6295_v5, %v6293_v63 }
 0x1f3   : > { %v6789_v25 = vpop.permute.xlu0 %1176  ;;  %v6816_v54 = vpop.permute.xlu2 %1180 }
 0x1f4   : > { %11615 = vst [vmem:[#allocation93_spill] sm:$0xff] %v6789_v25  ;;  %v201_v25 = vsel %vm11427_vm0, %v6293_v63, %v6282_v56  ;;  %v297_v63 = vmul.f32 %v6271_v53, %v284_v11 }
 0x1f5   : > { %v6791_v52 = vpop.permute.xlu1 %1156  ;;  %11621 = vst [vmem:[#allocation99_spill] sm:$0xff] %v6816_v54 }
 0x1f6   : > { %11616 = vst [vmem:[#allocation94_spill] sm:$0xff] %v6791_v52  ;;  %v215_v52 = vmul.f32 %v6247_v42, %v201_v25  ;;  %v242_v25 = vsel %vm11426_vm1, %v6334_v28, %v6286_v58 }
 0x1fb   : > { %v6793_v32 = vpop.permute.xlu0 %1192 }
 0x1fc   : > { %11617 = vst [vmem:[#allocation95_spill] sm:$0xff] %v6793_v32  ;;  %v243_v32 = vsel %vm11426_vm1, %v6286_v58, %v6306_v13  ;;  %v285_v13 = vsel %vm11428_vm2, %v6332_v27, %v6318_v21  ;;  %v326_v21 = vsel %vm323_vm3, %v6368_v50, %v6344_v33  ;;  %v283_v58 = vsel %vm11428_vm2, %v6359_v44, %v6309_v14 }
 0x1fd   : > { %v6797_v41 = vpop.permute.xlu1 %1178  ;;  %v256_v56 = vmul.f32 %v6264_v48, %v243_v32  ;;  %v214_v33 = vmul.f32 %v6247_v42, %v200_v37  ;;  %v366_v14 = vsel %vm11357_vm4, %v6365_v49, %v6392_v31 }
 0x1fe   : > { %11619 = vst [vmem:[#allocation97_spill] sm:$0xff] %v6797_v41  ;;  %v257_v41 = vmul.f32 %v6264_v48, %v244_v12  ;;  %v325_v12 = vsel %vm323_vm3, %v6338_v30, %v6368_v50  ;;  %v379_v37 = vmul.f32 %v6324_v23, %v366_v14 }
 0x1ff   : > { %v260_v50 = vadd.f32 %v256_v56, %v215_v52  ;;  %v338_v11 = vmul.f32 %v6298_v7, %v325_v12 }
 0x200   : > { %v261_v54 = vadd.f32 %v257_v41, %v216_v46 }
 0x201   : > { %v301_v52 = vadd.f32 %v297_v63, %v260_v50  ;;  %v372_v63 = vsel %vm11357_vm4, %v6413_v16, %v6415_v9 }
 0x202   : > { %v377_v50 = vmul.f32 %v6324_v23, %v372_v63 }
 0x203   : > { %v6799_v3 = vpop.permute.xlu0 %1217 }
 0x204   : > { %11620 = vst [vmem:[#allocation98_spill] sm:$0xff] %v6799_v3  ;;  %v207_v3 = vsel %vm11427_vm0, %v6284_v57, %v6295_v5  ;;  %v249_v57 = vsel %vm11426_vm1, %v6320_v22, %v6334_v28  ;;  %v290_v22 = vsel %vm11428_vm2, %v6346_v35, %v6359_v44  ;;  %v298_v5 = vmul.f32 %v6271_v53, %v285_v13 }
 0x205   : > { %v213_v32 = vmul.f32 %v6247_v42, %v207_v3  ;;  %v254_v27 = vmul.f32 %v6264_v48, %v249_v57  ;;  %v6853_v28 = vpop.permute.xlu1 %1197  ;;  %v255_v35 = vmul.f32 %v6264_v48, %v242_v25  ;;  %v339_v13 = vmul.f32 %v6298_v7, %v326_v21 }
 0x206   : > { %v295_v57 = vmul.f32 %v6271_v53, %v290_v22  ;;  %v296_v44 = vmul.f32 %v6271_v53, %v283_v58  ;;  %v367_v42 = vsel %vm11357_vm4, %v6392_v31, %v6374_v55  ;;  %v331_v48 = vsel %vm323_vm3, %v6381_v62, %v6388_v10  ;;  %v6876_v53 = vpop.permute.xlu2 %1215 }
 0x207   : > { %v302_v41 = vadd.f32 %v298_v5, %v261_v54  ;;  %v258_v46 = vadd.f32 %v254_v27, %v213_v32  ;;  %v259_v56 = vadd.f32 %v255_v35, %v214_v33  ;;  %v324_v25 = vsel %vm323_vm3, %v6388_v10, %v6338_v30  ;;  %11623 = vst [vmem:[#allocation101_spill] sm:$0xff] %v6876_v53 }
 0x208   : > { %v380_v55 = vmul.f32 %v6324_v23, %v367_v42  ;;  %v336_v31 = vmul.f32 %v6298_v7, %v331_v48  ;;  %v407_v62 = vsel %vm11354_vm5, %v6390_v15, %v6438_v34  ;;  %v408_v54 = vsel %vm11354_vm5, %v6438_v34, %v6399_v18 }
 0x209   : > { %v342_v32 = vadd.f32 %v338_v11, %v301_v52  ;;  %v343_v12 = vadd.f32 %v339_v13, %v302_v41  ;;  %v299_v21 = vadd.f32 %v295_v57, %v258_v46  ;;  %v300_v22 = vadd.f32 %v296_v44, %v259_v56  ;;  %v11626_v44 = vld [vmem:[#allocation16_spill] sm:$0xff] }
 0x20a   : > { %v337_v30 = vmul.f32 %v6298_v7, %v324_v25  ;;  %v365_v10 = vsel %vm11357_vm4, %v6415_v9, %v6365_v49  ;;  %v420_v34 = vmul.f32 %v6352_v40, %v407_v62  ;;  %v421_v18 = vmul.f32 %v6352_v40, %v408_v54  ;;  %v11629_v25 = vld [vmem:[#allocation19_spill] sm:$0xff] }
 0x20b   : > { %v6855_v3 = vpop.permute.xlu0 %1233  ;;  %v6902_v7 = vsel %vm11352_vm6, %v6417_v17, %v6467_v29  ;;  %v6907_v49 = vsel %vm11352_vm6, %v6467_v29, %v6434_v36  ;;  %v383_v9 = vadd.f32 %v379_v37, %v342_v32  ;;  %v384_v16 = vadd.f32 %v380_v55, %v343_v12  ;;  %v11628_v37 = vld [vmem:[#allocation15_spill] sm:$0xff]  ;;  %v11631_v32 = vld [vmem:[#allocation24_spill] sm:$0xff]  ;;  %v11632_v12 = vld [vmem:[#allocation18_spill] sm:$0xff] }
 0x20c   : > { %11622 = vst [vmem:[#allocation100_spill] sm:$0xff] %v6855_v3  ;;  %v340_v58 = vadd.f32 %v336_v31, %v299_v21  ;;  %v413_v33 = vsel %vm11354_vm5, %v6454_v1, %v6448_v59  ;;  %v378_v35 = vmul.f32 %v6324_v23, %v365_v10  ;;  %v406_v11 = vsel %vm11354_vm5, %v6448_v59, %v6390_v15  ;;  %v11633_v10 = vld [vmem:[#allocation12_spill] sm:$0xff] }
 0x20d   : > { %v6893_v5 = vpop.permute.xlu1 %1219  ;;  %11625 = vst [vmem:[#allocation103_spill] sm:$0xff] %v6907_v49  ;;  %v503_v36 = vsel %vm11344_vm7, %v6401_v51, %v6496_v45  ;;  %v341_v29 = vadd.f32 %v337_v30, %v300_v22  ;;  %v461_v13 = vmul.f32 %v6378_v61, %v6902_v7  ;;  %v462_v57 = vmul.f32 %v6378_v61, %v6907_v49  ;;  %v11673_v3 = vld [vmem:[#allocation8_spill] sm:$0xff] }
 0x20e   : > { %v6927_v1 = vsel %vm11352_vm6, %v6480_v20, %v6472_v60  ;;  %v424_v23 = vadd.f32 %v420_v34, %v383_v9  ;;  %v425_v14 = vadd.f32 %v421_v18, %v384_v16  ;;  %v418_v15 = vmul.f32 %v6352_v40, %v413_v33  ;;  %v6944_v46 = vpop.permute.xlu2 %1221  ;;  %v11635_v9 = vld [vmem:[#allocation22_spill] sm:$0xff]  ;;  %v11638_v16 = vld [vmem:[#allocation27_spill] sm:$0xff] }
 0x20f   : > { %v6933_v45 = vsel %vm11344_vm7, %v6491_v38, %v6401_v51  ;;  %v419_v59 = vmul.f32 %v6352_v40, %v406_v11  ;;  %v516_v42 = vmul.f32 %v11626_v44, %v503_v36  ;;  %v6940_v48 = vsel %vm11352_vm6, %v6472_v60, %v6417_v17  ;;  %11627 = vst [vmem:[#allocation16_spill] sm:$0xff] %v6944_v46 }
 0x210   : > { %v381_v20 = vadd.f32 %v377_v50, %v340_v58  ;;  %v382_v52 = vadd.f32 %v378_v35, %v341_v29  ;;  %v459_v41 = vmul.f32 %v6378_v61, %v6927_v1  ;;  %v465_v56 = vadd.f32 %v461_v13, %v424_v23  ;;  %v11639_v35 = vld [vmem:[#allocation17_spill] sm:$0xff]  ;;  %v11640_v13 = vld [vmem:[#allocation30_spill] sm:$0xff] }
 0x211   : > { %v466_v51 = vadd.f32 %v462_v57, %v425_v14  ;;  %v508_v40 = vsel %vm11344_vm7, %v11629_v25, %v11628_v37  ;;  %v515_v55 = vmul.f32 %v11626_v44, %v6933_v45  ;;  %v460_v62 = vmul.f32 %v6378_v61, %v6940_v48  ;;  %v11641_v57 = vld [vmem:[#allocation20_spill] sm:$0xff]  ;;  %v11642_v14 = vld [vmem:[#allocation21_spill] sm:$0xff] }
 0x212   : > { %v422_v60 = vadd.f32 %v418_v15, %v381_v20  ;;  %v501_v54 = vsel %vm11344_vm7, %v11628_v37, %v6491_v38  ;;  %v6963_v21 = vsel %vm11343_vm8, %v11632_v12, %v11631_v32  ;;  %v423_v22 = vadd.f32 %v419_v59, %v382_v52  ;;  %v11637_v38 = vld [vmem:[#allocation25_spill] sm:$0xff]  ;;  %v11643_v15 = vld [vmem:[#allocation28_spill] sm:$0xff]  ;;  %v11644_v20 = vld [vmem:[#allocation31_spill] sm:$0xff] }
 0x213   : > { %v6895_v27 = vpop.permute.xlu0 %1258  ;;  %v520_v30 = vadd.f32 %v516_v42, %v466_v51  ;;  %v6966_v63 = vmul.f32 %v11633_v10, %v503_v36  ;;  %v513_v18 = vmul.f32 %v11626_v44, %v508_v40  ;;  %v6972_v61 = vsel %vm11343_vm8, %v11631_v32, %v11635_v9  ;;  %v11646_v32 = vld [vmem:[#allocation26_spill] sm:$0xff] }
 0x214   : > { %11624 = vst [vmem:[#allocation102_spill] sm:$0xff] %v6895_v27  ;;  %v463_v34 = vadd.f32 %v459_v41, %v422_v60  ;;  %v6977_v58 = vsel %vm11343_vm8, %v11638_v16, %v11637_v38  ;;  %v514_v33 = vmul.f32 %v11626_v44, %v501_v54  ;;  %v519_v50 = vadd.f32 %v515_v55, %v465_v56  ;;  %v11645_v60 = vld [vmem:[#allocation34_spill] sm:$0xff]  ;;  %v11649_v16 = vld [vmem:[#allocation36_spill] sm:$0xff] }
 0x215   : > { %v6951_v31 = vpop.permute.xlu1 %1238  ;;  %11634 = vst [vmem:[#allocation19_spill] sm:$0xff] %v6966_v63  ;;  %v568_v11 = vmul.f32 %v11639_v35, %v6963_v21  ;;  %v6985_v36 = vsel %vm11343_vm8, %v11637_v38, %v11632_v12  ;;  %v464_v29 = vadd.f32 %v460_v62, %v423_v22  ;;  %v609_v23 = vsel %vm11342_vm9, %v11641_v57, %v11640_v13  ;;  %v11647_v12 = vld [vmem:[#allocation37_spill] sm:$0xff] }
 0x216   : > { %11636 = vst [vmem:[#allocation24_spill] sm:$0xff] %v6972_v61  ;;  %v614_v59 = vsel %vm11342_vm9, %v11643_v15, %v11642_v14  ;;  %v569_v44 = vmul.f32 %v11639_v35, %v6972_v61  ;;  %v566_v42 = vmul.f32 %v11639_v35, %v6977_v58  ;;  %v607_v52 = vsel %vm11342_vm9, %v11642_v14, %v11644_v20  ;;  %v11652_v13 = vld [vmem:[#allocation33_spill] sm:$0xff]  ;;  %v11653_v14 = vld [vmem:[#allocation32_spill] sm:$0xff]  ;;  %v11654_v15 = vld [vmem:[#allocation42_spill] sm:$0xff] }
 0x217   : > { %v608_v41 = vsel %vm11342_vm9, %v11644_v20, %v11641_v57  ;;  %v517_v56 = vadd.f32 %v513_v18, %v463_v34  ;;  %v7004_v51 = vmul.f32 %v11633_v10, %v508_v40  ;;  %v567_v37 = vmul.f32 %v11639_v35, %v6985_v36  ;;  %v11650_v35 = vld [vmem:[#allocation23_spill] sm:$0xff] }
 0x218   : > { %v518_v25 = vadd.f32 %v514_v33, %v464_v29  ;;  %v572_v55 = vadd.f32 %v568_v11, %v519_v50  ;;  %v619_v62 = vmul.f32 %v11645_v60, %v614_v59  ;;  %v649_v22 = vsel %vm11338_vm10, %v11647_v12, %v11646_v32  ;;  %v7022_v50 = vpop.permute.xlu2 %1256 }
 0x219   : > { %v620_v34 = vmul.f32 %v11645_v60, %v607_v52  ;;  %v621_v40 = vmul.f32 %v11645_v60, %v608_v41  ;;  %v622_v18 = vmul.f32 %v11645_v60, %v609_v23  ;;  %v655_v33 = vsel %vm11338_vm10, %v11650_v35, %v11649_v16  ;;  %11651 = vst [vmem:[#allocation12_spill] sm:$0xff] %v7022_v50  ;;  %v11655_v52 = vld [vmem:[#allocation40_spill] sm:$0xff]  ;;  %v11656_v60 = vld [vmem:[#allocation39_spill] sm:$0xff] }
 0x21a   : > { %v573_v11 = vadd.f32 %v569_v44, %v520_v30  ;;  %v570_v29 = vadd.f32 %v566_v42, %v517_v56  ;;  %v650_v57 = vsel %vm11338_vm10, %v11646_v32, %v11652_v13  ;;  %v690_v59 = vsel %vm11336_vm11, %v11654_v15, %v11653_v14  ;;  %v11658_v13 = vld [vmem:[#allocation35_spill] sm:$0xff] }
 0x21b   : > { %v6953_v17 = vpop.permute.xlu0 %1274  ;;  %v571_v20 = vadd.f32 %v567_v37, %v518_v25  ;;  %v648_v23 = vsel %vm11338_vm10, %v11649_v16, %v11647_v12  ;;  %v691_v41 = vsel %vm11336_vm11, %v11653_v14, %v11655_v52  ;;  %v662_v30 = vmul.f32 %v11656_v60, %v649_v22  ;;  %v11657_v12 = vld [vmem:[#allocation45_spill] sm:$0xff]  ;;  %v11660_v14 = vld [vmem:[#allocation38_spill] sm:$0xff] }
 0x21c   : > { %11630 = vst [vmem:[#allocation15_spill] sm:$0xff] %v6953_v17  ;;  %v7038_v44 = vmul.f32 %v11633_v10, %v501_v54  ;;  %v7042_v42 = vmul.f32 %v11633_v10, %v6933_v45  ;;  %v623_v56 = vadd.f32 %v619_v62, %v570_v29  ;;  %v660_v37 = vmul.f32 %v11656_v60, %v655_v33  ;;  %v11661_v52 = vld [vmem:[#allocation13_spill] sm:$0xff]  ;;  %v11663_v10 = vld [vmem:[#allocation14_spill] sm:$0xff] }
 0x21d   : > { %v7012_v9 = vpop.permute.xlu1 %1260  ;;  %v624_v25 = vadd.f32 %v620_v34, %v571_v20  ;;  %v625_v32 = vadd.f32 %v621_v40, %v572_v55  ;;  %v626_v35 = vadd.f32 %v622_v18, %v573_v11  ;;  %v703_v16 = vmul.f32 %v11657_v12, %v690_v59  ;;  %v11665_v34 = vld [vmem:[#allocation43_spill] sm:$0xff]  ;;  %v11666_v40 = vld [vmem:[#allocation29_spill] sm:$0xff]  ;;  %v11667_v33 = vld [vmem:[#allocation6_spill] sm:$0xff] }
 0x21e   : > { %v7047_v17 = vmul.f32 %v11658_v13, %v691_v41  ;;  %v661_v22 = vmul.f32 %v11656_v60, %v648_v23  ;;  %v663_v54 = vmul.f32 %v11656_v60, %v650_v57  ;;  %v7053_v45 = vmul.f32 %v11661_v52, %v11660_v14  ;;  %v11668_v20 = vld [vmem:[#allocation51_spill] sm:$0xff]  ;;  %v11669_v23 = vld [vmem:[#allocation49_spill] sm:$0xff] }
 0x21f   : > { %v7057_v62 = vmul.f32 %v11663_v10, %v11660_v14  ;;  %v666_v55 = vadd.f32 %v662_v30, %v625_v32  ;;  %v696_v18 = vsel %vm11336_vm11, %v11666_v40, %v11665_v34  ;;  %v7064_v11 = vmul.f32 %v11667_v33, %v11660_v14  ;;  %v11671_v32 = vld [vmem:[#allocation46_spill] sm:$0xff] }
 0x220   : > { %11659 = vst [vmem:[#allocation22_spill] sm:$0xff] %v7047_v17  ;;  %v664_v29 = vadd.f32 %v660_v37, %v623_v56  ;;  %v689_v57 = vsel %vm11336_vm11, %v11665_v34, %v11654_v15  ;;  %v7072_v60 = vsel %vm806_vm12, %v11669_v23, %v11668_v20  ;;  %v11672_v10 = vld [vmem:[#allocation2_spill] sm:$0xff]  ;;  %v704_v33 = vmul.f32 %v11657_v12, %v691_v41 }
 0x221   : > { %11662 = vst [vmem:[#allocation25_spill] sm:$0xff] %v7053_v45  ;;  %v738_v40 = vmul.f32 %v11672_v10, %v11671_v32  ;;  %v707_v14 = vadd.f32 %v703_v16, %v666_v55  ;;  %v665_v56 = vadd.f32 %v661_v22, %v624_v25  ;;  %v667_v37 = vadd.f32 %v663_v54, %v626_v35  ;;  %v7090_v10 = vpop.permute.xlu2 %1262  ;;  %v11677_v25 = vld [vmem:[#allocation9_spill] sm:$0xff]  ;;  %v11678_v16 = vld [vmem:[#allocation56_spill] sm:$0xff] }
 0x222   : > { %11664 = vst [vmem:[#allocation27_spill] sm:$0xff] %v7057_v62  ;;  %v7082_v15 = vmul.f32 %v11658_v13, %v696_v18  ;;  %v701_v34 = vmul.f32 %v11657_v12, %v696_v18  ;;  %v736_v17 = vmul.f32 %v11673_v3, %v11671_v32  ;;  %v702_v63 = vmul.f32 %v11657_v12, %v689_v57  ;;  %v11679_v22 = vld [vmem:[#allocation41_spill] sm:$0xff]  ;;  %v11680_v12 = vld [vmem:[#allocation3_spill] sm:$0xff] }
 0x223   : > { %v7014_v38 = vpop.permute.xlu0 %1299  ;;  %11675 = vst [vmem:[#allocation30_spill] sm:$0xff] %v7090_v10  ;;  %v7093_v41 = vmul.f32 %v11658_v13, %v689_v57  ;;  %v737_v35 = vmul.f32 %v11677_v25, %v11671_v32  ;;  %v862_v54 = vsel %vm859_vm13, %v11679_v22, %v11678_v16  ;;  %v1346_v3 = vrot.slane %v7064_v11, 1  ;;  %v11682_v16 = vld [vmem:[#allocation44_spill] sm:$0xff] }
 0x224   : > { %11648 = vst [vmem:[#allocation18_spill] sm:$0xff] %v7014_v38  ;;  %v739_v55 = vmul.f32 %v11680_v12, %v11671_v32  ;;  %v708_v18 = vadd.f32 %v704_v33, %v667_v37  ;;  %v742_v20 = vadd.f32 %v738_v40, %v707_v14  ;;  %v7104_v49 = vmul.f32 %v11658_v13, %v690_v59  ;;  %v11681_v38 = vld [vmem:[#allocation57_spill] sm:$0xff]  ;;  %v11683_v32 = vld [vmem:[#allocation54_spill] sm:$0xff] }
 0x225   : > { %v7074_v52 = vpop.permute.xlu1 %1279  ;;  %11676 = vst [vmem:[#allocation20_spill] sm:$0xff] %v7093_v41  ;;  %v705_v57 = vadd.f32 %v701_v34, %v664_v29  ;;  %v903_v25 = vsel %vm900_vm14, %v11681_v38, %v6642_v6  ;;  %v1345_v50 = vrot.slane %v7057_v62, 1  ;;  %v706_v27 = vadd.f32 %v702_v63, %v665_v56  ;;  %v11684_v14 = vld [vmem:[#allocation62_spill] sm:$0xff] }
 0x226   : > { %v808_v53 = vsel %vm806_vm12, %v11682_v16, %v11669_v23  ;;  %v879_v33 = vmul.f32 %v11683_v32, %v862_v54  ;;  %v944_v59 = vsel %vm941_vm15, %v6658_v0, %v11684_v14  ;;  %v1354_v29 = vadd.f32 %v1346_v3, %v7064_v11  ;;  %v11688_v23 = vld [vmem:[#allocation60_spill] sm:$0xff] }
 0x227   : > { %v1358_v40 = vrot.slane %v7064_v11, 2  ;;  %v1344_v63 = vrot.slane %v7053_v45, 1  ;;  %v7124_v56 = vadd.f32 %v739_v55, %v708_v18  ;;  %v920_v34 = vmul.f32 %v11688_v23, %v903_v25 }
 0x228   : > { %vm994_vm11 = vcmask 883712   ;;  %v740_v54 = vadd.f32 %v736_v17, %v705_v57  ;;  %v1353_v12 = vadd.f32 %v1345_v50, %v7057_v62  ;;  %v1357_v14 = vrot.slane %v7057_v62, 2 }
 0x229   : > { %11686 = vst [vmem:[#allocation28_spill] sm:$0xff] %v7124_v56  ;;  %v7133_v3 = vsel %vm994_vm11, %v6710_v2, %v6694_v24  ;;  %v741_v6 = vadd.f32 %v737_v35, %v706_v27  ;;  %v961_v56 = vmul.f32 %v6674_v26, %v944_v59  ;;  %v1366_v25 = vadd.f32 %v1358_v40, %v1354_v29  ;;  %v7144_v24 = vpop.permute.xlu2 %1297  ;;  %v11691_v27 = vld [vmem:[#allocation48_spill] sm:$0xff] }
 0x22a   : > { %v1370_v57 = vrot.slane %v7064_v11, 3  ;;  %vm1047_vm10 = vcmask 875520   ;;  %v1014_v50 = vmul.f32 %v6724_v8, %v7133_v3  ;;  %11689 = vst [vmem:[#allocation31_spill] sm:$0xff] %v7144_v24  ;;  %v7157_v40 = vadd.f32 %v1357_v14, %v1353_v12 }
 0x22b   : > { %v7076_v30 = vpop.permute.xlu0 %1315  ;;  %vm1100_vm9 = vcmask 867328   ;;  %vm1141_vm8 = vcmask 736256   ;;  %vm1182_vm7 = vcmask 728064   ;;  %vm1223_vm6 = vcmask 719872  }
 0x22c   : > { %11670 = vst [vmem:[#allocation17_spill] sm:$0xff] %v7076_v30  ;;  %v11674_v30 = vld [vmem:[#allocation53_spill] sm:$0xff]  ;;  %v7172_v12 = vadd.f32 %v1370_v57, %v1366_v25  ;;  %v11703_v25 = vld [vmem:[#allocation63_spill] sm:$0xff]  ;;  %vm1264_vm5 = vcmask 711680   ;;  %vm11429_vm4 = vcmask 703488  }
 0x22d   : > { %v826_v61 = vmul.f32 %v11674_v30, %v7072_v60  ;;  %v7117_v13 = vpop.permute.xlu1 %1301  ;;  %v825_v55 = vmul.f32 %v11674_v30, %v808_v53  ;;  %11694 = vst [vmem:[#allocation26_spill] sm:$0xff] %v7157_v40  ;;  %v11700_v40 = vld [vmem:[#allocation58_spill] sm:$0xff]  ;;  %v902_v57 = vsel %vm900_vm14, %v11703_v25, %v11681_v38 }
 0x22e   : > { %11698 = vst [vmem:[#allocation37_spill] sm:$0xff] %v7172_v12  ;;  %v11710_v12 = vld [vmem:[#allocation64_spill] sm:$0xff] }
 0x22f   : > { %v830_v41 = vadd.f32 %v826_v61, %v742_v20  ;;  %v11687_v61 = vld [vmem:[#allocation52_spill] sm:$0xff]  ;;  %v829_v17 = vadd.f32 %v825_v55, %v741_v6  ;;  %v11702_v55 = vld [vmem:[#allocation55_spill] sm:$0xff]  ;;  %v7216_v24 = vmul.f32 %v11710_v12, %v944_v59 }
 0x230   : > { %v807_v20 = vsel %vm806_vm12, %v11687_v61, %v11682_v16 }
 0x231   : > { %v883_v18 = vadd.f32 %v879_v33, %v830_v41  ;;  %v824_v16 = vmul.f32 %v11674_v30, %v807_v20  ;;  %v11692_v41 = vld [vmem:[#allocation10_spill] sm:$0xff]  ;;  %v11693_v33 = vld [vmem:[#allocation11_spill] sm:$0xff] }
 0x232   : > { %v7151_v35 = vmul.f32 %v11692_v41, %v11691_v27  ;;  %v7155_v29 = vmul.f32 %v11693_v33, %v11691_v27  ;;  %v7167_v41 = vsel %vm1047_vm10, %v6719_v47, %v6721_v43  ;;  %v11697_v33 = vld [vmem:[#allocation87_spill] sm:$0xff] }
 0x233   : > { %v7121_v37 = vpop.permute.xlu0 %1382  ;;  %v924_v61 = vadd.f32 %v920_v34, %v883_v18  ;;  %v11695_v34 = vld [vmem:[#allocation4_spill] sm:$0xff]  ;;  %v11706_v43 = vld [vmem:[#allocation99_spill] sm:$0xff] }
 0x234   : > { %11685 = vst [vmem:[#allocation21_spill] sm:$0xff] %v7121_v37  ;;  %v7147_v37 = vadd.f32 %v1344_v63, %v7053_v45  ;;  %v7162_v18 = vmul.f32 %v11695_v34, %v11691_v27  ;;  %v828_v63 = vadd.f32 %v824_v16, %v740_v54  ;;  %v11701_v34 = vld [vmem:[#allocation50_spill] sm:$0xff]  ;;  %v7183_v16 = vmul.f32 %v11702_v55, %v807_v20  ;;  %v11705_v20 = vld [vmem:[#allocation80_spill] sm:$0xff] }
 0x235   : > { %v965_v62 = vadd.f32 %v961_v56, %v924_v61  ;;  %v860_v6 = vsel %vm859_vm13, %v11701_v34, %v11700_v40  ;;  %v861_v56 = vsel %vm859_vm13, %v11700_v40, %v11679_v22  ;;  %v7186_v61 = vmul.f32 %v11702_v55, %v808_v53  ;;  %v11704_v22 = vld [vmem:[#allocation66_spill] sm:$0xff] }
 0x236   : > { %11690 = vst [vmem:[#allocation34_spill] sm:$0xff] %v7147_v37  ;;  %v11696_v37 = vld [vmem:[#allocation86_spill] sm:$0xff]  ;;  %v1144_v34 = vsel %vm1141_vm8, %v6787_v4, %v6785_v19  ;;  %v7204_v40 = vmul.f32 %v11702_v55, %v7072_v60  ;;  %v877_v38 = vmul.f32 %v11683_v32, %v860_v6  ;;  %v878_v19 = vmul.f32 %v11683_v32, %v861_v56 }
 0x237   : > { %v1103_v14 = vsel %vm1100_vm9, %v11697_v33, %v11696_v37  ;;  %v1018_v54 = vadd.f32 %v1014_v50, %v965_v62  ;;  %v7194_v37 = vpop.permute.xlu1 %1320  ;;  %v901_v62 = vsel %vm900_vm14, %v11704_v22, %v11703_v25  ;;  %v1067_v50 = vmul.f32 %v11705_v20, %v7167_v41  ;;  %v11708_v25 = vld [vmem:[#allocation67_spill] sm:$0xff]  ;;  %v11709_v45 = vld [vmem:[#allocation94_spill] sm:$0xff] }
 0x238   : > { %v1120_v53 = vmul.f32 %v6781_v39, %v1103_v14  ;;  %v943_v22 = vsel %vm941_vm15, %v11708_v25, %v6658_v0  ;;  %v1161_v14 = vmul.f32 %v11709_v45, %v1144_v34  ;;  %v919_v60 = vmul.f32 %v11688_v23, %v902_v57  ;;  %v7227_v34 = vpop.permute.xlu2 %1303 }
 0x239   : > { %v1071_v27 = vadd.f32 %v1067_v50, %v1018_v54  ;;  %v918_v6 = vmul.f32 %v11688_v23, %v901_v62  ;;  %v1226_v56 = vsel %vm1223_vm6, %v6893_v5, %v6944_v46  ;;  %11712 = vst [vmem:[#allocation23_spill] sm:$0xff] %v7227_v34  ;;  %v881_v59 = vadd.f32 %v877_v38, %v828_v63  ;;  %v11714_v46 = vld [vmem:[#allocation68_spill] sm:$0xff] }
 0x23a   : > { %v882_v50 = vadd.f32 %v878_v19, %v829_v17  ;;  %v960_v57 = vmul.f32 %v6674_v26, %v943_v22  ;;  %v1267_v62 = vsel %vm1264_vm5, %v7012_v9, %v7090_v10  ;;  %v1308_v17 = vsel %vm11429_vm4, %v7117_v13, %v7227_v34  ;;  %v11721_v10 = vld [vmem:[#allocation84_spill] sm:$0xff] }
 0x23b   : > { %v7174_v11 = vpop.permute.xlu0 %1498  ;;  %v1124_v0 = vadd.f32 %v1120_v53, %v1071_v27  ;;  %v7244_v63 = vmul.f32 %v11710_v12, %v943_v22  ;;  %v11718_v22 = vld [vmem:[#allocation81_spill] sm:$0xff] }
 0x23c   : > { %11699 = vst [vmem:[#allocation36_spill] sm:$0xff] %v7174_v11  ;;  %v11707_v11 = vld [vmem:[#allocation97_spill] sm:$0xff]  ;;  %v923_v53 = vadd.f32 %v919_v60, %v882_v50 }
 0x23d   : > { %v1185_v30 = vsel %vm1182_vm7, %v11707_v11, %v11706_v43  ;;  %v11711_v43 = vld [vmem:[#allocation69_spill] sm:$0xff]  ;;  %v1165_v27 = vadd.f32 %v1161_v14, %v1124_v0  ;;  %v11716_v0 = vld [vmem:[#allocation79_spill] sm:$0xff] }
 0x23e   : > { %v942_v55 = vsel %vm941_vm15, %v11711_v43, %v11708_v25  ;;  %v1202_v54 = vmul.f32 %v6853_v28, %v1185_v30  ;;  %v996_v43 = vsel %vm994_vm11, %v11714_v46, %v6710_v2  ;;  %v1243_v30 = vmul.f32 %v6951_v31, %v1226_v56  ;;  %v11715_v56 = vld [vmem:[#allocation73_spill] sm:$0xff] }
 0x23f   : > { %v922_v25 = vadd.f32 %v918_v6, %v881_v59  ;;  %v959_v19 = vmul.f32 %v6674_v26, %v942_v55  ;;  %v7247_v38 = vmul.f32 %v11710_v12, %v942_v55  ;;  %v1284_v2 = vmul.f32 %v7074_v52, %v1267_v62  ;;  %v11717_v59 = vld [vmem:[#allocation75_spill] sm:$0xff]  ;;  %v7257_v34 = vpop.permute.xlu1 %1395  ;;  %v11725_v12 = vld [vmem:[#allocation93_spill] sm:$0xff] }
 0x240   : > { %v964_v14 = vadd.f32 %v960_v57, %v923_v53  ;;  %v995_v60 = vsel %vm994_vm11, %v11715_v56, %v11714_v46  ;;  %v1013_v6 = vmul.f32 %v6724_v8, %v996_v43  ;;  %v1048_v50 = vsel %vm1047_vm10, %v11717_v59, %v11716_v0  ;;  %v11719_v53 = vld [vmem:[#allocation74_spill] sm:$0xff] }
 0x241   : > { %v472_v55 = vmul.f32 %v11718_v22, %v6927_v1  ;;  %v1325_v57 = vmul.f32 %v7194_v37, %v1308_v17  ;;  %v7265_v46 = vmul.f32 %v11719_v53, %v995_v60  ;;  %v7270_v56 = vsel %vm1047_vm10, %v11716_v0, %v6719_v47  ;;  %v11720_v17 = vld [vmem:[#allocation83_spill] sm:$0xff] }
 0x242   : > { %v474_v59 = vmul.f32 %v11718_v22, %v6902_v7  ;;  %v7275_v1 = vmul.f32 %v11719_v53, %v996_v43  ;;  %v1101_v47 = vsel %vm1100_vm9, %v11721_v10, %v11720_v17  ;;  %v1102_v7 = vsel %vm1100_vm9, %v11720_v17, %v11697_v33  ;;  %v11724_v17 = vld [vmem:[#allocation89_spill] sm:$0xff] }
 0x243   : > { %v7233_v23 = vpop.permute.xlu0 %1593  ;;  %v1066_v43 = vmul.f32 %v11705_v20, %v7270_v56 }
 0x244   : > { %11713 = vst [vmem:[#allocation33_spill] sm:$0xff] %v7233_v23  ;;  %v1206_v23 = vadd.f32 %v1202_v54, %v1165_v27  ;;  %v473_v54 = vmul.f32 %v11718_v22, %v6940_v48  ;;  %v963_v27 = vadd.f32 %v959_v19, %v922_v25  ;;  %v7279_v48 = vmul.f32 %v11719_v53, %v7133_v3 }
 0x245   : > { %v1017_v25 = vadd.f32 %v1013_v6, %v964_v14  ;;  %v1065_v19 = vmul.f32 %v11705_v20, %v1048_v50  ;;  %v529_v3 = vadd.f32 %v7004_v51, %v472_v55  ;;  %v531_v6 = vadd.f32 %v7042_v42, %v474_v59  ;;  %v11722_v51 = vld [vmem:[#allocation78_spill] sm:$0xff] }
 0x246   : > { %v1247_v62 = vadd.f32 %v1243_v30, %v1206_v23  ;;  %v1012_v23 = vmul.f32 %v6724_v8, %v995_v60  ;;  %v530_v0 = vadd.f32 %v7038_v44, %v473_v54  ;;  %v7293_v60 = vpop.permute.xlu2 %1336  ;;  %v1079_v44 = vmul.f32 %v11722_v51, %v7167_v41  ;;  %v11726_v41 = vld [vmem:[#allocation96_spill] sm:$0xff] }
 0x247   : > { %v1118_v54 = vmul.f32 %v6781_v39, %v1101_v47 }
 0x248   : > { %v1288_v30 = vadd.f32 %v1284_v2, %v1247_v62  ;;  %v1016_v55 = vadd.f32 %v1012_v23, %v963_v27  ;;  %v1183_v27 = vsel %vm1182_vm7, %v11726_v41, %v11725_v12  ;;  %v7318_v23 = vpop.permute.xlu1 %1461 }
 0x24a   : > { %v7295_v2 = vadd.f32 %v1325_v57, %v1288_v30  ;;  %v1119_v57 = vmul.f32 %v6781_v39, %v1102_v7  ;;  %v11723_v30 = vld [vmem:[#allocation88_spill] sm:$0xff]  ;;  %v1069_v20 = vadd.f32 %v1065_v19, %v1016_v55 }
 0x24b   : > { %v1142_v42 = vsel %vm1141_vm8, %v11724_v17, %v11723_v30  ;;  %v11727_v7 = vld [vmem:[#allocation20_spill] sm:$0xff] }
 0x24c   : > { %v7297_v14 = vpop.permute.xlu0 %575  ;;  %v1159_v8 = vmul.f32 %v11709_v45, %v1142_v42  ;;  %v1122_v19 = vadd.f32 %v1118_v54, %v1069_v20  ;;  %v11730_v54 = vld [vmem:[#allocation102_spill] sm:$0xff] }
 0x24d   : > { %v578_v10 = vmul.f32 %v7297_v14, %v6977_v58  ;;  %v579_v33 = vmul.f32 %v7297_v14, %v6985_v36  ;;  %v580_v62 = vmul.f32 %v7297_v14, %v6963_v21  ;;  %v1070_v36 = vadd.f32 %v1066_v43, %v1017_v25 }
 0x24e   : > { %v1508_v21 = vrot.slane %v7295_v2, 1  ;;  %v1200_v43 = vmul.f32 %v6853_v28, %v1183_v27 }
 0x24f   : > { %v582_v59 = vadd.f32 %v578_v10, %v529_v3  ;;  %v583_v58 = vadd.f32 %v579_v33, %v530_v0  ;;  %v584_v53 = vadd.f32 %v580_v62, %v531_v6  ;;  %v1077_v0 = vmul.f32 %v11722_v51, %v1048_v50  ;;  %v11728_v6 = vld [vmem:[#allocation98_spill] sm:$0xff]  ;;  %v11729_v10 = vld [vmem:[#allocation101_spill] sm:$0xff] }
 0x250   : > { %v1123_v25 = vadd.f32 %v1119_v57, %v1070_v36  ;;  %v1224_v33 = vsel %vm1223_vm6, %v11729_v10, %v11728_v6  ;;  %v1516_v50 = vadd.f32 %v1508_v21, %v7295_v2  ;;  %v11731_v57 = vld [vmem:[#allocation12_spill] sm:$0xff] }
 0x251   : > { %v717_v47 = vadd.f32 %v7082_v15, %v582_v59  ;;  %v718_v39 = vadd.f32 %v11727_v7, %v583_v58  ;;  %v719_v3 = vadd.f32 %v7104_v49, %v584_v53  ;;  %v1143_v49 = vsel %vm1141_vm8, %v11723_v30, %v6787_v4  ;;  %v11732_v59 = vld [vmem:[#allocation18_spill] sm:$0xff]  ;;  %v11733_v58 = vld [vmem:[#allocation31_spill] sm:$0xff] }
 0x252   : > { %v1163_v53 = vadd.f32 %v1159_v8, %v1122_v19  ;;  %v1241_v20 = vmul.f32 %v6951_v31, %v1224_v33  ;;  %v1265_v17 = vsel %vm1264_vm5, %v11731_v57, %v11730_v54  ;;  %v7344_v8 = vpop.permute.xlu2 %1415  ;;  %v1520_v30 = vrot.slane %v7295_v2, 2 }
 0x253   : > { %v763_v62 = vadd.f32 %v7151_v35, %v717_v47  ;;  %v764_v55 = vadd.f32 %v7155_v29, %v718_v39  ;;  %v765_v15 = vadd.f32 %v7162_v18, %v719_v3  ;;  %v1160_v29 = vmul.f32 %v11709_v45, %v1143_v49 }
 0x254   : > { %v1204_v18 = vadd.f32 %v1200_v43, %v1163_v53  ;;  %v1282_v4 = vmul.f32 %v7074_v52, %v1265_v17  ;;  %v1306_v36 = vsel %vm11429_vm4, %v11733_v58, %v11732_v59  ;;  %v1528_v47 = vadd.f32 %v1520_v30, %v1516_v50  ;;  %v11738_v58 = vld [vmem:[#allocation47_spill] sm:$0xff] }
 0x255   : > { %v840_v42 = vadd.f32 %v7183_v16, %v763_v62  ;;  %v841_v35 = vadd.f32 %v7186_v61, %v764_v55  ;;  %v842_v39 = vadd.f32 %v7204_v40, %v765_v15  ;;  %v1184_v40 = vsel %vm1182_vm7, %v11725_v12, %v11707_v11  ;;  %v7369_v55 = vpop.permute.xlu1 %1544 }
 0x256   : > { %v1245_v41 = vadd.f32 %v1241_v20, %v1204_v18  ;;  %v1323_v27 = vmul.f32 %v7194_v37, %v1306_v36  ;;  %v1201_v7 = vmul.f32 %v6853_v28, %v1184_v40  ;;  %v1532_v11 = vrot.slane %v7295_v2, 3  ;;  %v11737_v18 = vld [vmem:[#allocation25_spill] sm:$0xff]  ;;  %v11739_v36 = vld [vmem:[#allocation51_spill] sm:$0xff] }
 0x257   : > { %v975_v21 = vadd.f32 %v7247_v38, %v840_v42  ;;  %v976_v16 = vadd.f32 %v7244_v63, %v841_v35  ;;  %v977_v61 = vadd.f32 %v7216_v24, %v842_v39  ;;  %v1078_v63 = vmul.f32 %v11722_v51, %v7270_v56  ;;  %v11734_v24 = vld [vmem:[#allocation103_spill] sm:$0xff] }
 0x258   : > { %v475_v43 = vmul.f32 %v11718_v22, %v11734_v24  ;;  %v1286_v10 = vadd.f32 %v1282_v4, %v1245_v41  ;;  %v1164_v12 = vadd.f32 %v1160_v29, %v1123_v25  ;;  %v1225_v33 = vsel %vm1223_vm6, %v11728_v6, %v6893_v5  ;;  %v11736_v6 = vld [vmem:[#allocation21_spill] sm:$0xff] }
 0x259   : > { %v1028_v3 = vadd.f32 %v7265_v46, %v975_v21  ;;  %v1029_v19 = vadd.f32 %v7275_v1, %v976_v16  ;;  %v1030_v38 = vadd.f32 %v7279_v48, %v977_v61  ;;  %v1242_v1 = vmul.f32 %v6951_v31, %v1225_v33  ;;  %v11740_v61 = vld [vmem:[#allocation24_spill] sm:$0xff] }
 0x25a   : > { %v7372_v48 = vadd.f32 %v1323_v27, %v1286_v10  ;;  %v1540_v15 = vadd.f32 %v1532_v11, %v1528_v47  ;;  %v1205_v22 = vadd.f32 %v1201_v7, %v1164_v12  ;;  %v1266_v2 = vsel %vm1264_vm5, %v11730_v54, %v7012_v9  ;;  %v7387_v54 = vpop.permute.xlu2 %1474  ;;  %v11741_v27 = vld [vmem:[#allocation19_spill] sm:$0xff]  ;;  %v11742_v11 = vld [vmem:[#allocation48_spill] sm:$0xff]  ;;  %v11743_v12 = vld [vmem:[#allocation5_spill] sm:$0xff] }
 0x25b   : > { %v1081_v62 = vadd.f32 %v1077_v0, %v1028_v3  ;;  %v1083_v46 = vadd.f32 %v1079_v44, %v1030_v38  ;;  %v7374_v56 = vadd.f32 %v1078_v63, %v1029_v19  ;;  %v1283_v5 = vmul.f32 %v7074_v52, %v1266_v2  ;;  %v11735_v0 = vld [vmem:[#allocation37_spill] sm:$0xff]  ;;  %v11748_v2 = vld [vmem:[#allocation27_spill] sm:$0xff] }
 0x25c   : > { %v1307_v44 = vsel %vm11429_vm4, %v11732_v59, %v7117_v13  ;;  %v1387_v53 = vadd.f32 %v11736_v6, %v11735_v0  ;;  %v1549_v20 = vadd.f32 %v7369_v55, %v1540_v15  ;;  %v1246_v35 = vadd.f32 %v1242_v1, %v1205_v22  ;;  %v11745_v15 = vld [vmem:[#allocation34_spill] sm:$0xff] }
 0x25d   : > { %v1423_v25 = vrot.slane %v1081_v62, 1  ;;  %v1425_v49 = vrot.slane %v1083_v46, 1  ;;  %v1435_v17 = vrot.slane %v1081_v62, 2  ;;  %v1437_v42 = vrot.slane %v1083_v46, 2  ;;  %v11747_v22 = vld [vmem:[#allocation26_spill] sm:$0xff] }
 0x25e   : > { %v1324_v9 = vmul.f32 %v7194_v37, %v1307_v44  ;;  %v1424_v39 = vrot.slane %v7374_v56, 1  ;;  %v1506_v29 = vrot.slane %v7372_v48, 1  ;;  %v1368_v13 = vrot.slane %v11737_v18, 3 }
 0x25f   : > { %v1431_v50 = vadd.f32 %v1423_v25, %v1081_v62  ;;  %v1433_v57 = vadd.f32 %v1425_v49, %v1083_v46  ;;  %v1449_v59 = vrot.slane %v1083_v46, 3  ;;  %v819_v21 = vsel %vm806_vm12, %v11739_v36, %v11738_v58  ;;  %v11744_v46 = vld [vmem:[#allocation53_spill] sm:$0xff] }
 0x260   : > { %v1287_v16 = vadd.f32 %v1283_v5, %v1246_v35  ;;  %v581_v40 = vmul.f32 %v7297_v14, %v11740_v61  ;;  %v1447_v41 = vrot.slane %v1081_v62, 3  ;;  %v532_v47 = vadd.f32 %v11741_v27, %v475_v43  ;;  %v11753_v36 = vld [vmem:[#allocation65_spill] sm:$0xff] }
 0x261   : > { %v1443_v4 = vadd.f32 %v1435_v17, %v1431_v50  ;;  %v1445_v30 = vadd.f32 %v1437_v42, %v1433_v57  ;;  %v1391_v7 = vmax.f32 %v1387_v53, 0.0  ;;  %v1553_v19 = vmax.f32 %v1549_v20, 0.0  ;;  %v11750_v53 = vld [vmem:[#allocation61_spill] sm:$0xff]  ;;  %v11751_v20 = vld [vmem:[#allocation56_spill] sm:$0xff] }
 0x262   : > { %v7398_v38 = vadd.f32 %v1324_v9, %v1287_v16  ;;  %v1432_v63 = vadd.f32 %v1424_v39, %v7374_v56  ;;  %v1514_v10 = vadd.f32 %v1506_v29, %v7372_v48  ;;  %v762_v33 = vmul.f32 %v11743_v12, %v11742_v11  ;;  %v11754_v16 = vld [vmem:[#allocation59_spill] sm:$0xff] }
 0x263   : > { %v1457_v3 = vadd.f32 %v1449_v59, %v1445_v30  ;;  %v1455_v24 = vadd.f32 %v1447_v41, %v1443_v4  ;;  %v827_v1 = vmul.f32 %v11744_v46, %v819_v21  ;;  %v11746_v14 = vrot.slane %v11737_v18, 2  ;;  %v11752_v18 = vld [vmem:[#allocation28_spill] sm:$0xff]  ;;  %v11755_v41 = vld [vmem:[#allocation22_spill] sm:$0xff]  ;;  %v11756_v46 = vld [vmem:[#allocation55_spill] sm:$0xff] }
 0x264   : > { %v11749_v25 = vrot.slane %v11748_v2, 3  ;;  %v585_v5 = vadd.f32 %v581_v40, %v532_v47  ;;  %v1436_v44 = vrot.slane %v7374_v56, 2  ;;  %v1518_v0 = vrot.slane %v7372_v48, 2  ;;  %v7424_v40 = vpop.permute.xlu2 %1557 }
 0x265   : > { %v1364_v62 = vadd.f32 %v11746_v14, %v11745_v15  ;;  %v1466_v43 = vadd.f32 %v7318_v23, %v1457_v3  ;;  %v872_v50 = vsel %vm859_vm13, %v11751_v20, %v11750_v53  ;;  %v1400_v57 = vperm.slane %v1391_v7, 0  ;;  %v11761_v53 = vld [vmem:[#allocation36_spill] sm:$0xff] }
 0x266   : > { %v1377_v49 = vadd.f32 %v11749_v25, %v11747_v22  ;;  %v1562_v42 = vperm.slane %v1553_v19, 0  ;;  %v1444_v35 = vadd.f32 %v1436_v44, %v1432_v63  ;;  %v1464_v9 = vadd.f32 %v7318_v23, %v1455_v24  ;;  %v7436_v24 = vld [vmem:[%s11211_s1] sm:$0xf] }
 0x267   : > { %v1470_v17 = vmax.f32 %v1466_v43, 0.0  ;;  %v1507_v39 = vrot.slane %v7398_v38, 1  ;;  %v1526_v29 = vadd.f32 %v1518_v0, %v1514_v10  ;;  %v831_v4 = vadd.f32 %v827_v1, %v11752_v18  ;;  %v11757_v1 = vld [vmem:[#allocation60_spill] sm:$0xff]  ;;  %v11759_v43 = vld [vmem:[#allocation62_spill] sm:$0xff] }
 0x268   : > { %v1376_v30 = vadd.f32 %v1368_v13, %v1364_v62  ;;  %v1404_v59 = vmul.f32 %v1400_v57, %v7257_v34  ;;  %v913_v61 = vsel %vm900_vm14, %v11754_v16, %v11753_v36  ;;  %v720_v27 = vadd.f32 %v11755_v41, %v585_v5  ;;  %v11758_v62 = vld [vmem:[#allocation70_spill] sm:$0xff] }
 0x269   : > { %v1479_v58 = vperm.slane %v1470_v17, 0  ;;  %v1448_v47 = vrot.slane %v7374_v56, 3  ;;  %v1530_v7 = vrot.slane %v7372_v48, 3  ;;  %v880_v3 = vmul.f32 %v11683_v32, %v872_v50 }
 0x26a   : > { %v1385_v19 = vadd.f32 %v11736_v6, %v1376_v30  ;;  %v1566_v63 = vmul.f32 %v1562_v42, %v7424_v40  ;;  %v1468_v11 = vmax.f32 %v1464_v9, 0.0  ;;  %v1515_v12 = vadd.f32 %v1507_v39, %v7398_v38  ;;  %v11763_v39 = vld [vmem:[#allocation71_spill] sm:$0xff]  ;;  %v11765_v30 = vld [vmem:[#allocation76_spill] sm:$0xff] }
 0x26b   : > { %v1483_v13 = vmul.f32 %v1479_v58, %v7387_v54  ;;  %v1456_v10 = vadd.f32 %v1448_v47, %v1444_v35  ;;  %v1538_v56 = vadd.f32 %v1530_v7, %v1526_v29  ;;  %v839_v48 = vmul.f32 %v11756_v46, %v819_v21 }
 0x26c   : > { %v921_v32 = vmul.f32 %v11757_v1, %v913_v61  ;;  %v1408_v15 = vadd.f32 %v1404_v59, %v7293_v60  ;;  %v954_v22 = vsel %vm941_vm15, %v11759_v43, %v11758_v62  ;;  %v766_v2 = vadd.f32 %v762_v33, %v720_v27  ;;  %v11762_v33 = vld [vmem:[#allocation72_spill] sm:$0xff]  ;;  %v11767_v27 = vld [vmem:[#allocation77_spill] sm:$0xff]  ;;  %v11773_v43 = vld [vmem:[#allocation90_spill] sm:$0xff] }
 0x26d   : > { %v1487_v14 = vadd.f32 %v1483_v13, %v7344_v8  ;;  %v1519_v25 = vrot.slane %v7398_v38, 2  ;;  %v1547_v5 = vadd.f32 %v7369_v55, %v1538_v56  ;;  %v884_v44 = vadd.f32 %v880_v3, %v831_v4  ;;  %v11764_v4 = vld [vmem:[#allocation82_spill] sm:$0xff]  ;;  %v11766_v61 = vld [vmem:[#allocation64_spill] sm:$0xff]  ;;  %v11770_v56 = vld [vmem:[#allocation85_spill] sm:$0xff] }
 0x26e   : > { %v7449_v0 = vperm.slane %v7436_v24, 2  ;;  %v1570_v20 = vadd.f32 %v1566_v63, %v11761_v53  ;;  %v1389_v50 = vmax.f32 %v1385_v19, 0.0  ;;  %v1465_v57 = vadd.f32 %v7318_v23, %v1456_v10 }
 0x26f   : > { %v1491_v21 = vadd.f32 %v1487_v14, %v1408_v15  ;;  %v1477_v17 = vperm.slane %v1468_v11, 0  ;;  %v1527_v42 = vadd.f32 %v1519_v25, %v1515_v12  ;;  %v925_v35 = vadd.f32 %v921_v32, %v884_v44  ;;  %v11769_v11 = vld [vmem:[#allocation80_spill] sm:$0xff]  ;;  %v11772_v15 = vld [vmem:[#allocation74_spill] sm:$0xff] }
 0x270   : > { %11760 = vst [vmem:[#allocation32_spill] sm:$0xff] %v7449_v0  ;;  %v962_v9 = vmul.f32 %v6674_v26, %v954_v22  ;;  %v1007_v29 = vsel %vm994_vm11, %v11763_v39, %v11762_v33  ;;  %v1060_v59 = vsel %vm1047_vm10, %v11765_v30, %v11764_v4  ;;  %v843_v58 = vadd.f32 %v839_v48, %v766_v2  ;;  %v11774_v2 = vld [vmem:[#allocation91_spill] sm:$0xff]  ;;  %v11775_v25 = vld [vmem:[#allocation92_spill] sm:$0xff] }
 0x271   : > { %v1574_v18 = vadd.f32 %v1570_v20, %v1491_v21  ;;  %v1531_v36 = vrot.slane %v7398_v38, 3  ;;  %v1551_v16 = vmax.f32 %v1547_v5, 0.0  ;;  %v974_v41 = vmul.f32 %v11766_v61, %v954_v22  ;;  %v11771_v38 = vld [vmem:[#allocation86_spill] sm:$0xff] }
 0x272   : > { %v1015_v47 = vmul.f32 %v11767_v27, %v1007_v29  ;;  %v1386_v7 = vadd.f32 %v11736_v6, %v1377_v49  ;;  %v1398_v3 = vperm.slane %v1389_v50, 0  ;;  %v1469_v19 = vmax.f32 %v1465_v57, 0.0 }
 0x273   : > { %v7465_v26 = vmul.f32 %v7449_v0, %v1574_v18  ;;  %v1481_v13 = vmul.f32 %v1477_v17, %v7387_v54  ;;  %v1539_v63 = vadd.f32 %v1531_v36, %v1527_v42  ;;  %v966_v10 = vadd.f32 %v962_v9, %v925_v35  ;;  %v11776_v17 = vld [vmem:[#allocation95_spill] sm:$0xff]  ;;  %v11779_v36 = vld [vmem:[#allocation16_spill] sm:$0xff] }
 0x274   : > { %v1068_v12 = vmul.f32 %v11769_v11, %v1060_v59  ;;  %v1113_v46 = vsel %vm1100_vm9, %v11771_v38, %v11770_v56  ;;  %v1402_v49 = vmul.f32 %v1398_v3, %v7257_v34  ;;  %v978_v48 = vadd.f32 %v974_v41, %v843_v58  ;;  %v11777_v42 = vld [vmem:[#allocation99_spill] sm:$0xff]  ;;  %v11778_v58 = vld [vmem:[#allocation100_spill] sm:$0xff] }
 0x275   : > { %11768 = vst [vmem:[#allocation42_spill] sm:$0xff] %v7465_v26  ;;  %1667 = vrot.lane.b32.xlu2 %v7465_v26, %s6024_s22  ;;  %1638 = vrot.lane.b32.xlu0 %v7465_v26, %s6023_s21  ;;  %v1548_v1 = vadd.f32 %v7369_v55, %v1539_v63  ;;  %v1560_v32 = vperm.slane %v1551_v16, 0  ;;  %v1027_v14 = vmul.f32 %v11772_v15, %v1007_v29  ;;  %v1390_v44 = vmax.f32 %v1386_v7, 0.0 }
 0x276   : > { %1608 = vrot.lane.b32.xlu1 %v7465_v26, %s6021_s20  ;;  %v1019_v62 = vadd.f32 %v1015_v47, %v966_v10  ;;  %v1121_v22 = vmul.f32 %v11773_v43, %v1113_v46  ;;  %v1154_v5 = vsel %vm1141_vm8, %v11775_v25, %v11774_v2  ;;  %v1478_v21 = vperm.slane %v1469_v19, 0  ;;  %v11783_v46 = vld [vmem:[#allocation17_spill] sm:$0xff] }
 0x277   : > { %v1485_v20 = vadd.f32 %v1481_v13, %v7344_v8  ;;  %v1162_v57 = vmul.f32 %v11709_v45, %v1154_v5  ;;  %v1195_v35 = vsel %vm1182_vm7, %v11777_v42, %v11776_v17  ;;  %v1406_v9 = vadd.f32 %v1402_v49, %v7293_v60  ;;  %v11781_v13 = vld [vmem:[#allocation30_spill] sm:$0xff]  ;;  %v11784_v49 = vld [vmem:[#allocation23_spill] sm:$0xff] }
 0x278   : > { %v1072_v50 = vadd.f32 %v1068_v12, %v1019_v62  ;;  %v1031_v33 = vadd.f32 %v1027_v14, %v978_v48  ;;  %v1552_v39 = vmax.f32 %v1548_v1, 0.0  ;;  %v1564_v29 = vmul.f32 %v1560_v32, %v7424_v40  ;;  %v11785_v62 = vld [vmem:[#allocation38_spill] sm:$0xff] }
 0x279   : > { %v1080_v18 = vmul.f32 %v11722_v51, %v1060_v59  ;;  %v1203_v30 = vmul.f32 %v6853_v28, %v1195_v35  ;;  %v1236_v16 = vsel %vm1223_vm6, %v11779_v36, %v11778_v58  ;;  %v1399_v45 = vperm.slane %v1390_v44, 0  ;;  %v7504_v51 = vld [vmem:[%s11212_s2 + $0x60] sm:$0xf] }
 0x27a   : > { %v1125_v4 = vadd.f32 %v1121_v22, %v1072_v50  ;;  %v1482_v61 = vmul.f32 %v1478_v21, %v7387_v54  ;;  %v1489_v41 = vadd.f32 %v1485_v20, %v1406_v9  ;;  %v1244_v47 = vmul.f32 %v6951_v31, %v1236_v16  ;;  %v11780_v31 = vld [vmem:[#allocation15_spill] sm:$0xff] }
 0x27b   : > { %v1403_v28 = vmul.f32 %v1399_v45, %v7257_v34  ;;  %v1084_v59 = vadd.f32 %v1080_v18, %v1031_v33  ;;  %v1561_v7 = vperm.slane %v1552_v39, 0  ;;  %v1568_v3 = vadd.f32 %v1564_v29, %v11761_v53 }
 0x27c   : > { %v1166_v27 = vadd.f32 %v1162_v57, %v1125_v4  ;;  %v1277_v63 = vsel %vm1264_vm5, %v11781_v13, %v11780_v31  ;;  %v7515_v11 = vperm.slane %v7436_v24, 0  ;;  %v1486_v12 = vadd.f32 %v1482_v61, %v7344_v8 }
 0x27d   : > { %1696 = vrot.lane.b32.xlu2 %v7465_v26, %s6026_s23  ;;  %1678 = vperm.xlu0 %5815, %v7504_v51   ;;  %v1285_v10 = vmul.f32 %v7074_v52, %v1277_v63  ;;  %v1572_v56 = vadd.f32 %v1568_v3, %v1489_v41  ;;  %v1318_v48 = vsel %vm11429_vm4, %v11784_v49, %v11783_v46  ;;  %v1426_v15 = vrot.slane %v1084_v59, 1  ;;  %v11786_v52 = vld [vmem:[#allocation7_spill] sm:$0xff] }
 0x27e   : > { %1649 = vperm.xlu1 %5816, %v7504_v51   ;;  %v1207_v19 = vadd.f32 %v1203_v30, %v1166_v27  ;;  %11782 = vst [vmem:[#allocation40_spill] sm:$0xff] %v7515_v11  ;;  %v1326_v1 = vmul.f32 %v7194_v37, %v1318_v48  ;;  %v1407_v32 = vadd.f32 %v1403_v28, %v7293_v60  ;;  %v11788_v5 = vmov 3  }
 0x27f   : > { %v1565_v14 = vmul.f32 %v1561_v7, %v7424_v40  ;;  %v786_v43 = vmul.f32 %v11786_v52, %v11785_v62  ;;  %v7527_v25 = vmul.f32 %v7515_v11, %v1572_v56  ;;  %v1434_v37 = vadd.f32 %v1426_v15, %v1084_v59 }
 0x280   : > { %v1248_v38 = vadd.f32 %v1244_v47, %v1207_v19  ;;  %v1490_v2 = vadd.f32 %v1486_v12, %v1407_v32  ;;  %v11789_v20 = vmov 12   ;;  %v7538_v57 = vperm.slane %v7436_v24, 1 }
 0x281   : > { %11787 = vst [vmem:[#allocation39_spill] sm:$0xff] %v7527_v25  ;;  %v1569_v21 = vadd.f32 %v1565_v14, %v11761_v53  ;;  %v1347_v50 = vrot.slane %v786_v43, 1  ;;  %v1438_v17 = vrot.slane %v1084_v59, 2  ;;  %v1359_v39 = vrot.slane %v786_v43, 2 }
 0x282   : > { %v1289_v22 = vadd.f32 %v1285_v10, %v1248_v38  ;;  %11790 = vst [vmem:[#allocation45_spill] sm:$0xff] %v7538_v57  ;;  %v1450_v29 = vrot.slane %v1084_v59, 3  ;;  %v11792_v58 = vmov 4   ;;  %v1371_v16 = vrot.slane %v786_v43, 3 }
 0x283   : > { %v1573_v42 = vadd.f32 %v1569_v21, %v1490_v2  ;;  %v1446_v35 = vadd.f32 %v1438_v17, %v1434_v37  ;;  %v1355_v33 = vadd.f32 %v1347_v50, %v786_v43  ;;  %v11793_v3 = vmov 5  }
 0x284   : > { %v1330_v44 = vadd.f32 %v1326_v1, %v1289_v22  ;;  %v7578_v49 = vperm.slane %v7436_v24, 3  ;;  %v7604_v24 = vpop.permute.xlu2 %1620  ;;  %v11799_v1 = vmov 9   ;;  %v11800_v15 = vmov 10  }
 0x285   : > { %1725 = vrot.lane.b32.xlu2 %v7465_v26, %s6028_s24  ;;  %5817 = vset.pattern.permute.xlu0 %v11788_v5  ;;  %v7541_v18 = vmul.f32 %v7538_v57, %v1573_v42  ;;  %v1458_v4 = vadd.f32 %v1450_v29, %v1446_v35  ;;  %v1367_v36 = vadd.f32 %v1359_v39, %v1355_v33  ;;  %v11801_v62 = vmov 11  }
 0x286   : > { %1634 = vrot.lane.b32.xlu1 %v7527_v25, %s6023_s21  ;;  %1707 = vperm.xlu0 %5817, %v7504_v51   ;;  %v1509_v9 = vrot.slane %v1330_v44, 1  ;;  %v1521_v45 = vrot.slane %v1330_v44, 2  ;;  %v1533_v47 = vrot.slane %v1330_v44, 3  ;;  %11795 = vst [vmem:[#allocation13_spill] sm:$0xff] %v7578_v49  ;;  %v11802_v22 = vmov 14  }
 0x287   : > { %5826 = vset.pattern.permute.xlu1 %v11789_v20  ;;  %11791 = vst [vmem:[#allocation35_spill] sm:$0xff] %v7541_v18  ;;  %v1467_v61 = vadd.f32 %v7318_v23, %v1458_v4  ;;  %v1379_v27 = vadd.f32 %v1371_v16, %v1367_v36  ;;  %v11803_v42 = vmov 15   ;;  %v11804_v33 = vmov 16  }
 0x288   : > { %v1517_v30 = vadd.f32 %v1509_v9, %v1330_v44  ;;  %vm11869_vm4 = vcmask 179200  }
 0x289   : > { %v1388_v28 = vadd.f32 %v11736_v6, %v1379_v27  ;;  %v1471_v59 = vmax.f32 %v1467_v61, 0.0  ;;  %v11806_v61 = vmov 18  }
 0x28a   : > { %v1529_v41 = vadd.f32 %v1521_v45, %v1517_v30  ;;  %v11805_v30 = vmov 17  }
 0x28b   : > { %v1392_v23 = vmax.f32 %v1388_v28, 0.0  ;;  %v1480_v31 = vperm.slane %v1471_v59, 0 }
 0x28c   : > { %v1541_v7 = vadd.f32 %v1533_v47, %v1529_v41  ;;  %v11807_v47 = vmov 19  }
 0x28d   : > { %1754 = vrot.lane.b32.xlu2 %v7465_v26, %s6031_s25  ;;  %v1401_v63 = vperm.slane %v1392_v23, 0  ;;  %v1484_v6 = vmul.f32 %v1480_v31, %v7387_v54  ;;  %v11809_v23 = vmov 13  }
 0x28e   : > { %1665 = vrot.lane.b32.xlu1 %v7541_v18, %s6024_s22  ;;  %5818 = vset.pattern.permute.xlu0 %v11792_v58  ;;  %v1550_v19 = vadd.f32 %v7369_v55, %v1541_v7  ;;  %v11794_v55 = vmov 6   ;;  %v11808_v7 = vmov 20  }
 0x28f   : > { %1736 = vperm.xlu0 %5818, %v7504_v51   ;;  %v1405_v10 = vmul.f32 %v1401_v63, %v7257_v34  ;;  %v1488_v56 = vadd.f32 %v1484_v6, %v7344_v8 }
 0x290   : > { %v1554_v13 = vmax.f32 %v1550_v19, 0.0 }
 0x291   : > { %v1409_v38 = vadd.f32 %v1405_v10, %v7293_v60  ;;  %v11811_v10 = vmov 22  }
 0x292   : > { %v1563_v12 = vperm.slane %v1554_v13, 0  ;;  %v11810_v13 = vmov 21  }
 0x293   : > { %v1492_v54 = vadd.f32 %v1488_v56, %v1409_v38  ;;  %v11812_v56 = vmov 0  }
 0x294   : > { %v1567_v46 = vmul.f32 %v1563_v12, %v7424_v40  ;;  %v11797_v40 = vmov 7  }
 0x295   : > { %1783 = vrot.lane.b32.xlu2 %v7465_v26, %s6033_s26 }
 0x296   : > { %1694 = vrot.lane.b32.xlu1 %v7541_v18, %s6026_s23  ;;  %v1571_v34 = vadd.f32 %v1567_v46, %v11761_v53  ;;  %v11798_v53 = vmov 8   ;;  %v11813_v46 = vmov 23  }
 0x297   : > { %5819 = vset.pattern.permute.xlu0 %v11793_v3 }
 0x298   : > { %1765 = vperm.xlu0 %5819, %v7504_v51   ;;  %v1575_v8 = vadd.f32 %v1571_v34, %v1492_v54 }
 0x29a   : > { %v7583_v60 = vmul.f32 %v7578_v49, %v1575_v8  ;;  %v11814_v8 = vmov 24  }
 0x29c   : > { %11796 = vst [vmem:[#allocation14_spill] sm:$0xff] %v7583_v60 }
 0x29d   : > { %1604 = vrot.lane.b32.xlu2 %v7527_v25, %s6021_s20 }
 0x29e   : > { %1723 = vrot.lane.b32.xlu1 %v7541_v18, %s6028_s24 }
 0x2a0   : > { %1606 = vrot.lane.b32.xlu0 %v7541_v18, %s6021_s20 }
 0x2a1   : > { %5820 = vset.pattern.permute.xlu0 %v11794_v55 }
 0x2a5   : > { %1636 = vrot.lane.b32.xlu2 %v7541_v18, %s6023_s21 }
 0x2a6   : > { %1752 = vrot.lane.b32.xlu1 %v7541_v18, %s6031_s25 }
 0x2a8   : > { %1663 = vrot.lane.b32.xlu0 %v7527_v25, %s6024_s22 }
 0x2ad   : > { %1692 = vrot.lane.b32.xlu2 %v7527_v25, %s6026_s23 }
 0x2ae   : > { %1781 = vrot.lane.b32.xlu1 %v7541_v18, %s6033_s26 }
 0x2b0   : > { %1631 = vrot.lane.b32.xlu0 %v7583_v60, %s6023_s21 }
 0x2b5   : > { %1721 = vrot.lane.b32.xlu2 %v7527_v25, %s6028_s24 }
 0x2b6   : > { %1598 = vrot.lane.b32.xlu1 %v7583_v60, %s6021_s20 }
 0x2b8   : > { %1794 = vperm.xlu0 %5820, %v7504_v51  }
 0x2bd   : > { %1750 = vrot.lane.b32.xlu2 %v7527_v25, %s6031_s25 }
 0x2be   : > { %1689 = vrot.lane.b32.xlu1 %v7583_v60, %s6026_s23 }
 0x2c0   : > { %5821 = vset.pattern.permute.xlu0 %v11797_v40 }
 0x2c1   : > { %1823 = vperm.xlu0 %5821, %v7504_v51  }
 0x2c5   : > { %1779 = vrot.lane.b32.xlu2 %v7527_v25, %s6033_s26 }
 0x2c6   : > { %1718 = vrot.lane.b32.xlu1 %v7583_v60, %s6028_s24 }
 0x2c9   : > { %5822 = vset.pattern.permute.xlu0 %v11798_v53 }
 0x2ca   : > { %1852 = vperm.xlu0 %5822, %v7504_v51  }
 0x2cd   : > { %1660 = vrot.lane.b32.xlu2 %v7583_v60, %s6024_s22 }
 0x2ce   : > { %1747 = vrot.lane.b32.xlu1 %v7583_v60, %s6031_s25 }
 0x2cf   : > { %v7612_v48 = vpop.permute.xlu2 %1667 }
 0x2d2   : > { %5823 = vset.pattern.permute.xlu0 %v11799_v1 }
 0x2d3   : > { %1881 = vperm.xlu0 %5823, %v7504_v51  }
 0x2d5   : > { %1808 = vrot.lane.b32.xlu2 %v7527_v25, %s6034_s27 }
 0x2d6   : > { %1776 = vrot.lane.b32.xlu1 %v7583_v60, %s6033_s26 }
 0x2d7   : > { %v7620_v32 = vpop.permute.xlu2 %1696 }
 0x2db   : > { %5824 = vset.pattern.permute.xlu0 %v11800_v15 }
 0x2dc   : > { %1910 = vperm.xlu0 %5824, %v7504_v51  }
 0x2dd   : > { %1812 = vrot.lane.b32.xlu2 %v7465_v26, %s6034_s27 }
 0x2de   : > { %1805 = vrot.lane.b32.xlu1 %v7583_v60, %s6034_s27 }
 0x2df   : > { %v7628_v14 = vpop.permute.xlu2 %1725 }
 0x2e4   : > { %5825 = vset.pattern.permute.xlu0 %v11801_v62 }
 0x2e5   : > { %1939 = vperm.xlu0 %5825, %v7504_v51   ;;  %1837 = vrot.lane.b32.xlu2 %v7527_v25, %s6035_s30 }
 0x2e6   : > { %1810 = vrot.lane.b32.xlu1 %v7541_v18, %s6034_s27 }
 0x2e7   : > { %v7636_v52 = vpop.permute.xlu2 %1754 }
 0x2e8   : > { %v7638_v43 = vpop.permute.xlu1 %1608 }
 0x2ed   : > { %1968 = vrot.lane.b32.xlu0 %v7583_v60, %s11430_s9  ;;  %1841 = vrot.lane.b32.xlu2 %v7465_v26, %s6035_s30 }
 0x2ee   : > { %1834 = vrot.lane.b32.xlu1 %v7583_v60, %s6035_s30  ;;  %5828 = vset.pattern.permute.xlu0 %v11802_v22 }
 0x2ef   : > { %v7647_v2 = vpop.permute.xlu2 %1783 }
 0x2f0   : > { %v7649_v44 = vpop.permute.xlu1 %1649 }
 0x2f5   : > { %1993 = vrot.lane.b32.xlu0 %v7541_v18, %s6046_s10  ;;  %1866 = vrot.lane.b32.xlu2 %v7527_v25, %s6038_s4 }
 0x2f6   : > { %1839 = vrot.lane.b32.xlu1 %v7541_v18, %s6035_s30 }
 0x2f7   : > { %v7657_v37 = vpop.permute.xlu2 %1604 }
 0x2f8   : > { %v7659_v21 = vpop.permute.xlu1 %1634 }
 0x2fd   : > { %1870 = vrot.lane.b32.xlu2 %v7465_v26, %s6038_s4  ;;  %2009 = vperm.xlu0 %5828, %v7504_v51  }
 0x2fe   : > { %1863 = vrot.lane.b32.xlu1 %v7583_v60, %s6038_s4 }
 0x2ff   : > { %v7666_v50 = vpop.permute.xlu2 %1636 }
 0x300   : > { %v7668_v17 = vpop.permute.xlu1 %1665 }
 0x305   : > { %1895 = vrot.lane.b32.xlu2 %v7527_v25, %s6039_s5  ;;  %5829 = vset.pattern.permute.xlu0 %v11803_v42 }
 0x306   : > { %1868 = vrot.lane.b32.xlu1 %v7541_v18, %s6038_s4  ;;  %2038 = vperm.xlu0 %5829, %v7504_v51  }
 0x307   : > { %v7676_v35 = vpop.permute.xlu2 %1692 }
 0x308   : > { %v7678_v9 = vpop.permute.xlu1 %1694 }
 0x30d   : > { %1899 = vrot.lane.b32.xlu2 %v7465_v26, %s6039_s5 }
 0x30e   : > { %1892 = vrot.lane.b32.xlu1 %v7583_v60, %s6039_s5  ;;  %5830 = vset.pattern.permute.xlu0 %v11804_v33 }
 0x30f   : > { %v7685_v39 = vpop.permute.xlu2 %1721  ;;  %2067 = vperm.xlu0 %5830, %v7504_v51  }
 0x310   : > { %v7688_v29 = vpop.permute.xlu1 %1723 }
 0x315   : > { %1924 = vrot.lane.b32.xlu2 %v7527_v25, %s6041_s6 }
 0x316   : > { %1897 = vrot.lane.b32.xlu1 %v7541_v18, %s6039_s5 }
 0x317   : > { %v7694_v4 = vpop.permute.xlu2 %1750  ;;  %5831 = vset.pattern.permute.xlu0 %v11805_v30 }
 0x318   : > { %v7697_v36 = vpop.permute.xlu1 %1752  ;;  %2096 = vperm.xlu0 %5831, %v7504_v51  }
 0x31d   : > { %1928 = vrot.lane.b32.xlu2 %v7465_v26, %s6041_s6 }
 0x31e   : > { %1921 = vrot.lane.b32.xlu1 %v7583_v60, %s6041_s6 }
 0x31f   : > { %v7704_v16 = vpop.permute.xlu2 %1779 }
 0x320   : > { %v7706_v45 = vpop.permute.xlu1 %1781  ;;  %5832 = vset.pattern.permute.xlu0 %v11806_v61 }
 0x321   : > { %2125 = vperm.xlu0 %5832, %v7504_v51  }
 0x325   : > { %1962 = vrot.lane.b32.xlu2 %v7527_v25, %s11430_s9 }
 0x326   : > { %1926 = vrot.lane.b32.xlu1 %v7541_v18, %s6041_s6 }
 0x327   : > { %v7714_v41 = vpop.permute.xlu2 %1660 }
 0x328   : > { %v7716_v27 = vpop.permute.xlu1 %1598 }
 0x329   : > { %5833 = vset.pattern.permute.xlu0 %v11807_v47 }
 0x32a   : > { %2154 = vperm.xlu0 %5833, %v7504_v51  }
 0x32d   : > { %1966 = vrot.lane.b32.xlu2 %v7465_v26, %s11430_s9 }
 0x32e   : > { %1951 = vperm.xlu1 %5826, %v7504_v51  }
 0x32f   : > { %v7723_v28 = vpop.permute.xlu2 %1808 }
 0x330   : > { %v7725_v59 = vpop.permute.xlu1 %1689 }
 0x332   : > { %5834 = vset.pattern.permute.xlu0 %v11808_v7  ;;  %v7786_v7 = vpop.permute.xlu0 %1638 }
 0x333   : > { %2183 = vperm.xlu0 %5834, %v7504_v51  }
 0x335   : > { %1991 = vrot.lane.b32.xlu2 %v7527_v25, %s6046_s10 }
 0x336   : > { %1964 = vrot.lane.b32.xlu1 %v7541_v18, %s11430_s9 }
 0x337   : > { %v7733_v19 = vpop.permute.xlu2 %1812  ;;  %5827 = vset.pattern.permute.xlu1 %v11809_v23 }
 0x338   : > { %v7736_v31 = vpop.permute.xlu1 %1718 }
 0x33a   : > { %v7800_v47 = vpop.permute.xlu0 %1678 }
 0x33b   : > { %5835 = vset.pattern.permute.xlu0 %v11810_v13 }
 0x33c   : > { %2212 = vperm.xlu0 %5835, %v7504_v51  }
 0x33d   : > { %1997 = vrot.lane.b32.xlu2 %v7583_v60, %s6046_s10 }
 0x33e   : > { %1980 = vperm.xlu1 %5827, %v7504_v51  }
 0x33f   : > { %v7743_v63 = vpop.permute.xlu2 %1837 }
 0x340   : > { %v7745_v6 = vpop.permute.xlu1 %1747 }
 0x342   : > { %v7810_v62 = vpop.permute.xlu0 %1707 }
 0x344   : > { %5836 = vset.pattern.permute.xlu0 %v11811_v10 }
 0x345   : > { %2022 = vrot.lane.b32.xlu2 %v7541_v18, %s6048_s11  ;;  %2241 = vperm.xlu0 %5836, %v7504_v51  }
 0x346   : > { %1995 = vrot.lane.b32.xlu1 %v7465_v26, %s6046_s10 }
 0x347   : > { %v7753_v12 = vpop.permute.xlu2 %1841  ;;  %5839 = vset.pattern.permute.xlu1 %v11812_v56 }
 0x348   : > { %v7756_v38 = vpop.permute.xlu1 %1776 }
 0x34a   : > { %v7824_v1 = vpop.permute.xlu0 %1736 }
 0x34d   : > { %2026 = vrot.lane.b32.xlu2 %v7583_v60, %s6048_s11  ;;  %5837 = vset.pattern.permute.xlu0 %v11813_v46 }
 0x34e   : > { %2020 = vrot.lane.b32.xlu1 %v7527_v25, %s6048_s11  ;;  %2270 = vperm.xlu0 %5837, %v7504_v51  }
 0x34f   : > { %v7764_v54 = vpop.permute.xlu2 %1866 }
 0x350   : > { %v7766_v34 = vpop.permute.xlu1 %1805 }
 0x352   : > { %v7834_v53 = vpop.permute.xlu0 %1765 }
 0x355   : > { %2051 = vrot.lane.b32.xlu2 %v7541_v18, %s6049_s14 }
 0x356   : > { %2024 = vrot.lane.b32.xlu1 %v7465_v26, %s6048_s11  ;;  %5838 = vset.pattern.permute.xlu0 %v11814_v8 }
 0x357   : > { %v7773_v56 = vpop.permute.xlu2 %1870  ;;  %2299 = vperm.xlu0 %5838, %v7504_v51  }
 0x358   : > { %v7776_v46 = vpop.permute.xlu1 %1810 }
 0x35a   : > { %v7844_v3 = vpop.permute.xlu0 %1606 }
 0x35d   : > { %2055 = vrot.lane.b32.xlu2 %v7583_v60, %s6049_s14 }
 0x35e   : > { %2049 = vrot.lane.b32.xlu1 %v7527_v25, %s6049_s14 }
 0x35f   : > { %v7782_v10 = vpop.permute.xlu2 %1895 }
 0x360   : > { %11815 = vst [vmem:[#allocation43_spill] sm:$0xff] %v7782_v10  ;;  %v7784_v13 = vpop.permute.xlu1 %1834 }
 0x362   : > { %v7858_v0 = vpop.permute.xlu0 %1663 }
 0x365   : > { %2080 = vrot.lane.b32.xlu2 %v7541_v18, %s6053_s15 }
 0x366   : > { %2053 = vrot.lane.b32.xlu1 %v7465_v26, %s6049_s14 }
 0x367   : > { %v7792_v51 = vpop.permute.xlu2 %1899 }
 0x368   : > { %11816 = vst [vmem:[#allocation29_spill] sm:$0xff] %v7792_v51  ;;  %v7794_v8 = vpop.permute.xlu1 %1839 }
 0x36d   : > { %2084 = vrot.lane.b32.xlu2 %v7583_v60, %s6053_s15 }
 0x36e   : > { %2078 = vrot.lane.b32.xlu1 %v7527_v25, %s6053_s15 }
 0x36f   : > { %v7802_v20 = vpop.permute.xlu2 %1924 }
 0x370   : > { %11817 = vst [vmem:[#allocation6_spill] sm:$0xff] %v7802_v20  ;;  %v7804_v61 = vpop.permute.xlu1 %1863 }
 0x375   : > { %2109 = vrot.lane.b32.xlu2 %v7541_v18, %s6054_s17 }
 0x376   : > { %2082 = vrot.lane.b32.xlu1 %v7465_v26, %s6053_s15 }
 0x377   : > { %v7812_v30 = vpop.permute.xlu2 %1928 }
 0x378   : > { %11818 = vst [vmem:[#allocation49_spill] sm:$0xff] %v7812_v30  ;;  %v7814_v33 = vpop.permute.xlu1 %1868 }
 0x37d   : > { %2113 = vrot.lane.b32.xlu2 %v7583_v60, %s6054_s17 }
 0x37e   : > { %2107 = vrot.lane.b32.xlu1 %v7527_v25, %s6054_s17 }
 0x37f   : > { %v7820_v15 = vpop.permute.xlu2 %1962 }
 0x380   : > { %11819 = vst [vmem:[#allocation46_spill] sm:$0xff] %v7820_v15  ;;  %v7822_v42 = vpop.permute.xlu1 %1892 }
 0x385   : > { %2138 = vrot.lane.b32.xlu2 %v7541_v18, %s11820_s16 }
 0x386   : > { %2111 = vrot.lane.b32.xlu1 %v7465_v26, %s6054_s17 }
 0x387   : > { %v7830_v22 = vpop.permute.xlu2 %1966 }
 0x388   : > { %11821 = vst [vmem:[#allocation2_spill] sm:$0xff] %v7830_v22  ;;  %v7832_v23 = vpop.permute.xlu1 %1897 }
 0x389   : > { %11822 = vst [vmem:[#allocation8_spill] sm:$0xff] %v7832_v23 }
 0x38d   : > { %2142 = vrot.lane.b32.xlu2 %v7583_v60, %s11820_s16 }
 0x38e   : > { %2136 = vrot.lane.b32.xlu1 %v7527_v25, %s11820_s16 }
 0x38f   : > { %v7840_v40 = vpop.permute.xlu2 %1991 }
 0x390   : > { %11823 = vst [vmem:[#allocation9_spill] sm:$0xff] %v7840_v40  ;;  %v7842_v55 = vpop.permute.xlu1 %1921  ;;  %v7872_v40 = vpop.permute.xlu0 %1631 }
 0x391   : > { %11824 = vst [vmem:[#allocation41_spill] sm:$0xff] %v7842_v55 }
 0x395   : > { %2167 = vrot.lane.b32.xlu2 %v7541_v18, %s11825_s8 }
 0x396   : > { %2140 = vrot.lane.b32.xlu1 %v7465_v26, %s11820_s16 }
 0x397   : > { %v7850_v58 = vpop.permute.xlu2 %1997 }
 0x398   : > { %11826 = vst [vmem:[#allocation3_spill] sm:$0xff] %v7850_v58  ;;  %v7852_v5 = vpop.permute.xlu1 %1926  ;;  %v7882_v22 = vpop.permute.xlu0 %1794 }
 0x399   : > { %11827 = vst [vmem:[#allocation57_spill] sm:$0xff] %v7852_v5 }
 0x39d   : > { %2171 = vrot.lane.b32.xlu2 %v7583_v60, %s11825_s8 }
 0x39e   : > { %2165 = vrot.lane.b32.xlu1 %v7527_v25, %s11825_s8 }
 0x39f   : > { %v7860_v57 = vpop.permute.xlu2 %2022 }
 0x3a0   : > { %11828 = vst [vmem:[#allocation44_spill] sm:$0xff] %v7860_v57  ;;  %v7862_v49 = vpop.permute.xlu1 %1951  ;;  %v7892_v15 = vpop.permute.xlu0 %1823 }
 0x3a1   : > { %11829 = vst [vmem:[#allocation54_spill] sm:$0xff] %v7862_v49 }
 0x3a5   : > { %2196 = vrot.lane.b32.xlu2 %v7541_v18, %s11830_s7 }
 0x3a6   : > { %2169 = vrot.lane.b32.xlu1 %v7465_v26, %s11825_s8 }
 0x3a7   : > { %v7868_v11 = vpop.permute.xlu2 %2026 }
 0x3a8   : > { %11831 = vst [vmem:[#allocation52_spill] sm:$0xff] %v7868_v11  ;;  %v7870_v58 = vpop.permute.xlu1 %1964  ;;  %v7902_v5 = vpop.permute.xlu0 %1852 }
 0x3a9   : > { %11832 = vst [vmem:[#allocation10_spill] sm:$0xff] %v7870_v58 }
 0x3ad   : > { %2200 = vrot.lane.b32.xlu2 %v7583_v60, %s11830_s7 }
 0x3ae   : > { %2194 = vrot.lane.b32.xlu1 %v7527_v25, %s11830_s7 }
 0x3af   : > { %v7878_v57 = vpop.permute.xlu2 %2051 }
 0x3b0   : > { %11833 = vst [vmem:[#allocation11_spill] sm:$0xff] %v7878_v57  ;;  %v7880_v49 = vpop.permute.xlu1 %1980 }
 0x3b1   : > { %11834 = vst [vmem:[#allocation4_spill] sm:$0xff] %v7880_v49 }
 0x3b5   : > { %2225 = vrot.lane.b32.xlu2 %v7541_v18, %s11835_s28 }
 0x3b6   : > { %2198 = vrot.lane.b32.xlu1 %v7465_v26, %s11830_s7 }
 0x3b7   : > { %v7888_v11 = vpop.permute.xlu2 %2055 }
 0x3b8   : > { %11836 = vst [vmem:[#allocation87_spill] sm:$0xff] %v7888_v11  ;;  %v7890_v58 = vpop.permute.xlu1 %1995 }
 0x3b9   : > { %11837 = vst [vmem:[#allocation58_spill] sm:$0xff] %v7890_v58 }
 0x3bd   : > { %2229 = vrot.lane.b32.xlu2 %v7583_v60, %s11835_s28 }
 0x3be   : > { %2223 = vrot.lane.b32.xlu1 %v7527_v25, %s11835_s28 }
 0x3bf   : > { %v7898_v57 = vpop.permute.xlu2 %2080 }
 0x3c0   : > { %11838 = vst [vmem:[#allocation50_spill] sm:$0xff] %v7898_v57  ;;  %v7900_v49 = vpop.permute.xlu1 %2020  ;;  %v7916_v57 = vpop.permute.xlu0 %1881 }
 0x3c1   : > { %11839 = vst [vmem:[#allocation63_spill] sm:$0xff] %v7900_v49 }
 0x3c5   : > { %2254 = vrot.lane.b32.xlu2 %v7541_v18, %s11840_s18 }
 0x3c6   : > { %2227 = vrot.lane.b32.xlu1 %v7465_v26, %s11835_s28 }
 0x3c7   : > { %v7908_v11 = vpop.permute.xlu2 %2084 }
 0x3c8   : > { %11841 = vst [vmem:[#allocation66_spill] sm:$0xff] %v7908_v11  ;;  %v7910_v58 = vpop.permute.xlu1 %2024  ;;  %v7930_v30 = vpop.permute.xlu0 %1910 }
 0x3c9   : > { %11842 = vst [vmem:[#allocation97_spill] sm:$0xff] %v7910_v58 }
 0x3ca   : > { %11848 = vst [vmem:[#allocation73_spill] sm:$0xff] %v7930_v30 }
 0x3cd   : > { %2258 = vrot.lane.b32.xlu2 %v7583_v60, %s11840_s18 }
 0x3ce   : > { %2252 = vrot.lane.b32.xlu1 %v7527_v25, %s11840_s18 }
 0x3cf   : > { %v7918_v49 = vpop.permute.xlu2 %2109 }
 0x3d0   : > { %11843 = vst [vmem:[#allocation67_spill] sm:$0xff] %v7918_v49  ;;  %v7920_v20 = vpop.permute.xlu1 %2049 }
 0x3d1   : > { %11844 = vst [vmem:[#allocation94_spill] sm:$0xff] %v7920_v20 }
 0x3d5   : > { %2283 = vrot.lane.b32.xlu2 %v7541_v18, %s11845_s29  ;;  %v7940_v18 = vpop.permute.xlu0 %1939 }
 0x3d6   : > { %2256 = vrot.lane.b32.xlu1 %v7465_v26, %s11840_s18  ;;  %11851 = vst [vmem:[#allocation81_spill] sm:$0xff] %v7940_v18 }
 0x3d7   : > { %v7928_v58 = vpop.permute.xlu2 %2113 }
 0x3d8   : > { %v7926_v11 = vpop.permute.xlu1 %2053  ;;  %11847 = vst [vmem:[#allocation68_spill] sm:$0xff] %v7928_v58 }
 0x3d9   : > { %11846 = vst [vmem:[#allocation69_spill] sm:$0xff] %v7926_v11 }
 0x3dd   : > { %2287 = vrot.lane.b32.xlu2 %v7583_v60, %s11845_s29  ;;  %v7948_v55 = vpop.permute.xlu0 %1968 }
 0x3de   : > { %2281 = vrot.lane.b32.xlu1 %v7527_v25, %s11845_s29  ;;  %11854 = vst [vmem:[#allocation78_spill] sm:$0xff] %v7948_v55 }
 0x3df   : > { %v7938_v20 = vpop.permute.xlu2 %2138 }
 0x3e0   : > { %v7936_v49 = vpop.permute.xlu1 %2078  ;;  %11850 = vst [vmem:[#allocation75_spill] sm:$0xff] %v7938_v20 }
 0x3e1   : > { %11849 = vst [vmem:[#allocation79_spill] sm:$0xff] %v7936_v49 }
 0x3e5   : > { %v7954_v25 = vpop.permute.xlu0 %1993 }
 0x3e6   : > { %2285 = vrot.lane.b32.xlu1 %v7465_v26, %s11845_s29  ;;  %11857 = vst [vmem:[#allocation93_spill] sm:$0xff] %v7954_v25 }
 0x3e7   : > { %v7946_v58 = vpop.permute.xlu2 %2142 }
 0x3e8   : > { %v7944_v11 = vpop.permute.xlu1 %2082  ;;  %11853 = vst [vmem:[#allocation84_spill] sm:$0xff] %v7946_v58  ;;  %v1611_v58 = vsel %vm11427_vm0, %v7844_v3, %v7638_v43 }
 0x3e9   : > { %11852 = vst [vmem:[#allocation83_spill] sm:$0xff] %v7944_v11  ;;  %v1625_v11 = vmul.f32 %v7604_v24, %v1611_v58 }
 0x3ed   : > { %v7958_v20 = vpop.permute.xlu0 %2009 }
 0x3ee   : > { %11859 = vst [vmem:[#allocation20_spill] sm:$0xff] %v7958_v20  ;;  %v11865_v20 = vld [vmem:[#allocation33_spill] sm:$0xff] }
 0x3ef   : > { %v7952_v60 = vpop.permute.xlu2 %2167 }
 0x3f0   : > { %v7950_v30 = vpop.permute.xlu1 %2107  ;;  %11856 = vst [vmem:[#allocation89_spill] sm:$0xff] %v7952_v60  ;;  %v1610_v60 = vsel %vm11427_vm0, %v7657_v37, %v7844_v3  ;;  %v1612_v3 = vsel %vm11427_vm0, %v7638_v43, %v7716_v27 }
 0x3f1   : > { %11855 = vst [vmem:[#allocation88_spill] sm:$0xff] %v7950_v30  ;;  %v1624_v58 = vmul.f32 %v7604_v24, %v1610_v60  ;;  %v1626_v60 = vmul.f32 %v7604_v24, %v1612_v3 }
 0x3f3   : > { %v1628_v43 = vadd.f32 %v1624_v58, %v11865_v20 }
 0x3f5   : > { %v7968_v26 = vpop.permute.xlu0 %2038 }
 0x3f6   : > { %11862 = vst [vmem:[#allocation102_spill] sm:$0xff] %v7968_v26  ;;  %v1629_v26 = vadd.f32 %v1625_v11, %v11865_v20  ;;  %v1669_v11 = vsel %vm11428_vm2, %v7858_v0, %v7668_v17 }
 0x3f7   : > { %v7960_v18 = vpop.permute.xlu2 %2171 }
 0x3f8   : > { %v7956_v49 = vpop.permute.xlu1 %2111  ;;  %11860 = vst [vmem:[#allocation98_spill] sm:$0xff] %v7960_v18  ;;  %v1641_v18 = vsel %vm11426_vm1, %v7666_v50, %v7786_v7 }
 0x3f9   : > { %11858 = vst [vmem:[#allocation96_spill] sm:$0xff] %v7956_v49  ;;  %v1617_v49 = vsel %vm11427_vm0, %v7716_v27, %v7657_v37  ;;  %v1640_v37 = vsel %vm11426_vm1, %v7659_v21, %v7666_v50  ;;  %v1654_v25 = vmul.f32 %v7649_v44, %v1641_v18 }
 0x3fa   : > { %v1653_v18 = vmul.f32 %v7649_v44, %v1640_v37  ;;  %v1705_v37 = vsel %vm323_vm3, %v7725_v59, %v7676_v35 }
 0x3fb   : > { %v1658_v27 = vadd.f32 %v1654_v25, %v1629_v26  ;;  %v1682_v26 = vmul.f32 %v7800_v47, %v1669_v11  ;;  %v1642_v25 = vsel %vm11426_vm1, %v7786_v7, %v7872_v40 }
 0x3fc   : > { %v1657_v3 = vadd.f32 %v1653_v18, %v1628_v43  ;;  %v1655_v7 = vmul.f32 %v7649_v44, %v1642_v25  ;;  %v1710_v43 = vmul.f32 %v7810_v62, %v1705_v37 }
 0x3fd   : > { %v8004_v50 = vpop.permute.xlu0 %2067 }
 0x400   : > { %v7962_v23 = vpop.permute.xlu1 %2136 }
 0x401   : > { %11861 = vst [vmem:[#allocation101_spill] sm:$0xff] %v7962_v23  ;;  %v7981_v23 = vpop.permute.xlu2 %2196 }
 0x402   : > { %11864 = vst [vmem:[#allocation18_spill] sm:$0xff] %v7981_v23  ;;  %v1670_v23 = vsel %vm11428_vm2, %v7668_v17, %v7612_v48 }
 0x403   : > { %v1683_v51 = vmul.f32 %v7800_v47, %v1670_v23  ;;  %v1676_v23 = vsel %vm11428_vm2, %v7714_v41, %v7858_v0  ;;  %v1671_v0 = vsel %vm11428_vm2, %v7612_v48, %v7714_v41 }
 0x405   : > { %v1687_v58 = vadd.f32 %v1683_v51, %v1658_v27  ;;  %v1681_v51 = vmul.f32 %v7800_v47, %v1676_v23  ;;  %v1757_v27 = vsel %vm11869_vm4, %v7697_v36, %v7636_v52 }
 0x408   : > { %v7973_v30 = vpop.permute.xlu1 %2140 }
 0x409   : > { %11863 = vst [vmem:[#allocation12_spill] sm:$0xff] %v7973_v30  ;;  %v1623_v30 = vmul.f32 %v7604_v24, %v1617_v49  ;;  %v1647_v49 = vsel %vm11426_vm1, %v7872_v40, %v7659_v21  ;;  %v1699_v24 = vsel %vm323_vm3, %v7678_v9, %v7620_v32  ;;  %v1698_v21 = vsel %vm323_vm3, %v7676_v35, %v7678_v9  ;;  %v8031_v9 = vpop.permute.xlu2 %2200 }
 0x40a   : > { %v1652_v17 = vmul.f32 %v7649_v44, %v1647_v49  ;;  %v1712_v40 = vmul.f32 %v7810_v62, %v1699_v24  ;;  %v1711_v49 = vmul.f32 %v7810_v62, %v1698_v21  ;;  %v1700_v35 = vsel %vm323_vm3, %v7620_v32, %v7725_v59  ;;  %v8054_v32 = vpop.permute.xlu0 %2096 }
 0x40b   : > { %v1627_v55 = vadd.f32 %v1623_v30, %v11865_v20  ;;  %v1630_v30 = vadd.f32 %v1626_v60, %v11865_v20  ;;  %v1686_v20 = vadd.f32 %v1682_v26, %v1657_v3  ;;  %vm11866_vm1 = vcmask 310272  }
 0x40c   : > { %vm11867_vm0 = vmmov %vm11866_vm1  ;;  %v1716_v41 = vadd.f32 %v1712_v40, %v1687_v58  ;;  %v1684_v59 = vmul.f32 %v7800_v47, %v1671_v0  ;;  %v1713_v21 = vmul.f32 %v7810_v62, %v1700_v35 }
 0x40d   : > { %v1656_v11 = vadd.f32 %v1652_v17, %v1627_v55  ;;  %v1659_v60 = vadd.f32 %v1655_v7, %v1630_v30  ;;  %v1734_v55 = vsel %vm11866_vm1, %v7736_v31, %v7685_v39  ;;  %v1728_v44 = vsel %vm11867_vm0, %v7688_v29, %v7628_v14  ;;  %vm11868_vm2 = vmmov %vm11867_vm0 }
 0x40e   : > { %v1727_v48 = vsel %vm11868_vm2, %v7685_v39, %v7688_v29  ;;  %vm11870_vm1 = vmmov %vm11867_vm0  ;;  %v1715_v29 = vadd.f32 %v1711_v49, %v1686_v20  ;;  %v1739_v47 = vmul.f32 %v7824_v1, %v1734_v55  ;;  %v1741_v17 = vmul.f32 %v7824_v1, %v1728_v44 }
 0x40f   : > { %v1685_v18 = vadd.f32 %v1681_v51, %v1656_v11  ;;  %v1729_v24 = vsel %vm11870_vm1, %v7628_v14, %v7736_v31  ;;  %vm11871_vm0 = vmmov %vm11869_vm4  ;;  %v1740_v30 = vmul.f32 %v7824_v1, %v1727_v48  ;;  %v1688_v14 = vadd.f32 %v1684_v59, %v1659_v60 }
 0x410   : > { %v8008_v10 = vpop.permute.xlu1 %2165  ;;  %v1763_v26 = vsel %vm11871_vm0, %v7745_v6, %v7694_v4  ;;  %vm11872_vm2 = vmmov %vm11871_vm0  ;;  %v1742_v23 = vmul.f32 %v7824_v1, %v1729_v24  ;;  %vm11874_vm1 = vcmask 171008  }
 0x411   : > { %v1756_v39 = vsel %vm11872_vm2, %v7694_v4, %v7697_v36  ;;  %v1714_v31 = vadd.f32 %v1710_v43, %v1685_v18  ;;  %vm11873_vm4 = vmmov %vm11871_vm0  ;;  %v1768_v3 = vmul.f32 %v7834_v53, %v1763_v26  ;;  %v1792_v62 = vsel %vm11874_vm1, %v7756_v38, %v7704_v16  ;;  %v8096_v51 = vpop.permute.xlu2 %2225 }
 0x412   : > { %v1758_v58 = vsel %vm11873_vm4, %v7636_v52, %v7745_v6  ;;  %v1745_v4 = vadd.f32 %v1741_v17, %v1716_v41  ;;  %v1770_v36 = vmul.f32 %v7834_v53, %v1757_v27  ;;  %v1769_v37 = vmul.f32 %v7834_v53, %v1756_v39  ;;  %vm11875_vm0 = vmmov %vm11874_vm1 }
 0x413   : > { %v1786_v40 = vsel %vm11875_vm0, %v7706_v45, %v7647_v2  ;;  %v1744_v1 = vadd.f32 %v1740_v30, %v1715_v29  ;;  %v1717_v7 = vadd.f32 %v1713_v21, %v1688_v14  ;;  %v1743_v11 = vadd.f32 %v1739_v47, %v1714_v31  ;;  %vm11876_vm2 = vmmov %vm11875_vm0 }
 0x414   : > { %v1787_v52 = vsel %vm11876_vm2, %v7647_v2, %v7756_v38  ;;  %vm11877_vm4 = vmmov %vm11875_vm0  ;;  %v1771_v49 = vmul.f32 %v7834_v53, %v1758_v58  ;;  %v1797_v20 = vmul.f32 %v7882_v22, %v1792_v62  ;;  %vm11878_vm1 = vcmask 162816   ;;  %v8100_v38 = vpop.permute.xlu0 %2125 }
 0x415   : > { %v1785_v6 = vsel %vm11877_vm4, %v7704_v16, %v7706_v45  ;;  %v1821_v0 = vsel %vm11878_vm1, %v7766_v34, %v7723_v28  ;;  %v1799_v35 = vmul.f32 %v7882_v22, %v1786_v40  ;;  %v1746_v43 = vadd.f32 %v1742_v23, %v1717_v7  ;;  %vm11879_vm0 = vmmov %vm11878_vm1  ;;  %v11894_v7 = vld [vmem:[#allocation8_spill] sm:$0xff] }
 0x416   : > { %v1798_v60 = vmul.f32 %v7882_v22, %v1785_v6  ;;  %v1772_v2 = vadd.f32 %v1768_v3, %v1743_v11  ;;  %v1800_v16 = vmul.f32 %v7882_v22, %v1787_v52  ;;  %v1816_v53 = vsel %vm11879_vm0, %v7733_v19, %v7766_v34  ;;  %vm11880_vm2 = vmmov %vm11879_vm0 }
 0x417   : > { %v1814_v45 = vsel %vm11880_vm2, %v7723_v28, %v7776_v46  ;;  %vm11881_vm4 = vmmov %vm11879_vm0  ;;  %v1774_v48 = vadd.f32 %v1770_v36, %v1745_v4  ;;  %v1826_v41 = vmul.f32 %v7892_v15, %v1821_v0  ;;  %v1773_v27 = vadd.f32 %v1769_v37, %v1744_v1  ;;  %v11890_v4 = vld [vmem:[#allocation29_spill] sm:$0xff]  ;;  %v11892_v36 = vld [vmem:[#allocation43_spill] sm:$0xff] }
 0x418   : > { %v8063_v25 = vpop.permute.xlu1 %2169  ;;  %v1815_v55 = vsel %vm11881_vm4, %v7776_v46, %v7733_v19  ;;  %vm11882_vm1 = vcmask 154624   ;;  %v1775_v59 = vadd.f32 %v1771_v49, %v1746_v43  ;;  %v1801_v34 = vadd.f32 %v1797_v20, %v1772_v2  ;;  %v11897_v20 = vld [vmem:[#allocation73_spill] sm:$0xff] }
 0x419   : > { %v1850_v22 = vsel %vm11882_vm1, %v7784_v13, %v7743_v63  ;;  %vm11883_vm0 = vmmov %vm11882_vm1  ;;  %v1829_v46 = vmul.f32 %v7892_v15, %v1816_v53  ;;  %v1827_v18 = vmul.f32 %v7892_v15, %v1814_v45  ;;  %v1828_v24 = vmul.f32 %v7892_v15, %v1815_v55  ;;  %v8155_v37 = vpop.permute.xlu2 %2229  ;;  %v11899_v43 = vld [vmem:[#allocation49_spill] sm:$0xff] }
 0x41a   : > { %v1845_v28 = vsel %vm11883_vm0, %v7753_v12, %v7784_v13  ;;  %vm11884_vm2 = vmmov %vm11883_vm0  ;;  %v1804_v39 = vadd.f32 %v1800_v16, %v1775_v59  ;;  %v1802_v29 = vadd.f32 %v1798_v60, %v1773_v27  ;;  %v1803_v21 = vadd.f32 %v1799_v35, %v1774_v48  ;;  %v11898_v35 = vld [vmem:[#allocation41_spill] sm:$0xff] }
 0x41b   : > { %v1843_v19 = vsel %vm11884_vm2, %v7743_v63, %v7794_v8  ;;  %vm11885_vm4 = vmmov %vm11883_vm0  ;;  %v1855_v47 = vmul.f32 %v7902_v5, %v1850_v22  ;;  %v1830_v13 = vadd.f32 %v1826_v41, %v1801_v34  ;;  %v1858_v17 = vmul.f32 %v7902_v5, %v1845_v28  ;;  %v11903_v55 = vld [vmem:[#allocation57_spill] sm:$0xff]  ;;  %v2315_v41 = vld [vmem:[%s11212_s2 + $0x78] sm:$0xf] }
 0x41c   : > { %v1844_v26 = vsel %vm11885_vm4, %v7794_v8, %v7753_v12  ;;  %v1856_v63 = vmul.f32 %v7902_v5, %v1843_v19  ;;  %vm11886_vm1 = vcmask 146432   ;;  %v1833_v31 = vadd.f32 %v1829_v46, %v1804_v39  ;;  %v8146_v3 = vpop.permute.xlu0 %2154  ;;  %2318 = vperm.xlu1 %5839, %v2315_v41   ;;  %v11905_v28 = vld [vmem:[#allocation46_spill] sm:$0xff] }
 0x41d   : > { %v1879_v30 = vsel %vm11886_vm1, %v7804_v61, %v7764_v54  ;;  %v1857_v15 = vmul.f32 %v7902_v5, %v1844_v26  ;;  %vm11887_vm0 = vmmov %vm11886_vm1  ;;  %v1831_v23 = vadd.f32 %v1827_v18, %v1802_v29  ;;  %v1832_v58 = vadd.f32 %v1828_v24, %v1803_v21  ;;  %v11906_v19 = vld [vmem:[#allocation78_spill] sm:$0xff]  ;;  %v11907_v18 = vld [vmem:[#allocation81_spill] sm:$0xff] }
 0x41e   : > { %v1874_v12 = vsel %vm11887_vm0, %v7773_v56, %v7804_v61  ;;  %vm11888_vm2 = vmmov %vm11887_vm0  ;;  %v1859_v62 = vadd.f32 %v1855_v47, %v1830_v13  ;;  %v1884_v5 = vmul.f32 %v7916_v57, %v1879_v30  ;;  %vm11891_vm1 = vcmask 15360   ;;  %v11909_v47 = vld [vmem:[#allocation2_spill] sm:$0xff] }
 0x41f   : > { %v1872_v8 = vsel %vm11888_vm2, %v7764_v54, %v7814_v33  ;;  %vm11889_vm4 = vmmov %vm11887_vm0  ;;  %v1903_v61 = vsel %vm11891_vm1, %v11890_v4, %v7822_v42  ;;  %v1862_v52 = vadd.f32 %v1858_v17, %v1833_v31  ;;  %v1860_v6 = vadd.f32 %v1856_v63, %v1831_v23  ;;  %v11913_v31 = vld [vmem:[#allocation54_spill] sm:$0xff] }
 0x420   : > { %v8112_v44 = vpop.permute.xlu1 %2194  ;;  %v1873_v14 = vsel %vm11889_vm4, %v7814_v33, %v7773_v56  ;;  %vm11893_vm0 = vmmov %vm11891_vm1  ;;  %v1887_v33 = vmul.f32 %v7916_v57, %v1874_v12  ;;  %v1885_v56 = vmul.f32 %v7916_v57, %v1872_v8  ;;  %v1861_v49 = vadd.f32 %v1857_v15, %v1832_v58  ;;  %v11910_v15 = vld [vmem:[#allocation93_spill] sm:$0xff]  ;;  %v11914_v58 = vld [vmem:[#allocation14_spill] sm:$0xff] }
 0x421   : > { %v1908_v54 = vsel %vm11893_vm0, %v7822_v42, %v11892_v36  ;;  %v1886_v1 = vmul.f32 %v7916_v57, %v1873_v14  ;;  %vm11895_vm2 = vmmov %vm11893_vm0  ;;  %v1916_v60 = vmul.f32 %v11897_v20, %v1903_v61  ;;  %vm11900_vm1 = vcmask 7168   ;;  %v11901_v57 = vld [vmem:[#allocation6_spill] sm:$0xff]  ;;  %v11911_v12 = vld [vmem:[#allocation9_spill] sm:$0xff] }
 0x422   : > { %v1901_v11 = vsel %vm11895_vm2, %v11892_v36, %v11894_v7  ;;  %vm11896_vm4 = vmmov %vm11893_vm0  ;;  %v1913_v0 = vmul.f32 %v11897_v20, %v1908_v54  ;;  %v1932_v2 = vsel %vm11900_vm1, %v11899_v43, %v11898_v35  ;;  %v1888_v53 = vadd.f32 %v1884_v5, %v1859_v62  ;;  %v11912_v14 = vld [vmem:[#allocation39_spill] sm:$0xff] }
 0x423   : > { %v1902_v42 = vsel %vm11896_vm4, %v11894_v7, %v11890_v4  ;;  %vm11902_vm0 = vmmov %vm11900_vm1  ;;  %v1914_v45 = vmul.f32 %v11897_v20, %v1901_v11  ;;  %v1891_v27 = vadd.f32 %v1887_v33, %v1862_v52  ;;  %v1889_v22 = vadd.f32 %v1885_v56, %v1860_v6  ;;  %v11915_v36 = vld [vmem:[#allocation35_spill] sm:$0xff]  ;;  %v11916_v33 = vld [vmem:[#allocation10_spill] sm:$0xff] }
 0x424   : > { %v1937_v16 = vsel %vm11902_vm0, %v11898_v35, %v11901_v57  ;;  %vm11904_vm2 = vmmov %vm11902_vm0  ;;  %v1890_v59 = vadd.f32 %v1886_v1, %v1861_v49  ;;  %v1915_v34 = vmul.f32 %v11897_v20, %v1902_v42  ;;  %v1978_v46 = vsel %vm806_vm12, %v11906_v19, %v11905_v28  ;;  %v8196_v63 = vpop.permute.xlu0 %2183  ;;  %v11917_v11 = vld [vmem:[#allocation4_spill] sm:$0xff]  ;;  %v8215_v49 = vpop.permute.xlu2 %2254 }
 0x425   : > { %v1930_v48 = vsel %vm11904_vm2, %v11901_v57, %v11903_v55  ;;  %v1942_v24 = vmul.f32 %v11907_v18, %v1937_v16  ;;  %v1945_v26 = vmul.f32 %v11907_v18, %v1932_v2  ;;  %vm11908_vm4 = vmmov %vm11902_vm0  ;;  %v1917_v29 = vadd.f32 %v1913_v0, %v1888_v53  ;;  %v11918_v42 = vld [vmem:[#allocation20_spill] sm:$0xff]  ;;  %v11920_v53 = vld [vmem:[#allocation58_spill] sm:$0xff] }
 0x426   : > { %v1931_v39 = vsel %vm11908_vm4, %v11903_v55, %v11899_v43  ;;  %v1920_v21 = vadd.f32 %v1916_v60, %v1891_v27  ;;  %v1972_v13 = vsel %vm806_vm12, %v11909_v47, %v11906_v19  ;;  %v1943_v17 = vmul.f32 %v11907_v18, %v1930_v48  ;;  %v11919_v60 = vld [vmem:[#allocation42_spill] sm:$0xff]  ;;  %v11921_v48 = vld [vmem:[#allocation3_spill] sm:$0xff]  ;;  %v11922_v19 = vld [vmem:[#allocation44_spill] sm:$0xff] }
 0x427   : > { %v1918_v30 = vadd.f32 %v1914_v45, %v1889_v22  ;;  %v1999_v8 = vsel %vm859_vm13, %v11911_v12, %v11910_v15  ;;  %v1954_v23 = vmul.f32 %v11913_v31, %v11912_v14  ;;  %v1957_v62 = vmul.f32 %v11913_v31, %v11914_v58 }
 0x428   : > { %v8157_v40 = vpop.permute.xlu1 %2198  ;;  %v1919_v4 = vadd.f32 %v1915_v34, %v1890_v59  ;;  %v1944_v61 = vmul.f32 %v11907_v18, %v1931_v39  ;;  %v1955_v54 = vmul.f32 %v11913_v31, %v11915_v36  ;;  %v1970_v56 = vsel %vm806_vm12, %v11905_v28, %v11916_v33  ;;  %v11924_v39 = vld [vmem:[#allocation52_spill] sm:$0xff] }
 0x429   : > { %v1946_v1 = vadd.f32 %v1942_v24, %v1917_v29  ;;  %v1949_v7 = vadd.f32 %v1945_v26, %v1920_v21  ;;  %v1983_v52 = vmul.f32 %v11917_v11, %v1970_v56  ;;  %v1986_v6 = vmul.f32 %v11917_v11, %v1978_v46  ;;  %v11923_v46 = vld [vmem:[#allocation63_spill] sm:$0xff]  ;;  %v11925_v21 = vld [vmem:[#allocation97_spill] sm:$0xff] }
 0x42a   : > { %v2012_v20 = vmul.f32 %v11918_v42, %v1999_v8  ;;  %v1947_v0 = vadd.f32 %v1943_v17, %v1918_v30  ;;  %v1956_v35 = vmul.f32 %v11913_v31, %v11919_v60  ;;  %v1971_v43 = vsel %vm806_vm12, %v11916_v33, %v11909_v47  ;;  %v11927_v8 = vld [vmem:[#allocation94_spill] sm:$0xff]  ;;  %v11929_v33 = vld [vmem:[#allocation87_spill] sm:$0xff] }
 0x42b   : > { %v1958_v2 = vadd.f32 %v1954_v23, %v1946_v1  ;;  %v1961_v57 = vadd.f32 %v1957_v62, %v1949_v7  ;;  %v1984_v16 = vmul.f32 %v11917_v11, %v1971_v43  ;;  %v2000_v45 = vsel %vm859_vm13, %v11910_v15, %v11920_v53  ;;  %v11930_v43 = vld [vmem:[#allocation69_spill] sm:$0xff] }
 0x42c   : > { %v1948_v55 = vadd.f32 %v1944_v61, %v1919_v4  ;;  %v2007_v41 = vsel %vm859_vm13, %v11921_v48, %v11911_v12  ;;  %v1985_v27 = vmul.f32 %v11917_v11, %v1972_v13  ;;  %v1959_v22 = vadd.f32 %v1955_v54, %v1947_v0  ;;  %v8244_v13 = vpop.permute.xlu0 %2212  ;;  %v11926_v12 = vld [vmem:[#allocation11_spill] sm:$0xff]  ;;  %v11928_v61 = vld [vmem:[#allocation102_spill] sm:$0xff] }
 0x42d   : > { %v1987_v59 = vadd.f32 %v1983_v52, %v1958_v2  ;;  %v1990_v34 = vadd.f32 %v1986_v6, %v1961_v57  ;;  %v2001_v28 = vsel %vm859_vm13, %v11920_v53, %v11921_v48  ;;  %v2028_v18 = vsel %vm900_vm14, %v11923_v46, %v11922_v19  ;;  %v11931_v57 = vld [vmem:[#allocation50_spill] sm:$0xff]  ;;  %v8277_v48 = vpop.permute.xlu2 %2258 }
 0x42e   : > { %v1960_v24 = vadd.f32 %v1956_v35, %v1948_v55  ;;  %v2013_v26 = vmul.f32 %v11918_v42, %v2000_v45  ;;  %v2036_v29 = vsel %vm900_vm14, %v11924_v39, %v11923_v46  ;;  %v2029_v47 = vsel %vm900_vm14, %v11922_v19, %v11925_v21  ;;  %v11933_v45 = vld [vmem:[#allocation66_spill] sm:$0xff]  ;;  %v11935_v19 = vld [vmem:[#allocation88_spill] sm:$0xff] }
 0x42f   : > { %v2015_v17 = vmul.f32 %v11918_v42, %v2007_v41  ;;  %v1988_v30 = vadd.f32 %v1984_v16, %v1959_v22  ;;  %v2030_v15 = vsel %vm900_vm14, %v11925_v21, %v11924_v39  ;;  %v2057_v31 = vsel %vm941_vm15, %v11927_v8, %v11926_v12  ;;  %v11932_v16 = vld [vmem:[#allocation79_spill] sm:$0xff]  ;;  %v11936_v39 = vld [vmem:[#allocation68_spill] sm:$0xff] }
 0x430   : > { %v8205_v5 = vpop.permute.xlu1 %2223  ;;  %v1989_v62 = vadd.f32 %v1985_v27, %v1960_v24  ;;  %v2014_v4 = vmul.f32 %v11918_v42, %v2001_v28  ;;  %v2041_v54 = vmul.f32 %v11928_v61, %v2028_v18  ;;  %v2065_v56 = vsel %vm941_vm15, %v11929_v33, %v11927_v8  ;;  %v11934_v28 = vld [vmem:[#allocation67_spill] sm:$0xff] }
 0x431   : > { %v2016_v1 = vadd.f32 %v2012_v20, %v1987_v59  ;;  %v2019_v7 = vadd.f32 %v2015_v17, %v1990_v34  ;;  %v2044_v11 = vmul.f32 %v11928_v61, %v2036_v29  ;;  %v2042_v52 = vmul.f32 %v11928_v61, %v2029_v47 }
 0x432   : > { %v2017_v6 = vadd.f32 %v2013_v26, %v1988_v30  ;;  %v2043_v0 = vmul.f32 %v11928_v61, %v2030_v15  ;;  %v2070_v35 = vmul.f32 %v8004_v50, %v2057_v31  ;;  %v2058_v42 = vsel %vm941_vm15, %v11926_v12, %v11930_v43  ;;  %v11937_v15 = vld [vmem:[#allocation83_spill] sm:$0xff]  ;;  %v11939_v61 = vld [vmem:[#allocation101_spill] sm:$0xff] }
 0x433   : > { %v2073_v2 = vmul.f32 %v8004_v50, %v2065_v56  ;;  %v2059_v20 = vsel %vm941_vm15, %v11930_v43, %v11929_v33  ;;  %v2086_v53 = vsel %vm994_vm11, %v11932_v16, %v11931_v57  ;;  %v2094_v55 = vsel %vm994_vm11, %v11933_v45, %v11932_v16  ;;  %v11940_v33 = vld [vmem:[#allocation84_spill] sm:$0xff] }
 0x434   : > { %v2018_v41 = vadd.f32 %v2014_v4, %v1989_v62  ;;  %v2045_v27 = vadd.f32 %v2041_v54, %v2016_v1  ;;  %v2048_v22 = vadd.f32 %v2044_v11, %v2019_v7  ;;  %v2046_v59 = vadd.f32 %v2042_v52, %v2017_v6  ;;  %v8289_v21 = vpop.permute.xlu0 %2241  ;;  %v11938_v4 = vld [vmem:[#allocation75_spill] sm:$0xff]  ;;  %v11943_v16 = vld [vmem:[#allocation96_spill] sm:$0xff] }
 0x435   : > { %v2071_v34 = vmul.f32 %v8004_v50, %v2058_v42  ;;  %v2115_v46 = vsel %vm1047_vm10, %v11935_v19, %v11934_v28  ;;  %v2072_v18 = vmul.f32 %v8004_v50, %v2059_v20  ;;  %v2099_v24 = vmul.f32 %v8054_v32, %v2086_v53  ;;  %v11941_v42 = vld [vmem:[#allocation89_spill] sm:$0xff]  ;;  %v11942_v20 = vld [vmem:[#allocation98_spill] sm:$0xff] }
 0x436   : > { %v2102_v26 = vmul.f32 %v8054_v32, %v2094_v55  ;;  %v2123_v29 = vsel %vm1047_vm10, %v11936_v39, %v11935_v19  ;;  %v2047_v47 = vadd.f32 %v2043_v0, %v2018_v41  ;;  %v2074_v17 = vadd.f32 %v2070_v35, %v2045_v27 }
 0x437   : > { %v2077_v30 = vadd.f32 %v2073_v2, %v2048_v22  ;;  %v2087_v12 = vsel %vm994_vm11, %v11931_v57, %v11937_v15  ;;  %v2088_v50 = vsel %vm994_vm11, %v11937_v15, %v11933_v45  ;;  %v2128_v31 = vmul.f32 %v8100_v38, %v2115_v46  ;;  %v11944_v22 = vld [vmem:[#allocation12_spill] sm:$0xff]  ;;  %v11945_v46 = vld [vmem:[#allocation18_spill] sm:$0xff] }
 0x438   : > { %v8253_v23 = vpop.permute.xlu1 %2227  ;;  %v2131_v62 = vmul.f32 %v8100_v38, %v2123_v29  ;;  %v2144_v54 = vsel %vm1100_vm9, %v11939_v61, %v11938_v4  ;;  %v2152_v56 = vsel %vm1100_vm9, %v11940_v33, %v11939_v61  ;;  %v11433_v1 = vmov 25  }
 0x439   : > { %5840 = vset.pattern.permute.xlu2 %v11433_v1  ;;  %v6069_v7 = vmov 50   ;;  %v2075_v11 = vadd.f32 %v2071_v34, %v2046_v59  ;;  %v2076_v52 = vadd.f32 %v2072_v18, %v2047_v47  ;;  %v2103_v6 = vadd.f32 %v2099_v24, %v2074_v17  ;;  %v8328_v34 = vpop.permute.xlu2 %2283 }
 0x43a   : > { %5841 = vset.pattern.permute.xlu0 %v6069_v7  ;;  %v2106_v0 = vadd.f32 %v2102_v26, %v2077_v30  ;;  %v2100_v35 = vmul.f32 %v8054_v32, %v2087_v12  ;;  %v2101_v43 = vmul.f32 %v8054_v32, %v2088_v50  ;;  %v2173_v2 = vsel %vm1141_vm8, %v8008_v10, %v11941_v42 }
 0x43b   : > { %v2181_v57 = vsel %vm1141_vm8, %v11942_v20, %v8008_v10  ;;  %v2116_v53 = vsel %vm1047_vm10, %v11934_v28, %v11943_v16  ;;  %v2117_v45 = vsel %vm1047_vm10, %v11943_v16, %v11936_v39  ;;  %v2157_v55 = vmul.f32 %v8146_v3, %v2144_v54 }
 0x43c   : > { %v2160_v32 = vmul.f32 %v8146_v3, %v2152_v56  ;;  %v2132_v41 = vadd.f32 %v2128_v31, %v2103_v6  ;;  %v2135_v27 = vadd.f32 %v2131_v62, %v2106_v0  ;;  %v2145_v59 = vsel %vm1100_vm9, %v11938_v4, %v11944_v22  ;;  %v2271_v26 = vpop.permute.xlu0 %2270 }
 0x43d   : > { %v2146_v10 = vsel %vm1100_vm9, %v11944_v22, %v11940_v33  ;;  %v2186_v28 = vmul.f32 %v8196_v63, %v2173_v2  ;;  %v2189_v19 = vmul.f32 %v8196_v63, %v2181_v57  ;;  %v2202_v18 = vsel %vm1182_vm7, %v8112_v44, %v11945_v46 }
 0x43e   : > { %v2210_v24 = vsel %vm1182_vm7, %v8031_v9, %v8112_v44  ;;  %v2104_v39 = vadd.f32 %v2100_v35, %v2075_v11  ;;  %v2105_v29 = vadd.f32 %v2101_v43, %v2076_v52  ;;  %v2129_v47 = vmul.f32 %v8100_v38, %v2116_v53 }
 0x43f   : > { %v2130_v17 = vmul.f32 %v8100_v38, %v2117_v45  ;;  %v2161_v15 = vadd.f32 %v2157_v55, %v2132_v41  ;;  %v2164_v12 = vadd.f32 %v2160_v32, %v2135_v27  ;;  %v2231_v50 = vsel %vm1223_vm6, %v8205_v5, %v8096_v51 }
 0x440   : > { %v2253_v8 = vpop.permute.xlu1 %2252  ;;  %v2239_v31 = vsel %vm1223_vm6, %v8155_v37, %v8205_v5  ;;  %v2158_v44 = vmul.f32 %v8146_v3, %v2145_v59  ;;  %v2159_v62 = vmul.f32 %v8146_v3, %v2146_v10  ;;  %v2215_v4 = vmul.f32 %v8244_v13, %v2202_v18 }
 0x441   : > { %v2218_v61 = vmul.f32 %v8244_v13, %v2210_v24  ;;  %v2190_v38 = vadd.f32 %v2186_v28, %v2161_v15  ;;  %v2193_v54 = vadd.f32 %v2189_v19, %v2164_v12  ;;  %v2260_v33 = vsel %vm1264_vm5, %v2253_v8, %v8215_v49  ;;  %v2288_v27 = vpop.permute.xlu2 %2287 }
 0x442   : > { %v2268_v56 = vsel %vm1264_vm5, %v8277_v48, %v2253_v8  ;;  %v2174_v5 = vsel %vm1141_vm8, %v11941_v42, %v8063_v25  ;;  %v2175_v3 = vsel %vm1141_vm8, %v8063_v25, %v11942_v20  ;;  %v2244_v7 = vmul.f32 %v8289_v21, %v2231_v50  ;;  %v11948_v50 = vld [vmem:[#allocation40_spill] sm:$0xff] }
 0x443   : > { %v2247_v11 = vmul.f32 %v8289_v21, %v2239_v31  ;;  %v2133_v52 = vadd.f32 %v2129_v47, %v2104_v39  ;;  %v2134_v6 = vadd.f32 %v2130_v17, %v2105_v29  ;;  %v2203_v0 = vsel %vm1182_vm7, %v11945_v46, %v8157_v40 }
 0x444   : > { %v2204_v8 = vsel %vm1182_vm7, %v8157_v40, %v8031_v9  ;;  %v2219_v35 = vadd.f32 %v2215_v4, %v2190_v38  ;;  %v2222_v43 = vadd.f32 %v2218_v61, %v2193_v54  ;;  %v2273_v42 = vmul.f32 %v2271_v26, %v2260_v33  ;;  %v2300_v53 = vpop.permute.xlu0 %2299 }
 0x445   : > { %v2276_v2 = vmul.f32 %v2271_v26, %v2268_v56  ;;  %v2162_v57 = vadd.f32 %v2158_v44, %v2133_v52  ;;  %v2163_v25 = vadd.f32 %v2159_v62, %v2134_v6  ;;  %v2187_v20 = vmul.f32 %v8196_v63, %v2174_v5  ;;  %v11949_v44 = vld [vmem:[#allocation13_spill] sm:$0xff]  ;;  %v8403_v5 = vld [vmem:[%s11212_s2 + $0x70] sm:$0xf] }
 0x446   : > { %v2188_v16 = vmul.f32 %v8196_v63, %v2175_v3  ;;  %v2216_v45 = vmul.f32 %v8244_v13, %v2203_v0  ;;  %v2217_v55 = vmul.f32 %v8244_v13, %v2204_v8  ;;  %v2248_v32 = vadd.f32 %v2244_v7, %v2219_v35  ;;  %v11952_v3 = vld [vmem:[#allocation45_spill] sm:$0xff] }
 0x447   : > { %v2251_v41 = vadd.f32 %v2247_v11, %v2222_v43  ;;  %v2232_v9 = vsel %vm1223_vm6, %v8096_v51, %v8253_v23  ;;  %v2233_v40 = vsel %vm1223_vm6, %v8253_v23, %v8155_v37  ;;  %vm11946_vm1 = vcmask 703488   ;;  %v11954_v11 = vld [vmem:[#allocation32_spill] sm:$0xff] }
 0x448   : > { %v2257_v30 = vpop.permute.xlu1 %2256  ;;  %vm11947_vm0 = vmmov %vm11946_vm1  ;;  %v2277_v10 = vadd.f32 %v2273_v42, %v2248_v32  ;;  %v2191_v46 = vadd.f32 %v2187_v20, %v2162_v57  ;;  %v2192_v18 = vadd.f32 %v2188_v16, %v2163_v25  ;;  %v2245_v39 = vmul.f32 %v8289_v21, %v2232_v9 }
 0x449   : > { %v2280_v28 = vadd.f32 %v2276_v2, %v2251_v41  ;;  %v2261_v24 = vsel %vm1264_vm5, %v8215_v49, %v2257_v30  ;;  %v2262_v51 = vsel %vm1264_vm5, %v2257_v30, %v8277_v48  ;;  %v2246_v37 = vmul.f32 %v8289_v21, %v2233_v40  ;;  %vm11950_vm2 = vmmov %vm11947_vm0 }
 0x44a   : > { %v2220_v47 = vadd.f32 %v2216_v45, %v2191_v46  ;;  %v2221_v17 = vadd.f32 %v2217_v55, %v2192_v18  ;;  %v2274_v15 = vmul.f32 %v2271_v26, %v2261_v24  ;;  %v2275_v12 = vmul.f32 %v2271_v26, %v2262_v51  ;;  %vm11951_vm4 = vmmov %vm11947_vm0 }
 0x44b   : > { %v6071_v6 = vmov 51   ;;  %v11955_v0 = vmov 1   ;;  %v11432_v8 = vmov 26   ;;  %v6073_v35 = vmov 76  }
 0x44c   : > { %v2249_v49 = vadd.f32 %v2245_v39, %v2220_v47  ;;  %v2250_v4 = vadd.f32 %v2246_v37, %v2221_v17  ;;  %v6074_v43 = vmov 52   ;;  %v11441_v42 = vmov 27  }
 0x44d   : > { %v11956_v2 = vmov 2   ;;  %v6076_v57 = vmov 53   ;;  %v6077_v25 = vmov 77   ;;  %v11440_v20 = vmov 28  }
 0x44e   : > { %v2278_v26 = vadd.f32 %v2274_v15, %v2249_v49  ;;  %v2279_v30 = vadd.f32 %v2275_v12, %v2250_v4  ;;  %v6079_v16 = vmov 54   ;;  %v6080_v55 = vmov 55  }
 0x44f   : > { %v6081_v32 = vmov 78   ;;  %v11439_v41 = vmov 29   ;;  %v6086_v18 = vmov 57   ;;  %v11959_v24 = vmov 5  }
 0x450   : > { %v2282_v22 = vpop.permute.xlu1 %2281  ;;  %v6088_v47 = vmov 80   ;;  %v11438_v17 = vmov 31   ;;  %v11960_v49 = vmov 6   ;;  %v11977_v36 = vmov 16  }
 0x451   : > { %v2289_v63 = vsel %vm11946_vm1, %v2282_v22, %v8328_v34  ;;  %v2297_v59 = vsel %vm11947_vm0, %v2288_v27, %v2282_v22  ;;  %v11958_v22 = vmov 4   ;;  %vm12026_vm1 = vcmask 343040  }
 0x452   : > { %v2302_v13 = vmul.f32 %v2300_v53, %v2289_v63  ;;  %v2305_v19 = vmul.f32 %v2300_v53, %v2297_v59  ;;  %v6083_v63 = vmov 56   ;;  %vm12027_vm0 = vmmov %vm12026_vm1 }
 0x454   : > { %v2306_v23 = vadd.f32 %v2302_v13, %v2277_v10  ;;  %v2309_v29 = vadd.f32 %v2305_v19, %v2280_v28  ;;  %v6084_v28 = vmov 79   ;;  %v11437_v13 = vmov 30  }
 0x456   : > { %v8388_v31 = vmul.f32 %v2306_v23, %v11948_v50  ;;  %v8391_v62 = vmul.f32 %v2309_v29, %v11949_v44  ;;  %v6087_v23 = vmov 58   ;;  %v11989_v44 = vmov 12  }
 0x458   : > { %v2286_v61 = vpop.permute.xlu1 %2285  ;;  %2329 = vrot.lane.b32.xlu1 %v8388_v31, %s6021_s20  ;;  %2323 = vrot.lane.b32.xlu2 %v8391_v62, %s6021_s20 }
 0x459   : > { %v2290_v48 = vsel %vm11950_vm2, %v8328_v34, %v2286_v61  ;;  %v2291_v21 = vsel %vm11951_vm4, %v2286_v61, %v2288_v27  ;;  %v6070_v34 = vmov 75   ;;  %v6090_v61 = vmov 59   ;;  %vm12029_vm2 = vmmov %vm12027_vm0 }
 0x45a   : > { %v2303_v38 = vmul.f32 %v2300_v53, %v2290_v48  ;;  %v2304_v54 = vmul.f32 %v2300_v53, %v2291_v21  ;;  %v11957_v53 = vmov 3   ;;  %vm12031_vm4 = vmmov %vm12027_vm0 }
 0x45c   : > { %v2307_v33 = vadd.f32 %v2303_v38, %v2278_v26  ;;  %v2308_v56 = vadd.f32 %v2304_v54, %v2279_v30  ;;  %v6091_v30 = vmov 81   ;;  %v11436_v38 = vmov 32  }
 0x45e   : > { %v8406_v7 = vmul.f32 %v2307_v33, %v11952_v3  ;;  %v8409_v52 = vmul.f32 %v2308_v56, %v11954_v11  ;;  %v6093_v33 = vmov 60   ;;  %v11988_v11 = vmov 18  }
 0x460   : > { %11953 = vst [vmem:[#allocation31_spill] sm:$0xff] %v8406_v7  ;;  %2345 = vperm.xlu1 %5839, %v8403_v5   ;;  %2331 = vrot.lane.b32.xlu2 %v8406_v7, %s6021_s20 }
 0x461   : > { %2333 = vrot.lane.b32.xlu0 %v8409_v52, %s6021_s20  ;;  %s11996_s20 = smov 127  }
 0x468   : > { %5842 = vset.pattern.permute.xlu1 %v6070_v34  ;;  %2361 = vperm.xlu2 %5840, %v8403_v5   ;;  %v11961_v34 = vmov 7  }
 0x469   : > { %2377 = vperm.xlu0 %5841, %v8403_v5   ;;  %2393 = vperm.xlu1 %5842, %v8403_v5  }
 0x470   : > { %2408 = vrot.lane.b32.xlu2 %v8391_v62, %s6023_s21 }
 0x471   : > { %2415 = vrot.lane.b32.xlu0 %v8409_v52, %s6023_s21  ;;  %2411 = vrot.lane.b32.xlu1 %v8388_v31, %s6023_s21 }
 0x472   : > { %5845 = vset.pattern.permute.xlu0 %v6071_v6  ;;  %5843 = vset.pattern.permute.xlu1 %v11955_v0 }
 0x473   : > { %5844 = vset.pattern.permute.xlu2 %v11432_v8  ;;  %v11965_v8 = vmov 14  }
 0x478   : > { %2413 = vrot.lane.b32.xlu2 %v8406_v7, %s6023_s21 }
 0x479   : > { %2458 = vperm.xlu0 %5845, %v8403_v5   ;;  %2426 = vperm.xlu1 %5843, %v8403_v5  }
 0x480   : > { %2442 = vperm.xlu2 %5844, %v8403_v5  }
 0x481   : > { %2496 = vrot.lane.b32.xlu0 %v8409_v52, %s6024_s22  ;;  %5846 = vset.pattern.permute.xlu1 %v6073_v35 }
 0x482   : > { %2474 = vperm.xlu1 %5846, %v8403_v5   ;;  %5849 = vset.pattern.permute.xlu0 %v6074_v43 }
 0x488   : > { %2489 = vrot.lane.b32.xlu2 %v8391_v62, %s6024_s22 }
 0x489   : > { %2539 = vperm.xlu0 %5849, %v8403_v5   ;;  %5848 = vset.pattern.permute.xlu2 %v11441_v42  ;;  %v11442_v42 = vmov 35  }
 0x48a   : > { %2492 = vrot.lane.b32.xlu1 %v8388_v31, %s6024_s22 }
 0x48b   : > { %5847 = vset.pattern.permute.xlu1 %v11956_v2 }
 0x48e   : > { %v8479_v9 = vpop.permute.xlu1 %2318 }
 0x490   : > { %2494 = vrot.lane.b32.xlu2 %v8406_v7, %s6024_s22 }
 0x491   : > { %2577 = vrot.lane.b32.xlu0 %v8409_v52, %s6026_s23 }
 0x492   : > { %2507 = vperm.xlu1 %5847, %v8403_v5   ;;  %5853 = vset.pattern.permute.xlu0 %v6076_v57  ;;  %v6094_v57 = vmov 61  }
 0x498   : > { %2523 = vperm.xlu2 %5848, %v8403_v5  }
 0x499   : > { %2620 = vperm.xlu0 %5853, %v8403_v5  }
 0x49a   : > { %5850 = vset.pattern.permute.xlu1 %v6077_v25 }
 0x49b   : > { %2555 = vperm.xlu1 %5850, %v8403_v5  }
 0x4a0   : > { %2570 = vrot.lane.b32.xlu2 %v8391_v62, %s6026_s23 }
 0x4a1   : > { %2658 = vrot.lane.b32.xlu0 %v8409_v52, %s6028_s24  ;;  %5852 = vset.pattern.permute.xlu2 %v11440_v20  ;;  %v6100_v20 = vmov 84  }
 0x4a2   : > { %5857 = vset.pattern.permute.xlu0 %v6079_v16  ;;  %v6095_v16 = vmov 82  }
 0x4a3   : > { %2573 = vrot.lane.b32.xlu1 %v8388_v31, %s6026_s23 }
 0x4a4   : > { %5851 = vset.pattern.permute.xlu1 %v11957_v53 }
 0x4a8   : > { %2575 = vrot.lane.b32.xlu2 %v8406_v7, %s6026_s23 }
 0x4a9   : > { %2701 = vperm.xlu0 %5857, %v8403_v5  }
 0x4ab   : > { %2588 = vperm.xlu1 %5851, %v8403_v5  }
 0x4b0   : > { %2604 = vperm.xlu2 %5852, %v8403_v5  }
 0x4b1   : > { %2739 = vrot.lane.b32.xlu0 %v8409_v52, %s6031_s25 }
 0x4b2   : > { %v8465_v45 = vpop.permute.xlu2 %2323  ;;  %5861 = vset.pattern.permute.xlu0 %v6080_v55  ;;  %v11434_v55 = vmov 33  }
 0x4b3   : > { %5854 = vset.pattern.permute.xlu1 %v6081_v32 }
 0x4b4   : > { %2636 = vperm.xlu1 %5854, %v8403_v5  }
 0x4b8   : > { %2651 = vrot.lane.b32.xlu2 %v8391_v62, %s6028_s24 }
 0x4b9   : > { %2782 = vperm.xlu0 %5861, %v8403_v5   ;;  %5856 = vset.pattern.permute.xlu2 %v11439_v41 }
 0x4ba   : > { %v8472_v27 = vpop.permute.xlu2 %2331 }
 0x4bc   : > { %2654 = vrot.lane.b32.xlu1 %v8388_v31, %s6028_s24 }
 0x4bd   : > { %5855 = vset.pattern.permute.xlu1 %v11958_v22 }
 0x4c0   : > { %2656 = vrot.lane.b32.xlu2 %v8406_v7, %s6028_s24 }
 0x4c1   : > { %2820 = vrot.lane.b32.xlu0 %v8409_v52, %s6033_s26 }
 0x4c2   : > { %v8483_v40 = vpop.permute.xlu2 %2361  ;;  %5865 = vset.pattern.permute.xlu0 %v6083_v63 }
 0x4c4   : > { %2669 = vperm.xlu1 %5855, %v8403_v5  }
 0x4c8   : > { %2685 = vperm.xlu2 %5856, %v8403_v5  }
 0x4c9   : > { %2863 = vperm.xlu0 %5865, %v8403_v5  }
 0x4ca   : > { %v8488_v59 = vpop.permute.xlu1 %2329  ;;  %v8490_v10 = vpop.permute.xlu2 %2408 }
 0x4cc   : > { %5858 = vset.pattern.permute.xlu1 %v6084_v28  ;;  %v6097_v28 = vmov 87  }
 0x4cd   : > { %2717 = vperm.xlu1 %5858, %v8403_v5  }
 0x4d0   : > { %2732 = vrot.lane.b32.xlu2 %v8391_v62, %s6031_s25 }
 0x4d1   : > { %2901 = vrot.lane.b32.xlu0 %v8409_v52, %s6034_s27  ;;  %5860 = vset.pattern.permute.xlu2 %v11437_v13  ;;  %v11971_v13 = vmov 15  }
 0x4d2   : > { %v8498_v19 = vpop.permute.xlu1 %2345  ;;  %v8500_v46 = vpop.permute.xlu2 %2413  ;;  %5869 = vset.pattern.permute.xlu0 %v6086_v18  ;;  %v11962_v18 = vmov 8  }
 0x4d3   : > { %v8634_v41 = vpop.permute.xlu0 %2333 }
 0x4d5   : > { %2735 = vrot.lane.b32.xlu1 %v8388_v31, %s6031_s25 }
 0x4d6   : > { %5859 = vset.pattern.permute.xlu1 %v11959_v24  ;;  %v11982_v24 = vmov 17  }
 0x4d8   : > { %2737 = vrot.lane.b32.xlu2 %v8406_v7, %s6031_s25 }
 0x4d9   : > { %2944 = vperm.xlu0 %5869, %v8403_v5  }
 0x4da   : > { %v8508_v51 = vpop.permute.xlu2 %2442 }
 0x4db   : > { %v8510_v39 = vpop.permute.xlu1 %2393 }
 0x4dd   : > { %2750 = vperm.xlu1 %5859, %v8403_v5  }
 0x4e0   : > { %2766 = vperm.xlu2 %5860, %v8403_v5  }
 0x4e1   : > { %2982 = vrot.lane.b32.xlu0 %v8409_v52, %s6035_s30 }
 0x4e2   : > { %v8516_v37 = vpop.permute.xlu2 %2489  ;;  %5873 = vset.pattern.permute.xlu0 %v6087_v23 }
 0x4e3   : > { %v8518_v29 = vpop.permute.xlu1 %2411 }
 0x4e5   : > { %5862 = vset.pattern.permute.xlu1 %v6088_v47 }
 0x4e6   : > { %2798 = vperm.xlu1 %5862, %v8403_v5  }
 0x4e8   : > { %2813 = vrot.lane.b32.xlu2 %v8391_v62, %s6033_s26 }
 0x4e9   : > { %3025 = vperm.xlu0 %5873, %v8403_v5   ;;  %5864 = vset.pattern.permute.xlu2 %v11438_v17 }
 0x4ea   : > { %v8525_v15 = vpop.permute.xlu2 %2494 }
 0x4eb   : > { %v8527_v12 = vpop.permute.xlu1 %2426 }
 0x4ee   : > { %2816 = vrot.lane.b32.xlu1 %v8388_v31, %s6033_s26 }
 0x4ef   : > { %5863 = vset.pattern.permute.xlu1 %v11960_v49 }
 0x4f0   : > { %2818 = vrot.lane.b32.xlu2 %v8406_v7, %s6033_s26 }
 0x4f1   : > { %3063 = vrot.lane.b32.xlu0 %v8409_v52, %s6038_s4 }
 0x4f2   : > { %v8536_v4 = vpop.permute.xlu2 %2523  ;;  %5877 = vset.pattern.permute.xlu0 %v6090_v61  ;;  %v11963_v61 = vmov 13  }
 0x4f4   : > { %v8538_v48 = vpop.permute.xlu1 %2474 }
 0x4f6   : > { %2831 = vperm.xlu1 %5863, %v8403_v5  }
 0x4f8   : > { %2847 = vperm.xlu2 %5864, %v8403_v5  }
 0x4f9   : > { %3106 = vperm.xlu0 %5877, %v8403_v5  }
 0x4fa   : > { %v8543_v21 = vpop.permute.xlu2 %2570 }
 0x4fc   : > { %v8545_v26 = vpop.permute.xlu1 %2492 }
 0x4fe   : > { %5866 = vset.pattern.permute.xlu1 %v6091_v30 }
 0x4ff   : > { %2879 = vperm.xlu1 %5866, %v8403_v5  }
 0x500   : > { %2894 = vrot.lane.b32.xlu2 %v8391_v62, %s6034_s27 }
 0x501   : > { %3144 = vrot.lane.b32.xlu0 %v8409_v52, %s6039_s5  ;;  %5868 = vset.pattern.permute.xlu2 %v11436_v38 }
 0x502   : > { %v8553_v54 = vpop.permute.xlu2 %2575  ;;  %5881 = vset.pattern.permute.xlu0 %v6093_v33 }
 0x504   : > { %v8555_v56 = vpop.permute.xlu1 %2507 }
 0x507   : > { %2897 = vrot.lane.b32.xlu1 %v8388_v31, %s6034_s27 }
 0x508   : > { %2899 = vrot.lane.b32.xlu2 %v8406_v7, %s6034_s27  ;;  %5867 = vset.pattern.permute.xlu1 %v11961_v34 }
 0x509   : > { %3187 = vperm.xlu0 %5881, %v8403_v5  }
 0x50a   : > { %v8563_v6 = vpop.permute.xlu2 %2604 }
 0x50d   : > { %v8565_v35 = vpop.permute.xlu1 %2555 }
 0x50f   : > { %2912 = vperm.xlu1 %5867, %v8403_v5  }
 0x510   : > { %2928 = vperm.xlu2 %5868, %v8403_v5  }
 0x511   : > { %3225 = vrot.lane.b32.xlu0 %v8409_v52, %s6041_s6 }
 0x512   : > { %v8571_v43 = vpop.permute.xlu2 %2651  ;;  %5885 = vset.pattern.permute.xlu0 %v6094_v57  ;;  %v6098_v57 = vmov 83  }
 0x515   : > { %v8573_v25 = vpop.permute.xlu1 %2573 }
 0x517   : > { %5870 = vset.pattern.permute.xlu1 %v6095_v16  ;;  %v11435_v16 = vmov 34  }
 0x518   : > { %2960 = vperm.xlu1 %5870, %v8403_v5   ;;  %2975 = vrot.lane.b32.xlu2 %v8391_v62, %s6035_s30 }
 0x519   : > { %3268 = vperm.xlu0 %5885, %v8403_v5   ;;  %5872 = vset.pattern.permute.xlu2 %v11434_v55  ;;  %v11968_v55 = vmov 9  }
 0x51a   : > { %v8580_v32 = vpop.permute.xlu2 %2656 }
 0x51d   : > { %v8582_v63 = vpop.permute.xlu1 %2588 }
 0x520   : > { %2978 = vrot.lane.b32.xlu1 %v8388_v31, %s6035_s30  ;;  %2980 = vrot.lane.b32.xlu2 %v8406_v7, %s6035_s30 }
 0x521   : > { %5890 = vset.pattern.permute.xlu0 %v6097_v28  ;;  %5871 = vset.pattern.permute.xlu1 %v11962_v18 }
 0x522   : > { %3348 = vperm.xlu0 %5890, %v8403_v5   ;;  %v8590_v23 = vpop.permute.xlu2 %2685 }
 0x526   : > { %v8592_v47 = vpop.permute.xlu1 %2636 }
 0x528   : > { %2993 = vperm.xlu1 %5871, %v8403_v5   ;;  %3009 = vperm.xlu2 %5872, %v8403_v5  }
 0x52a   : > { %5891 = vset.pattern.permute.xlu0 %v11963_v61  ;;  %v8597_v30 = vpop.permute.xlu2 %2732 }
 0x52b   : > { %3381 = vperm.xlu0 %5891, %v8403_v5  }
 0x52e   : > { %v8600_v33 = vpop.permute.xlu1 %2654 }
 0x530   : > { %5874 = vset.pattern.permute.xlu1 %v6098_v57  ;;  %3056 = vrot.lane.b32.xlu2 %v8391_v62, %s6038_s4 }
 0x531   : > { %3041 = vperm.xlu1 %5874, %v8403_v5   ;;  %5876 = vset.pattern.permute.xlu2 %v11435_v16 }
 0x532   : > { %v8606_v28 = vpop.permute.xlu2 %2737 }
 0x533   : > { %11964 = vst [vmem:[#allocation103_spill] sm:$0xff] %v8606_v28  ;;  %3446 = vrot.lane.b32.xlu0 %v8406_v7, %s6046_s10 }
 0x534   : > { %5895 = vset.pattern.permute.xlu0 %v11965_v8 }
 0x536   : > { %v8611_v1 = vpop.permute.xlu1 %2669 }
 0x537   : > { %11966 = vst [vmem:[#allocation37_spill] sm:$0xff] %v8611_v1 }
 0x538   : > { %3061 = vrot.lane.b32.xlu2 %v8406_v7, %s6038_s4 }
 0x539   : > { %3059 = vrot.lane.b32.xlu1 %v8388_v31, %s6038_s4 }
 0x53a   : > { %v8617_v57 = vpop.permute.xlu2 %2766  ;;  %5875 = vset.pattern.permute.xlu1 %v11968_v55  ;;  %v6104_v55 = vmov 86  }
 0x53b   : > { %11967 = vst [vmem:[#allocation21_spill] sm:$0xff] %v8617_v57  ;;  %3462 = vperm.xlu0 %5895, %v8403_v5  }
 0x53f   : > { %v8621_v16 = vpop.permute.xlu1 %2717 }
 0x540   : > { %11969 = vst [vmem:[#allocation25_spill] sm:$0xff] %v8621_v16  ;;  %3090 = vperm.xlu2 %5876, %v8403_v5  }
 0x541   : > { %3074 = vperm.xlu1 %5875, %v8403_v5  }
 0x542   : > { %v8625_v38 = vpop.permute.xlu2 %2813 }
 0x543   : > { %11970 = vst [vmem:[#allocation47_spill] sm:$0xff] %v8625_v38  ;;  %3527 = vrot.lane.b32.xlu0 %v8406_v7, %s6048_s11 }
 0x544   : > { %5899 = vset.pattern.permute.xlu0 %v11971_v13 }
 0x547   : > { %v8630_v17 = vpop.permute.xlu1 %2735 }
 0x548   : > { %11972 = vst [vmem:[#allocation51_spill] sm:$0xff] %v8630_v17  ;;  %3137 = vrot.lane.b32.xlu2 %v8391_v62, %s6039_s5 }
 0x549   : > { %5878 = vset.pattern.permute.xlu1 %v6100_v20  ;;  %5880 = vset.pattern.permute.xlu2 %v11442_v42  ;;  %v8649_v20 = vpop.permute.xlu0 %2377  ;;  %v11976_v42 = vmov 10  }
 0x54a   : > { %3122 = vperm.xlu1 %5878, %v8403_v5   ;;  %v8638_v14 = vpop.permute.xlu2 %2818 }
 0x54b   : > { %11973 = vst [vmem:[#allocation24_spill] sm:$0xff] %v8638_v14  ;;  %3543 = vperm.xlu0 %5899, %v8403_v5  }
 0x54f   : > { %v8641_v58 = vpop.permute.xlu1 %2750 }
 0x550   : > { %11974 = vst [vmem:[#allocation19_spill] sm:$0xff] %v8641_v58  ;;  %3142 = vrot.lane.b32.xlu2 %v8406_v7, %s6039_s5 }
 0x551   : > { %v8662_v61 = vpop.permute.xlu0 %2415 }
 0x552   : > { %3140 = vrot.lane.b32.xlu1 %v8388_v31, %s6039_s5  ;;  %v8647_v60 = vpop.permute.xlu2 %2847 }
 0x553   : > { %11975 = vst [vmem:[#allocation48_spill] sm:$0xff] %v8647_v60  ;;  %3608 = vrot.lane.b32.xlu0 %v8406_v7, %s6049_s14  ;;  %5879 = vset.pattern.permute.xlu1 %v11976_v42  ;;  %v6102_v42 = vmov 36   ;;  %v6113_v60 = vmov 89  }
 0x554   : > { %5903 = vset.pattern.permute.xlu0 %v11977_v36  ;;  %v6103_v36 = vmov 85  }
 0x558   : > { %v8655_v13 = vpop.permute.xlu1 %2798  ;;  %3171 = vperm.xlu2 %5880, %v8403_v5  }
 0x559   : > { %11978 = vst [vmem:[#allocation5_spill] sm:$0xff] %v8655_v13  ;;  %v8674_v49 = vpop.permute.xlu0 %2458  ;;  %v12018_v13 = vmov 23  }
 0x55a   : > { %3155 = vperm.xlu1 %5879, %v8403_v5   ;;  %v8659_v8 = vpop.permute.xlu2 %2894 }
 0x55b   : > { %11979 = vst [vmem:[#allocation53_spill] sm:$0xff] %v8659_v8  ;;  %3624 = vperm.xlu0 %5903, %v8403_v5  }
 0x560   : > { %v8664_v18 = vpop.permute.xlu1 %2816  ;;  %3218 = vrot.lane.b32.xlu2 %v8391_v62, %s6041_s6 }
 0x561   : > { %11980 = vst [vmem:[#allocation34_spill] sm:$0xff] %v8664_v18  ;;  %5884 = vset.pattern.permute.xlu2 %v6102_v42  ;;  %v8687_v42 = vpop.permute.xlu0 %2496 }
 0x562   : > { %5882 = vset.pattern.permute.xlu1 %v6103_v36  ;;  %v8668_v34 = vpop.permute.xlu2 %2899  ;;  %v11985_v36 = vmov 11  }
 0x563   : > { %11981 = vst [vmem:[#allocation26_spill] sm:$0xff] %v8668_v34  ;;  %3689 = vrot.lane.b32.xlu0 %v8406_v7, %s6053_s15  ;;  %3203 = vperm.xlu1 %5882, %v8403_v5   ;;  %v12005_v34 = vmov 21  }
 0x564   : > { %5907 = vset.pattern.permute.xlu0 %v11982_v24 }
 0x568   : > { %v8676_v53 = vpop.permute.xlu1 %2831  ;;  %3223 = vrot.lane.b32.xlu2 %v8406_v7, %s6041_s6 }
 0x569   : > { %11983 = vst [vmem:[#allocation27_spill] sm:$0xff] %v8676_v53  ;;  %v8703_v50 = vpop.permute.xlu0 %2539 }
 0x56a   : > { %v8680_v2 = vpop.permute.xlu2 %2928 }
 0x56b   : > { %11984 = vst [vmem:[#allocation61_spill] sm:$0xff] %v8680_v2  ;;  %3705 = vperm.xlu0 %5907, %v8403_v5   ;;  %3221 = vrot.lane.b32.xlu1 %v8388_v31, %s6041_s6 }
 0x56c   : > { %5883 = vset.pattern.permute.xlu1 %v11985_v36 }
 0x570   : > { %3252 = vperm.xlu2 %5884, %v8403_v5  }
 0x571   : > { %v8689_v24 = vpop.permute.xlu1 %2879 }
 0x572   : > { %11986 = vst [vmem:[#allocation56_spill] sm:$0xff] %v8689_v24  ;;  %v8691_v22 = vpop.permute.xlu2 %2975  ;;  %v6106_v24 = vmov 37  }
 0x573   : > { %11987 = vst [vmem:[#allocation28_spill] sm:$0xff] %v8691_v22  ;;  %3770 = vrot.lane.b32.xlu0 %v8406_v7, %s6054_s17  ;;  %3236 = vperm.xlu1 %5883, %v8403_v5   ;;  %v6105_v22 = vmov 62  }
 0x574   : > { %5911 = vset.pattern.permute.xlu0 %v11988_v11  ;;  %v11994_v11 = vmov 19  }
 0x578   : > { %5887 = vset.pattern.permute.xlu2 %v11989_v44 }
 0x579   : > { %v8698_v3 = vpop.permute.xlu1 %2897  ;;  %3300 = vperm.xlu2 %5887, %v8403_v5  }
 0x57a   : > { %11990 = vst [vmem:[#allocation65_spill] sm:$0xff] %v8698_v3  ;;  %v8701_v36 = vpop.permute.xlu2 %2980 }
 0x57b   : > { %11991 = vst [vmem:[#allocation59_spill] sm:$0xff] %v8701_v36  ;;  %3786 = vperm.xlu0 %5911, %v8403_v5   ;;  %5886 = vset.pattern.permute.xlu1 %v6104_v55  ;;  %v8715_v36 = vpop.permute.xlu0 %2577 }
 0x57c   : > { %3284 = vperm.xlu1 %5886, %v8403_v5  }
 0x581   : > { %v8707_v2 = vpop.permute.xlu1 %2912  ;;  %5889 = vset.pattern.permute.xlu2 %v6105_v22 }
 0x582   : > { %11992 = vst [vmem:[#allocation22_spill] sm:$0xff] %v8707_v2  ;;  %3332 = vperm.xlu2 %5889, %v8403_v5   ;;  %v8710_v44 = vpop.permute.xlu2 %3009  ;;  %v6108_v2 = vmov 38  }
 0x583   : > { %11993 = vst [vmem:[#allocation55_spill] sm:$0xff] %v8710_v44  ;;  %3851 = vrot.lane.b32.xlu0 %v8406_v7, %s11820_s16  ;;  %v6107_v44 = vmov 63  }
 0x584   : > { %5915 = vset.pattern.permute.xlu0 %v11994_v11  ;;  %5888 = vset.pattern.permute.xlu1 %v6106_v24  ;;  %v8727_v11 = vpop.permute.xlu0 %2620 }
 0x585   : > { %3316 = vperm.xlu1 %5888, %v8403_v5  }
 0x58a   : > { %v8718_v55 = vpop.permute.xlu1 %2960  ;;  %3365 = vrot.lane.b32.xlu2 %v8406_v7, %s11996_s20  ;;  %v8722_v22 = vpop.permute.xlu2 %3056 }
 0x58b   : > { %11995 = vst [vmem:[#allocation60_spill] sm:$0xff] %v8718_v55  ;;  %3867 = vperm.xlu0 %5915, %v8403_v5   ;;  %5893 = vset.pattern.permute.xlu2 %v6107_v44 }
 0x58c   : > { %11997 = vst [vmem:[#allocation70_spill] sm:$0xff] %v8722_v22  ;;  %v12000_v22 = vmov 20   ;;  %v8740_v44 = vpop.permute.xlu0 %2658 }
 0x58d   : > { %3363 = vrot.lane.b32.xlu1 %v8388_v31, %s11996_s20 }
 0x58e   : > { %5892 = vset.pattern.permute.xlu1 %v6108_v2 }
 0x592   : > { %v8729_v24 = vpop.permute.xlu1 %2978  ;;  %3369 = vrot.lane.b32.xlu2 %v8391_v62, %s11996_s20  ;;  %v8733_v55 = vpop.permute.xlu2 %3061 }
 0x593   : > { %11998 = vst [vmem:[#allocation62_spill] sm:$0xff] %v8729_v24  ;;  %3932 = vrot.lane.b32.xlu0 %v8406_v7, %s11825_s8  ;;  %v6109_v24 = vmov 64  }
 0x594   : > { %11999 = vst [vmem:[#allocation36_spill] sm:$0xff] %v8733_v55  ;;  %5919 = vset.pattern.permute.xlu0 %v12000_v22 }
 0x595   : > { %3367 = vrot.lane.b32.xlu1 %v8409_v52, %s11996_s20 }
 0x59a   : > { %v8742_v3 = vpop.permute.xlu1 %2993  ;;  %3413 = vperm.xlu2 %5893, %v8403_v5   ;;  %v8745_v2 = vpop.permute.xlu2 %3090 }
 0x59b   : > { %12001 = vst [vmem:[#allocation72_spill] sm:$0xff] %v8742_v3  ;;  %3948 = vperm.xlu0 %5919, %v8403_v5   ;;  %v8757_v3 = vpop.permute.xlu0 %2701 }
 0x59c   : > { %12002 = vst [vmem:[#allocation71_spill] sm:$0xff] %v8745_v2  ;;  %v6110_v2 = vmov 88  }
 0x59d   : > { %3397 = vperm.xlu1 %5892, %v8403_v5  }
 0x5a2   : > { %3444 = vrot.lane.b32.xlu2 %v8388_v31, %s6046_s10  ;;  %v8751_v55 = vpop.permute.xlu2 %3137 }
 0x5a3   : > { %12003 = vst [vmem:[#allocation82_spill] sm:$0xff] %v8751_v55  ;;  %4013 = vrot.lane.b32.xlu0 %v8406_v7, %s11830_s7  ;;  %v8755_v22 = vpop.permute.xlu1 %3041  ;;  %5897 = vset.pattern.permute.xlu2 %v6109_v24  ;;  %v6111_v24 = vmov 39  }
 0x5a4   : > { %12004 = vst [vmem:[#allocation76_spill] sm:$0xff] %v8755_v22  ;;  %5923 = vset.pattern.permute.xlu0 %v12005_v34  ;;  %v8768_v22 = vpop.permute.xlu0 %2739 }
 0x5a5   : > { %5894 = vset.pattern.permute.xlu1 %v6110_v2  ;;  %12008 = vst [vmem:[#allocation80_spill] sm:$0xff] %v8768_v22 }
 0x5a6   : > { %3429 = vperm.xlu1 %5894, %v8403_v5  }
 0x5aa   : > { %3450 = vrot.lane.b32.xlu2 %v8391_v62, %s6046_s10  ;;  %v8763_v53 = vpop.permute.xlu2 %3142 }
 0x5ab   : > { %12006 = vst [vmem:[#allocation64_spill] sm:$0xff] %v8763_v53  ;;  %4029 = vperm.xlu0 %5923, %v8403_v5   ;;  %v8766_v55 = vpop.permute.xlu1 %3059  ;;  %v12011_v53 = vmov 22  }
 0x5ac   : > { %12007 = vst [vmem:[#allocation77_spill] sm:$0xff] %v8766_v55  ;;  %v8781_v55 = vpop.permute.xlu0 %2782 }
 0x5ad   : > { %12012 = vst [vmem:[#allocation74_spill] sm:$0xff] %v8781_v55 }
 0x5ae   : > { %3448 = vrot.lane.b32.xlu1 %v8409_v52, %s6046_s10 }
 0x5af   : > { %5896 = vset.pattern.permute.xlu1 %v6111_v24  ;;  %v6112_v24 = vmov 65  }
 0x5b2   : > { %3494 = vperm.xlu2 %5897, %v8403_v5   ;;  %v8773_v2 = vpop.permute.xlu2 %3171 }
 0x5b3   : > { %12009 = vst [vmem:[#allocation85_spill] sm:$0xff] %v8773_v2  ;;  %4094 = vrot.lane.b32.xlu0 %v8406_v7, %s11835_s28  ;;  %v8777_v34 = vpop.permute.xlu1 %3074 }
 0x5b4   : > { %12010 = vst [vmem:[#allocation86_spill] sm:$0xff] %v8777_v34  ;;  %5927 = vset.pattern.permute.xlu0 %v12011_v53  ;;  %v8791_v53 = vpop.permute.xlu0 %2820 }
 0x5b5   : > { %12015 = vst [vmem:[#allocation92_spill] sm:$0xff] %v8791_v53 }
 0x5b6   : > { %3478 = vperm.xlu1 %5896, %v8403_v5  }
 0x5ba   : > { %3525 = vrot.lane.b32.xlu2 %v8388_v31, %s6048_s11  ;;  %v8785_v8 = vpop.permute.xlu2 %3218 }
 0x5bb   : > { %12013 = vst [vmem:[#allocation90_spill] sm:$0xff] %v8785_v8  ;;  %4110 = vperm.xlu0 %5927, %v8403_v5   ;;  %5901 = vset.pattern.permute.xlu2 %v6112_v24 }
 0x5bc   : > { %v8788_v2 = vpop.permute.xlu1 %3122 }
 0x5bd   : > { %12014 = vst [vmem:[#allocation91_spill] sm:$0xff] %v8788_v2  ;;  %v8808_v2 = vpop.permute.xlu0 %2863 }
 0x5be   : > { %5898 = vset.pattern.permute.xlu1 %v6113_v60  ;;  %v6114_v60 = vmov 40   ;;  %12020 = vst [vmem:[#allocation16_spill] sm:$0xff] %v8808_v2  ;;  %v6116_v2 = vmov 90  }
 0x5bf   : > { %3510 = vperm.xlu1 %5898, %v8403_v5  }
 0x5c2   : > { %3531 = vrot.lane.b32.xlu2 %v8391_v62, %s6048_s11  ;;  %v8795_v34 = vpop.permute.xlu2 %3223 }
 0x5c3   : > { %12016 = vst [vmem:[#allocation95_spill] sm:$0xff] %v8795_v34  ;;  %4175 = vrot.lane.b32.xlu0 %v8406_v7, %s11840_s18 }
 0x5c4   : > { %v8799_v8 = vpop.permute.xlu1 %3140  ;;  %5931 = vset.pattern.permute.xlu0 %v12018_v13 }
 0x5c5   : > { %12017 = vst [vmem:[#allocation99_spill] sm:$0xff] %v8799_v8  ;;  %v8822_v18 = vpop.permute.xlu0 %2901 }
 0x5c6   : > { %12025 = vst [vmem:[#allocation23_spill] sm:$0xff] %v8822_v18  ;;  %v2335_v18 = vsel %vm12031_vm4, %v8488_v59, %v8472_v27 }
 0x5c7   : > { %3529 = vrot.lane.b32.xlu1 %v8409_v52, %s6048_s11 }
 0x5c8   : > { %5900 = vset.pattern.permute.xlu1 %v6114_v60  ;;  %v6115_v60 = vmov 66  }
 0x5ca   : > { %3575 = vperm.xlu2 %5901, %v8403_v5   ;;  %v8805_v24 = vpop.permute.xlu2 %3252 }
 0x5cb   : > { %12019 = vst [vmem:[#allocation100_spill] sm:$0xff] %v8805_v24  ;;  %4191 = vperm.xlu0 %5931, %v8403_v5   ;;  %v12024_v24 = vmov 24  }
 0x5cc   : > { %v8810_v34 = vpop.permute.xlu1 %3155 }
 0x5cd   : > { %12021 = vst [vmem:[#allocation15_spill] sm:$0xff] %v8810_v34  ;;  %v8850_v58 = vpop.permute.xlu0 %2944 }
 0x5ce   : > { %12032 = vst [vmem:[#allocation33_spill] sm:$0xff] %v8850_v58 }
 0x5cf   : > { %3559 = vperm.xlu1 %5900, %v8403_v5  }
 0x5d2   : > { %3606 = vrot.lane.b32.xlu2 %v8388_v31, %s6049_s14 }
 0x5d3   : > { %4256 = vrot.lane.b32.xlu0 %v8406_v7, %s11845_s29  ;;  %v8817_v13 = vpop.permute.xlu2 %3300  ;;  %5905 = vset.pattern.permute.xlu2 %v6115_v60  ;;  %v8836_v60 = vsel %vm12027_vm0, %v8634_v41, %v8465_v45 }
 0x5d4   : > { %12022 = vst [vmem:[#allocation30_spill] sm:$0xff] %v8817_v13  ;;  %5935 = vset.pattern.permute.xlu0 %v12024_v24  ;;  %v8831_v13 = vsel %vm12026_vm1, %v8472_v27, %v8634_v41  ;;  %v2351_v34 = vperm.slane %v8836_v60, 0  ;;  %vm12035_vm1 = vcmask 334848  }
 0x5d5   : > { %v8819_v8 = vpop.permute.xlu1 %3203  ;;  %v2366_v57 = vperm.slane %v8831_v13, 1  ;;  %vm12036_vm0 = vmmov %vm12035_vm1 }
 0x5d6   : > { %12023 = vst [vmem:[#allocation17_spill] sm:$0xff] %v8819_v8  ;;  %v2350_v8 = vperm.slane %v8831_v13, 0  ;;  %v2355_v53 = vmul.f32 %v2351_v34, %v8498_v19  ;;  %vm12038_vm4 = vmmov %vm12036_vm0 }
 0x5d7   : > { %5902 = vset.pattern.permute.xlu1 %v6116_v2  ;;  %v2342_v2 = vsel %vm12029_vm2, %v8465_v45, %v8488_v59  ;;  %v6117_v45 = vmov 41   ;;  %v2365_v59 = vperm.slane %v2335_v18, 1  ;;  %v2370_v1 = vmul.f32 %v2366_v57, %v8483_v40  ;;  %vm12037_vm2 = vmmov %vm12036_vm0 }
 0x5d8   : > { %3591 = vperm.xlu1 %5902, %v8403_v5   ;;  %v2348_v14 = vperm.slane %v2342_v2, 0  ;;  %v2364_v27 = vperm.slane %v2342_v2, 1  ;;  %v2380_v16 = vperm.slane %v2342_v2, 2  ;;  %v2396_v55 = vperm.slane %v2342_v2, 3 }
 0x5d9   : > { %v6118_v57 = vmov 67  }
 0x5da   : > { %3612 = vrot.lane.b32.xlu2 %v8391_v62, %s6049_s14  ;;  %v2352_v41 = vmul.f32 %v2348_v14, %v8498_v19  ;;  %v2367_v14 = vperm.slane %v8836_v60, 1  ;;  %v2368_v28 = vmul.f32 %v2364_v27, %v8483_v40  ;;  %v2399_v27 = vperm.slane %v8836_v60, 3 }
 0x5db   : > { %4272 = vperm.xlu0 %5935, %v8403_v5  }
 0x5dc   : > { %v8838_v24 = vpop.permute.xlu2 %3332  ;;  %v2371_v22 = vmul.f32 %v2367_v14, %v8483_v40 }
 0x5dd   : > { %12028 = vst [vmem:[#allocation38_spill] sm:$0xff] %v8838_v24  ;;  %v8843_v7 = vpop.permute.xlu1 %3221  ;;  %v2349_v24 = vperm.slane %v2335_v18, 0 }
 0x5de   : > { %12030 = vst [vmem:[#allocation7_spill] sm:$0xff] %v8843_v7  ;;  %v2354_v7 = vmul.f32 %v2350_v8, %v8498_v19  ;;  %v2381_v8 = vperm.slane %v2335_v18, 2 }
 0x5df   : > { %v2353_v58 = vmul.f32 %v2349_v24, %v8498_v19  ;;  %v2397_v19 = vperm.slane %v2335_v18, 3 }
 0x5e0   : > { %3610 = vrot.lane.b32.xlu1 %v8409_v52, %s6049_s14  ;;  %v2358_v34 = vadd.f32 %v2354_v7, %v8479_v9  ;;  %v2383_v7 = vperm.slane %v8836_v60, 2  ;;  %v2385_v18 = vmul.f32 %v2381_v8, %v8649_v20  ;;  %v8903_v60 = vsel %vm12037_vm2, %v8500_v46, %v8662_v61 }
 0x5e1   : > { %5904 = vset.pattern.permute.xlu1 %v6117_v45  ;;  %v2356_v45 = vadd.f32 %v2352_v41, %v8479_v9  ;;  %v2357_v24 = vadd.f32 %v2353_v58, %v8479_v9  ;;  %v2382_v41 = vperm.slane %v8831_v13, 2  ;;  %v2401_v14 = vmul.f32 %v2397_v19, %v8510_v39 }
 0x5e2   : > { %3656 = vperm.xlu2 %5905, %v8403_v5   ;;  %v2374_v58 = vadd.f32 %v2370_v1, %v2358_v34  ;;  %v8895_v1 = vsel %vm12036_vm0, %v8490_v10, %v8518_v29 }
 0x5e3   : > { %5941 = vset.pattern.permute.xlu0 %v11955_v0  ;;  %v2359_v0 = vadd.f32 %v2355_v53, %v8479_v9  ;;  %v2372_v2 = vadd.f32 %v2368_v28, %v2356_v45  ;;  %v2398_v53 = vperm.slane %v8831_v13, 3  ;;  %v2386_v28 = vmul.f32 %v2382_v41, %v8649_v20 }
 0x5e4   : > { %v8859_v38 = vpop.permute.xlu2 %3365  ;;  %v8890_v13 = vsel %vm12035_vm1, %v8518_v29, %v8500_v46  ;;  %v2403_v45 = vmul.f32 %v2399_v27, %v8510_v39  ;;  %vm12039_vm1 = vcmask 326656  }
 0x5e5   : > { %12033 = vst [vmem:[#allocation29_spill] sm:$0xff] %v8859_v38  ;;  %v8865_v17 = vpop.permute.xlu1 %3236  ;;  %v2369_v38 = vmul.f32 %v2365_v59, %v8483_v40  ;;  %v2375_v9 = vadd.f32 %v2371_v22, %v2359_v0  ;;  %v2384_v40 = vmul.f32 %v2380_v16, %v8649_v20  ;;  %v2387_v59 = vmul.f32 %v2383_v7, %v8649_v20  ;;  %vm12040_vm0 = vmmov %vm12039_vm1 }
 0x5e6   : > { %12034 = vst [vmem:[#allocation43_spill] sm:$0xff] %v8865_v17  ;;  %v8879_v17 = vpop.permute.xlu0 %2982  ;;  %v2400_v22 = vmul.f32 %v2396_v55, %v8510_v39  ;;  %v8908_v20 = vsel %vm12038_vm4, %v8662_v61, %v8490_v10  ;;  %v2402_v29 = vmul.f32 %v2398_v53, %v8510_v39  ;;  %v2429_v55 = vperm.slane %v8895_v1, 0  ;;  %vm12041_vm2 = vmmov %vm12040_vm0 }
 0x5e7   : > { %v2373_v16 = vadd.f32 %v2369_v38, %v2357_v24  ;;  %v2388_v8 = vadd.f32 %v2384_v40, %v2372_v2  ;;  %v2430_v34 = vperm.slane %v8890_v13, 0  ;;  %v2390_v46 = vadd.f32 %v2386_v28, %v2374_v58  ;;  %vm12042_vm4 = vmmov %vm12040_vm0 }
 0x5e8   : > { %3640 = vperm.xlu1 %5904, %v8403_v5   ;;  %v2391_v41 = vadd.f32 %v2387_v59, %v2375_v9  ;;  %v2431_v7 = vperm.slane %v8903_v60, 0  ;;  %v2432_v10 = vperm.slane %v8908_v20, 0  ;;  %v2433_v61 = vmul.f32 %v2429_v55, %v8527_v12 }
 0x5e9   : > { %v2389_v38 = vadd.f32 %v2385_v18, %v2373_v16  ;;  %v2434_v19 = vmul.f32 %v2430_v34, %v8527_v12  ;;  %v6119_v53 = vmov 91   ;;  %v2404_v27 = vadd.f32 %v2400_v22, %v2388_v8 }
 0x5ea   : > { %3687 = vrot.lane.b32.xlu2 %v8388_v31, %s6053_s15  ;;  %v2435_v39 = vmul.f32 %v2431_v7, %v8527_v12  ;;  %v2436_v2 = vmul.f32 %v2432_v10, %v8527_v12  ;;  %v2445_v58 = vperm.slane %v8895_v1, 1  ;;  %v2446_v9 = vperm.slane %v8890_v13, 1 }
 0x5eb   : > { %5909 = vset.pattern.permute.xlu2 %v6118_v57  ;;  %v2405_v40 = vadd.f32 %v2401_v14, %v2389_v38  ;;  %v2406_v18 = vadd.f32 %v2402_v29, %v2390_v46  ;;  %v2407_v57 = vadd.f32 %v2403_v45, %v2391_v41  ;;  %v2447_v28 = vperm.slane %v8903_v60, 1 }
 0x5ec   : > { %v8897_v0 = vpop.permute.xlu2 %3369  ;;  %v2448_v59 = vperm.slane %v8908_v20, 1  ;;  %v2437_v55 = vadd.f32 %v2433_v61, %v2404_v27  ;;  %v2449_v38 = vmul.f32 %v2445_v58, %v8508_v51  ;;  %v2450_v34 = vmul.f32 %v2446_v9, %v8508_v51 }
 0x5ed   : > { %v2438_v22 = vadd.f32 %v2434_v19, %v2405_v40  ;;  %v2439_v14 = vadd.f32 %v2435_v39, %v2406_v18  ;;  %v2440_v8 = vadd.f32 %v2436_v2, %v2407_v57  ;;  %v2451_v7 = vmul.f32 %v2447_v28, %v8508_v51 }
 0x5ee   : > { %v8915_v24 = vpop.permute.xlu1 %3284  ;;  %v8930_v16 = vpop.permute.xlu0 %3025  ;;  %v2452_v29 = vmul.f32 %v2448_v59, %v8508_v51  ;;  %v2461_v45 = vperm.slane %v8895_v1, 2  ;;  %v2462_v41 = vperm.slane %v8890_v13, 2  ;;  %v2453_v10 = vadd.f32 %v2449_v38, %v2437_v55 }
 0x5ef   : > { %v2463_v61 = vperm.slane %v8903_v60, 2  ;;  %v2464_v19 = vperm.slane %v8908_v20, 2  ;;  %v2455_v39 = vadd.f32 %v2451_v7, %v2439_v14  ;;  %v2479_v27 = vperm.slane %v8903_v60, 3 }
 0x5f0   : > { %5906 = vset.pattern.permute.xlu1 %v6119_v53  ;;  %v2454_v53 = vadd.f32 %v2450_v34, %v2438_v22  ;;  %v2456_v2 = vadd.f32 %v2452_v29, %v2440_v8  ;;  %v2465_v51 = vmul.f32 %v2461_v45, %v8674_v49  ;;  %v2466_v40 = vmul.f32 %v2462_v41, %v8674_v49 }
 0x5f1   : > { %3672 = vperm.xlu1 %5906, %v8403_v5   ;;  %v8952_v58 = vsel %vm12039_vm1, %v8525_v15, %v8687_v42  ;;  %v2480_v9 = vperm.slane %v8908_v20, 3  ;;  %v2467_v18 = vmul.f32 %v2463_v61, %v8674_v49  ;;  %v2468_v57 = vmul.f32 %v2464_v19, %v8674_v49 }
 0x5f2   : > { %3693 = vrot.lane.b32.xlu2 %v8391_v62, %s6053_s15  ;;  %v8961_v60 = vsel %vm12040_vm0, %v8687_v42, %v8516_v37  ;;  %v6120_v59 = vmov 42   ;;  %v2477_v55 = vperm.slane %v8895_v1, 3  ;;  %v2478_v22 = vperm.slane %v8890_v13, 3 }
 0x5f3   : > { %v2469_v14 = vadd.f32 %v2465_v51, %v2453_v10  ;;  %v2470_v8 = vadd.f32 %v2466_v40, %v2454_v53  ;;  %v2471_v20 = vadd.f32 %v2467_v18, %v2455_v39  ;;  %v2472_v38 = vadd.f32 %v2468_v57, %v2456_v2 }
 0x5f4   : > { %v8932_v12 = vpop.permute.xlu2 %3413  ;;  %v2528_v34 = vperm.slane %v8952_v58, 1  ;;  %v8971_v49 = vsel %vm12041_vm2, %v8516_v37, %v8545_v26  ;;  %v2529_v7 = vperm.slane %v8961_v60, 1  ;;  %v2481_v29 = vmul.f32 %v2477_v55, %v8538_v48 }
 0x5f5   : > { %v2482_v1 = vmul.f32 %v2478_v22, %v8538_v48  ;;  %v8981_v13 = vsel %vm12042_vm4, %v8545_v26, %v8525_v15  ;;  %v2512_v45 = vperm.slane %v8952_v58, 0  ;;  %v2513_v41 = vperm.slane %v8961_v60, 0 }
 0x5f6   : > { %v8973_v42 = vpop.permute.xlu0 %3063  ;;  %v2544_v37 = vperm.slane %v8952_v58, 2  ;;  %v2483_v10 = vmul.f32 %v2479_v27, %v8538_v48  ;;  %v2545_v61 = vperm.slane %v8961_v60, 2  ;;  %v2510_v39 = vperm.slane %v8971_v49, 0 }
 0x5f7   : > { %v8939_v46 = vpop.permute.xlu1 %3316  ;;  %v2532_v2 = vmul.f32 %v2528_v34, %v8536_v4  ;;  %v2484_v26 = vmul.f32 %v2480_v9, %v8538_v48  ;;  %v2511_v51 = vperm.slane %v8981_v13, 0  ;;  %v2533_v27 = vmul.f32 %v2529_v7, %v8536_v4 }
 0x5f8   : > { %v2485_v40 = vadd.f32 %v2481_v29, %v2469_v14  ;;  %v2486_v18 = vadd.f32 %v2482_v1, %v2470_v8  ;;  %v2514_v57 = vmul.f32 %v2510_v39, %v8555_v56  ;;  %v2526_v55 = vperm.slane %v8971_v49, 1 }
 0x5f9   : > { %3691 = vrot.lane.b32.xlu1 %v8409_v52, %s6053_s15  ;;  %v2515_v22 = vmul.f32 %v2511_v51, %v8555_v56  ;;  %v2516_v48 = vmul.f32 %v2512_v45, %v8555_v56  ;;  %v6121_v34 = vmov 68   ;;  %v2542_v14 = vperm.slane %v8971_v49, 2 }
 0x5fa   : > { %3737 = vperm.xlu2 %5909, %v8403_v5   ;;  %5908 = vset.pattern.permute.xlu1 %v6120_v59  ;;  %v2487_v59 = vadd.f32 %v2483_v10, %v2471_v20  ;;  %v2543_v8 = vperm.slane %v8981_v13, 2  ;;  %v2517_v7 = vmul.f32 %v2513_v41, %v8555_v56  ;;  %v2488_v29 = vadd.f32 %v2484_v26, %v2472_v38 }
 0x5fb   : > { %v2548_v20 = vmul.f32 %v2544_v37, %v8703_v50  ;;  %v2549_v1 = vmul.f32 %v2545_v61, %v8703_v50  ;;  %v2558_v10 = vperm.slane %v8971_v49, 3  ;;  %v9016_v45 = vsel %vm323_vm3, %v8553_v54, %v8715_v36 }
 0x5fc   : > { %v8963_v28 = vpop.permute.xlu2 %3444  ;;  %v9021_v39 = vsel %vm323_vm3, %v8715_v36, %v8543_v21  ;;  %v2518_v51 = vadd.f32 %v2514_v57, %v2485_v40  ;;  %v2530_v56 = vmul.f32 %v2526_v55, %v8536_v4  ;;  %v2559_v38 = vperm.slane %v8981_v13, 3 }
 0x5fd   : > { %v2519_v41 = vadd.f32 %v2515_v22, %v2486_v18  ;;  %v2520_v37 = vadd.f32 %v2516_v48, %v2487_v59  ;;  %v2547_v15 = vmul.f32 %v2543_v8, %v8703_v50  ;;  %v2521_v19 = vadd.f32 %v2517_v7, %v2488_v29  ;;  %v9048_v22 = vld [vmem:[%s11212_s2 + $0x70] sm:$0xf] }
 0x5fe   : > { %v9025_v61 = vpop.permute.xlu0 %3106  ;;  %v2593_v36 = vperm.slane %v9016_v45, 0  ;;  %v2594_v40 = vperm.slane %v9021_v39, 0  ;;  %v2609_v57 = vperm.slane %v9016_v45, 1  ;;  %v6122_v18 = vmov 92  }
 0x5ff   : > { %v8987_v53 = vpop.permute.xlu1 %3363  ;;  %v2625_v59 = vperm.slane %v9016_v45, 2  ;;  %v2626_v55 = vperm.slane %v9021_v39, 2  ;;  %v9055_v8 = vsel %vm323_vm3, %v8573_v25, %v8553_v54  ;;  %v2537_v29 = vadd.f32 %v2533_v27, %v2521_v19 }
 0x600   : > { %v12045_v19 = vperm.slane %v8961_v60, 3  ;;  %vm12055_vm4 = vcmask 179200  }
 0x601   : > { %3721 = vperm.xlu1 %5908, %v8403_v5   ;;  %v2527_v5 = vperm.slane %v8981_v13, 1  ;;  %v2610_v13 = vperm.slane %v9021_v39, 1  ;;  %v9064_v48 = vmul.f32 %v2625_v59, %v8727_v11 }
 0x602   : > { %3768 = vrot.lane.b32.xlu2 %v8388_v31, %s6054_s17  ;;  %v2565_v27 = vmul.f32 %v12045_v19, %v8565_v35 }
 0x603   : > { %5913 = vset.pattern.permute.xlu2 %v6121_v34  ;;  %v2531_v26 = vmul.f32 %v2527_v5, %v8536_v4  ;;  %v2546_v34 = vmul.f32 %v2542_v14, %v8703_v50  ;;  %v2534_v4 = vadd.f32 %v2530_v56, %v2518_v51  ;;  %v9041_v50 = vsel %vm323_vm3, %v8543_v21, %v8573_v25 }
 0x604   : > { %v9004_v9 = vpop.permute.xlu2 %3450  ;;  %v2536_v14 = vadd.f32 %v2532_v2, %v2520_v37  ;;  %v2613_v51 = vmul.f32 %v2609_v57, %v8563_v6  ;;  %v2562_v56 = vmul.f32 %v2558_v10, %v8565_v35  ;;  %v2563_v2 = vmul.f32 %v2559_v38, %v8565_v35 }
 0x605   : > { %v2535_v5 = vadd.f32 %v2531_v26, %v2519_v41  ;;  %v2591_v41 = vperm.slane %v9041_v50, 0  ;;  %v2550_v54 = vadd.f32 %v2546_v34, %v2534_v4  ;;  %v12044_v25 = vperm.slane %v8952_v58, 3 }
 0x606   : > { %v2592_v10 = vperm.slane %v9055_v8, 0  ;;  %v2552_v57 = vadd.f32 %v2548_v20, %v2536_v14  ;;  %v2553_v34 = vadd.f32 %v2549_v1, %v2537_v29  ;;  %vm12046_vm3 = vcmask 310272  }
 0x607   : > { %v9027_v49 = vpop.permute.xlu1 %3367  ;;  %v2564_v37 = vmul.f32 %v12044_v25, %v8565_v35  ;;  %v2551_v26 = vadd.f32 %v2547_v15, %v2535_v5  ;;  %v2595_v38 = vmul.f32 %v2591_v41, %v8582_v63  ;;  %v2566_v4 = vadd.f32 %v2562_v56, %v2550_v54  ;;  %v9089_v15 = vpop.permute.xlu0 %3144  ;;  %vm12047_vm1 = vmmov %vm12046_vm3 }
 0x608   : > { %v2596_v58 = vmul.f32 %v2592_v10, %v8582_v63  ;;  %v2597_v25 = vmul.f32 %v2593_v36, %v8582_v63  ;;  %v9086_v35 = vsel %vm12046_vm3, %v8740_v44, %v8571_v43  ;;  %v2607_v60 = vperm.slane %v9041_v50, 1  ;;  %vm12048_vm0 = vmmov %vm12047_vm1 }
 0x609   : > { %5910 = vset.pattern.permute.xlu1 %v6122_v18  ;;  %v2614_v18 = vmul.f32 %v2610_v13, %v8563_v6  ;;  %v9076_v13 = vmul.f32 %v2626_v55, %v8727_v11  ;;  %v2567_v7 = vadd.f32 %v2563_v2, %v2551_v26  ;;  %v2568_v20 = vadd.f32 %v2564_v37, %v2552_v57  ;;  %vm12049_vm2 = vmmov %vm12048_vm0 }
 0x60a   : > { %3774 = vrot.lane.b32.xlu2 %v8391_v62, %s6054_s17  ;;  %3753 = vperm.xlu1 %5910, %v9048_v22   ;;  %v2569_v55 = vadd.f32 %v2565_v27, %v2553_v34  ;;  %v2608_v5 = vperm.slane %v9055_v8, 1  ;;  %v2598_v1 = vmul.f32 %v2594_v40, %v8582_v63  ;;  %v2623_v36 = vperm.slane %v9041_v50, 2  ;;  %vm12058_vm3 = vmmov %vm12055_vm4 }
 0x60b   : > { %v2624_v14 = vperm.slane %v9055_v8, 2  ;;  %v9099_v29 = vsel %vm12047_vm1, %v8580_v32, %v8740_v44  ;;  %v2599_v56 = vadd.f32 %v2595_v38, %v2566_v4  ;;  %v2675_v41 = vperm.slane %v9086_v35, 0  ;;  %vm12062_vm1 = vmmov %vm12058_vm3 }
 0x60c   : > { %v9057_v21 = vpop.permute.xlu2 %3494  ;;  %v2691_v63 = vperm.slane %v9086_v35, 1  ;;  %v2600_v40 = vadd.f32 %v2596_v58, %v2567_v7  ;;  %v2601_v54 = vadd.f32 %v2597_v25, %v2568_v20  ;;  %v6123_v37 = vmov 43  }
 0x60d   : > { %12043 = vst [vmem:[#allocation8_spill] sm:$0xff] %v9057_v21  ;;  %v2707_v19 = vperm.slane %v9086_v35, 2  ;;  %v2611_v44 = vmul.f32 %v2607_v60, %v8563_v6  ;;  %v2639_v10 = vperm.slane %v9041_v50, 3  ;;  %v2612_v26 = vmul.f32 %v2608_v5, %v8563_v6 }
 0x60e   : > { %v2640_v57 = vperm.slane %v9055_v8, 3  ;;  %v2706_v38 = vperm.slane %v9099_v29, 2  ;;  %v2602_v34 = vadd.f32 %v2598_v1, %v2569_v55  ;;  %v2627_v7 = vmul.f32 %v2623_v36, %v8727_v11 }
 0x60f   : > { %v9079_v59 = vpop.permute.xlu1 %3397  ;;  %v2628_v4 = vmul.f32 %v2624_v14, %v8727_v11  ;;  %v2674_v58 = vperm.slane %v9099_v29, 0  ;;  %v2615_v25 = vadd.f32 %v2611_v44, %v2599_v56  ;;  %v2616_v20 = vadd.f32 %v2612_v26, %v2600_v40  ;;  %v9147_v40 = vpop.permute.xlu0 %3187 }
 0x610   : > { %v9120_v50 = vsel %vm12048_vm0, %v8600_v33, %v8580_v32  ;;  %v9125_v6 = vsel %vm12049_vm2, %v8571_v43, %v8600_v33  ;;  %v2690_v60 = vperm.slane %v9099_v29, 1  ;;  %v9132_v55 = vmul.f32 %v2707_v19, %v8757_v3  ;;  %vm12063_vm0 = vmmov %vm12062_vm1 }
 0x611   : > { %v2618_v5 = vadd.f32 %v2614_v18, %v2602_v34  ;;  %v2643_v32 = vmul.f32 %v2639_v10, %v8592_v47  ;;  %v2644_v1 = vmul.f32 %v2640_v57, %v8592_v47  ;;  %v12051_v33 = vperm.slane %v9016_v45, 3 }
 0x612   : > { %3818 = vperm.xlu2 %5913, %v9048_v22   ;;  %3772 = vrot.lane.b32.xlu1 %v8409_v52, %s6054_s17  ;;  %v2694_v43 = vmul.f32 %v2690_v60, %v8590_v23  ;;  %v2672_v14 = vperm.slane %v9125_v6, 0  ;;  %v2673_v56 = vperm.slane %v9120_v50, 0  ;;  %v2632_v19 = vadd.f32 %v2628_v4, %v2616_v20  ;;  %v12056_v60 = vld [vmem:[#allocation37_spill] sm:$0xff] }
 0x613   : > { %5912 = vset.pattern.permute.xlu1 %v6123_v37  ;;  %v2617_v37 = vadd.f32 %v2613_v51, %v2601_v54  ;;  %v9135_v51 = vmul.f32 %v2706_v38, %v8757_v3  ;;  %v2645_v36 = vmul.f32 %v12051_v33, %v8592_v47  ;;  %v2631_v54 = vadd.f32 %v2627_v7, %v2615_v25  ;;  %v12054_v38 = vld [vmem:[#allocation80_spill] sm:$0xff] }
 0x614   : > { %v9103_v2 = vpop.permute.xlu2 %3525  ;;  %v2695_v10 = vmul.f32 %v2691_v63, %v8590_v23  ;;  %v6124_v26 = vmov 69   ;;  %v12053_v45 = vperm.slane %v9021_v39, 3  ;;  %v9160_v34 = vsel %vm12055_vm4, %v12054_v38, %v8597_v30 }
 0x615   : > { %v2633_v44 = vadd.f32 %v9064_v48, %v2617_v37  ;;  %v2676_v33 = vmul.f32 %v2672_v14, %v12056_v60  ;;  %v2677_v7 = vmul.f32 %v2673_v56, %v12056_v60  ;;  %v2634_v4 = vadd.f32 %v9076_v13, %v2618_v5  ;;  %v12057_v14 = vld [vmem:[#allocation103_spill] sm:$0xff] }
 0x616   : > { %v2646_v57 = vmul.f32 %v12053_v45, %v8592_v47  ;;  %v2647_v48 = vadd.f32 %v2643_v32, %v2631_v54  ;;  %v2648_v25 = vadd.f32 %v2644_v1, %v2632_v19  ;;  %v2688_v63 = vperm.slane %v9125_v6, 1 }
 0x617   : > { %v2649_v20 = vadd.f32 %v2645_v36, %v2633_v44  ;;  %v2689_v37 = vperm.slane %v9120_v50, 1  ;;  %v2678_v47 = vmul.f32 %v2674_v58, %v12056_v60  ;;  %v2679_v39 = vmul.f32 %v2675_v41, %v12056_v60 }
 0x618   : > { %v9127_v8 = vpop.permute.xlu1 %3429  ;;  %v2704_v45 = vperm.slane %v9125_v6, 2  ;;  %v9174_v56 = vsel %vm12058_vm3, %v12057_v14, %v12054_v38  ;;  %v2650_v5 = vadd.f32 %v2646_v57, %v2634_v4  ;;  %v2756_v32 = vperm.slane %v9160_v34, 0 }
 0x619   : > { %12050 = vst [vmem:[#allocation73_spill] sm:$0xff] %v9127_v8  ;;  %v2680_v1 = vadd.f32 %v2676_v33, %v2647_v48  ;;  %v2681_v36 = vadd.f32 %v2677_v7, %v2648_v25  ;;  %v2772_v58 = vperm.slane %v9160_v34, 1  ;;  %v2692_v54 = vmul.f32 %v2688_v63, %v8590_v23  ;;  %v12060_v7 = vld [vmem:[#allocation74_spill] sm:$0xff] }
 0x61a   : > { %3849 = vrot.lane.b32.xlu2 %v8388_v31, %s11820_s16  ;;  %3802 = vperm.xlu1 %5912, %v9048_v22   ;;  %v2705_v19 = vperm.slane %v9120_v50, 2  ;;  %v2693_v44 = vmul.f32 %v2689_v37, %v8590_v23  ;;  %v2787_v38 = vperm.slane %v9174_v56, 2  ;;  %v2682_v57 = vadd.f32 %v2678_v47, %v2649_v20  ;;  %v12061_v20 = vld [vmem:[#allocation51_spill] sm:$0xff]  ;;  %v12078_v8 = vld [vmem:[#allocation34_spill] sm:$0xff] }
 0x61b   : > { %5917 = vset.pattern.permute.xlu2 %v6124_v26  ;;  %v2788_v26 = vperm.slane %v9160_v34, 2  ;;  %v2683_v60 = vadd.f32 %v2679_v39, %v2650_v5  ;;  %v6125_v4 = vmov 93   ;;  %v2708_v25 = vmul.f32 %v2704_v45, %v8757_v3 }
 0x61c   : > { %v9150_v18 = vpop.permute.xlu2 %3531  ;;  %v2720_v63 = vperm.slane %v9125_v6, 3  ;;  %v2721_v41 = vperm.slane %v9120_v50, 3  ;;  %v2696_v23 = vadd.f32 %v2692_v54, %v2680_v1  ;;  %v2697_v37 = vadd.f32 %v2693_v44, %v2681_v36  ;;  %v12064_v54 = vld [vmem:[#allocation25_spill] sm:$0xff] }
 0x61d   : > { %12052 = vst [vmem:[#allocation41_spill] sm:$0xff] %v9150_v18  ;;  %v9190_v48 = vmul.f32 %v2788_v26, %v12060_v7  ;;  %v9199_v47 = vsel %vm12062_vm1, %v12061_v20, %v12057_v14  ;;  %v9204_v39 = vsel %vm12063_vm0, %v8597_v30, %v12061_v20  ;;  %v9206_v26 = vpop.permute.xlu0 %3225  ;;  %v2709_v6 = vmul.f32 %v2705_v19, %v8757_v3 }
 0x61e   : > { %v2755_v50 = vperm.slane %v9174_v56, 0  ;;  %v2771_v45 = vperm.slane %v9174_v56, 1  ;;  %v9213_v1 = vmul.f32 %v2787_v38, %v12060_v7  ;;  %v2698_v14 = vadd.f32 %v2694_v43, %v2682_v57  ;;  %v12069_v57 = vld [vmem:[#allocation47_spill] sm:$0xff] }
 0x61f   : > { %v2699_v36 = vadd.f32 %v2695_v10, %v2683_v60  ;;  %v2724_v44 = vmul.f32 %v2720_v63, %v12064_v54  ;;  %v2725_v20 = vmul.f32 %v2721_v41, %v12064_v54  ;;  %v2753_v27 = vperm.slane %v9204_v39, 0  ;;  %v12070_v60 = vld [vmem:[#allocation92_spill] sm:$0xff]  ;;  %v12072_v63 = vld [vmem:[#allocation19_spill] sm:$0xff] }
 0x620   : > { %v9176_v13 = vpop.permute.xlu1 %3448  ;;  %v2754_v3 = vperm.slane %v9199_v47, 0  ;;  %v2712_v11 = vadd.f32 %v2708_v25, %v2696_v23  ;;  %v12067_v38 = vperm.slane %v9099_v29, 3  ;;  %v12068_v43 = vperm.slane %v9086_v35, 3 }
 0x621   : > { %vm12071_vm2 = vcmask 171008   ;;  %v2714_v25 = vadd.f32 %v9135_v51, %v2698_v14  ;;  %v2715_v29 = vadd.f32 %v9132_v55, %v2699_v36  ;;  %v6126_v55 = vmov 44  }
 0x622   : > { %3855 = vrot.lane.b32.xlu2 %v8391_v62, %s11820_s16  ;;  %5914 = vset.pattern.permute.xlu1 %v6125_v4  ;;  %v12065_v4 = vld [vmem:[#allocation21_spill] sm:$0xff]  ;;  %v2726_v5 = vmul.f32 %v12067_v38, %v12064_v54  ;;  %v2727_v10 = vmul.f32 %v12068_v43, %v12064_v54  ;;  %v9231_v41 = vsel %vm12071_vm2, %v12070_v60, %v12069_v57  ;;  %v2770_v54 = vperm.slane %v9199_v47, 1  ;;  %vm12075_vm4 = vmmov %vm12071_vm2 }
 0x623   : > { %3834 = vperm.xlu1 %5914, %v9048_v22   ;;  %v2775_v30 = vmul.f32 %v2771_v45, %v12065_v4  ;;  %v2757_v45 = vmul.f32 %v2753_v27, %v12072_v63  ;;  %v2758_v18 = vmul.f32 %v2754_v3, %v12072_v63  ;;  %v2728_v23 = vadd.f32 %v2724_v44, %v2712_v11  ;;  %vm12079_vm3 = vmmov %vm12071_vm2 }
 0x624   : > { %v9187_v33 = vpop.permute.xlu2 %3575  ;;  %v2759_v38 = vmul.f32 %v2755_v50, %v12072_v63  ;;  %v2760_v27 = vmul.f32 %v2756_v32, %v12072_v63  ;;  %v2776_v3 = vmul.f32 %v2772_v58, %v12065_v4  ;;  %v2730_v51 = vadd.f32 %v2726_v5, %v2714_v25  ;;  %vm12082_vm1 = vmmov %vm12071_vm2 }
 0x625   : > { %12059 = vst [vmem:[#allocation49_spill] sm:$0xff] %v9187_v33  ;;  %v2713_v33 = vadd.f32 %v2709_v6, %v2697_v37  ;;  %v2769_v37 = vperm.slane %v9204_v39, 1  ;;  %v2731_v14 = vadd.f32 %v2727_v10, %v2715_v29  ;;  %v2869_v11 = vperm.slane %v9231_v41, 2  ;;  %v9258_v10 = vpop.permute.xlu0 %3268 }
 0x626   : > { %v2837_v36 = vperm.slane %v9231_v41, 0  ;;  %v2761_v50 = vadd.f32 %v2757_v45, %v2728_v23  ;;  %v2785_v58 = vperm.slane %v9204_v39, 2  ;;  %v2786_v5 = vperm.slane %v9199_v47, 2 }
 0x627   : > { %v2729_v6 = vadd.f32 %v2725_v20, %v2713_v33  ;;  %v12074_v33 = vld [vmem:[#allocation24_spill] sm:$0xff]  ;;  %v2853_v20 = vperm.slane %v9231_v41, 1  ;;  %v2773_v43 = vmul.f32 %v2769_v37, %v12065_v4  ;;  %v2774_v63 = vmul.f32 %v2770_v54, %v12065_v4 }
 0x628   : > { %v9220_v19 = vpop.permute.xlu1 %3478  ;;  %v9252_v44 = vsel %vm12075_vm4, %v12074_v33, %v12070_v60  ;;  %v2763_v25 = vadd.f32 %v2759_v38, %v2730_v51  ;;  %v2764_v29 = vadd.f32 %v2760_v27, %v2731_v14  ;;  %v2802_v37 = vperm.slane %v9199_v47, 3  ;;  %v12089_v60 = vld [vmem:[#allocation27_spill] sm:$0xff] }
 0x629   : > { %12066 = vst [vmem:[#allocation6_spill] sm:$0xff] %v9220_v19  ;;  %v2762_v32 = vadd.f32 %v2758_v18, %v2729_v6  ;;  %v2801_v18 = vperm.slane %v9204_v39, 3  ;;  %v2868_v45 = vperm.slane %v9252_v44, 2  ;;  %v2777_v6 = vadd.f32 %v2773_v43, %v2761_v50  ;;  %v12081_v50 = vld [vmem:[#allocation5_spill] sm:$0xff] }
 0x62a   : > { %3899 = vperm.xlu2 %5917, %v9048_v22   ;;  %v9273_v4 = vsel %vm12079_vm3, %v12069_v57, %v12078_v8  ;;  %v2789_v54 = vmul.f32 %v2785_v58, %v12060_v7  ;;  %v2790_v39 = vmul.f32 %v2786_v5, %v12060_v7  ;;  %v2836_v38 = vperm.slane %v9252_v44, 0  ;;  %v12083_v58 = vld [vmem:[#allocation48_spill] sm:$0xff] }
 0x62b   : > { %3853 = vrot.lane.b32.xlu1 %v8409_v52, %s11820_s16  ;;  %v2778_v19 = vadd.f32 %v2774_v63, %v2762_v32  ;;  %v2852_v27 = vperm.slane %v9252_v44, 1  ;;  %v6127_v47 = vmov 70   ;;  %v2779_v14 = vadd.f32 %v2775_v30, %v2763_v25 }
 0x62c   : > { %v9239_v35 = vpop.permute.xlu2 %3606  ;;  %5916 = vset.pattern.permute.xlu1 %v6126_v55  ;;  %v12076_v55 = vld [vmem:[#allocation16_spill] sm:$0xff]  ;;  %v2805_v57 = vmul.f32 %v2801_v18, %v12081_v50  ;;  %v9287_v32 = vsel %vm12082_vm1, %v12078_v8, %v12074_v33  ;;  %v2834_v63 = vperm.slane %v9273_v4, 0  ;;  %v2793_v30 = vadd.f32 %v2789_v54, %v2777_v6 }
 0x62d   : > { %12073 = vst [vmem:[#allocation57_spill] sm:$0xff] %v9239_v35  ;;  %v9262_v35 = vmul.f32 %v2869_v11, %v12076_v55  ;;  %v2780_v11 = vadd.f32 %v2776_v3, %v2764_v29  ;;  %v9291_v7 = vmul.f32 %v2868_v45, %v12076_v55  ;;  %v2856_v5 = vmul.f32 %v2852_v27, %v12083_v58  ;;  %v12086_v45 = vld [vmem:[#allocation53_spill] sm:$0xff] }
 0x62e   : > { %v2794_v3 = vadd.f32 %v2790_v39, %v2778_v19  ;;  %v2806_v25 = vmul.f32 %v2802_v37, %v12081_v50  ;;  %v12084_v29 = vperm.slane %v9174_v56, 3  ;;  %v12085_v33 = vperm.slane %v9160_v34, 3 }
 0x62f   : > { %vm12088_vm0 = vcmask 162816   ;;  %v2835_v27 = vperm.slane %v9287_v32, 0  ;;  %v2838_v6 = vmul.f32 %v2834_v63, %v12089_v60  ;;  %v2795_v19 = vadd.f32 %v9213_v1, %v2779_v14 }
 0x630   : > { %v2807_v8 = vmul.f32 %v12084_v29, %v12081_v50  ;;  %v2808_v18 = vmul.f32 %v12085_v33, %v12081_v50  ;;  %v2796_v37 = vadd.f32 %v9190_v48, %v2780_v11  ;;  %v2809_v54 = vadd.f32 %v2805_v57, %v2793_v30  ;;  %v9316_v29 = vpop.permute.xlu0 %3348  ;;  %vm12092_vm2 = vmmov %vm12088_vm0 }
 0x631   : > { %v9267_v23 = vpop.permute.xlu1 %3510  ;;  %v2850_v56 = vperm.slane %v9273_v4, 1  ;;  %v2839_v39 = vmul.f32 %v2835_v27, %v12089_v60  ;;  %v2840_v34 = vmul.f32 %v2836_v38, %v12089_v60  ;;  %v2841_v50 = vmul.f32 %v2837_v36, %v12089_v60  ;;  %v12091_v38 = vld [vmem:[#allocation26_spill] sm:$0xff]  ;;  %vm12096_vm4 = vmmov %vm12088_vm0 }
 0x632   : > { %12077 = vst [vmem:[#allocation46_spill] sm:$0xff] %v9267_v23  ;;  %3930 = vrot.lane.b32.xlu2 %v8388_v31, %s11825_s8  ;;  %v2810_v63 = vadd.f32 %v2806_v25, %v2794_v3  ;;  %v2811_v23 = vadd.f32 %v2807_v8, %v2795_v19  ;;  %v2812_v48 = vadd.f32 %v2808_v18, %v2796_v37  ;;  %v2851_v14 = vperm.slane %v9287_v32, 1  ;;  %vm12097_vm3 = vmmov %vm12088_vm0 }
 0x633   : > { %5921 = vset.pattern.permute.xlu2 %v6127_v47  ;;  %3883 = vperm.xlu1 %5916, %v9048_v22   ;;  %v12087_v47 = vld [vmem:[#allocation23_spill] sm:$0xff]  ;;  %v2842_v60 = vadd.f32 %v2838_v6, %v2809_v54  ;;  %v2866_v30 = vperm.slane %v9273_v4, 2  ;;  %v2867_v3 = vperm.slane %v9287_v32, 2  ;;  %v6128_v25 = vmov 94  }
 0x634   : > { %v9281_v51 = vpop.permute.xlu2 %3612  ;;  %v9306_v43 = vsel %vm12088_vm0, %v12087_v47, %v12086_v45  ;;  %v9328_v36 = vsel %vm12092_vm2, %v12091_v38, %v12087_v47  ;;  %v2854_v8 = vmul.f32 %v2850_v56, %v12083_v58  ;;  %v2843_v18 = vadd.f32 %v2839_v39, %v2810_v63  ;;  %v12094_v47 = vld [vmem:[#allocation33_spill] sm:$0xff] }
 0x635   : > { %12080 = vst [vmem:[#allocation78_spill] sm:$0xff] %v9281_v51  ;;  %v2857_v51 = vmul.f32 %v2853_v20, %v12083_v58  ;;  %v2950_v1 = vperm.slane %v9306_v43, 2  ;;  %v2918_v20 = vperm.slane %v9306_v43, 0  ;;  %v2934_v57 = vperm.slane %v9306_v43, 1  ;;  %v12095_v56 = vld [vmem:[#allocation65_spill] sm:$0xff] }
 0x636   : > { %v2844_v27 = vadd.f32 %v2840_v34, %v2811_v23  ;;  %v2845_v19 = vadd.f32 %v2841_v50, %v2812_v48  ;;  %v2882_v54 = vperm.slane %v9273_v4, 3  ;;  %v2858_v21 = vadd.f32 %v2854_v8, %v2842_v60 }
 0x637   : > { %v9339_v6 = vmul.f32 %v2950_v1, %v12094_v47  ;;  %v9349_v23 = vsel %vm12096_vm4, %v12086_v45, %v12095_v56  ;;  %v2870_v39 = vmul.f32 %v2866_v30, %v12076_v55  ;;  %v2871_v34 = vmul.f32 %v2867_v3, %v12076_v55  ;;  %v12098_v55 = vld [vmem:[#allocation56_spill] sm:$0xff] }
 0x638   : > { %v2917_v50 = vperm.slane %v9328_v36, 0  ;;  %v2933_v4 = vperm.slane %v9328_v36, 1  ;;  %v2860_v1 = vadd.f32 %v2856_v5, %v2844_v27  ;;  %v2861_v48 = vadd.f32 %v2857_v51, %v2845_v19  ;;  %v9373_v3 = vpop.permute.xlu0 %3381  ;;  %v12102_v27 = vld [vmem:[#allocation28_spill] sm:$0xff] }
 0x639   : > { %v9318_v33 = vpop.permute.xlu1 %3529  ;;  %v2886_v60 = vmul.f32 %v2882_v54, %v12098_v55  ;;  %v2915_v30 = vperm.slane %v9349_v23, 0  ;;  %v2874_v5 = vadd.f32 %v2870_v39, %v2858_v21  ;;  %vm12103_vm1 = vcmask 154624   ;;  %v12104_v54 = vld [vmem:[#allocation22_spill] sm:$0xff] }
 0x63a   : > { %12090 = vst [vmem:[#allocation81_spill] sm:$0xff] %v9318_v33  ;;  %3936 = vrot.lane.b32.xlu2 %v8391_v62, %s11825_s8  ;;  %v2855_v33 = vmul.f32 %v2851_v14, %v12083_v58  ;;  %v9383_v19 = vsel %vm12103_vm1, %v8879_v17, %v12102_v27  ;;  %v2877_v39 = vadd.f32 %v9262_v35, %v2861_v48  ;;  %v6129_v37 = vmov 45   ;;  %vm12107_vm0 = vmmov %vm12103_vm1 }
 0x63b   : > { %5918 = vset.pattern.permute.xlu1 %v6128_v25  ;;  %v2883_v25 = vperm.slane %v9287_v32, 3  ;;  %v9358_v32 = vsel %vm12097_vm3, %v12095_v56, %v12091_v38  ;;  %v2921_v14 = vmul.f32 %v2917_v50, %v12104_v54  ;;  %v3031_v35 = vperm.slane %v9383_v19, 2  ;;  %vm12109_vm2 = vmmov %vm12107_vm0 }
 0x63c   : > { %v9330_v11 = vpop.permute.xlu2 %3656  ;;  %3915 = vperm.xlu1 %5918, %v9048_v22   ;;  %v2859_v63 = vadd.f32 %v2855_v33, %v2843_v18  ;;  %v12099_v33 = vperm.slane %v9231_v41, 3  ;;  %v2916_v21 = vperm.slane %v9358_v32, 0  ;;  %v2876_v41 = vadd.f32 %v9291_v7, %v2860_v1  ;;  %vm12110_vm4 = vmmov %vm12107_vm0 }
 0x63d   : > { %12093 = vst [vmem:[#allocation2_spill] sm:$0xff] %v9330_v11  ;;  %v2949_v11 = vperm.slane %v9328_v36, 2  ;;  %v2887_v51 = vmul.f32 %v2883_v25, %v12098_v55  ;;  %v2919_v25 = vmul.f32 %v2915_v30, %v12104_v54  ;;  %v12105_v30 = vld [vmem:[#allocation61_spill] sm:$0xff]  ;;  %vm12116_vm3 = vcmask 146432  }
 0x63e   : > { %v2889_v38 = vmul.f32 %v12099_v33, %v12098_v55  ;;  %v2875_v56 = vadd.f32 %v2871_v34, %v2859_v63  ;;  %v2922_v33 = vmul.f32 %v2918_v20, %v12104_v54  ;;  %v2937_v34 = vmul.f32 %v2933_v4, %v12105_v30  ;;  %vm12120_vm1 = vmmov %vm12116_vm3 }
 0x63f   : > { %v9363_v45 = vmul.f32 %v2949_v11, %v12094_v47  ;;  %v12101_v11 = vperm.slane %v9252_v44, 3  ;;  %v2890_v44 = vadd.f32 %v2886_v60, %v2874_v5  ;;  %v2932_v20 = vperm.slane %v9358_v32, 1 }
 0x640   : > { %v2891_v63 = vadd.f32 %v2887_v51, %v2875_v56  ;;  %v2893_v7 = vadd.f32 %v2889_v38, %v2877_v39  ;;  %v2938_v60 = vmul.f32 %v2934_v57, %v12105_v30  ;;  %v2999_v5 = vperm.slane %v9383_v19, 0 }
 0x641   : > { %v9360_v58 = vpop.permute.xlu1 %3559  ;;  %v2888_v18 = vmul.f32 %v12101_v11, %v12098_v55  ;;  %v2931_v55 = vperm.slane %v9349_v23, 1  ;;  %v2920_v11 = vmul.f32 %v2916_v21, %v12104_v54  ;;  %v2923_v48 = vadd.f32 %v2919_v25, %v2890_v44  ;;  %v12106_v25 = vld [vmem:[#allocation59_spill] sm:$0xff]  ;;  %v12108_v44 = vld [vmem:[#allocation62_spill] sm:$0xff] }
 0x642   : > { %3980 = vperm.xlu2 %5921, %v9048_v22   ;;  %v2947_v21 = vperm.slane %v9349_v23, 2  ;;  %v9409_v57 = vmul.f32 %v3031_v35, %v8930_v16  ;;  %v9415_v56 = vsel %vm12107_vm0, %v12106_v25, %v8879_v17  ;;  %v2963_v39 = vperm.slane %v9349_v23, 3  ;;  %vm12122_vm0 = vmmov %vm12120_vm1 }
 0x643   : > { %v2892_v1 = vadd.f32 %v2888_v18, %v2876_v41  ;;  %v2935_v50 = vmul.f32 %v2931_v55, %v12105_v30  ;;  %v2924_v4 = vadd.f32 %v2920_v11, %v2891_v63  ;;  %v3015_v18 = vperm.slane %v9383_v19, 1 }
 0x644   : > { %v9375_v8 = vpop.permute.xlu2 %3687  ;;  %3934 = vrot.lane.b32.xlu1 %v8409_v52, %s11825_s8  ;;  %v6130_v41 = vmov 71   ;;  %v9422_v55 = vsel %vm12109_vm2, %v12102_v27, %v12108_v44  ;;  %v2951_v63 = vmul.f32 %v2947_v21, %v12094_v47  ;;  %v9431_v35 = vsel %vm12110_vm4, %v12108_v44, %v12106_v25  ;;  %v12111_v21 = vld [vmem:[#allocation60_spill] sm:$0xff]  ;;  %vm12125_vm2 = vmmov %vm12122_vm0 }
 0x645   : > { %12100 = vst [vmem:[#allocation93_spill] sm:$0xff] %v9375_v8  ;;  %5920 = vset.pattern.permute.xlu1 %v6129_v37  ;;  %v2926_v8 = vadd.f32 %v2922_v33, %v2893_v7  ;;  %v2948_v37 = vperm.slane %v9358_v32, 2  ;;  %v2925_v51 = vadd.f32 %v2921_v14, %v2892_v1  ;;  %v2936_v14 = vmul.f32 %v2932_v20, %v12105_v30  ;;  %v9433_v30 = vpop.permute.xlu0 %3446 }
 0x646   : > { %v2939_v33 = vadd.f32 %v2935_v50, %v2923_v48  ;;  %v2964_v7 = vperm.slane %v9358_v32, 3  ;;  %v2998_v27 = vperm.slane %v9415_v56, 0  ;;  %v3014_v48 = vperm.slane %v9415_v56, 1 }
 0x647   : > { %v2942_v17 = vadd.f32 %v2938_v60, %v2926_v8  ;;  %v2952_v23 = vmul.f32 %v2948_v37, %v12094_v47  ;;  %v2940_v1 = vadd.f32 %v2936_v14, %v2924_v4  ;;  %v2941_v20 = vadd.f32 %v2937_v34, %v2925_v51  ;;  %v12114_v51 = vld [vmem:[#allocation72_spill] sm:$0xff] }
 0x648   : > { %v2967_v32 = vmul.f32 %v2963_v39, %v12111_v21  ;;  %v12112_v8 = vperm.slane %v9306_v43, 3  ;;  %v2996_v50 = vperm.slane %v9422_v55, 0  ;;  %v3030_v25 = vperm.slane %v9415_v56, 2 }
 0x649   : > { %v2968_v44 = vmul.f32 %v2964_v7, %v12111_v21  ;;  %v2997_v47 = vperm.slane %v9431_v35, 0  ;;  %v2958_v37 = vadd.f32 %v9339_v6, %v2942_v17  ;;  %v12113_v34 = vperm.slane %v9328_v36, 3 }
 0x64a   : > { %4011 = vrot.lane.b32.xlu2 %v8388_v31, %s11830_s7  ;;  %v9405_v38 = vpop.permute.xlu1 %3591  ;;  %v2970_v60 = vmul.f32 %v12112_v8, %v12111_v21  ;;  %v3000_v14 = vmul.f32 %v2996_v50, %v12114_v51  ;;  %v3003_v43 = vmul.f32 %v2999_v5, %v12114_v51  ;;  %v2956_v39 = vadd.f32 %v2952_v23, %v2940_v1  ;;  %v12115_v5 = vld [vmem:[#allocation70_spill] sm:$0xff] }
 0x64b   : > { %5925 = vset.pattern.permute.xlu2 %v6130_v41  ;;  %v2955_v41 = vadd.f32 %v2951_v63, %v2939_v33  ;;  %v2969_v4 = vmul.f32 %v12113_v34, %v12111_v21  ;;  %v2957_v8 = vadd.f32 %v9363_v45, %v2941_v20  ;;  %v3001_v54 = vmul.f32 %v2997_v47, %v12114_v51 }
 0x64c   : > { %v9424_v11 = vpop.permute.xlu2 %3693  ;;  %3964 = vperm.xlu1 %5920, %v9048_v22   ;;  %v2974_v6 = vadd.f32 %v2970_v60, %v2958_v37  ;;  %v3012_v7 = vperm.slane %v9422_v55, 1  ;;  %v3002_v36 = vmul.f32 %v2998_v27, %v12114_v51  ;;  %v3046_v17 = vperm.slane %v9415_v56, 3  ;;  %v12118_v27 = vld [vmem:[#allocation55_spill] sm:$0xff] }
 0x64d   : > { %v2971_v63 = vadd.f32 %v2967_v32, %v2955_v41  ;;  %v2972_v21 = vadd.f32 %v2968_v44, %v2956_v39  ;;  %v9465_v45 = vsel %vm12116_vm3, %v8973_v42, %v12115_v5  ;;  %v3013_v23 = vperm.slane %v9431_v35, 1  ;;  %v12119_v39 = vld [vmem:[#allocation36_spill] sm:$0xff] }
 0x64e   : > { %v3034_v20 = vmul.f32 %v3030_v25, %v8930_v16  ;;  %v2973_v32 = vadd.f32 %v2969_v4, %v2957_v8  ;;  %v3007_v50 = vadd.f32 %v3003_v43, %v2974_v6  ;;  %v6131_v41 = vmov 95  }
 0x64f   : > { %v3004_v60 = vadd.f32 %v3000_v14, %v2971_v63  ;;  %v3018_v47 = vmul.f32 %v3014_v48, %v12118_v27  ;;  %v3019_v56 = vmul.f32 %v3015_v18, %v12118_v27  ;;  %v3028_v44 = vperm.slane %v9422_v55, 2  ;;  %v9478_v14 = vpop.permute.xlu0 %3462 }
 0x650   : > { %v3005_v37 = vadd.f32 %v3001_v54, %v2972_v21  ;;  %v3080_v34 = vperm.slane %v9465_v45, 0  ;;  %v3096_v51 = vperm.slane %v9465_v45, 1  ;;  %v3016_v25 = vmul.f32 %v3012_v7, %v12118_v27  ;;  %v12121_v21 = vld [vmem:[#allocation77_spill] sm:$0xff] }
 0x651   : > { %v3006_v4 = vadd.f32 %v3002_v36, %v2973_v32  ;;  %v3112_v43 = vperm.slane %v9465_v45, 2  ;;  %v3017_v48 = vmul.f32 %v3013_v23, %v12118_v27  ;;  %v3029_v18 = vperm.slane %v9431_v35, 2 }
 0x652   : > { %4017 = vrot.lane.b32.xlu2 %v8391_v62, %s11830_s7  ;;  %v9457_v33 = vpop.permute.xlu1 %3610  ;;  %v9486_v54 = vsel %vm12120_vm1, %v12119_v39, %v8973_v42  ;;  %v3044_v8 = vperm.slane %v9422_v55, 3  ;;  %v3020_v63 = vadd.f32 %v3016_v25, %v3004_v60  ;;  %v3023_v6 = vadd.f32 %v3019_v56, %v3007_v50  ;;  %v12123_v55 = vld [vmem:[#allocation76_spill] sm:$0xff] }
 0x653   : > { %v9492_v7 = vsel %vm12122_vm0, %v12115_v5, %v12121_v21  ;;  %v3032_v23 = vmul.f32 %v3028_v44, %v8930_v16  ;;  %v3045_v32 = vperm.slane %v9431_v35, 3  ;;  %v3022_v27 = vadd.f32 %v3018_v47, %v3006_v4 }
 0x654   : > { %v9468_v1 = vpop.permute.xlu2 %3737  ;;  %5922 = vset.pattern.permute.xlu1 %v6131_v41  ;;  %v3021_v41 = vadd.f32 %v3017_v48, %v3005_v37  ;;  %v3048_v60 = vmul.f32 %v3044_v8, %v12123_v55  ;;  %v12124_v50 = vperm.slane %v9383_v19, 3  ;;  %v9507_v5 = vsel %vm12125_vm2, %v12121_v21, %v12119_v39  ;;  %v12127_v21 = vld [vmem:[#allocation86_spill] sm:$0xff] }
 0x655   : > { %12117 = vst [vmem:[#allocation9_spill] sm:$0xff] %v9468_v1  ;;  %3996 = vperm.xlu1 %5922, %v9048_v22   ;;  %v3033_v44 = vmul.f32 %v3029_v18, %v8930_v16  ;;  %v3079_v35 = vperm.slane %v9486_v54, 0  ;;  %v3077_v37 = vperm.slane %v9492_v7, 0  ;;  %v3111_v47 = vperm.slane %v9486_v54, 2 }
 0x656   : > { %v3051_v56 = vmul.f32 %v12124_v50, %v12123_v55  ;;  %v3036_v4 = vadd.f32 %v3032_v23, %v3020_v63  ;;  %v3039_v48 = vadd.f32 %v9409_v57, %v3023_v6  ;;  %v3049_v19 = vmul.f32 %v3045_v32, %v12123_v55 }
 0x657   : > { %v3050_v8 = vmul.f32 %v3046_v17, %v12123_v55  ;;  %v3078_v39 = vperm.slane %v9507_v5, 0  ;;  %v3081_v50 = vmul.f32 %v3077_v37, %v12127_v21  ;;  %v3084_v16 = vmul.f32 %v3080_v34, %v12127_v21  ;;  %v12128_v34 = vld [vmem:[#allocation82_spill] sm:$0xff]  ;;  %v12130_v37 = vld [vmem:[#allocation71_spill] sm:$0xff] }
 0x658   : > { %v3037_v18 = vadd.f32 %v3033_v44, %v3021_v41  ;;  %v3038_v36 = vadd.f32 %v3034_v20, %v3022_v27  ;;  %v3052_v1 = vadd.f32 %v3048_v60, %v3036_v4  ;;  %v6132_v63 = vmov 46   ;;  %v9533_v41 = vpop.permute.xlu0 %3527 }
 0x659   : > { %v3093_v57 = vperm.slane %v9492_v7, 1  ;;  %v3082_v6 = vmul.f32 %v3078_v39, %v12127_v21  ;;  %v3083_v17 = vmul.f32 %v3079_v35, %v12127_v21  ;;  %v3116_v23 = vmul.f32 %v3112_v43, %v9025_v61 }
 0x65a   : > { %4061 = vperm.xlu2 %5925, %v9048_v22   ;;  %v9498_v42 = vpop.permute.xlu1 %3640  ;;  %v3095_v32 = vperm.slane %v9486_v54, 1  ;;  %vm12129_vm4 = vcmask 15360   ;;  %v3053_v20 = vadd.f32 %v3049_v19, %v3037_v18  ;;  %v3054_v27 = vadd.f32 %v3050_v8, %v3038_v36 }
 0x65b   : > { %v9531_v55 = vsel %vm12129_vm4, %v9089_v15, %v12128_v34  ;;  %v3094_v60 = vperm.slane %v9507_v5, 1  ;;  %v3115_v43 = vmul.f32 %v3111_v47, %v9025_v61  ;;  %v3127_v35 = vperm.slane %v9486_v54, 3  ;;  %v12131_v47 = vld [vmem:[#allocation64_spill] sm:$0xff]  ;;  %vm12132_vm3 = vmmov %vm12129_vm4 }
 0x65c   : > { %v9512_v25 = vpop.permute.xlu2 %3768  ;;  %v3099_v4 = vmul.f32 %v3095_v32, %v12130_v37  ;;  %v6133_v19 = vmov 72   ;;  %v3100_v36 = vmul.f32 %v3096_v51, %v12130_v37  ;;  %v3087_v8 = vadd.f32 %v3083_v17, %v3054_v27  ;;  %vm12135_vm1 = vmmov %vm12132_vm3 }
 0x65d   : > { %12126 = vst [vmem:[#allocation54_spill] sm:$0xff] %v9512_v25  ;;  %4015 = vrot.lane.b32.xlu1 %v8409_v52, %s11830_s7  ;;  %v3055_v25 = vadd.f32 %v3051_v56, %v3039_v48  ;;  %v3085_v56 = vadd.f32 %v3081_v50, %v3052_v1  ;;  %v3109_v48 = vperm.slane %v9492_v7, 2  ;;  %v3097_v1 = vmul.f32 %v3093_v57, %v12130_v37  ;;  %v12134_v57 = vld [vmem:[#allocation99_spill] sm:$0xff]  ;;  %vm12137_vm0 = vmmov %vm12135_vm1 }
 0x65e   : > { %5924 = vset.pattern.permute.xlu1 %v6132_v63  ;;  %v3161_v21 = vperm.slane %v9531_v55, 0  ;;  %v9550_v54 = vsel %vm12132_vm3, %v12131_v47, %v9089_v15  ;;  %v3110_v50 = vperm.slane %v9507_v5, 2  ;;  %v3098_v63 = vmul.f32 %v3094_v60, %v12130_v37  ;;  %v12136_v60 = vld [vmem:[#allocation91_spill] sm:$0xff] }
 0x65f   : > { %v3088_v44 = vadd.f32 %v3084_v16, %v3055_v25  ;;  %v3086_v25 = vadd.f32 %v3082_v6, %v3053_v20  ;;  %v3125_v16 = vperm.slane %v9492_v7, 3  ;;  %v3101_v51 = vadd.f32 %v3097_v1, %v3085_v56 }
 0x660   : > { %v9560_v6 = vsel %vm12135_vm1, %v12128_v34, %v12134_v57  ;;  %v3177_v15 = vperm.slane %v9531_v55, 1  ;;  %v3193_v17 = vperm.slane %v9531_v55, 2  ;;  %v3113_v20 = vmul.f32 %v3109_v48, %v9025_v61 }
 0x661   : > { %v3104_v32 = vadd.f32 %v3100_v36, %v3088_v44  ;;  %v3126_v7 = vperm.slane %v9507_v5, 3  ;;  %v3102_v27 = vadd.f32 %v3098_v63, %v3086_v25  ;;  %v3129_v56 = vmul.f32 %v3125_v16, %v12136_v60 }
 0x662   : > { %4092 = vrot.lane.b32.xlu2 %v8388_v31, %s11835_s28  ;;  %v9571_v44 = vsel %vm12137_vm0, %v12134_v57, %v12131_v47  ;;  %v3160_v34 = vperm.slane %v9550_v54, 0  ;;  %v3114_v37 = vmul.f32 %v3110_v50, %v9025_v61  ;;  %v12138_v36 = vperm.slane %v9465_v45, 3  ;;  %v9583_v47 = vpop.permute.xlu0 %3543  ;;  %v12139_v61 = vld [vmem:[#allocation15_spill] sm:$0xff] }
 0x663   : > { %v9542_v39 = vpop.permute.xlu1 %3672  ;;  %5929 = vset.pattern.permute.xlu2 %v6133_v19  ;;  %v3103_v19 = vadd.f32 %v3099_v4, %v3087_v8  ;;  %v3158_v48 = vperm.slane %v9560_v6, 0  ;;  %v3117_v5 = vadd.f32 %v3113_v20, %v3101_v51  ;;  %v3120_v25 = vadd.f32 %v3116_v23, %v3104_v32 }
 0x664   : > { %v9554_v18 = vpop.permute.xlu2 %3774  ;;  %v3132_v1 = vmul.f32 %v12138_v36, %v12136_v60  ;;  %v3130_v4 = vmul.f32 %v3126_v7, %v12136_v60  ;;  %v3131_v8 = vmul.f32 %v3127_v35, %v12136_v60  ;;  %v3159_v16 = vperm.slane %v9571_v44, 0 }
 0x665   : > { %12133 = vst [vmem:[#allocation10_spill] sm:$0xff] %v9554_v18  ;;  %4045 = vperm.xlu1 %5924, %v9048_v22   ;;  %v3162_v50 = vmul.f32 %v3158_v48, %v12139_v61  ;;  %v3165_v45 = vmul.f32 %v3161_v21, %v12139_v61  ;;  %v3209_v51 = vperm.slane %v9531_v55, 3  ;;  %v3118_v23 = vadd.f32 %v3114_v37, %v3102_v27  ;;  %v12140_v18 = vld [vmem:[#allocation90_spill] sm:$0xff] }
 0x666   : > { %v3119_v32 = vadd.f32 %v3115_v43, %v3103_v19  ;;  %v3133_v57 = vadd.f32 %v3129_v56, %v3117_v5  ;;  %v3136_v20 = vadd.f32 %v3132_v1, %v3120_v25  ;;  %v3174_v35 = vperm.slane %v9560_v6, 1  ;;  %v12143_v5 = vld [vmem:[#allocation85_spill] sm:$0xff] }
 0x667   : > { %v3163_v7 = vmul.f32 %v3159_v16, %v12139_v61  ;;  %v3164_v60 = vmul.f32 %v3160_v34, %v12139_v61  ;;  %v3197_v36 = vmul.f32 %v3193_v17, %v9147_v40  ;;  %v3192_v48 = vperm.slane %v9550_v54, 2  ;;  %v12144_v16 = vld [vmem:[#allocation95_spill] sm:$0xff] }
 0x668   : > { %vm12141_vm2 = vcmask 7168   ;;  %v3134_v55 = vadd.f32 %v3130_v4, %v3118_v23  ;;  %v6134_v27 = vmov 96   ;;  %v3135_v43 = vadd.f32 %v3131_v8, %v3119_v32 }
 0x669   : > { %v9599_v21 = vsel %vm12141_vm2, %v9206_v26, %v12140_v18  ;;  %v3175_v19 = vperm.slane %v9571_v44, 1  ;;  %v3166_v56 = vadd.f32 %v3162_v50, %v3133_v57  ;;  %v3169_v37 = vadd.f32 %v3165_v45, %v3136_v20  ;;  %vm12145_vm4 = vmmov %vm12141_vm2 }
 0x66a   : > { %4098 = vrot.lane.b32.xlu2 %v8391_v62, %s11835_s28  ;;  %v3176_v17 = vperm.slane %v9550_v54, 1  ;;  %v3208_v34 = vperm.slane %v9550_v54, 3  ;;  %v3181_v25 = vmul.f32 %v3177_v15, %v12143_v5  ;;  %v9611_v4 = vsel %vm12145_vm4, %v12144_v16, %v9206_v26  ;;  %vm12147_vm3 = vmmov %vm12141_vm2 }
 0x66b   : > { %v9588_v63 = vpop.permute.xlu1 %3691  ;;  %v3178_v8 = vmul.f32 %v3174_v35, %v12143_v5  ;;  %v3190_v61 = vperm.slane %v9560_v6, 2  ;;  %v3167_v50 = vadd.f32 %v3163_v7, %v3134_v55  ;;  %v3168_v45 = vadd.f32 %v3164_v60, %v3135_v43  ;;  %vm12148_vm1 = vmmov %vm12141_vm2 }
 0x66c   : > { %v9602_v1 = vpop.permute.xlu2 %3818  ;;  %v3196_v23 = vmul.f32 %v3192_v48, %v9147_v40  ;;  %v3180_v32 = vmul.f32 %v3176_v17, %v12143_v5  ;;  %v3242_v57 = vperm.slane %v9599_v21, 0  ;;  %v3191_v54 = vperm.slane %v9571_v44, 2  ;;  %v12149_v17 = vld [vmem:[#allocation17_spill] sm:$0xff] }
 0x66d   : > { %5926 = vset.pattern.permute.xlu1 %v6134_v27  ;;  %12142 = vst [vmem:[#allocation4_spill] sm:$0xff] %v9602_v1  ;;  %v3179_v15 = vmul.f32 %v3175_v19, %v12143_v5  ;;  %v3182_v26 = vadd.f32 %v3178_v8, %v3166_v56  ;;  %v3185_v20 = vadd.f32 %v3181_v25, %v3169_v37  ;;  %v12146_v27 = vld [vmem:[#allocation7_spill] sm:$0xff]  ;;  %v3241_v60 = vperm.slane %v9611_v4, 0  ;;  %v9637_v19 = vpop.permute.xlu0 %3608 }
 0x66e   : > { %4077 = vperm.xlu1 %5926, %v9048_v22   ;;  %v9624_v35 = vsel %vm12147_vm3, %v12140_v18, %v12146_v27  ;;  %v3206_v48 = vperm.slane %v9560_v6, 3  ;;  %v3207_v55 = vperm.slane %v9571_v44, 3  ;;  %v3194_v43 = vmul.f32 %v3190_v61, %v9147_v40 }
 0x66f   : > { %v3183_v56 = vadd.f32 %v3179_v15, %v3167_v50  ;;  %v3184_v18 = vadd.f32 %v3180_v32, %v3168_v45  ;;  %v3195_v37 = vmul.f32 %v3191_v54, %v9147_v40  ;;  %v3213_v25 = vmul.f32 %v3209_v51, %v12149_v17  ;;  %v12150_v50 = vld [vmem:[#allocation43_spill] sm:$0xff] }
 0x670   : > { %v3210_v5 = vmul.f32 %v3206_v48, %v12149_v17  ;;  %v3239_v6 = vperm.slane %v9624_v35, 0  ;;  %v3198_v44 = vadd.f32 %v3194_v43, %v3182_v26  ;;  %v3201_v8 = vadd.f32 %v3197_v36, %v3185_v20 }
 0x671   : > { %v3211_v1 = vmul.f32 %v3207_v55, %v12149_v17  ;;  %v3212_v61 = vmul.f32 %v3208_v34, %v12149_v17  ;;  %v3246_v40 = vmul.f32 %v3242_v57, %v12150_v50  ;;  %v6135_v32 = vmov 47  }
 0x672   : > { %4142 = vperm.xlu2 %5929, %v9048_v22   ;;  %v9634_v22 = vsel %vm12148_vm1, %v12146_v27, %v12144_v16  ;;  %v3243_v45 = vmul.f32 %v3239_v6, %v12150_v50  ;;  %v3199_v51 = vadd.f32 %v3195_v37, %v3183_v56  ;;  %v3200_v54 = vadd.f32 %v3196_v23, %v3184_v18 }
 0x673   : > { %v9626_v7 = vpop.permute.xlu1 %3721  ;;  %v3240_v16 = vperm.slane %v9634_v22, 0  ;;  %v3214_v26 = vadd.f32 %v3210_v5, %v3198_v44  ;;  %v3217_v20 = vadd.f32 %v3213_v25, %v3201_v8  ;;  %v3255_v27 = vperm.slane %v9624_v35, 1  ;;  %v12151_v8 = vld [vmem:[#allocation100_spill] sm:$0xff] }
 0x674   : > { %v9651_v36 = vpop.permute.xlu2 %3849  ;;  %v3245_v48 = vmul.f32 %v3241_v60, %v12150_v50  ;;  %v3215_v55 = vadd.f32 %v3211_v1, %v3199_v51  ;;  %v3256_v23 = vperm.slane %v9634_v22, 1  ;;  %v6136_v43 = vmov 73  }
 0x675   : > { %v3244_v15 = vmul.f32 %v3240_v16, %v12150_v50  ;;  %v3258_v56 = vperm.slane %v9599_v21, 1  ;;  %v3216_v18 = vadd.f32 %v3212_v61, %v3200_v54  ;;  %v3247_v37 = vadd.f32 %v3243_v45, %v3214_v26 }
 0x676   : > { %4096 = vrot.lane.b32.xlu1 %v8409_v52, %s11835_s28  ;;  %v3250_v17 = vadd.f32 %v3246_v40, %v3217_v20  ;;  %v3274_v60 = vperm.slane %v9599_v21, 2  ;;  %v3257_v25 = vperm.slane %v9611_v4, 1  ;;  %v3303_v6 = vperm.slane %v8388_v31, 0  ;;  %v9671_v40 = vpop.permute.xlu0 %3624 }
 0x677   : > { %5928 = vset.pattern.permute.xlu1 %v6135_v32  ;;  %v3248_v44 = vadd.f32 %v3244_v15, %v3215_v55  ;;  %v3262_v1 = vmul.f32 %v3258_v56, %v12151_v8  ;;  %v3259_v16 = vmul.f32 %v3255_v27, %v12151_v8  ;;  %v3271_v50 = vperm.slane %v9624_v35, 2  ;;  %v9678_v15 = vld [vmem:[%s11212_s2 + $0x70] sm:$0xf] }
 0x678   : > { %v3249_v32 = vadd.f32 %v3245_v48, %v3216_v18  ;;  %v3290_v61 = vperm.slane %v9599_v21, 3  ;;  %v3273_v45 = vperm.slane %v9611_v4, 2  ;;  %v3260_v51 = vmul.f32 %v3256_v23, %v12151_v8 }
 0x679   : > { %v3272_v54 = vperm.slane %v9634_v22, 2  ;;  %v3261_v26 = vmul.f32 %v3257_v25, %v12151_v8  ;;  %v3287_v20 = vperm.slane %v9624_v35, 3  ;;  %v3263_v21 = vadd.f32 %v3259_v16, %v3247_v37  ;;  %v12152_v8 = vld [vmem:[#allocation31_spill] sm:$0xff] }
 0x67a   : > { %4173 = vrot.lane.b32.xlu2 %v8388_v31, %s11840_s18  ;;  %v3266_v27 = vadd.f32 %v3262_v1, %v3250_v17  ;;  %v3278_v48 = vmul.f32 %v3274_v60, %v9258_v10  ;;  %v3289_v55 = vperm.slane %v9611_v4, 3  ;;  %v3288_v23 = vperm.slane %v9634_v22, 3 }
 0x67b   : > { %5933 = vset.pattern.permute.xlu2 %v6136_v43  ;;  %v3264_v43 = vadd.f32 %v3260_v51, %v3248_v44  ;;  %v3275_v56 = vmul.f32 %v3271_v50, %v9258_v10  ;;  %v3265_v18 = vadd.f32 %v3261_v26, %v3249_v32  ;;  %v3291_v57 = vmul.f32 %v3287_v20, %v8915_v24  ;;  %v12153_v26 = vld [vmem:[#allocation30_spill] sm:$0xff] }
 0x67c   : > { %v9661_v5 = vpop.permute.xlu1 %3753  ;;  %v3294_v34 = vmul.f32 %v3290_v61, %v8915_v24  ;;  %v3277_v35 = vmul.f32 %v3273_v45, %v9258_v10  ;;  %v3306_v37 = vperm.slane %v8391_v62, 0  ;;  %v3276_v17 = vmul.f32 %v3272_v54, %v9258_v10  ;;  %v9695_v22 = vpop.permute.xlu2 %3855 }
 0x67d   : > { %v3292_v4 = vmul.f32 %v3288_v23, %v8915_v24  ;;  %v3279_v60 = vadd.f32 %v3275_v56, %v3263_v21  ;;  %v3282_v25 = vadd.f32 %v3278_v48, %v3266_v27  ;;  %v3293_v44 = vmul.f32 %v3289_v55, %v8915_v24 }
 0x67e   : > { %4126 = vperm.xlu1 %5928, %v9678_v15   ;;  %v3304_v1 = vperm.slane %v12152_v8, 0  ;;  %v3280_v16 = vadd.f32 %v3276_v17, %v3264_v43  ;;  %v3319_v50 = vperm.slane %v8388_v31, 1  ;;  %v3322_v32 = vperm.slane %v8391_v62, 1 }
 0x67f   : > { %v3305_v45 = vperm.slane %v8409_v52, 0  ;;  %v3281_v10 = vadd.f32 %v3277_v35, %v3265_v18  ;;  %v3295_v51 = vadd.f32 %v3291_v57, %v3279_v60  ;;  %v3298_v54 = vadd.f32 %v3294_v34, %v3282_v25  ;;  %v9712_v57 = vpop.permute.xlu0 %3689 }
 0x680   : > { %v3307_v20 = vmul.f32 %v3303_v6, %v12153_v26  ;;  %v3296_v21 = vadd.f32 %v3292_v4, %v3280_v16  ;;  %v3320_v27 = vperm.slane %v12152_v8, 1  ;;  %v3321_v24 = vperm.slane %v8409_v52, 1 }
 0x681   : > { %v6137_v48 = vmov 97   ;;  %v3310_v55 = vmul.f32 %v3306_v37, %v12153_v26  ;;  %v3297_v23 = vadd.f32 %v3293_v44, %v3281_v10  ;;  %v3323_v43 = vmul.f32 %v3319_v50, %v8939_v46 }
 0x682   : > { %4179 = vrot.lane.b32.xlu2 %v8391_v62, %s11840_s18  ;;  %v3326_v56 = vmul.f32 %v3322_v32, %v8939_v46  ;;  %v3308_v34 = vmul.f32 %v3304_v1, %v12153_v26  ;;  %v3335_v6 = vperm.slane %v8388_v31, 2  ;;  %v3338_v18 = vperm.slane %v8391_v62, 2 }
 0x683   : > { %v3324_v35 = vmul.f32 %v3320_v27, %v8939_v46  ;;  %v3309_v17 = vmul.f32 %v3305_v45, %v12153_v26  ;;  %v3311_v37 = vadd.f32 %v3307_v20, %v3295_v51  ;;  %v3314_v4 = vadd.f32 %v3310_v55, %v3298_v54  ;;  %v12155_v54 = vld [vmem:[#allocation38_spill] sm:$0xff]  ;;  %v12156_v55 = vld [vmem:[#allocation29_spill] sm:$0xff] }
 0x684   : > { %v9701_v61 = vpop.permute.xlu1 %3772  ;;  %v3325_v60 = vmul.f32 %v3321_v24, %v8939_v46  ;;  %v3352_v25 = vperm.slane %v12152_v8, 3  ;;  %v3353_v44 = vperm.slane %v8409_v52, 3  ;;  %v3336_v1 = vperm.slane %v12152_v8, 2  ;;  %v9729_v24 = vpop.permute.xlu2 %3899 }
 0x685   : > { %v3312_v16 = vadd.f32 %v3308_v34, %v3296_v21  ;;  %v3337_v50 = vperm.slane %v8409_v52, 2  ;;  %v3313_v32 = vadd.f32 %v3309_v17, %v3297_v23  ;;  %v3327_v10 = vadd.f32 %v3323_v43, %v3311_v37 }
 0x686   : > { %5930 = vset.pattern.permute.xlu1 %v6137_v48  ;;  %v3330_v27 = vadd.f32 %v3326_v56, %v3314_v4  ;;  %v12154_v45 = vperm.slane %v8388_v31, 3  ;;  %v3356_v46 = vmul.f32 %v3352_v25, %v9316_v29  ;;  %v3339_v26 = vmul.f32 %v3335_v6, %v12155_v54 }
 0x687   : > { %4158 = vperm.xlu1 %5930, %v9678_v15   ;;  %v3328_v20 = vadd.f32 %v3324_v35, %v3312_v16  ;;  %v3342_v8 = vmul.f32 %v3338_v18, %v12155_v54  ;;  %v3329_v21 = vadd.f32 %v3325_v60, %v3313_v32  ;;  %v9737_v23 = vsel %vm806_vm12, %v8987_v53, %v12156_v55 }
 0x688   : > { %v3355_v51 = vmul.f32 %v12154_v45, %v9316_v29  ;;  %v3357_v43 = vmul.f32 %v3353_v44, %v9316_v29  ;;  %v3340_v56 = vmul.f32 %v3336_v1, %v12155_v54  ;;  %v9744_v34 = vsel %vm859_vm13, %v8963_v28, %v9433_v30 }
 0x689   : > { %v9749_v6 = vsel %vm806_vm12, %v8897_v0, %v8987_v53  ;;  %v3341_v18 = vmul.f32 %v3337_v50, %v12155_v54  ;;  %v3343_v35 = vadd.f32 %v3339_v26, %v3327_v10  ;;  %v3346_v17 = vadd.f32 %v3342_v8, %v3330_v27 }
 0x68a   : > { %4223 = vperm.xlu2 %5933, %v9678_v15   ;;  %v12157_v37 = vperm.slane %v8391_v62, 3  ;;  %v3344_v60 = vadd.f32 %v3340_v56, %v3328_v20  ;;  %v3384_v25 = vperm.slane %v9737_v23, 0  ;;  %v9761_v44 = vsel %vm806_vm12, %v12156_v55, %v9027_v49 }
 0x68b   : > { %v6138_v53 = vmov 48   ;;  %v3345_v1 = vadd.f32 %v3341_v18, %v3329_v21  ;;  %v3465_v16 = vperm.slane %v9744_v34, 0  ;;  %v3387_v50 = vperm.slane %v9749_v6, 0 }
 0x68c   : > { %v9731_v48 = vpop.permute.xlu1 %3802  ;;  %v3358_v4 = vmul.f32 %v12157_v37, %v9316_v29  ;;  %v9768_v32 = vsel %vm806_vm12, %v9027_v49, %v8897_v0  ;;  %v9772_v29 = vpop.permute.xlu0 %3705  ;;  %v3497_v27 = vperm.slane %v9744_v34, 2  ;;  %v3416_v54 = vperm.slane %v9737_v23, 2 }
 0x68d   : > { %v6139_v26 = vmov 74   ;;  %v3359_v20 = vadd.f32 %v3355_v51, %v3343_v35  ;;  %v3419_v0 = vperm.slane %v9749_v6, 2  ;;  %v3385_v49 = vperm.slane %v9761_v44, 0 }
 0x68e   : > { %v3362_v8 = vadd.f32 %v3358_v4, %v3346_v17  ;;  %v9784_v21 = vsel %vm859_vm13, %v9004_v9, %v8963_v28  ;;  %v3360_v55 = vadd.f32 %v3356_v46, %v3344_v60  ;;  %v3386_v56 = vperm.slane %v9768_v32, 0  ;;  %v9798_v60 = vpop.permute.xlu2 %3930 }
 0x68f   : > { %4177 = vrot.lane.b32.xlu1 %v8409_v52, %s11840_s18  ;;  %v9788_v18 = vmul.f32 %v3465_v16, %v9478_v14  ;;  %v3391_v51 = vmul.f32 %v3387_v50, %v9373_v3  ;;  %v3400_v35 = vperm.slane %v9737_v23, 1  ;;  %v3361_v17 = vadd.f32 %v3357_v43, %v3345_v1  ;;  %12159 = vst [vmem:[#allocation58_spill] sm:$0xff] %v9798_v60 }
 0x690   : > { %5932 = vset.pattern.permute.xlu1 %v6138_v53  ;;  %v3403_v4 = vperm.slane %v9749_v6, 1  ;;  %v3432_v28 = vperm.slane %v9737_v23, 3  ;;  %v3435_v46 = vperm.slane %v9749_v6, 3  ;;  %v3423_v53 = vmul.f32 %v3419_v0, %v8932_v12 }
 0x691   : > { %v3468_v16 = vperm.slane %v9784_v21, 0  ;;  %v3389_v50 = vmul.f32 %v3385_v49, %v9373_v3  ;;  %v3401_v43 = vperm.slane %v9761_v44, 1  ;;  %v3404_v23 = vmul.f32 %v3400_v35, %v9079_v59 }
 0x692   : > { %4254 = vrot.lane.b32.xlu2 %v8388_v31, %s11845_s29  ;;  %v3388_v31 = vmul.f32 %v3384_v25, %v9373_v3  ;;  %v3420_v25 = vmul.f32 %v3416_v54, %v8932_v12  ;;  %v3402_v54 = vperm.slane %v9768_v32, 1  ;;  %v3395_v6 = vadd.f32 %v3391_v51, %v3362_v8 }
 0x693   : > { %5937 = vset.pattern.permute.xlu2 %v6139_v26  ;;  %v3390_v26 = vmul.f32 %v3386_v56, %v9373_v3  ;;  %v3417_v45 = vperm.slane %v9761_v44, 2  ;;  %v3418_v0 = vperm.slane %v9768_v32, 2  ;;  %v3405_v10 = vmul.f32 %v3401_v43, %v9079_v59 }
 0x694   : > { %v3392_v1 = vadd.f32 %v3388_v31, %v3359_v20  ;;  %v3484_v49 = vperm.slane %v9784_v21, 1  ;;  %v3500_v20 = vperm.slane %v9784_v21, 2  ;;  %v3406_v3 = vmul.f32 %v3402_v54, %v9079_v59 }
 0x695   : > { %v9792_v37 = vpop.permute.xlu1 %3834  ;;  %v3407_v31 = vmul.f32 %v3403_v4, %v9079_v59  ;;  %v3472_v56 = vmul.f32 %v3468_v16, %v9478_v14  ;;  %v3393_v51 = vadd.f32 %v3389_v50, %v3360_v55  ;;  %v3433_v35 = vperm.slane %v9761_v44, 3 }
 0x696   : > { %12158 = vst [vmem:[#allocation20_spill] sm:$0xff] %v9792_v37  ;;  %v9820_v37 = vpop.permute.xlu0 %3770  ;;  %v3394_v43 = vadd.f32 %v3390_v26, %v3361_v17  ;;  %v3408_v60 = vadd.f32 %v3404_v23, %v3392_v1  ;;  %v3421_v54 = vmul.f32 %v3417_v45, %v8932_v12  ;;  %v3422_v59 = vmul.f32 %v3418_v0, %v8932_v12  ;;  %v12161_v45 = vld [vmem:[#allocation8_spill] sm:$0xff] }
 0x697   : > { %4207 = vperm.xlu1 %5932, %v9678_v15   ;;  %v3434_v4 = vperm.slane %v9768_v32, 3  ;;  %v3409_v16 = vadd.f32 %v3405_v10, %v3393_v51  ;;  %v3411_v44 = vadd.f32 %v3407_v31, %v3395_v6  ;;  %v9835_v17 = vsel %vm859_vm13, %v9433_v30, %v9176_v13  ;;  %v12162_v32 = vld [vmem:[#allocation73_spill] sm:$0xff] }
 0x698   : > { %v3410_v55 = vadd.f32 %v3406_v3, %v3394_v43  ;;  %v9840_v50 = vsel %vm859_vm13, %v9176_v13, %v9004_v9  ;;  %v9843_v1 = vmul.f32 %v3497_v27, %v12161_v45  ;;  %v3436_v10 = vmul.f32 %v3432_v28, %v12162_v32  ;;  %v9853_v13 = vpop.permute.xlu2 %3936  ;;  %v12163_v3 = vld [vmem:[#allocation41_spill] sm:$0xff] }
 0x699   : > { %v3437_v26 = vmul.f32 %v3433_v35, %v12162_v32  ;;  %v6140_v23 = vmov 98   ;;  %v9849_v6 = vmul.f32 %v3500_v20, %v12161_v45  ;;  %v3424_v30 = vadd.f32 %v3420_v25, %v3408_v60 }
 0x69a   : > { %4260 = vrot.lane.b32.xlu2 %v8391_v62, %s11845_s29  ;;  %v9825_v62 = vsel %vm900_vm14, %v9103_v2, %v9533_v41  ;;  %v3438_v0 = vmul.f32 %v3434_v4, %v12162_v32  ;;  %v3439_v9 = vmul.f32 %v3435_v46, %v12162_v32  ;;  %v3425_v27 = vadd.f32 %v3421_v54, %v3409_v16 }
 0x69b   : > { %v3546_v12 = vperm.slane %v9825_v62, 0  ;;  %v9859_v28 = vsel %vm900_vm14, %v12163_v3, %v9103_v2  ;;  %v3466_v31 = vperm.slane %v9835_v17, 0  ;;  %v3467_v20 = vperm.slane %v9840_v50, 0 }
 0x69c   : > { %v3578_v46 = vperm.slane %v9825_v62, 2  ;;  %v3426_v60 = vadd.f32 %v3422_v59, %v3410_v55  ;;  %v3427_v51 = vadd.f32 %v3423_v53, %v3411_v44  ;;  %v3440_v54 = vadd.f32 %v3436_v10, %v3424_v30  ;;  %v12164_v10 = vld [vmem:[#allocation6_spill] sm:$0xff] }
 0x69d   : > { %v9830_v8 = vpop.permute.xlu1 %3853  ;;  %v9867_v35 = vmul.f32 %v3546_v12, %v9583_v47  ;;  %v3441_v2 = vadd.f32 %v3437_v26, %v3425_v27  ;;  %v3549_v32 = vperm.slane %v9859_v28, 0  ;;  %v3471_v25 = vmul.f32 %v3467_v20, %v9478_v14 }
 0x69e   : > { %12160 = vst [vmem:[#allocation3_spill] sm:$0xff] %v9830_v8  ;;  %v3442_v4 = vadd.f32 %v3438_v0, %v3426_v60  ;;  %v3443_v16 = vadd.f32 %v3439_v9, %v3427_v51  ;;  %v3470_v8 = vmul.f32 %v3466_v31, %v9478_v14  ;;  %v3482_v59 = vperm.slane %v9835_v17, 1  ;;  %v9878_v44 = vpop.permute.xlu0 %3786 }
 0x69f   : > { %5934 = vset.pattern.permute.xlu1 %v6140_v23  ;;  %v3483_v53 = vperm.slane %v9840_v50, 1  ;;  %v3581_v12 = vperm.slane %v9859_v28, 2  ;;  %v12165_v26 = vperm.slane %v9744_v34, 1  ;;  %v3488_v0 = vmul.f32 %v3484_v49, %v12164_v10 }
 0x6a0   : > { %4239 = vperm.xlu1 %5934, %v9678_v15   ;;  %v3473_v14 = vadd.f32 %v9788_v18, %v3440_v54  ;;  %v3486_v27 = vmul.f32 %v3482_v59, %v12164_v10  ;;  %v3553_v20 = vmul.f32 %v3549_v32, %v9583_v47  ;;  %v3498_v60 = vperm.slane %v9835_v17, 2 }
 0x6a1   : > { %v3485_v30 = vmul.f32 %v12165_v26, %v12164_v10  ;;  %v3487_v31 = vmul.f32 %v3483_v53, %v12164_v10  ;;  %v3499_v51 = vperm.slane %v9840_v50, 2  ;;  %v3476_v43 = vadd.f32 %v3472_v56, %v3443_v16  ;;  %v12167_v53 = vld [vmem:[#allocation49_spill] sm:$0xff] }
 0x6a2   : > { %4304 = vperm.xlu2 %5937, %v9678_v15   ;;  %v3474_v26 = vadd.f32 %v3470_v8, %v3441_v2  ;;  %v3475_v49 = vadd.f32 %v3471_v25, %v3442_v4  ;;  %v3514_v9 = vperm.slane %v9835_v17, 3  ;;  %v3515_v18 = vperm.slane %v9840_v50, 3  ;;  %v12168_v56 = vld [vmem:[#allocation57_spill] sm:$0xff]  ;;  %v12170_v4 = vld [vmem:[#allocation46_spill] sm:$0xff] }
 0x6a3   : > { %v6141_v54 = vmov 49   ;;  %v12166_v59 = vmov 0   ;;  %v9898_v32 = vmul.f32 %v3578_v46, %v12167_v53  ;;  %v3489_v10 = vadd.f32 %v3485_v30, %v3473_v14  ;;  %v12169_v25 = vld [vmem:[#allocation81_spill] sm:$0xff] }
 0x6a4   : > { %v3492_v23 = vadd.f32 %v3488_v0, %v3476_v43  ;;  %v9903_v16 = vsel %vm941_vm15, %v12168_v56, %v9637_v19  ;;  %v3490_v8 = vadd.f32 %v3486_v27, %v3474_v26  ;;  %v3491_v17 = vadd.f32 %v3487_v31, %v3475_v49 }
 0x6a5   : > { %v9876_v55 = vpop.permute.xlu1 %3883  ;;  %v9910_v50 = vsel %vm900_vm14, %v9533_v41, %v12169_v25  ;;  %v9915_v46 = vsel %vm900_vm14, %v12169_v25, %v12163_v3  ;;  %v3502_v43 = vmul.f32 %v3498_v60, %v12161_v45  ;;  %v3503_v2 = vmul.f32 %v3499_v51, %v12161_v45  ;;  %v12173_v3 = vld [vmem:[#allocation78_spill] sm:$0xff] }
 0x6a6   : > { %v12171_v30 = vperm.slane %v9744_v34, 3  ;;  %v12172_v14 = vperm.slane %v9784_v21, 3  ;;  %v3627_v41 = vperm.slane %v9903_v16, 0  ;;  %v3518_v31 = vmul.f32 %v3514_v9, %v12170_v4 }
 0x6a7   : > { %v3519_v26 = vmul.f32 %v3515_v18, %v12170_v4  ;;  %v9931_v60 = vsel %vm941_vm15, %v12173_v3, %v12168_v56  ;;  %v3505_v45 = vadd.f32 %v9843_v1, %v3489_v10  ;;  %v3508_v34 = vadd.f32 %v9849_v6, %v3492_v23 }
 0x6a8   : > { %4258 = vrot.lane.b32.xlu1 %v8409_v52, %s11845_s29  ;;  %v9905_v52 = vpop.permute.xlu2 %3980  ;;  %v3517_v0 = vmul.f32 %v12171_v30, %v12170_v4  ;;  %v3520_v27 = vmul.f32 %v12172_v14, %v12170_v4  ;;  %v3547_v51 = vperm.slane %v9910_v50, 0  ;;  %v3548_v21 = vperm.slane %v9915_v46, 0  ;;  %v9943_v4 = vpop.permute.xlu0 %3851 }
 0x6a9   : > { %5936 = vset.pattern.permute.xlu1 %v6141_v54  ;;  %v9940_v54 = vmul.f32 %v3581_v12, %v12167_v53  ;;  %v3506_v18 = vadd.f32 %v3502_v43, %v3490_v8  ;;  %v3507_v25 = vadd.f32 %v3503_v2, %v3491_v17  ;;  %v3659_v56 = vperm.slane %v9903_v16, 2 }
 0x6aa   : > { %5939 = vset.pattern.permute.xlu2 %v12166_v59  ;;  %v3521_v1 = vadd.f32 %v3517_v0, %v3505_v45  ;;  %v3524_v10 = vadd.f32 %v3520_v27, %v3508_v34  ;;  %v3630_v6 = vperm.slane %v9931_v60, 0  ;;  %v9949_v23 = vmul.f32 %v3627_v41, %v9671_v40 }
 0x6ab   : > { %v3522_v30 = vadd.f32 %v3518_v31, %v3506_v18  ;;  %v3523_v14 = vadd.f32 %v3519_v26, %v3507_v25  ;;  %v3662_v17 = vperm.slane %v9931_v60, 2  ;;  %v3551_v43 = vmul.f32 %v3547_v51, %v9583_v47 }
 0x6ac   : > { %v3552_v2 = vmul.f32 %v3548_v21, %v9583_v47  ;;  %v3563_v27 = vperm.slane %v9910_v50, 1  ;;  %v3564_v45 = vperm.slane %v9915_v46, 1  ;;  %v12175_v41 = vperm.slane %v9825_v62, 1 }
 0x6ad   : > { %v9963_v31 = vmul.f32 %v3630_v6, %v9671_v40  ;;  %v3579_v26 = vperm.slane %v9910_v50, 2  ;;  %v3554_v18 = vadd.f32 %v9867_v35, %v3521_v1  ;;  %v3557_v51 = vadd.f32 %v3553_v20, %v3524_v10  ;;  %v12177_v20 = vld [vmem:[#allocation93_spill] sm:$0xff] }
 0x6ae   : > { %v9937_v49 = vpop.permute.xlu1 %3915  ;;  %v3566_v34 = vmul.f32 %v12175_v41, %v9360_v58  ;;  %v3567_v47 = vmul.f32 %v3563_v27, %v9360_v58  ;;  %v3568_v21 = vmul.f32 %v3564_v45, %v9360_v58  ;;  %v12176_v0 = vperm.slane %v9859_v28, 1 }
 0x6af   : > { %12174 = vst [vmem:[#allocation44_spill] sm:$0xff] %v9937_v49  ;;  %v3555_v8 = vadd.f32 %v3551_v43, %v3522_v30  ;;  %v3556_v41 = vadd.f32 %v3552_v2, %v3523_v14  ;;  %v3580_v6 = vperm.slane %v9915_v46, 2  ;;  %v3595_v9 = vperm.slane %v9910_v50, 3  ;;  %v12178_v14 = vld [vmem:[#allocation2_spill] sm:$0xff] }
 0x6b0   : > { %4288 = vperm.xlu1 %5936, %v9678_v15   ;;  %v9967_v25 = vpop.permute.xlu2 %4011  ;;  %v3569_v12 = vmul.f32 %v12176_v0, %v9360_v58  ;;  %v3570_v35 = vadd.f32 %v3566_v34, %v3554_v18  ;;  %v9981_v1 = vsel %vm994_vm11, %v12177_v20, %v9712_v57  ;;  %v9986_v10 = vsel %vm941_vm15, %v9637_v19, %v9457_v33 }
 0x6b1   : > { %v9991_v58 = vsel %vm941_vm15, %v9457_v33, %v12173_v3  ;;  %v3583_v50 = vmul.f32 %v3579_v26, %v12167_v53  ;;  %v3596_v30 = vperm.slane %v9915_v46, 3  ;;  %v9996_v43 = vmul.f32 %v3659_v56, %v12178_v14  ;;  %v10005_v3 = vpop.permute.xlu0 %3867 }
 0x6b2   : > { %v9999_v2 = vmul.f32 %v3662_v17, %v12178_v14  ;;  %v6142_v0 = vmov 99   ;;  %v3571_v27 = vadd.f32 %v3567_v47, %v3555_v8  ;;  %v3572_v19 = vadd.f32 %v3568_v21, %v3556_v41 }
 0x6b3   : > { %v3573_v45 = vadd.f32 %v3569_v12, %v3557_v51  ;;  %v12179_v34 = vperm.slane %v9825_v62, 3  ;;  %v3584_v46 = vmul.f32 %v3580_v6, %v12167_v53  ;;  %v3708_v56 = vperm.slane %v9981_v1, 0 }
 0x6b4   : > { %v3628_v17 = vperm.slane %v9986_v10, 0  ;;  %v3629_v26 = vperm.slane %v9991_v58, 0  ;;  %v3724_v8 = vperm.slane %v9981_v1, 1  ;;  %v3586_v12 = vadd.f32 %v9898_v32, %v3570_v35 }
 0x6b5   : > { %v3598_v33 = vmul.f32 %v12179_v34, %v9405_v38  ;;  %v3599_v18 = vmul.f32 %v3595_v9, %v9405_v38  ;;  %v12180_v62 = vperm.slane %v9859_v28, 3  ;;  %v3740_v51 = vperm.slane %v9981_v1, 2 }
 0x6b6   : > { %v9976_v49 = vpop.permute.xlu1 %3934  ;;  %v3600_v47 = vmul.f32 %v3596_v30, %v9405_v38  ;;  %v10023_v21 = vsel %vm994_vm11, %v9424_v11, %v12177_v20  ;;  %v3587_v41 = vadd.f32 %v3583_v50, %v3571_v27  ;;  %v3588_v6 = vadd.f32 %v3584_v46, %v3572_v19 }
 0x6b7   : > { %v3589_v32 = vadd.f32 %v9940_v54, %v3573_v45  ;;  %v3602_v9 = vadd.f32 %v3598_v33, %v3586_v12  ;;  %v3632_v35 = vmul.f32 %v3628_v17, %v9671_v40  ;;  %v3633_v28 = vmul.f32 %v3629_v26, %v9671_v40 }
 0x6b8   : > { %5938 = vset.pattern.permute.xlu1 %v6142_v0  ;;  %v3644_v0 = vperm.slane %v9986_v10, 1  ;;  %v3645_v34 = vperm.slane %v9991_v58, 1  ;;  %v10035_v20 = vmul.f32 %v3708_v56, %v9772_v29  ;;  %v3603_v50 = vadd.f32 %v3599_v18, %v3587_v41 }
 0x6b9   : > { %4320 = vperm.xlu1 %5938, %v9678_v15   ;;  %v3601_v15 = vmul.f32 %v12180_v62, %v9405_v38  ;;  %v10030_v62 = vpop.permute.xlu2 %4017  ;;  %v3711_v54 = vperm.slane %v10023_v21, 0  ;;  %v3604_v27 = vadd.f32 %v3600_v47, %v3588_v6  ;;  %v12181_v19 = vperm.slane %v9903_v16, 1 }
 0x6ba   : > { %v3648_v45 = vmul.f32 %v3644_v0, %v9498_v42  ;;  %v3649_v33 = vmul.f32 %v3645_v34, %v9498_v42  ;;  %v3727_v46 = vperm.slane %v10023_v21, 1  ;;  %v3743_v17 = vperm.slane %v10023_v21, 2  ;;  %v12183_v34 = vld [vmem:[#allocation54_spill] sm:$0xff] }
 0x6bb   : > { %v3605_v30 = vadd.f32 %v3601_v15, %v3589_v32  ;;  %v3647_v40 = vmul.f32 %v12181_v19, %v9498_v42  ;;  %v3660_v56 = vperm.slane %v9986_v10, 2  ;;  %v12182_v26 = vperm.slane %v9931_v60, 1 }
 0x6bc   : > { %v3636_v18 = vadd.f32 %v3632_v35, %v3603_v50  ;;  %v3637_v15 = vadd.f32 %v3633_v28, %v3604_v27  ;;  %v3661_v47 = vperm.slane %v9991_v58, 2  ;;  %v3635_v41 = vadd.f32 %v9949_v23, %v3602_v9 }
 0x6bd   : > { %v3650_v12 = vmul.f32 %v12182_v26, %v9498_v42  ;;  %v3715_v6 = vmul.f32 %v3711_v54, %v9772_v29  ;;  %v3638_v0 = vadd.f32 %v9963_v31, %v3605_v30  ;;  %v10058_v19 = vsel %vm1047_vm10, %v12183_v34, %v9820_v37  ;;  %v10060_v42 = vpop.permute.xlu0 %3932  ;;  %v12184_v54 = vld [vmem:[#allocation9_spill] sm:$0xff] }
 0x6be   : > { %v10032_v38 = vpop.permute.xlu1 %3964  ;;  %v3676_v35 = vperm.slane %v9986_v10, 3  ;;  %v3651_v28 = vadd.f32 %v3647_v40, %v3635_v41  ;;  %v3652_v50 = vadd.f32 %v3648_v45, %v3636_v18  ;;  %v3653_v27 = vadd.f32 %v3649_v33, %v3637_v15  ;;  %v12187_v15 = vld [vmem:[#allocation10_spill] sm:$0xff] }
 0x6bf   : > { %v3664_v23 = vmul.f32 %v3660_v56, %v12178_v14  ;;  %v3677_v9 = vperm.slane %v9991_v58, 3  ;;  %v10066_v26 = vmul.f32 %v3740_v51, %v12184_v54  ;;  %v3654_v31 = vadd.f32 %v3650_v12, %v3638_v0 }
 0x6c0   : > { %v3665_v30 = vmul.f32 %v3661_v47, %v12178_v14  ;;  %v3789_v32 = vperm.slane %v10058_v19, 0  ;;  %v10073_v53 = vsel %vm994_vm11, %v9712_v57, %v9588_v63  ;;  %v10078_v10 = vsel %vm994_vm11, %v9588_v63, %v9424_v11 }
 0x6c1   : > { %5940 = vset.pattern.permute.xlu1 %v12166_v59  ;;  %v12185_v58 = vperm.slane %v9903_v16, 3  ;;  %v3680_v40 = vmul.f32 %v3676_v35, %v9542_v39  ;;  %v3681_v14 = vmul.f32 %v3677_v9, %v9542_v39  ;;  %v12186_v45 = vperm.slane %v9931_v60, 3  ;;  %v10094_v18 = vpop.permute.xlu2 %4061 }
 0x6c2   : > { %v10091_v57 = vmul.f32 %v3743_v17, %v12184_v54  ;;  %v3667_v11 = vadd.f32 %v9996_v43, %v3651_v28  ;;  %v3668_v63 = vadd.f32 %v3664_v23, %v3652_v50  ;;  %v3669_v12 = vadd.f32 %v3665_v30, %v3653_v27 }
 0x6c3   : > { %v3679_v51 = vmul.f32 %v12185_v58, %v9542_v39  ;;  %v3682_v33 = vmul.f32 %v12186_v45, %v9542_v39  ;;  %v3670_v16 = vadd.f32 %v9999_v2, %v3654_v31  ;;  %v10100_v47 = vsel %vm1047_vm10, %v12187_v15, %v12183_v34 }
 0x6c4   : > { %v3709_v39 = vperm.slane %v10073_v53, 0  ;;  %v3710_v60 = vperm.slane %v10078_v10, 0  ;;  %v10105_v17 = vmul.f32 %v3789_v32, %v9878_v44  ;;  %v3805_v43 = vperm.slane %v10058_v19, 1 }
 0x6c5   : > { %v3821_v41 = vperm.slane %v10058_v19, 2  ;;  %v3683_v35 = vadd.f32 %v3679_v51, %v3667_v11  ;;  %v3684_v2 = vadd.f32 %v3680_v40, %v3668_v63  ;;  %v3685_v28 = vadd.f32 %v3681_v14, %v3669_v12  ;;  %v10118_v51 = vpop.permute.xlu0 %3948 }
 0x6c6   : > { %v3686_v50 = vadd.f32 %v3682_v33, %v3670_v16  ;;  %v3792_v34 = vperm.slane %v10100_v47, 0  ;;  %v3824_v23 = vperm.slane %v10100_v47, 2  ;;  %v3713_v32 = vmul.f32 %v3709_v39, %v9772_v29 }
 0x6c7   : > { %v10088_v56 = vpop.permute.xlu1 %3996  ;;  %v3714_v31 = vmul.f32 %v3710_v60, %v9772_v29  ;;  %v3725_v30 = vperm.slane %v10073_v53, 1  ;;  %v3726_v58 = vperm.slane %v10078_v10, 1  ;;  %v3741_v40 = vperm.slane %v10073_v53, 2 }
 0x6c8   : > { %v3742_v14 = vperm.slane %v10078_v10, 2  ;;  %v3728_v45 = vmul.f32 %v3724_v8, %v9626_v7  ;;  %v3731_v33 = vmul.f32 %v3727_v46, %v9626_v7  ;;  %v3716_v11 = vadd.f32 %v10035_v20, %v3683_v35 }
 0x6c9   : > { %v3719_v63 = vadd.f32 %v3715_v6, %v3686_v50  ;;  %v3729_v29 = vmul.f32 %v3725_v30, %v9626_v7  ;;  %v3730_v12 = vmul.f32 %v3726_v58, %v9626_v7  ;;  %v3796_v39 = vmul.f32 %v3792_v34, %v9878_v44  ;;  %v12188_v6 = vld [vmem:[#allocation4_spill] sm:$0xff] }
 0x6ca   : > { %v3757_v60 = vperm.slane %v10073_v53, 3  ;;  %v3758_v9 = vperm.slane %v10078_v10, 3  ;;  %v10137_v8 = vsel %vm1100_vm9, %v9651_v36, %v9943_v4  ;;  %v3717_v46 = vadd.f32 %v3713_v32, %v3684_v2  ;;  %v10147_v10 = vpop.permute.xlu2 %4092 }
 0x6cb   : > { %v3718_v20 = vadd.f32 %v3714_v31, %v3685_v28  ;;  %v10140_v35 = vmul.f32 %v3821_v41, %v12188_v6  ;;  %v10143_v7 = vmul.f32 %v3824_v23, %v12188_v6  ;;  %v3745_v50 = vmul.f32 %v3741_v40, %v12184_v54 }
 0x6cc   : > { %v3746_v34 = vmul.f32 %v3742_v14, %v12184_v54  ;;  %v3732_v53 = vadd.f32 %v3728_v45, %v3716_v11  ;;  %v3735_v30 = vadd.f32 %v3731_v33, %v3719_v63  ;;  %v3733_v58 = vadd.f32 %v3729_v29, %v3717_v46 }
 0x6cd   : > { %v3734_v0 = vadd.f32 %v3730_v12, %v3718_v20  ;;  %v3870_v27 = vperm.slane %v10137_v8, 0  ;;  %v10153_v41 = vsel %vm1100_vm9, %v9695_v22, %v9651_v36  ;;  %v12189_v2 = vperm.slane %v9981_v1, 3  ;;  %v10183_v12 = vpop.permute.xlu0 %4013 }
 0x6ce   : > { %v12190_v54 = vperm.slane %v10023_v21, 3  ;;  %v10164_v32 = vsel %vm1047_vm10, %v9820_v37, %v9701_v61  ;;  %v10169_v31 = vsel %vm1047_vm10, %v9701_v61, %v12187_v15  ;;  %v3886_v36 = vperm.slane %v10137_v8, 1 }
 0x6cf   : > { %v10129_v16 = vpop.permute.xlu1 %4015  ;;  %v3760_v28 = vmul.f32 %v12189_v2, %v9661_v5  ;;  %v3902_v40 = vperm.slane %v10137_v8, 2  ;;  %v3761_v1 = vmul.f32 %v3757_v60, %v9661_v5  ;;  %v3762_v14 = vmul.f32 %v3758_v9, %v9661_v5 }
 0x6d0   : > { %v3763_v23 = vmul.f32 %v12190_v54, %v9661_v5  ;;  %v3918_v21 = vperm.slane %v10137_v8, 3  ;;  %v3873_v45 = vperm.slane %v10153_v41, 0  ;;  %v3748_v37 = vadd.f32 %v10066_v26, %v3732_v53 }
 0x6d1   : > { %v3751_v33 = vadd.f32 %v10091_v57, %v3735_v30  ;;  %v3749_v11 = vadd.f32 %v3745_v50, %v3733_v58  ;;  %v3750_v63 = vadd.f32 %v3746_v34, %v3734_v0  ;;  %v3790_v61 = vperm.slane %v10164_v32, 0 }
 0x6d2   : > { %v3791_v15 = vperm.slane %v10169_v31, 0  ;;  %v10186_v5 = vmul.f32 %v3870_v27, %v10005_v3  ;;  %v3889_v9 = vperm.slane %v10153_v41, 1  ;;  %v3764_v60 = vadd.f32 %v3760_v28, %v3748_v37 }
 0x6d3   : > { %v3767_v46 = vadd.f32 %v3763_v23, %v3751_v33  ;;  %v3905_v26 = vperm.slane %v10153_v41, 2  ;;  %v3921_v57 = vperm.slane %v10153_v41, 3  ;;  %v3765_v0 = vadd.f32 %v3761_v1, %v3749_v11 }
 0x6d4   : > { %v3766_v20 = vadd.f32 %v3762_v14, %v3750_v63  ;;  %v10192_v50 = vmul.f32 %v3873_v45, %v10005_v3  ;;  %v3806_v34 = vperm.slane %v10164_v32, 1  ;;  %v3822_v53 = vperm.slane %v10164_v32, 2 }
 0x6d5   : > { %v3809_v27 = vmul.f32 %v3805_v43, %v9731_v48  ;;  %v3794_v30 = vmul.f32 %v3790_v61, %v9878_v44  ;;  %v3795_v58 = vmul.f32 %v3791_v15, %v9878_v44  ;;  %v3807_v2 = vperm.slane %v10169_v31, 1  ;;  %v10212_v43 = vpop.permute.xlu2 %4098  ;;  %v12192_v44 = vld [vmem:[#allocation58_spill] sm:$0xff] }
 0x6d6   : > { %v12191_v28 = vperm.slane %v10100_v47, 1  ;;  %v10206_v23 = vmul.f32 %v3902_v40, %v9729_v24  ;;  %v10209_v1 = vmul.f32 %v3905_v26, %v9729_v24  ;;  %v3797_v14 = vadd.f32 %v10105_v17, %v3764_v60 }
 0x6d7   : > { %v10181_v29 = vpop.permute.xlu1 %4045  ;;  %v3800_v45 = vadd.f32 %v3796_v39, %v3767_v46  ;;  %v3823_v37 = vperm.slane %v10169_v31, 2  ;;  %v10218_v33 = vsel %vm1141_vm8, %v12192_v44, %v10060_v42  ;;  %v3810_v11 = vmul.f32 %v3806_v34, %v9731_v48  ;;  %v12193_v34 = vld [vmem:[#allocation20_spill] sm:$0xff] }
 0x6d8   : > { %v3812_v54 = vmul.f32 %v12191_v28, %v9731_v48  ;;  %v3811_v40 = vmul.f32 %v3807_v2, %v9731_v48  ;;  %v3826_v63 = vmul.f32 %v3822_v53, %v12188_v6  ;;  %v3838_v61 = vperm.slane %v10164_v32, 3  ;;  %v12195_v53 = vld [vmem:[#allocation3_spill] sm:$0xff] }
 0x6d9   : > { %v3839_v17 = vperm.slane %v10169_v31, 3  ;;  %v3813_v39 = vadd.f32 %v3809_v27, %v3797_v14  ;;  %v3798_v15 = vadd.f32 %v3794_v30, %v3765_v0  ;;  %v3799_v60 = vadd.f32 %v3795_v58, %v3766_v20 }
 0x6da   : > { %v3816_v46 = vadd.f32 %v3812_v54, %v3800_v45  ;;  %v10228_v26 = vsel %vm1141_vm8, %v9853_v13, %v12192_v44  ;;  %v3951_v28 = vperm.slane %v10218_v33, 0  ;;  %v12194_v48 = vperm.slane %v10058_v19, 3  ;;  %v10250_v54 = vpop.permute.xlu0 %4029 }
 0x6db   : > { %v10237_v32 = vsel %vm1100_vm9, %v9943_v4, %v12195_v53  ;;  %v10242_v31 = vsel %vm1100_vm9, %v12195_v53, %v9695_v22  ;;  %v3827_v20 = vmul.f32 %v3823_v37, %v12188_v6  ;;  %v3814_v27 = vadd.f32 %v3810_v11, %v3798_v15 }
 0x6dc   : > { %v3841_v2 = vmul.f32 %v12194_v48, %v12193_v34  ;;  %v3815_v30 = vadd.f32 %v3811_v40, %v3799_v60  ;;  %v12196_v19 = vperm.slane %v10100_v47, 3  ;;  %v3967_v4 = vperm.slane %v10218_v33, 1 }
 0x6dd   : > { %v3983_v14 = vperm.slane %v10218_v33, 2  ;;  %v3954_v45 = vperm.slane %v10228_v26, 0  ;;  %v3829_v22 = vadd.f32 %v10140_v35, %v3813_v39  ;;  %v3999_v44 = vperm.slane %v10218_v33, 3 }
 0x6de   : > { %v3844_v58 = vmul.f32 %v12196_v19, %v12193_v34  ;;  %v3832_v6 = vadd.f32 %v10143_v7, %v3816_v46  ;;  %v3871_v37 = vperm.slane %v10237_v32, 0  ;;  %v3872_v11 = vperm.slane %v10242_v31, 0 }
 0x6df   : > { %v10261_v47 = vmul.f32 %v3951_v28, %v10118_v51  ;;  %v3842_v40 = vmul.f32 %v3838_v61, %v12193_v34  ;;  %v3843_v15 = vmul.f32 %v3839_v17, %v12193_v34  ;;  %v3845_v60 = vadd.f32 %v3841_v2, %v3829_v22  ;;  %v10274_v61 = vpop.permute.xlu2 %4142 }
 0x6e0   : > { %v10244_v0 = vpop.permute.xlu1 %4077  ;;  %v3970_v48 = vperm.slane %v10228_v26, 1  ;;  %v3830_v53 = vadd.f32 %v3826_v63, %v3814_v27  ;;  %v3831_v35 = vadd.f32 %v3827_v20, %v3815_v30  ;;  %v3848_v39 = vadd.f32 %v3844_v58, %v3832_v6 }
 0x6e1   : > { %v10267_v19 = vmul.f32 %v3954_v45, %v10118_v51  ;;  %v3986_v7 = vperm.slane %v10228_v26, 2  ;;  %v4002_v46 = vperm.slane %v10228_v26, 3  ;;  %v3890_v28 = vmul.f32 %v3886_v36, %v9876_v55 }
 0x6e2   : > { %v3875_v17 = vmul.f32 %v3871_v37, %v10005_v3  ;;  %v3876_v34 = vmul.f32 %v3872_v11, %v10005_v3  ;;  %v3887_v63 = vperm.slane %v10237_v32, 1  ;;  %v3888_v2 = vperm.slane %v10242_v31, 1 }
 0x6e3   : > { %v3846_v20 = vadd.f32 %v3842_v40, %v3830_v53  ;;  %v3847_v27 = vadd.f32 %v3843_v15, %v3831_v35  ;;  %v3878_v30 = vadd.f32 %v10186_v5, %v3845_v60  ;;  %v3893_v58 = vmul.f32 %v3889_v9, %v9876_v55  ;;  %v10303_v53 = vpop.permute.xlu0 %4094 }
 0x6e4   : > { %v3903_v36 = vperm.slane %v10237_v32, 2  ;;  %v3881_v22 = vadd.f32 %v10192_v50, %v3848_v39  ;;  %v3891_v3 = vmul.f32 %v3887_v63, %v9876_v55  ;;  %v3892_v6 = vmul.f32 %v3888_v2, %v9876_v55  ;;  %v12197_v39 = vld [vmem:[#allocation44_spill] sm:$0xff] }
 0x6e5   : > { %v10291_v37 = vmul.f32 %v3983_v14, %v9905_v52  ;;  %v10294_v11 = vmul.f32 %v3986_v7, %v9905_v52  ;;  %v10299_v5 = vsel %vm1182_vm7, %v9967_v25, %v10183_v12  ;;  %v3894_v9 = vadd.f32 %v3890_v28, %v3878_v30 }
 0x6e6   : > { %v3879_v40 = vadd.f32 %v3875_v17, %v3846_v20  ;;  %v3880_v15 = vadd.f32 %v3876_v34, %v3847_v27  ;;  %v3904_v50 = vperm.slane %v10242_v31, 2  ;;  %v3919_v60 = vperm.slane %v10237_v32, 3 }
 0x6e7   : > { %v3920_v55 = vperm.slane %v10242_v31, 3  ;;  %v3897_v14 = vadd.f32 %v3893_v58, %v3881_v22  ;;  %v10309_v35 = vsel %vm1182_vm7, %v10030_v62, %v9967_v25  ;;  %v3922_v7 = vmul.f32 %v3918_v21, %v12197_v39  ;;  %v10337_v30 = vpop.permute.xlu2 %4173 }
 0x6e8   : > { %v10284_v45 = vpop.permute.xlu1 %4096  ;;  %v3907_v28 = vmul.f32 %v3903_v36, %v9729_v24  ;;  %v4032_v17 = vperm.slane %v10299_v5, 0  ;;  %v3895_v34 = vadd.f32 %v3891_v3, %v3879_v40  ;;  %v3896_v32 = vadd.f32 %v3892_v6, %v3880_v15 }
 0x6e9   : > { %v3910_v63 = vadd.f32 %v10206_v23, %v3894_v9  ;;  %v3925_v31 = vmul.f32 %v3921_v57, %v12197_v39  ;;  %v10323_v25 = vsel %vm1141_vm8, %v10060_v42, %v9976_v49  ;;  %v10328_v8 = vsel %vm1141_vm8, %v9976_v49, %v9853_v13 }
 0x6ea   : > { %v3908_v21 = vmul.f32 %v3904_v50, %v9729_v24  ;;  %v4048_v2 = vperm.slane %v10299_v5, 1  ;;  %v4064_v23 = vperm.slane %v10299_v5, 2  ;;  %v4035_v20 = vperm.slane %v10309_v35, 0 }
 0x6eb   : > { %v3913_v41 = vadd.f32 %v10209_v1, %v3897_v14  ;;  %v3923_v57 = vmul.f32 %v3919_v60, %v12197_v39  ;;  %v3924_v42 = vmul.f32 %v3920_v55, %v12197_v39  ;;  %v3926_v27 = vadd.f32 %v3922_v7, %v3910_v63 }
 0x6ec   : > { %v10342_v13 = vmul.f32 %v4032_v17, %v10250_v54  ;;  %v4080_v24 = vperm.slane %v10299_v5, 3  ;;  %v3952_v49 = vperm.slane %v10323_v25, 0  ;;  %v3953_v36 = vperm.slane %v10328_v8, 0 }
 0x6ed   : > { %v3911_v22 = vadd.f32 %v3907_v28, %v3895_v34  ;;  %v3912_v1 = vadd.f32 %v3908_v21, %v3896_v32  ;;  %v3929_v3 = vadd.f32 %v3925_v31, %v3913_v41  ;;  %v3971_v6 = vmul.f32 %v3967_v4, %v10032_v38  ;;  %v10364_v34 = vpop.permute.xlu0 %4110 }
 0x6ee   : > { %v10351_v9 = vmul.f32 %v4035_v20, %v10250_v54  ;;  %v4051_v40 = vperm.slane %v10309_v35, 1  ;;  %v4067_v15 = vperm.slane %v10309_v35, 2  ;;  %v4083_v50 = vperm.slane %v10309_v35, 3 }
 0x6ef   : > { %v3927_v60 = vadd.f32 %v3923_v57, %v3911_v22  ;;  %v3928_v55 = vadd.f32 %v3924_v42, %v3912_v1  ;;  %v3959_v14 = vadd.f32 %v10261_v47, %v3926_v27  ;;  %v3974_v39 = vmul.f32 %v3970_v48, %v10032_v38 }
 0x6f0   : > { %v10339_v58 = vpop.permute.xlu1 %4126  ;;  %v3956_v7 = vmul.f32 %v3952_v49, %v10118_v51  ;;  %v3957_v4 = vmul.f32 %v3953_v36, %v10118_v51  ;;  %v3968_v28 = vperm.slane %v10323_v25, 1  ;;  %v3969_v17 = vperm.slane %v10328_v8, 1 }
 0x6f1   : > { %v10367_v32 = vmul.f32 %v4064_v23, %v10094_v18  ;;  %v10372_v47 = vsel %vm1223_vm6, %v10147_v10, %v10303_v53  ;;  %v3962_v48 = vadd.f32 %v10267_v19, %v3929_v3  ;;  %v3975_v63 = vadd.f32 %v3971_v6, %v3959_v14 }
 0x6f2   : > { %v10376_v31 = vmul.f32 %v4067_v15, %v10094_v18  ;;  %v3984_v51 = vperm.slane %v10323_v25, 2  ;;  %v3972_v21 = vmul.f32 %v3968_v28, %v10032_v38  ;;  %v3973_v20 = vmul.f32 %v3969_v17, %v10032_v38 }
 0x6f3   : > { %v3985_v23 = vperm.slane %v10328_v8, 2  ;;  %v4000_v41 = vperm.slane %v10323_v25, 3  ;;  %v3978_v57 = vadd.f32 %v3974_v39, %v3962_v48  ;;  %v4003_v42 = vmul.f32 %v3999_v44, %v10088_v56 }
 0x6f4   : > { %v3960_v19 = vadd.f32 %v3956_v7, %v3927_v60  ;;  %v3961_v27 = vadd.f32 %v3957_v4, %v3928_v55  ;;  %v4001_v49 = vperm.slane %v10328_v8, 3  ;;  %v4113_v36 = vperm.slane %v10372_v47, 0  ;;  %v10404_v8 = vpop.permute.xlu2 %4179 }
 0x6f5   : > { %v10393_v38 = vsel %vm1223_vm6, %v10212_v43, %v10147_v10  ;;  %v3991_v25 = vadd.f32 %v10291_v37, %v3975_v63  ;;  %v4006_v33 = vmul.f32 %v4002_v46, %v10088_v56  ;;  %v10402_v44 = vsel %vm1182_vm7, %v10183_v12, %v10129_v16  ;;  %v10428_v17 = vpop.permute.xlu0 %4175 }
 0x6f6   : > { %v3988_v1 = vmul.f32 %v3984_v51, %v9905_v52  ;;  %v3976_v3 = vadd.f32 %v3972_v21, %v3960_v19  ;;  %v3977_v6 = vadd.f32 %v3973_v20, %v3961_v27  ;;  %v10410_v10 = vsel %vm1182_vm7, %v10129_v16, %v10030_v62 }
 0x6f7   : > { %v3989_v37 = vmul.f32 %v3985_v23, %v9905_v52  ;;  %v4129_v26 = vperm.slane %v10372_v47, 1  ;;  %v3994_v46 = vadd.f32 %v10294_v11, %v3978_v57  ;;  %v4007_v15 = vadd.f32 %v4003_v42, %v3991_v25 }
 0x6f8   : > { %v4145_v12 = vperm.slane %v10372_v47, 2  ;;  %v4161_v60 = vperm.slane %v10372_v47, 3  ;;  %v4116_v55 = vperm.slane %v10393_v38, 0  ;;  %v4033_v14 = vperm.slane %v10402_v44, 0 }
 0x6f9   : > { %v10388_v22 = vpop.permute.xlu1 %4158  ;;  %v10420_v39 = vmul.f32 %v4113_v36, %v10364_v34  ;;  %v4010_v62 = vadd.f32 %v4006_v33, %v3994_v46  ;;  %v4034_v16 = vperm.slane %v10410_v10, 0  ;;  %v4052_v52 = vmul.f32 %v4048_v2, %v10181_v29 }
 0x6fa   : > { %v3992_v11 = vadd.f32 %v3988_v1, %v3976_v3  ;;  %v3993_v7 = vadd.f32 %v3989_v37, %v3977_v6  ;;  %v4004_v4 = vmul.f32 %v4000_v41, %v10088_v56  ;;  %v4005_v28 = vmul.f32 %v4001_v49, %v10088_v56 }
 0x6fb   : > { %v4132_v48 = vperm.slane %v10393_v38, 1  ;;  %v4148_v63 = vperm.slane %v10393_v38, 2  ;;  %v4040_v51 = vadd.f32 %v10342_v13, %v4007_v15  ;;  %v4055_v21 = vmul.f32 %v4051_v40, %v10181_v29 }
 0x6fc   : > { %v4120_v20 = vmul.f32 %v4116_v55, %v10364_v34  ;;  %v4164_v2 = vperm.slane %v10393_v38, 3  ;;  %v4037_v23 = vmul.f32 %v4033_v14, %v10250_v54  ;;  %v4049_v41 = vperm.slane %v10402_v44, 1  ;;  %v10456_v1 = vpop.permute.xlu2 %4223 }
 0x6fd   : > { %v4038_v56 = vmul.f32 %v4034_v16, %v10250_v54  ;;  %v4050_v42 = vperm.slane %v10410_v10, 1  ;;  %v4043_v19 = vadd.f32 %v10351_v9, %v4010_v62  ;;  %v4056_v27 = vadd.f32 %v4052_v52, %v4040_v51 }
 0x6fe   : > { %v4008_v13 = vadd.f32 %v4004_v4, %v3992_v11  ;;  %v4009_v49 = vadd.f32 %v4005_v28, %v3993_v7  ;;  %v10444_v40 = vmul.f32 %v4145_v12, %v10274_v61  ;;  %v4053_v36 = vmul.f32 %v4049_v41, %v10181_v29  ;;  %v10487_v7 = vpop.permute.xlu0 %4191 }
 0x6ff   : > { %v10450_v25 = vsel %vm1264_vm5, %v10337_v30, %v10428_v17  ;;  %v4054_v33 = vmul.f32 %v4050_v42, %v10181_v29  ;;  %v4059_v54 = vadd.f32 %v4055_v21, %v4043_v19  ;;  %v4084_v9 = vmul.f32 %v4080_v24, %v10244_v0 }
 0x700   : > { %v10459_v3 = vmul.f32 %v4148_v63, %v10274_v61  ;;  %v4041_v6 = vadd.f32 %v4037_v23, %v4008_v13  ;;  %v4065_v37 = vperm.slane %v10402_v44, 2  ;;  %v4066_v46 = vperm.slane %v10410_v10, 2 }
 0x701   : > { %v10438_v57 = vpop.permute.xlu1 %4177  ;;  %v4042_v15 = vadd.f32 %v4038_v56, %v4009_v49  ;;  %v4072_v12 = vadd.f32 %v10367_v32, %v4056_v27  ;;  %v4087_v29 = vmul.f32 %v4083_v50, %v10244_v0  ;;  %v10470_v5 = vsel %vm1223_vm6, %v10303_v53, %v10284_v45  ;;  %v4344_v27 = vld [vmem:[%s11212_s2 + $0x88] sm:$0xf] }
 0x702   : > { %v4081_v24 = vperm.slane %v10402_v44, 3  ;;  %v4082_v55 = vperm.slane %v10410_v10, 3  ;;  %v4194_v14 = vperm.slane %v10450_v25, 0  ;;  %v4057_v62 = vadd.f32 %v4053_v36, %v4041_v6  ;;  %4347 = vperm.xlu2 %5939, %v4344_v27  }
 0x703   : > { %v4058_v16 = vadd.f32 %v4054_v33, %v4042_v15  ;;  %v4075_v52 = vadd.f32 %v10376_v31, %v4059_v54  ;;  %v4088_v32 = vadd.f32 %v4084_v9, %v4072_v12  ;;  %v10479_v35 = vsel %vm1223_vm6, %v10284_v45, %v10212_v43 }
 0x704   : > { %v4069_v50 = vmul.f32 %v4065_v37, %v10094_v18  ;;  %v4070_v53 = vmul.f32 %v4066_v46, %v10094_v18  ;;  %v4210_v44 = vperm.slane %v10450_v25, 1  ;;  %v4114_v10 = vperm.slane %v10470_v5, 0  ;;  %v4255_v36 = vpop.permute.xlu2 %4254 }
 0x705   : > { %v4226_v31 = vperm.slane %v10450_v25, 2  ;;  %v10493_v4 = vsel %vm1264_vm5, %v10404_v8, %v10337_v30  ;;  %v4091_v43 = vadd.f32 %v4087_v29, %v4075_v52  ;;  %v4133_v18 = vmul.f32 %v4129_v26, %v10339_v58 }
 0x706   : > { %v4198_v45 = vmul.f32 %v4194_v14, %v10487_v7  ;;  %v4242_v28 = vperm.slane %v10450_v25, 3  ;;  %v4085_v63 = vmul.f32 %v4081_v24, %v10244_v0  ;;  %v4115_v51 = vperm.slane %v10479_v35, 0  ;;  %v4257_v38 = vpop.permute.xlu0 %4256 }
 0x707   : > { %v4073_v21 = vadd.f32 %v4069_v50, %v4057_v62  ;;  %v4074_v23 = vadd.f32 %v4070_v53, %v4058_v16  ;;  %v4121_v41 = vadd.f32 %v10420_v39, %v4088_v32  ;;  %v4136_v30 = vmul.f32 %v4132_v48, %v10339_v58 }
 0x708   : > { %v4197_v56 = vperm.slane %v10493_v4, 0  ;;  %v4086_v42 = vmul.f32 %v4082_v55, %v10244_v0  ;;  %v4118_v26 = vmul.f32 %v4114_v10, %v10364_v34  ;;  %v4130_v19 = vperm.slane %v10470_v5, 1 }
 0x709   : > { %v10485_v11 = vpop.permute.xlu1 %4207  ;;  %v4213_v13 = vperm.slane %v10493_v4, 1  ;;  %v4229_v49 = vperm.slane %v10493_v4, 2  ;;  %v4124_v39 = vadd.f32 %v4120_v20, %v4091_v43  ;;  %v4137_v33 = vadd.f32 %v4133_v18, %v4121_v41 }
 0x70a   : > { %v4089_v48 = vadd.f32 %v4085_v63, %v4073_v21  ;;  %v4119_v54 = vmul.f32 %v4115_v51, %v10364_v34  ;;  %v4131_v0 = vperm.slane %v10479_v35, 1  ;;  %v4134_v9 = vmul.f32 %v4130_v19, %v10339_v58 }
 0x70b   : > { %v4245_v6 = vperm.slane %v10493_v4, 3  ;;  %v4140_v37 = vadd.f32 %v4136_v30, %v4124_v39  ;;  %v4165_v46 = vmul.f32 %v4161_v60, %v10388_v22  ;;  %v10523_v20 = vsel %vm1264_vm5, %v10428_v17, %v10438_v57 }
 0x70c   : > { %v4090_v15 = vadd.f32 %v4086_v42, %v4074_v23  ;;  %v4122_v12 = vadd.f32 %v4118_v26, %v4089_v48  ;;  %v4146_v34 = vperm.slane %v10470_v5, 2  ;;  %v4135_v29 = vmul.f32 %v4131_v0, %v10339_v58  ;;  %v4261_v23 = vpop.permute.xlu2 %4260 }
 0x70d   : > { %v4147_v24 = vperm.slane %v10479_v35, 2  ;;  %v4162_v55 = vperm.slane %v10470_v5, 3  ;;  %v4153_v14 = vadd.f32 %v10444_v40, %v4137_v33  ;;  %v4168_v47 = vmul.f32 %v4164_v2, %v10388_v22 }
 0x70e   : > { %v4123_v17 = vadd.f32 %v4119_v54, %v4090_v15  ;;  %v4138_v62 = vadd.f32 %v4134_v9, %v4122_v12  ;;  %v10538_v16 = vsel %vm1264_vm5, %v10438_v57, %v10404_v8  ;;  %v4195_v58 = vperm.slane %v10523_v20, 0 }
 0x70f   : > { %v4201_v52 = vmul.f32 %v4197_v56, %v10487_v7  ;;  %v4230_v5 = vmul.f32 %v4226_v31, %v10456_v1  ;;  %v4156_v40 = vadd.f32 %v10459_v3, %v4140_v37  ;;  %v4169_v32 = vadd.f32 %v4165_v46, %v4153_v14 }
 0x710   : > { %v4150_v2 = vmul.f32 %v4146_v34, %v10274_v61  ;;  %v4163_v50 = vperm.slane %v10479_v35, 3  ;;  %v4139_v53 = vadd.f32 %v4135_v29, %v4123_v17  ;;  %v4166_v10 = vmul.f32 %v4162_v55, %v10388_v22  ;;  %v4273_v55 = vpop.permute.xlu0 %4272 }
 0x711   : > { %vm12198_vm6 = vcmask 703488   ;;  %v4172_v57 = vadd.f32 %v4168_v47, %v4156_v40  ;;  %v4196_v43 = vperm.slane %v10538_v16, 0  ;;  %v4214_v18 = vmul.f32 %v4210_v44, %v10485_v11 }
 0x712   : > { %v10533_v60 = vpop.permute.xlu1 %4239  ;;  %v10548_v8 = vsel %vm12198_vm6, %v4255_v36, %v4257_v38  ;;  %v12199_v31 = vmov 9   ;;  %v4151_v3 = vmul.f32 %v4147_v24, %v10274_v61  ;;  %v4154_v63 = vadd.f32 %v4150_v2, %v4138_v62  ;;  %vm12200_vm5 = vmmov %vm12198_vm6 }
 0x713   : > { %5950 = vset.pattern.permute.xlu2 %v12199_v31  ;;  %v4199_v51 = vmul.f32 %v4195_v58, %v10487_v7  ;;  %v4211_v35 = vperm.slane %v10523_v20, 1  ;;  %v4233_v21 = vmul.f32 %v4229_v49, %v10456_v1  ;;  %v4167_v41 = vmul.f32 %v4163_v50, %v10388_v22  ;;  %vm12201_vm7 = vmmov %vm12200_vm5 }
 0x714   : > { %v4202_v30 = vadd.f32 %v4198_v45, %v4169_v32  ;;  %v4217_v56 = vmul.f32 %v4213_v13, %v10485_v11  ;;  %v4275_v42 = vperm.slane %v10548_v8, 0  ;;  %v4155_v44 = vadd.f32 %v4151_v3, %v4139_v53  ;;  %vm12202_vm8 = vmmov %vm12200_vm5 }
 0x715   : > { %v4170_v26 = vadd.f32 %v4166_v10, %v4154_v63  ;;  %v4215_v19 = vmul.f32 %v4211_v35, %v10485_v11  ;;  %v4200_v61 = vmul.f32 %v4196_v43, %v10487_v7  ;;  %v4212_v27 = vperm.slane %v10538_v16, 1 }
 0x716   : > { %v4205_v39 = vadd.f32 %v4201_v52, %v4172_v57  ;;  %v4218_v33 = vadd.f32 %v4214_v18, %v4202_v30  ;;  %v10564_v49 = vsel %vm12200_vm5, %v4261_v23, %v4255_v36  ;;  %v4227_v22 = vperm.slane %v10523_v20, 2 }
 0x717   : > { %v4203_v45 = vadd.f32 %v4199_v51, %v4170_v26  ;;  %v4171_v54 = vadd.f32 %v4167_v41, %v4155_v44  ;;  %v4216_v0 = vmul.f32 %v4212_v27, %v10485_v11  ;;  %v4246_v7 = vmul.f32 %v4242_v28, %v10533_v60 }
 0x718   : > { %v4221_v9 = vadd.f32 %v4217_v56, %v4205_v39  ;;  %v4228_v37 = vperm.slane %v10538_v16, 2  ;;  %v4243_v46 = vperm.slane %v10523_v20, 3  ;;  %v4234_v34 = vadd.f32 %v4230_v5, %v4218_v33 }
 0x719   : > { %v4219_v36 = vadd.f32 %v4215_v19, %v4203_v45  ;;  %v4204_v12 = vadd.f32 %v4200_v61, %v4171_v54  ;;  %v4249_v29 = vmul.f32 %v4245_v6, %v10533_v60  ;;  %v4291_v24 = vperm.slane %v10548_v8, 1 }
 0x71a   : > { %v4259_v48 = vpop.permute.xlu1 %4258  ;;  %v4278_v25 = vperm.slane %v10564_v49, 0  ;;  %v4231_v28 = vmul.f32 %v4227_v22, %v10456_v1  ;;  %v4247_v20 = vmul.f32 %v4243_v46, %v10533_v60  ;;  %v4244_v14 = vperm.slane %v10538_v16, 3 }
 0x71b   : > { %v10568_v13 = vsel %vm12201_vm7, %v4257_v38, %v4259_v48  ;;  %v4264_v11 = vsel %vm12202_vm8, %v4259_v48, %v4261_v23  ;;  %v4220_v47 = vadd.f32 %v4216_v0, %v4204_v12  ;;  %v4237_v17 = vadd.f32 %v4233_v21, %v4221_v9  ;;  %v4305_v23 = vpop.permute.xlu2 %4304 }
 0x71c   : > { %v4276_v15 = vperm.slane %v10568_v13, 0  ;;  %v4250_v62 = vadd.f32 %v4246_v7, %v4234_v34  ;;  %v4235_v58 = vadd.f32 %v4231_v28, %v4219_v36  ;;  %v4277_v52 = vperm.slane %v4264_v11, 0 }
 0x71d   : > { %v4292_v6 = vperm.slane %v10568_v13, 1  ;;  %v4279_v5 = vmul.f32 %v4275_v42, %v4273_v55  ;;  %v4294_v40 = vperm.slane %v10564_v49, 1  ;;  %v4232_v32 = vmul.f32 %v4228_v37, %v10456_v1 }
 0x71e   : > { %v4280_v4 = vmul.f32 %v4276_v15, %v4273_v55  ;;  %v4253_v38 = vadd.f32 %v4249_v29, %v4237_v17  ;;  %v4248_v50 = vmul.f32 %v4244_v14, %v10533_v60  ;;  %v4251_v53 = vadd.f32 %v4247_v20, %v4235_v58  ;;  %v12204_v14 = vld [vmem:[#allocation45_spill] sm:$0xff] }
 0x71f   : > { %v4282_v57 = vmul.f32 %v4278_v25, %v4273_v55  ;;  %v4236_v43 = vadd.f32 %v4232_v32, %v4220_v47  ;;  %v4283_v18 = vadd.f32 %v4279_v5, %v4250_v62  ;;  %v4281_v3 = vmul.f32 %v4277_v52, %v4273_v55  ;;  %v12205_v17 = vld [vmem:[#allocation13_spill] sm:$0xff]  ;;  %v12206_v52 = vld [vmem:[#allocation32_spill] sm:$0xff] }
 0x720   : > { %v4293_v63 = vperm.slane %v4264_v11, 1  ;;  %v4308_v51 = vperm.slane %v10568_v13, 2  ;;  %v4284_v35 = vadd.f32 %v4280_v4, %v4251_v53  ;;  %v4307_v21 = vperm.slane %v10548_v8, 2 }
 0x721   : > { %v4286_v1 = vadd.f32 %v4282_v57, %v4253_v38  ;;  %v4252_v41 = vadd.f32 %v4248_v50, %v4236_v43  ;;  %v4310_v42 = vperm.slane %v10564_v49, 2  ;;  %v4309_v19 = vperm.slane %v4264_v11, 2 }
 0x722   : > { %v4289_v2 = vpop.permute.xlu1 %4288  ;;  %v4311_v26 = vmul.f32 %v4307_v21, %v4305_v23  ;;  %v4312_v61 = vmul.f32 %v4308_v51, %v4305_v23  ;;  %v4323_v39 = vperm.slane %v10548_v8, 3  ;;  %v4326_v33 = vperm.slane %v10564_v49, 3 }
 0x723   : > { %v4295_v10 = vmul.f32 %v4291_v24, %v4289_v2  ;;  %v4296_v16 = vmul.f32 %v4292_v6, %v4289_v2  ;;  %v4298_v31 = vmul.f32 %v4294_v40, %v4289_v2  ;;  %v4297_v30 = vmul.f32 %v4293_v63, %v4289_v2  ;;  %v4343_v6 = vld [vmem:[%s11212_s2 + $0x80] sm:$0xf] }
 0x724   : > { %v4285_v27 = vadd.f32 %v4281_v3, %v4252_v41  ;;  %v4314_v48 = vmul.f32 %v4310_v42, %v4305_v23  ;;  %v4324_v22 = vperm.slane %v10568_v13, 3  ;;  %v4325_v45 = vperm.slane %v4264_v11, 3  ;;  %v12203_v13 = vld [vmem:[#allocation40_spill] sm:$0xff] }
 0x725   : > { %v4299_v56 = vadd.f32 %v4295_v10, %v4283_v18  ;;  %v4300_v60 = vadd.f32 %v4296_v16, %v4284_v35  ;;  %v4302_v44 = vadd.f32 %v4298_v31, %v4286_v1  ;;  %v4313_v12 = vmul.f32 %v4309_v19, %v4305_v23 }
 0x726   : > { %v4301_v54 = vadd.f32 %v4297_v30, %v4285_v27  ;;  %v12207_v5 = vmov 4   ;;  %v12208_v40 = vmov 2   ;;  %v12209_v32 = vmov 3  }
 0x727   : > { %v4315_v9 = vadd.f32 %v4311_v26, %v4299_v56  ;;  %v4316_v7 = vadd.f32 %v4312_v61, %v4300_v60  ;;  %v4318_v37 = vadd.f32 %v4314_v48, %v4302_v44  ;;  %v12210_v38 = vmov 6  }
 0x728   : > { %v4317_v8 = vadd.f32 %v4313_v12, %v4301_v54  ;;  %v12211_v2 = vmov 5   ;;  %v12212_v50 = vmov 7   ;;  %v12213_v10 = vmov 8  }
 0x729   : > { %v12214_v57 = vmov 18   ;;  %vm12215_vm9 = vcmask 162816   ;;  %vm12216_vm13 = vcmask 171008   ;;  %vm12223_vm6 = vcmask 154624  }
 0x72a   : > { %vm12217_vm14 = vmmov %vm12216_vm13 }
 0x72b   : > { %v4321_v0 = vpop.permute.xlu1 %4320  ;;  %vm12218_vm0 = vmmov %vm12216_vm13 }
 0x72c   : > { %v4327_v46 = vmul.f32 %v4323_v39, %v4321_v0  ;;  %v4328_v36 = vmul.f32 %v4324_v22, %v4321_v0  ;;  %v4330_v15 = vmul.f32 %v4326_v33, %v4321_v0  ;;  %v4329_v34 = vmul.f32 %v4325_v45, %v4321_v0  ;;  %vm12219_vm2 = vmmov %vm12218_vm0 }
 0x72d   : > { %vm12220_vm4 = vmmov %vm12215_vm9 }
 0x72e   : > { %v4331_v29 = vadd.f32 %v4327_v46, %v4315_v9  ;;  %v4332_v24 = vadd.f32 %v4328_v36, %v4316_v7  ;;  %v4334_v55 = vadd.f32 %v4330_v15, %v4318_v37  ;;  %v4333_v20 = vadd.f32 %v4329_v34, %v4317_v8  ;;  %vm12221_vm3 = vmmov %vm12220_vm4 }
 0x72f   : > { %vm12222_vm1 = vmmov %vm12221_vm3 }
 0x730   : > { %v4335_v25 = vmax.f32 %v4331_v29, 0.0  ;;  %v4336_v49 = vmax.f32 %v4332_v24, 0.0  ;;  %v4338_v28 = vmax.f32 %v4334_v55, 0.0  ;;  %v4337_v58 = vmax.f32 %v4333_v20, 0.0  ;;  %vm12224_vm5 = vmmov %vm12223_vm6 }
 0x731   : > { %vm12225_vm7 = vmmov %vm12224_vm5 }
 0x732   : > { %v10597_v11 = vmul.f32 %v4335_v25, %v12203_v13  ;;  %v10600_v47 = vmul.f32 %v4336_v49, %v12204_v14  ;;  %v10603_v62 = vmul.f32 %v4338_v28, %v12205_v17  ;;  %v10612_v4 = vmul.f32 %v4337_v58, %v12206_v52  ;;  %vm12226_vm8 = vmmov %vm12224_vm5 }
 0x734   : > { %4352 = vrot.lane.b32.xlu0 %v10603_v62, %s6033_s26  ;;  %4360 = vrot.lane.b32.xlu2 %v10600_v47, %s6033_s26 }
 0x735   : > { %4358 = vrot.lane.b32.xlu1 %v10597_v11, %s6033_s26 }
 0x73c   : > { %4385 = vrot.lane.b32.xlu2 %v10603_v62, %s6034_s27  ;;  %4362 = vrot.lane.b32.xlu0 %v10612_v4, %s6033_s26 }
 0x73d   : > { %4374 = vperm.xlu1 %5940, %v4343_v6  }
 0x744   : > { %4392 = vrot.lane.b32.xlu2 %v10612_v4, %s6034_s27  ;;  %4388 = vrot.lane.b32.xlu0 %v10597_v11, %s6034_s27 }
 0x745   : > { %4390 = vrot.lane.b32.xlu1 %v10600_v47, %s6034_s27 }
 0x746   : > { %5944 = vset.pattern.permute.xlu1 %v12207_v5 }
 0x74c   : > { %4417 = vrot.lane.b32.xlu2 %v10597_v11, %s6035_s30  ;;  %4403 = vperm.xlu0 %5941, %v4343_v6  }
 0x74d   : > { %4414 = vrot.lane.b32.xlu1 %v10603_v62, %s6035_s30 }
 0x754   : > { %4421 = vrot.lane.b32.xlu2 %v10612_v4, %s6035_s30  ;;  %5942 = vset.pattern.permute.xlu0 %v12208_v40 }
 0x755   : > { %4419 = vrot.lane.b32.xlu1 %v10600_v47, %s6035_s30  ;;  %4432 = vperm.xlu0 %5942, %v4343_v6  }
 0x75c   : > { %4446 = vrot.lane.b32.xlu2 %v10597_v11, %s6041_s6  ;;  %v4348_v53 = vpop.permute.xlu2 %4347 }
 0x75d   : > { %4443 = vrot.lane.b32.xlu1 %v10603_v62, %s6041_s6  ;;  %5943 = vset.pattern.permute.xlu0 %v12209_v32 }
 0x75e   : > { %4461 = vperm.xlu0 %5943, %v4343_v6  }
 0x764   : > { %4450 = vrot.lane.b32.xlu2 %v10612_v4, %s6041_s6 }
 0x765   : > { %4448 = vrot.lane.b32.xlu1 %v10600_v47, %s6041_s6 }
 0x766   : > { %4490 = vrot.lane.b32.xlu0 %v10603_v62, %s11996_s20 }
 0x767   : > { %5946 = vset.pattern.permute.xlu0 %v12210_v38 }
 0x76c   : > { %4484 = vrot.lane.b32.xlu2 %v10597_v11, %s11996_s20 }
 0x76d   : > { %4473 = vperm.xlu1 %5944, %v4343_v6  }
 0x76e   : > { %4515 = vrot.lane.b32.xlu0 %v10600_v47, %s6049_s14 }
 0x774   : > { %4488 = vrot.lane.b32.xlu2 %v10612_v4, %s11996_s20 }
 0x775   : > { %4486 = vrot.lane.b32.xlu1 %v10600_v47, %s11996_s20 }
 0x776   : > { %4531 = vperm.xlu0 %5946, %v4343_v6   ;;  %5945 = vset.pattern.permute.xlu1 %v12211_v2 }
 0x77c   : > { %4513 = vrot.lane.b32.xlu2 %v10597_v11, %s6049_s14 }
 0x77d   : > { %4502 = vperm.xlu1 %5945, %v4343_v6  }
 0x77e   : > { %5947 = vset.pattern.permute.xlu0 %v12212_v50 }
 0x77f   : > { %4560 = vperm.xlu0 %5947, %v4343_v6  }
 0x784   : > { %4519 = vrot.lane.b32.xlu2 %v10603_v62, %s6049_s14 }
 0x785   : > { %4517 = vrot.lane.b32.xlu1 %v10612_v4, %s6049_s14 }
 0x786   : > { %5949 = vset.pattern.permute.xlu1 %v12166_v59 }
 0x787   : > { %5948 = vset.pattern.permute.xlu0 %v12213_v10 }
 0x788   : > { %4589 = vperm.xlu0 %5948, %v4343_v6  }
 0x78c   : > { %4544 = vrot.lane.b32.xlu2 %v10600_v47, %s6053_s15 }
 0x78d   : > { %4542 = vrot.lane.b32.xlu1 %v10597_v11, %s6053_s15 }
 0x78e   : > { %v4361_v16 = vpop.permute.xlu2 %4360 }
 0x790   : > { %5951 = vset.pattern.permute.xlu0 %v12214_v57 }
 0x794   : > { %4548 = vrot.lane.b32.xlu2 %v10603_v62, %s6053_s15 }
 0x795   : > { %4546 = vrot.lane.b32.xlu1 %v10612_v4, %s6053_s15 }
 0x796   : > { %v4386_v43 = vpop.permute.xlu2 %4385 }
 0x79c   : > { %4573 = vrot.lane.b32.xlu2 %v10600_v47, %s6054_s17 }
 0x79d   : > { %4571 = vrot.lane.b32.xlu1 %v10597_v11, %s6054_s17 }
 0x79e   : > { %v4393_v18 = vpop.permute.xlu2 %4392 }
 0x79f   : > { %v4396_v31 = vsel %vm12215_vm9, %v4393_v18, %v4386_v43  ;;  %vm12227_vm9 = vcmask 7168  }
 0x7a4   : > { %4577 = vrot.lane.b32.xlu2 %v10603_v62, %s6054_s17 }
 0x7a5   : > { %4575 = vrot.lane.b32.xlu1 %v10612_v4, %s6054_s17 }
 0x7a6   : > { %v4353_v3 = vpop.permute.xlu0 %4352  ;;  %v4418_v63 = vpop.permute.xlu2 %4417 }
 0x7a7   : > { %v4359_v51 = vpop.permute.xlu1 %4358 }
 0x7a8   : > { %v4364_v35 = vsel %vm12216_vm13, %v4359_v51, %v4361_v16  ;;  %v4371_v1 = vsel %vm12217_vm14, %v4353_v3, %v4359_v51  ;;  %vm12228_vm13 = vmmov %vm12227_vm9 }
 0x7a9   : > { %vm12229_vm14 = vmmov %vm12227_vm9 }
 0x7ae   : > { %v4422_v21 = vpop.permute.xlu2 %4421  ;;  %v4363_v23 = vpop.permute.xlu0 %4362 }
 0x7af   : > { %v4375_v41 = vpop.permute.xlu1 %4374  ;;  %v4365_v30 = vsel %vm12218_vm0, %v4361_v16, %v4363_v23  ;;  %v4366_v56 = vsel %vm12219_vm2, %v4363_v23, %v4353_v3  ;;  %vm12230_vm0 = vmmov %vm12227_vm9 }
 0x7b0   : > { %v4377_v60 = vmul.f32 %v4375_v41, %v4371_v1  ;;  %v4378_v42 = vmul.f32 %v4375_v41, %v4364_v35  ;;  %v4379_v44 = vmul.f32 %v4375_v41, %v4365_v30  ;;  %v4380_v26 = vmul.f32 %v4375_v41, %v4366_v56 }
 0x7b2   : > { %v4381_v19 = vadd.f32 %v4377_v60, %v4348_v53  ;;  %v4382_v61 = vadd.f32 %v4378_v42, %v4348_v53  ;;  %v4383_v27 = vadd.f32 %v4379_v44, %v4348_v53  ;;  %v4384_v39 = vadd.f32 %v4380_v26, %v4348_v53 }
 0x7b6   : > { %v4447_v33 = vpop.permute.xlu2 %4446  ;;  %v4389_v48 = vpop.permute.xlu0 %4388 }
 0x7b7   : > { %v4391_v22 = vpop.permute.xlu1 %4390  ;;  %v4401_v0 = vsel %vm12222_vm1, %v4386_v43, %v4389_v48  ;;  %vm12249_vm1 = vmmov %vm12219_vm2 }
 0x7b8   : > { %v4395_v45 = vsel %vm12220_vm4, %v4391_v22, %v4393_v18  ;;  %v4394_v54 = vsel %vm12221_vm3, %v4389_v48, %v4391_v22  ;;  %vm12246_vm4 = vmmov %vm12219_vm2 }
 0x7b9   : > { %vm12248_vm3 = vmmov %vm12219_vm2 }
 0x7be   : > { %v4404_v9 = vpop.permute.xlu0 %4403  ;;  %v4451_v37 = vpop.permute.xlu2 %4450 }
 0x7bf   : > { %v4415_v7 = vpop.permute.xlu1 %4414  ;;  %v4406_v46 = vmul.f32 %v4404_v9, %v4401_v0  ;;  %v4407_v36 = vmul.f32 %v4404_v9, %v4394_v54  ;;  %v4408_v15 = vmul.f32 %v4404_v9, %v4395_v45  ;;  %v4409_v12 = vmul.f32 %v4404_v9, %v4396_v31 }
 0x7c0   : > { %v4425_v34 = vsel %vm12223_vm6, %v4422_v21, %v4415_v7  ;;  %v4430_v29 = vsel %vm12224_vm5, %v4415_v7, %v4418_v63  ;;  %vm12252_vm6 = vcmask 162816  }
 0x7c1   : > { %v4410_v24 = vadd.f32 %v4406_v46, %v4381_v19  ;;  %v4411_v55 = vadd.f32 %v4407_v36, %v4382_v61  ;;  %v4412_v8 = vadd.f32 %v4408_v15, %v4383_v27  ;;  %v4413_v25 = vadd.f32 %v4409_v12, %v4384_v39  ;;  %v4605_v19 = vld [vmem:[%s11212_s2 + $0x98] sm:$0xf]  ;;  %vm12253_vm5 = vmmov %vm12252_vm6 }
 0x7c2   : > { %4608 = vperm.xlu1 %5949, %v4605_v19  }
 0x7c6   : > { %v4485_v16 = vpop.permute.xlu2 %4484 }
 0x7c7   : > { %v4420_v49 = vpop.permute.xlu1 %4419  ;;  %v4433_v28 = vpop.permute.xlu0 %4432 }
 0x7c8   : > { %v4423_v20 = vsel %vm12225_vm7, %v4418_v63, %v4420_v49  ;;  %v4424_v58 = vsel %vm12226_vm8, %v4420_v49, %v4422_v21  ;;  %v4435_v6 = vmul.f32 %v4433_v28, %v4430_v29  ;;  %v4438_v53 = vmul.f32 %v4433_v28, %v4425_v34  ;;  %vm12254_vm7 = vmmov %vm12253_vm5 }
 0x7c9   : > { %v4436_v57 = vmul.f32 %v4433_v28, %v4423_v20  ;;  %v4437_v43 = vmul.f32 %v4433_v28, %v4424_v58  ;;  %vm12255_vm8 = vmmov %vm12253_vm5 }
 0x7ca   : > { %v4439_v18 = vadd.f32 %v4435_v6, %v4410_v24  ;;  %v4442_v31 = vadd.f32 %v4438_v53, %v4413_v25 }
 0x7cb   : > { %v4440_v3 = vadd.f32 %v4436_v57, %v4411_v55  ;;  %v4441_v51 = vadd.f32 %v4437_v43, %v4412_v8 }
 0x7ce   : > { %v4489_v23 = vpop.permute.xlu2 %4488 }
 0x7cf   : > { %v4444_v35 = vpop.permute.xlu1 %4443 }
 0x7d0   : > { %v4462_v41 = vpop.permute.xlu0 %4461  ;;  %v4459_v54 = vsel %vm12228_vm13, %v4444_v35, %v4447_v33  ;;  %v4454_v9 = vsel %vm12229_vm14, %v4451_v37, %v4444_v35 }
 0x7d1   : > { %v4464_v7 = vmul.f32 %v4462_v41, %v4459_v54  ;;  %v4467_v46 = vmul.f32 %v4462_v41, %v4454_v9 }
 0x7d3   : > { %v4468_v34 = vadd.f32 %v4464_v7, %v4439_v18  ;;  %v4471_v8 = vadd.f32 %v4467_v46, %v4442_v31 }
 0x7d6   : > { %v4514_v63 = vpop.permute.xlu2 %4513 }
 0x7d7   : > { %v4449_v1 = vpop.permute.xlu1 %4448 }
 0x7d8   : > { %v4452_v30 = vsel %vm12227_vm9, %v4447_v33, %v4449_v1  ;;  %v4491_v26 = vpop.permute.xlu0 %4490  ;;  %v4453_v33 = vsel %vm12230_vm0, %v4449_v1, %v4451_v37  ;;  %vm12257_vm9 = vcmask 154624  }
 0x7d9   : > { %v4465_v56 = vmul.f32 %v4462_v41, %v4452_v30  ;;  %v4500_v29 = vsel %vm806_vm12, %v4491_v26, %v4485_v16  ;;  %v4466_v6 = vmul.f32 %v4462_v41, %v4453_v33  ;;  %v4494_v43 = vsel %vm806_vm12, %v4489_v23, %v4491_v26  ;;  %vm12258_vm13 = vmmov %vm12257_vm9 }
 0x7da   : > { %vm12261_vm14 = vmmov %vm12257_vm9 }
 0x7db   : > { %v10697_v60 = vadd.f32 %v4465_v56, %v4440_v3  ;;  %v4470_v1 = vadd.f32 %v4466_v6, %v4441_v51  ;;  %vm12262_vm0 = vmmov %vm12257_vm9 }
 0x7de   : > { %v4520_v42 = vpop.permute.xlu2 %4519 }
 0x7df   : > { %v4474_v21 = vpop.permute.xlu1 %4473 }
 0x7e0   : > { %v4516_v39 = vpop.permute.xlu0 %4515  ;;  %v4476_v36 = vmul.f32 %v4474_v21, %v10597_v11  ;;  %v4479_v15 = vmul.f32 %v4474_v21, %v10603_v62  ;;  %v4477_v30 = vmul.f32 %v4474_v21, %v10600_v47  ;;  %v4478_v41 = vmul.f32 %v4474_v21, %v10612_v4 }
 0x7e1   : > { %v4521_v18 = vsel %vm941_vm15, %v4514_v63, %v4516_v39 }
 0x7e2   : > { %v4480_v20 = vadd.f32 %v4476_v36, %v4468_v34  ;;  %v4483_v58 = vadd.f32 %v4479_v15, %v4471_v8 }
 0x7e6   : > { %v4545_v27 = vpop.permute.xlu2 %4544 }
 0x7e7   : > { %v4487_v44 = vpop.permute.xlu1 %4486 }
 0x7e8   : > { %v4532_v45 = vpop.permute.xlu0 %4531  ;;  %v4492_v24 = vsel %vm806_vm12, %v4485_v16, %v4487_v44  ;;  %v4529_v16 = vsel %vm941_vm15, %v4520_v42, %v4514_v63  ;;  %v4493_v56 = vsel %vm806_vm12, %v4487_v44, %v4489_v23  ;;  %v4481_v44 = vadd.f32 %v4477_v30, %v10697_v60 }
 0x7e9   : > { %v4534_v31 = vmul.f32 %v4532_v45, %v4521_v18  ;;  %v4537_v37 = vmul.f32 %v4532_v45, %v4529_v16  ;;  %v12234_v16 = vmov 10   ;;  %v12235_v18 = vmov 28  }
 0x7ea   : > { %v12241_v30 = vmov 12  }
 0x7ee   : > { %v4549_v22 = vpop.permute.xlu2 %4548 }
 0x7ef   : > { %v4503_v61 = vpop.permute.xlu1 %4502 }
 0x7f0   : > { %v4505_v25 = vmul.f32 %v4503_v61, %v4492_v24  ;;  %v4508_v49 = vmul.f32 %v4503_v61, %v4500_v29  ;;  %v4506_v54 = vmul.f32 %v4503_v61, %v4493_v56  ;;  %v12242_v56 = vmov 30  }
 0x7f1   : > { %v4561_v55 = vpop.permute.xlu0 %4560 }
 0x7f2   : > { %v4509_v53 = vadd.f32 %v4505_v25, %v4480_v20  ;;  %v4512_v57 = vadd.f32 %v4508_v49, %v4483_v58 }
 0x7f4   : > { %v4538_v26 = vadd.f32 %v4534_v31, %v4509_v53  ;;  %v4541_v7 = vadd.f32 %v4537_v37, %v4512_v57  ;;  %v10743_v53 = vld [vmem:[%s11212_s2 + $0x90] sm:$0xf]  ;;  %v12236_v31 = vmov 20   ;;  %v12237_v37 = vmov 11  }
 0x7f6   : > { %v10706_v12 = vpop.permute.xlu2 %4573 }
 0x7f7   : > { %v4518_v48 = vpop.permute.xlu1 %4517 }
 0x7f8   : > { %v4522_v63 = vsel %vm941_vm15, %v4516_v39, %v4518_v48  ;;  %v4523_v36 = vsel %vm941_vm15, %v4518_v48, %v4520_v42  ;;  %v4510_v48 = vadd.f32 %v4506_v54, %v4481_v44 }
 0x7f9   : > { %v4535_v24 = vmul.f32 %v4532_v45, %v4522_v63  ;;  %v4536_v39 = vmul.f32 %v4532_v45, %v4523_v36  ;;  %v12247_v63 = vmov 23  }
 0x7fa   : > { %v4590_v19 = vpop.permute.xlu0 %4589 }
 0x7fb   : > { %v4539_v60 = vadd.f32 %v4535_v24, %v4510_v48 }
 0x7fe   : > { %v4578_v9 = vpop.permute.xlu2 %4577 }
 0x7ff   : > { %v4543_v0 = vpop.permute.xlu1 %4542 }
 0x800   : > { %v4550_v11 = vsel %vm994_vm11, %v4543_v0, %v4545_v27  ;;  %v4558_v62 = vsel %vm994_vm11, %v4549_v22, %v4543_v0  ;;  %v4507_v0 = vmul.f32 %v4503_v61, %v4494_v43  ;;  %v4482_v61 = vadd.f32 %v4478_v41, %v4470_v1 }
 0x801   : > { %v4563_v3 = vmul.f32 %v4561_v55, %v4550_v11  ;;  %v4566_v35 = vmul.f32 %v4561_v55, %v4558_v62  ;;  %v12240_v1 = vmov 31  }
 0x802   : > { %v4511_v33 = vadd.f32 %v4507_v0, %v4482_v61  ;;  %v12244_v0 = vmov 22  }
 0x803   : > { %v4567_v15 = vadd.f32 %v4563_v3, %v4538_v26  ;;  %v4570_v4 = vadd.f32 %v4566_v35, %v4541_v7  ;;  %v12238_v3 = vmov 21   ;;  %v12239_v35 = vmov 29  }
 0x804   : > { %v4540_v6 = vadd.f32 %v4536_v39, %v4511_v33 }
 0x807   : > { %v4547_v28 = vpop.permute.xlu1 %4546 }
 0x808   : > { %v4551_v34 = vsel %vm994_vm11, %v4545_v27, %v4547_v28  ;;  %v4552_v29 = vsel %vm994_vm11, %v4547_v28, %v4549_v22 }
 0x809   : > { %v4564_v25 = vmul.f32 %v4561_v55, %v4551_v34  ;;  %v4565_v49 = vmul.f32 %v4561_v55, %v4552_v29 }
 0x80b   : > { %v4568_v45 = vadd.f32 %v4564_v25, %v4539_v60 }
 0x80f   : > { %v4572_v46 = vpop.permute.xlu1 %4571 }
 0x810   : > { %v4579_v51 = vsel %vm1047_vm10, %v4572_v46, %v10706_v12  ;;  %v4587_v47 = vsel %vm1047_vm10, %v4578_v9, %v4572_v46 }
 0x811   : > { %v4592_v21 = vmul.f32 %v4590_v19, %v4579_v51  ;;  %v4595_v23 = vmul.f32 %v4590_v19, %v4587_v47 }
 0x813   : > { %v4596_v8 = vadd.f32 %v4592_v21, %v4567_v15  ;;  %v4599_v42 = vadd.f32 %v4595_v23, %v4570_v4 }
 0x815   : > { %v10728_v20 = vmul.f32 %v4596_v8, %v12203_v13  ;;  %v10731_v58 = vmul.f32 %v4599_v42, %v12205_v17  ;;  %v4569_v13 = vadd.f32 %v4565_v49, %v4540_v6 }
 0x817   : > { %v4576_v11 = vpop.permute.xlu1 %4575  ;;  %4613 = vrot.lane.b32.xlu2 %v10731_v58, %s6033_s26  ;;  %4619 = vrot.lane.b32.xlu1 %v10728_v20, %s6033_s26 }
 0x818   : > { %v4580_v27 = vsel %vm1047_vm10, %v10706_v12, %v4576_v11  ;;  %v4581_v22 = vsel %vm1047_vm10, %v4576_v11, %v4578_v9  ;;  %v12231_v12 = vmov 27  }
 0x819   : > { %v4593_v55 = vmul.f32 %v4590_v19, %v4580_v27  ;;  %v4594_v28 = vmul.f32 %v4590_v19, %v4581_v22  ;;  %v12243_v19 = vmov 13  }
 0x81b   : > { %v4597_v17 = vadd.f32 %v4593_v55, %v4568_v45  ;;  %v4598_v62 = vadd.f32 %v4594_v28, %v4569_v13 }
 0x81d   : > { %v10746_v57 = vmul.f32 %v4597_v17, %v12204_v14  ;;  %v10749_v43 = vmul.f32 %v4598_v62, %v12206_v52  ;;  %v12232_v14 = vmov 19   ;;  %v12233_v52 = vmov 1  }
 0x81f   : > { %4621 = vrot.lane.b32.xlu2 %v10746_v57, %s6033_s26  ;;  %4635 = vperm.xlu1 %5949, %v10743_v53  }
 0x820   : > { %4623 = vrot.lane.b32.xlu0 %v10749_v43, %s6033_s26 }
 0x827   : > { %4651 = vperm.xlu2 %5950, %v10743_v53   ;;  %5952 = vset.pattern.permute.xlu1 %v12231_v12 }
 0x828   : > { %4667 = vperm.xlu0 %5951, %v10743_v53   ;;  %4683 = vperm.xlu1 %5952, %v10743_v53  }
 0x82f   : > { %4698 = vrot.lane.b32.xlu2 %v10731_v58, %s6034_s27 }
 0x830   : > { %4705 = vrot.lane.b32.xlu0 %v10749_v43, %s6034_s27  ;;  %4701 = vrot.lane.b32.xlu1 %v10728_v20, %s6034_s27 }
 0x831   : > { %5955 = vset.pattern.permute.xlu0 %v12232_v14  ;;  %5953 = vset.pattern.permute.xlu1 %v12233_v52 }
 0x832   : > { %5954 = vset.pattern.permute.xlu2 %v12234_v16 }
 0x834   : > { %v4609_v54 = vpop.permute.xlu1 %4608 }
 0x837   : > { %4703 = vrot.lane.b32.xlu2 %v10746_v57, %s6034_s27 }
 0x838   : > { %4748 = vperm.xlu0 %5955, %v10743_v53   ;;  %4716 = vperm.xlu1 %5953, %v10743_v53  }
 0x83f   : > { %4732 = vperm.xlu2 %5954, %v10743_v53  }
 0x840   : > { %4786 = vrot.lane.b32.xlu0 %v10749_v43, %s6035_s30  ;;  %5956 = vset.pattern.permute.xlu1 %v12235_v18 }
 0x841   : > { %4764 = vperm.xlu1 %5956, %v10743_v53   ;;  %5959 = vset.pattern.permute.xlu0 %v12236_v31 }
 0x847   : > { %4779 = vrot.lane.b32.xlu2 %v10731_v58, %s6035_s30 }
 0x848   : > { %4829 = vperm.xlu0 %5959, %v10743_v53   ;;  %5958 = vset.pattern.permute.xlu2 %v12237_v37 }
 0x849   : > { %4782 = vrot.lane.b32.xlu1 %v10728_v20, %s6035_s30 }
 0x84a   : > { %5957 = vset.pattern.permute.xlu1 %v12208_v40 }
 0x84f   : > { %4784 = vrot.lane.b32.xlu2 %v10746_v57, %s6035_s30 }
 0x850   : > { %4867 = vrot.lane.b32.xlu0 %v10749_v43, %s6041_s6 }
 0x851   : > { %4797 = vperm.xlu1 %5957, %v10743_v53   ;;  %5963 = vset.pattern.permute.xlu0 %v12238_v3 }
 0x857   : > { %4813 = vperm.xlu2 %5958, %v10743_v53  }
 0x858   : > { %4910 = vperm.xlu0 %5963, %v10743_v53  }
 0x859   : > { %5960 = vset.pattern.permute.xlu1 %v12239_v35 }
 0x85a   : > { %4845 = vperm.xlu1 %5960, %v10743_v53  }
 0x85f   : > { %4860 = vrot.lane.b32.xlu2 %v10731_v58, %s6041_s6 }
 0x860   : > { %5968 = vset.pattern.permute.xlu0 %v12240_v1  ;;  %5962 = vset.pattern.permute.xlu2 %v12241_v30 }
 0x861   : > { %4990 = vperm.xlu0 %5968, %v10743_v53  }
 0x862   : > { %4863 = vrot.lane.b32.xlu1 %v10728_v20, %s6041_s6 }
 0x863   : > { %5961 = vset.pattern.permute.xlu1 %v12209_v32 }
 0x867   : > { %4865 = vrot.lane.b32.xlu2 %v10746_v57, %s6041_s6 }
 0x869   : > { %5969 = vset.pattern.permute.xlu0 %v12211_v2 }
 0x86a   : > { %5023 = vperm.xlu0 %5969, %v10743_v53   ;;  %4878 = vperm.xlu1 %5961, %v10743_v53  }
 0x86f   : > { %4894 = vperm.xlu2 %5962, %v10743_v53  }
 0x871   : > { %v4614_v41 = vpop.permute.xlu2 %4613 }
 0x872   : > { %5088 = vrot.lane.b32.xlu0 %v10746_v57, %s6049_s14  ;;  %5964 = vset.pattern.permute.xlu1 %v12242_v56 }
 0x873   : > { %4926 = vperm.xlu1 %5964, %v10743_v53   ;;  %5973 = vset.pattern.permute.xlu0 %v12210_v38 }
 0x877   : > { %5965 = vset.pattern.permute.xlu2 %v12207_v5  ;;  %v12245_v5 = vmov 14  }
 0x878   : > { %4942 = vperm.xlu2 %5965, %v10743_v53  }
 0x879   : > { %v4622_v2 = vpop.permute.xlu2 %4621 }
 0x87a   : > { %5104 = vperm.xlu0 %5973, %v10743_v53  }
 0x87b   : > { %5966 = vset.pattern.permute.xlu1 %v12243_v19 }
 0x87c   : > { %4958 = vperm.xlu1 %5966, %v10743_v53  }
 0x880   : > { %5967 = vset.pattern.permute.xlu2 %v12244_v0 }
 0x881   : > { %4974 = vperm.xlu2 %5967, %v10743_v53   ;;  %v4652_v9 = vpop.permute.xlu2 %4651 }
 0x882   : > { %5171 = vrot.lane.b32.xlu0 %v10749_v43, %s6053_s15 }
 0x883   : > { %5977 = vset.pattern.permute.xlu0 %v12212_v50 }
 0x884   : > { %5005 = vrot.lane.b32.xlu1 %v10728_v20, %s11996_s20 }
 0x885   : > { %5970 = vset.pattern.permute.xlu1 %v12245_v5 }
 0x889   : > { %5007 = vrot.lane.b32.xlu2 %v10746_v57, %s11996_s20  ;;  %v10830_v38 = vpop.permute.xlu2 %4698  ;;  %v4620_v26 = vpop.permute.xlu1 %4619 }
 0x88a   : > { %v4625_v7 = vsel %vm12219_vm2, %v4620_v26, %v4622_v2  ;;  %v4632_v46 = vsel %vm12246_vm4, %v4614_v41, %v4620_v26  ;;  %5185 = vperm.xlu0 %5977, %v10743_v53   ;;  %5971 = vset.pattern.permute.xlu2 %v12247_v63  ;;  %vm12263_vm2 = vcmask 7168  }
 0x88b   : > { %v4654_v50 = vperm.slane %v4632_v46, 1  ;;  %v4655_v36 = vperm.slane %v4625_v7, 1  ;;  %v4638_v15 = vperm.slane %v4632_v46, 0  ;;  %v4639_v4 = vperm.slane %v4625_v7, 0  ;;  %vm12264_vm4 = vmmov %vm12263_vm2 }
 0x88c   : > { %5009 = vrot.lane.b32.xlu1 %v10749_v43, %s11996_s20  ;;  %v4670_v45 = vperm.slane %v4632_v46, 2  ;;  %v4671_v13 = vperm.slane %v4625_v7, 2  ;;  %v4686_v17 = vperm.slane %v4632_v46, 3 }
 0x88d   : > { %v4658_v51 = vmul.f32 %v4654_v50, %v4652_v9  ;;  %v4659_v47 = vmul.f32 %v4655_v36, %v4652_v9 }
 0x891   : > { %5011 = vrot.lane.b32.xlu2 %v10731_v58, %s11996_s20  ;;  %v10840_v21 = vpop.permute.xlu2 %4703  ;;  %v4636_v23 = vpop.permute.xlu1 %4635 }
 0x892   : > { %v4642_v44 = vmul.f32 %v4638_v15, %v4636_v23  ;;  %v4643_v61 = vmul.f32 %v4639_v4, %v4636_v23  ;;  %5252 = vrot.lane.b32.xlu0 %v10749_v43, %s6054_s17  ;;  %v4624_v34 = vpop.permute.xlu0 %4623 }
 0x893   : > { %v4626_v29 = vsel %vm12248_vm3, %v4622_v2, %v4624_v34  ;;  %v4627_v24 = vsel %vm12249_vm1, %v4624_v34, %v4614_v41  ;;  %5981 = vset.pattern.permute.xlu0 %v12213_v10  ;;  %v4687_v10 = vperm.slane %v4625_v7, 3  ;;  %vm12268_vm3 = vmmov %vm12263_vm2 }
 0x894   : > { %v4646_v39 = vadd.f32 %v4642_v44, %v4609_v54  ;;  %v4647_v8 = vadd.f32 %v4643_v61, %v4609_v54  ;;  %v4640_v42 = vperm.slane %v4626_v29, 0  ;;  %v4641_v48 = vperm.slane %v4627_v24, 0  ;;  %5039 = vperm.xlu1 %5970, %v10743_v53   ;;  %vm12269_vm1 = vmmov %vm12263_vm2 }
 0x895   : > { %v4656_v33 = vperm.slane %v4626_v29, 1  ;;  %v4657_v25 = vperm.slane %v4627_v24, 1  ;;  %v4672_v62 = vperm.slane %v4626_v29, 2  ;;  %v4673_v12 = vperm.slane %v4627_v24, 2 }
 0x896   : > { %v4644_v49 = vmul.f32 %v4640_v42, %v4636_v23  ;;  %v4645_v60 = vmul.f32 %v4641_v48, %v4636_v23  ;;  %v4662_v27 = vadd.f32 %v4658_v51, %v4646_v39  ;;  %v4663_v22 = vadd.f32 %v4659_v47, %v4647_v8 }
 0x897   : > { %v4660_v6 = vmul.f32 %v4656_v33, %v4652_v9  ;;  %v4661_v11 = vmul.f32 %v4657_v25, %v4652_v9  ;;  %v4688_v16 = vperm.slane %v4626_v29, 3  ;;  %v4689_v18 = vperm.slane %v4627_v24, 3 }
 0x898   : > { %v4648_v55 = vadd.f32 %v4644_v49, %v4609_v54  ;;  %v4649_v28 = vadd.f32 %v4645_v60, %v4609_v54  ;;  %v12250_v9 = vmov 32   ;;  %v12251_v23 = vmov 24  }
 0x899   : > { %5055 = vperm.xlu2 %5971, %v10743_v53   ;;  %v4733_v14 = vpop.permute.xlu2 %4732  ;;  %v12256_v48 = vmov 15  }
 0x89a   : > { %v4664_v31 = vadd.f32 %v4660_v6, %v4648_v55  ;;  %v4665_v37 = vadd.f32 %v4661_v11, %v4649_v28  ;;  %v4668_v3 = vpop.permute.xlu0 %4667  ;;  %v4684_v35 = vpop.permute.xlu1 %4683  ;;  %5266 = vperm.xlu0 %5981, %v10743_v53  }
 0x89b   : > { %v4674_v1 = vmul.f32 %v4670_v45, %v4668_v3  ;;  %v4675_v30 = vmul.f32 %v4671_v13, %v4668_v3  ;;  %v4676_v41 = vmul.f32 %v4672_v62, %v4668_v3  ;;  %v4677_v56 = vmul.f32 %v4673_v12, %v4668_v3 }
 0x89c   : > { %v4690_v2 = vmul.f32 %v4686_v17, %v4684_v35  ;;  %v4691_v19 = vmul.f32 %v4687_v10, %v4684_v35  ;;  %v4692_v54 = vmul.f32 %v4688_v16, %v4684_v35  ;;  %v4693_v0 = vmul.f32 %v4689_v18, %v4684_v35  ;;  %5972 = vset.pattern.permute.xlu1 %v12250_v9 }
 0x89d   : > { %v4678_v5 = vadd.f32 %v4674_v1, %v4662_v27  ;;  %v4679_v26 = vadd.f32 %v4675_v30, %v4663_v22  ;;  %v4680_v7 = vadd.f32 %v4676_v41, %v4664_v31  ;;  %v4681_v46 = vadd.f32 %v4677_v56, %v4665_v37  ;;  %5071 = vperm.xlu1 %5972, %v10743_v53  }
 0x89f   : > { %v4694_v63 = vadd.f32 %v4690_v2, %v4678_v5  ;;  %v4695_v50 = vadd.f32 %v4691_v19, %v4679_v26  ;;  %v4696_v36 = vadd.f32 %v4692_v54, %v4680_v7  ;;  %v4697_v51 = vadd.f32 %v4693_v0, %v4681_v46 }
 0x8a1   : > { %v10852_v47 = vpop.permute.xlu2 %4779  ;;  %5086 = vrot.lane.b32.xlu2 %v10728_v20, %s6049_s14 }
 0x8a2   : > { %v4706_v15 = vpop.permute.xlu0 %4705  ;;  %v4702_v4 = vpop.permute.xlu1 %4701  ;;  %5975 = vset.pattern.permute.xlu2 %v12251_v23  ;;  %5986 = vset.pattern.permute.xlu0 %v12166_v59 }
 0x8a3   : > { %v10860_v44 = vsel %vm12252_vm6, %v10840_v21, %v4706_v15  ;;  %v10864_v61 = vsel %vm12253_vm5, %v4706_v15, %v10830_v38  ;;  %v4707_v34 = vsel %vm12254_vm7, %v4702_v4, %v10840_v21  ;;  %v4714_v29 = vsel %vm12255_vm8, %v10830_v38, %v4702_v4 }
 0x8a4   : > { %v4737_v24 = vperm.slane %v10860_v44, 1  ;;  %v4738_v39 = vperm.slane %v10864_v61, 1  ;;  %v4735_v33 = vperm.slane %v4714_v29, 1  ;;  %v4736_v25 = vperm.slane %v4707_v34, 1 }
 0x8a5   : > { %5090 = vrot.lane.b32.xlu1 %v10749_v43, %s6049_s14  ;;  %v4721_v38 = vperm.slane %v10860_v44, 0  ;;  %v4722_v21 = vperm.slane %v10864_v61, 0  ;;  %v4719_v11 = vperm.slane %v4714_v29, 0  ;;  %v4720_v27 = vperm.slane %v4707_v34, 0 }
 0x8a6   : > { %v4741_v8 = vmul.f32 %v4737_v24, %v4733_v14  ;;  %v4742_v42 = vmul.f32 %v4738_v39, %v4733_v14  ;;  %5974 = vset.pattern.permute.xlu1 %v12256_v48  ;;  %v4739_v49 = vmul.f32 %v4735_v33, %v4733_v14  ;;  %v4740_v60 = vmul.f32 %v4736_v25, %v4733_v14 }
 0x8a7   : > { %v4753_v10 = vperm.slane %v10860_v44, 2  ;;  %v4754_v62 = vperm.slane %v10864_v61, 2  ;;  %v4751_v12 = vperm.slane %v4714_v29, 2  ;;  %v4752_v14 = vperm.slane %v4707_v34, 2 }
 0x8a8   : > { %v4769_v23 = vperm.slane %v10860_v44, 3  ;;  %v4770_v24 = vperm.slane %v10864_v61, 3  ;;  %v12259_v33 = vmov 16   ;;  %v12260_v61 = vmov 33  }
 0x8a9   : > { %v10875_v6 = vpop.permute.xlu2 %4784  ;;  %5092 = vrot.lane.b32.xlu2 %v10731_v58, %s6049_s14  ;;  %s12280_s14 = sshll.u32 %s12282_s13, 4 }
 0x8aa   : > { %v4749_v22 = vpop.permute.xlu0 %4748  ;;  %v4717_v45 = vpop.permute.xlu1 %4716  ;;  %s170_s28 = scalar_lea.vmem %s11213_s3, %s12280_s14 }
 0x8ab   : > { %v4723_v13 = vmul.f32 %v4719_v11, %v4717_v45  ;;  %v4724_v55 = vmul.f32 %v4720_v27, %v4717_v45  ;;  %v4725_v28 = vmul.f32 %v4721_v38, %v4717_v45  ;;  %v4726_v17 = vmul.f32 %v4722_v21, %v4717_v45 }
 0x8ac   : > { %v4755_v3 = vmul.f32 %v4751_v12, %v4749_v22  ;;  %v4756_v35 = vmul.f32 %v4752_v14, %v4749_v22  ;;  %v4757_v1 = vmul.f32 %v4753_v10, %v4749_v22  ;;  %v4758_v30 = vmul.f32 %v4754_v62, %v4749_v22 }
 0x8ad   : > { %5120 = vperm.xlu1 %5974, %v10743_v53   ;;  %v4727_v16 = vadd.f32 %v4723_v13, %v4694_v63  ;;  %v4728_v18 = vadd.f32 %v4724_v55, %v4695_v50  ;;  %v4729_v31 = vadd.f32 %v4725_v28, %v4696_v36  ;;  %v4730_v37 = vadd.f32 %v4726_v17, %v4697_v51 }
 0x8ae   : > { %v4767_v36 = vperm.slane %v4714_v29, 3  ;;  %v4768_v51 = vperm.slane %v4707_v34, 3 }
 0x8af   : > { %v4743_v41 = vadd.f32 %v4739_v49, %v4727_v16  ;;  %v4744_v56 = vadd.f32 %v4740_v60, %v4728_v18  ;;  %v4745_v2 = vadd.f32 %v4741_v8, %v4729_v31  ;;  %v4746_v19 = vadd.f32 %v4742_v42, %v4730_v37 }
 0x8b1   : > { %v4814_v54 = vpop.permute.xlu2 %4813  ;;  %5136 = vperm.xlu2 %5975, %v10743_v53   ;;  %v4759_v9 = vadd.f32 %v4755_v3, %v4743_v41  ;;  %v4760_v5 = vadd.f32 %v4756_v35, %v4744_v56  ;;  %v4761_v26 = vadd.f32 %v4757_v1, %v4745_v2  ;;  %v4762_v7 = vadd.f32 %v4758_v30, %v4746_v19 }
 0x8b2   : > { %v4787_v0 = vpop.permute.xlu0 %4786 }
 0x8b3   : > { %v10887_v46 = vsel %vm12257_vm9, %v10875_v6, %v4787_v0  ;;  %v10891_v63 = vsel %vm12258_vm13, %v4787_v0, %v10852_v47  ;;  %v4765_v50 = vpop.permute.xlu1 %4764 }
 0x8b4   : > { %v4818_v15 = vperm.slane %v10887_v46, 1  ;;  %v4819_v4 = vperm.slane %v10891_v63, 1  ;;  %v4771_v42 = vmul.f32 %v4767_v36, %v4765_v50  ;;  %v4772_v48 = vmul.f32 %v4768_v51, %v4765_v50 }
 0x8b5   : > { %5167 = vrot.lane.b32.xlu1 %v10728_v20, %s6053_s15  ;;  %v4773_v25 = vmul.f32 %v4769_v23, %v4765_v50  ;;  %v4774_v29 = vmul.f32 %v4770_v24, %v4765_v50  ;;  %v4802_v62 = vperm.slane %v10887_v46, 0  ;;  %v4803_v12 = vperm.slane %v10891_v63, 0 }
 0x8b6   : > { %v4822_v39 = vmul.f32 %v4818_v15, %v4814_v54  ;;  %v4823_v8 = vmul.f32 %v4819_v4, %v4814_v54  ;;  %5978 = vset.pattern.permute.xlu1 %v12259_v33  ;;  %v4775_v34 = vadd.f32 %v4771_v42, %v4759_v9  ;;  %v4776_v49 = vadd.f32 %v4772_v48, %v4760_v5 }
 0x8b7   : > { %v4777_v60 = vadd.f32 %v4773_v25, %v4761_v26  ;;  %v4778_v38 = vadd.f32 %v4774_v29, %v4762_v7  ;;  %v4834_v14 = vperm.slane %v10887_v46, 2  ;;  %v4850_v2 = vperm.slane %v10887_v46, 3 }
 0x8b8   : > { %v4851_v19 = vperm.slane %v10891_v63, 3  ;;  %v12265_v23 = vmov 25  }
 0x8b9   : > { %v10900_v21 = vpop.permute.xlu2 %4860  ;;  %5169 = vrot.lane.b32.xlu2 %v10746_v57, %s6053_s15 }
 0x8ba   : > { %v4830_v44 = vpop.permute.xlu0 %4829  ;;  %5976 = vset.pattern.permute.xlu2 %v12260_v61 }
 0x8bb   : > { %v4783_v11 = vpop.permute.xlu1 %4782 }
 0x8bc   : > { %v4788_v27 = vsel %vm12261_vm14, %v4783_v11, %v10875_v6  ;;  %v4795_v22 = vsel %vm12262_vm0, %v10852_v47, %v4783_v11  ;;  %v4835_v47 = vperm.slane %v10891_v63, 2 }
 0x8bd   : > { %v4816_v45 = vperm.slane %v4795_v22, 1  ;;  %v4817_v13 = vperm.slane %v4788_v27, 1  ;;  %5173 = vrot.lane.b32.xlu1 %v10731_v58, %s6053_s15  ;;  %v4800_v16 = vperm.slane %v4795_v22, 0  ;;  %v4801_v18 = vperm.slane %v4788_v27, 0 }
 0x8be   : > { %v4832_v31 = vperm.slane %v4795_v22, 2  ;;  %v4833_v37 = vperm.slane %v4788_v27, 2  ;;  %v4839_v0 = vmul.f32 %v4835_v47, %v4830_v44  ;;  %v4848_v63 = vperm.slane %v4795_v22, 3 }
 0x8bf   : > { %v4820_v55 = vmul.f32 %v4816_v45, %v4814_v54  ;;  %v4821_v28 = vmul.f32 %v4817_v13, %v4814_v54  ;;  %v4838_v54 = vmul.f32 %v4834_v14, %v4830_v44  ;;  %v4849_v33 = vperm.slane %v4788_v27, 3 }
 0x8c0   : > { %v4836_v50 = vmul.f32 %v4832_v31, %v4830_v44  ;;  %v4837_v36 = vmul.f32 %v4833_v37, %v4830_v44 }
 0x8c1   : > { %v10911_v17 = vpop.permute.xlu2 %4865  ;;  %5152 = vperm.xlu2 %5976, %v10743_v53  }
 0x8c2   : > { %v4868_v10 = vpop.permute.xlu0 %4867 }
 0x8c3   : > { %v4798_v6 = vpop.permute.xlu1 %4797  ;;  %v10920_v3 = vsel %vm12263_vm2, %v10911_v17, %v4868_v10  ;;  %v10924_v35 = vsel %vm12264_vm4, %v4868_v10, %v10900_v21  ;;  %v12267_v10 = vmov 34  }
 0x8c4   : > { %v4804_v1 = vmul.f32 %v4800_v16, %v4798_v6  ;;  %v4805_v30 = vmul.f32 %v4801_v18, %v4798_v6  ;;  %v4806_v41 = vmul.f32 %v4802_v62, %v4798_v6  ;;  %v4807_v56 = vmul.f32 %v4803_v12, %v4798_v6  ;;  %v5334_v62 = vld [vmem:[%s11212_s2 + $0xa8] sm:$0x7] }
 0x8c5   : > { %5201 = vperm.xlu1 %5978, %v10743_v53   ;;  %v4899_v51 = vperm.slane %v10920_v3, 1  ;;  %v4900_v15 = vperm.slane %v10924_v35, 1  ;;  %5337 = vperm.xlu0 %5986, %v5334_v62   ;;  %v4883_v37 = vperm.slane %v10920_v3, 0 }
 0x8c6   : > { %v4808_v9 = vadd.f32 %v4804_v1, %v4775_v34  ;;  %v4809_v5 = vadd.f32 %v4805_v30, %v4776_v49  ;;  %v4810_v26 = vadd.f32 %v4806_v41, %v4777_v60  ;;  %v4811_v7 = vadd.f32 %v4807_v56, %v4778_v38 }
 0x8c7   : > { %v4884_v1 = vperm.slane %v10924_v35, 0 }
 0x8c8   : > { %v4824_v24 = vadd.f32 %v4820_v55, %v4808_v9  ;;  %v4825_v42 = vadd.f32 %v4821_v28, %v4809_v5  ;;  %v4826_v46 = vadd.f32 %v4822_v39, %v4810_v26  ;;  %v4827_v48 = vadd.f32 %v4823_v8, %v4811_v7 }
 0x8c9   : > { %v4895_v4 = vpop.permute.xlu2 %4894  ;;  %5979 = vset.pattern.permute.xlu2 %v12265_v23  ;;  %v12266_v39 = vmov 17   ;;  %v4915_v26 = vperm.slane %v10920_v3, 2  ;;  %v4916_v7 = vperm.slane %v10924_v35, 2 }
 0x8ca   : > { %5217 = vperm.xlu2 %5979, %v10743_v53   ;;  %v4903_v25 = vmul.f32 %v4899_v51, %v4895_v4  ;;  %v4904_v29 = vmul.f32 %v4900_v15, %v4895_v4  ;;  %v4840_v49 = vadd.f32 %v4836_v50, %v4824_v24  ;;  %v4841_v60 = vadd.f32 %v4837_v36, %v4825_v42 }
 0x8cb   : > { %v4842_v38 = vadd.f32 %v4838_v54, %v4826_v46  ;;  %v4843_v44 = vadd.f32 %v4839_v0, %v4827_v48 }
 0x8cc   : > { %v4846_v34 = vpop.permute.xlu1 %4845 }
 0x8cd   : > { %v4852_v61 = vmul.f32 %v4848_v63, %v4846_v34  ;;  %v4853_v11 = vmul.f32 %v4849_v33, %v4846_v34  ;;  %v4854_v45 = vmul.f32 %v4850_v2, %v4846_v34  ;;  %v4855_v13 = vmul.f32 %v4851_v19, %v4846_v34  ;;  %5248 = vrot.lane.b32.xlu1 %v10728_v20, %s6054_s17  ;;  %v4911_v19 = vpop.permute.xlu0 %4910 }
 0x8ce   : > { %5982 = vset.pattern.permute.xlu1 %v12266_v39  ;;  %5990 = vset.pattern.permute.xlu0 %v12209_v32  ;;  %v4920_v23 = vmul.f32 %v4916_v7, %v4911_v19  ;;  %v12270_v34 = vmov 26  }
 0x8cf   : > { %v4856_v8 = vadd.f32 %v4852_v61, %v4840_v49  ;;  %v4857_v55 = vadd.f32 %v4853_v11, %v4841_v60  ;;  %v4858_v22 = vadd.f32 %v4854_v45, %v4842_v38  ;;  %v4859_v27 = vadd.f32 %v4855_v13, %v4843_v44 }
 0x8d0   : > { %v4931_v61 = vperm.slane %v10920_v3, 3  ;;  %v4932_v11 = vperm.slane %v10924_v35, 3 }
 0x8d2   : > { %v10936_v28 = vpop.permute.xlu2 %4942  ;;  %5250 = vrot.lane.b32.xlu2 %v10746_v57, %s6054_s17 }
 0x8d3   : > { %5980 = vset.pattern.permute.xlu2 %v12267_v10 }
 0x8d4   : > { %v4864_v12 = vpop.permute.xlu1 %4863 }
 0x8d5   : > { %v4869_v6 = vsel %vm12268_vm3, %v4864_v12, %v10911_v17  ;;  %v4876_v14 = vsel %vm12269_vm1, %v10900_v21, %v4864_v12  ;;  %5254 = vrot.lane.b32.xlu1 %v10731_v58, %s6054_s17  ;;  %v10990_v7 = vpop.permute.xlu0 %4990 }
 0x8d6   : > { %v4897_v47 = vperm.slane %v4876_v14, 1  ;;  %v4898_v16 = vperm.slane %v4869_v6, 1  ;;  %v4881_v30 = vperm.slane %v4876_v14, 0  ;;  %v4882_v41 = vperm.slane %v4869_v6, 0 }
 0x8d7   : > { %v4913_v17 = vperm.slane %v4876_v14, 2  ;;  %v4914_v2 = vperm.slane %v4869_v6, 2  ;;  %v4929_v45 = vperm.slane %v4876_v14, 3  ;;  %v4930_v13 = vperm.slane %v4869_v6, 3 }
 0x8d8   : > { %v4901_v18 = vmul.f32 %v4897_v47, %v4895_v4  ;;  %v4902_v31 = vmul.f32 %v4898_v16, %v4895_v4  ;;  %v4919_v4 = vmul.f32 %v4915_v26, %v4911_v19 }
 0x8d9   : > { %v4917_v24 = vmul.f32 %v4913_v17, %v4911_v19  ;;  %v4918_v42 = vmul.f32 %v4914_v2, %v4911_v19  ;;  %v4962_v2 = vperm.slane %v10746_v57, 1  ;;  %v4963_v19 = vperm.slane %v10749_v43, 1 }
 0x8da   : > { %5233 = vperm.xlu2 %5980, %v10743_v53  }
 0x8db   : > { %v10953_v56 = vpop.permute.xlu2 %4974 }
 0x8dc   : > { %v4879_v21 = vpop.permute.xlu1 %4878 }
 0x8dd   : > { %v4885_v54 = vmul.f32 %v4881_v30, %v4879_v21  ;;  %v4886_v0 = vmul.f32 %v4882_v41, %v4879_v21  ;;  %v4887_v9 = vmul.f32 %v4883_v37, %v4879_v21  ;;  %v4888_v5 = vmul.f32 %v4884_v1, %v4879_v21  ;;  %5282 = vperm.xlu1 %5982, %v10743_v53  }
 0x8de   : > { %v4964_v21 = vperm.slane %v10731_v58, 1 }
 0x8df   : > { %v4889_v50 = vadd.f32 %v4885_v54, %v4856_v8  ;;  %v4890_v36 = vadd.f32 %v4886_v0, %v4857_v55  ;;  %v4891_v51 = vadd.f32 %v4887_v9, %v4858_v22  ;;  %v4892_v15 = vadd.f32 %v4888_v5, %v4859_v27 }
 0x8e0   : > { %v4948_v8 = vperm.slane %v10731_v58, 0  ;;  %v4947_v55 = vperm.slane %v10749_v43, 0  ;;  %v12271_v27 = vmov 35   ;;  %v4980_v54 = vperm.slane %v10731_v58, 2 }
 0x8e1   : > { %v4905_v46 = vadd.f32 %v4901_v18, %v4889_v50  ;;  %v4906_v48 = vadd.f32 %v4902_v31, %v4890_v36  ;;  %v4907_v63 = vadd.f32 %v4903_v25, %v4891_v51  ;;  %v4908_v33 = vadd.f32 %v4904_v29, %v4892_v15 }
 0x8e2   : > { %5983 = vset.pattern.permute.xlu2 %v12270_v34  ;;  %v4945_v25 = vperm.slane %v10728_v20, 0  ;;  %v4946_v29 = vperm.slane %v10746_v57, 0  ;;  %v4951_v14 = vmul.f32 %v4947_v55, %v10936_v28  ;;  %v4952_v47 = vmul.f32 %v4948_v8, %v10936_v28 }
 0x8e3   : > { %5298 = vperm.xlu2 %5983, %v10743_v53   ;;  %v4921_v49 = vadd.f32 %v4917_v24, %v4905_v46  ;;  %v4922_v60 = vadd.f32 %v4918_v42, %v4906_v48  ;;  %v4923_v38 = vadd.f32 %v4919_v4, %v4907_v63  ;;  %v4924_v44 = vadd.f32 %v4920_v23, %v4908_v33  ;;  %v10963_v39 = vpop.permute.xlu2 %5007 }
 0x8e4   : > { %v4949_v35 = vmul.f32 %v4945_v25, %v10936_v28  ;;  %v4950_v6 = vmul.f32 %v4946_v29, %v10936_v28  ;;  %v4961_v28 = vperm.slane %v10728_v20, 1  ;;  %v4977_v0 = vperm.slane %v10728_v20, 2 }
 0x8e5   : > { %v4927_v22 = vpop.permute.xlu1 %4926  ;;  %5984 = vset.pattern.permute.xlu1 %v12271_v27  ;;  %v4978_v9 = vperm.slane %v10746_v57, 2  ;;  %v4979_v5 = vperm.slane %v10749_v43, 2  ;;  %v4984_v42 = vmul.f32 %v4980_v54, %v10953_v56 }
 0x8e6   : > { %v4933_v10 = vmul.f32 %v4929_v45, %v4927_v22  ;;  %v4934_v62 = vmul.f32 %v4930_v13, %v4927_v22  ;;  %v4935_v3 = vmul.f32 %v4931_v61, %v4927_v22  ;;  %v4936_v12 = vmul.f32 %v4932_v11, %v4927_v22  ;;  %5314 = vperm.xlu1 %5984, %v10743_v53   ;;  %v5333_v53 = vld [vmem:[%s11212_s2 + $0xa0] sm:$0x7] }
 0x8e7   : > { %v4981_v4 = vmul.f32 %v4977_v0, %v10953_v56  ;;  %v4982_v23 = vmul.f32 %v4978_v9, %v10953_v56  ;;  %v4983_v24 = vmul.f32 %v4979_v5, %v10953_v56 }
 0x8e8   : > { %v4937_v16 = vadd.f32 %v4933_v10, %v4921_v49  ;;  %v4938_v18 = vadd.f32 %v4934_v62, %v4922_v60  ;;  %v4939_v31 = vadd.f32 %v4935_v3, %v4923_v38  ;;  %v4940_v37 = vadd.f32 %v4936_v12, %v4924_v44 }
 0x8e9   : > { %v4993_v38 = vperm.slane %v10728_v20, 3  ;;  %v4996_v44 = vperm.slane %v10731_v58, 3  ;;  %v5024_v20 = vpop.permute.xlu0 %5023 }
 0x8ea   : > { %v4953_v1 = vadd.f32 %v4949_v35, %v4937_v16  ;;  %v4954_v30 = vadd.f32 %v4950_v6, %v4938_v18  ;;  %v4955_v41 = vadd.f32 %v4951_v14, %v4939_v31  ;;  %v4956_v17 = vadd.f32 %v4952_v47, %v4940_v37 }
 0x8eb   : > { %5985 = vset.pattern.permute.xlu2 %v12166_v59  ;;  %v10987_v26 = vpop.permute.xlu2 %5011  ;;  %v4997_v45 = vmul.f32 %v4993_v38, %v10990_v7  ;;  %v5000_v13 = vmul.f32 %v4996_v44, %v10990_v7 }
 0x8ec   : > { %5343 = vperm.xlu2 %5985, %v5333_v53  }
 0x8ee   : > { %v4959_v59 = vpop.permute.xlu1 %4958  ;;  %5987 = vset.pattern.permute.xlu1 %v12233_v52 }
 0x8ef   : > { %v4965_v50 = vmul.f32 %v4961_v28, %v4959_v59  ;;  %v4966_v36 = vmul.f32 %v4962_v2, %v4959_v59  ;;  %v4967_v51 = vmul.f32 %v4963_v19, %v4959_v59  ;;  %v4968_v15 = vmul.f32 %v4964_v21, %v4959_v59  ;;  %5359 = vperm.xlu1 %5987, %v5333_v53  }
 0x8f1   : > { %v4969_v46 = vadd.f32 %v4965_v50, %v4953_v1  ;;  %v4970_v48 = vadd.f32 %v4966_v36, %v4954_v30  ;;  %v4971_v63 = vadd.f32 %v4967_v51, %v4955_v41  ;;  %v4972_v33 = vadd.f32 %v4968_v15, %v4956_v17  ;;  %v5089_v59 = vpop.permute.xlu0 %5088 }
 0x8f3   : > { %v4985_v52 = vadd.f32 %v4981_v4, %v4969_v46  ;;  %v10996_v34 = vadd.f32 %v4982_v23, %v4970_v48  ;;  %v10998_v49 = vadd.f32 %v4983_v24, %v4971_v63  ;;  %v4988_v60 = vadd.f32 %v4984_v42, %v4972_v33  ;;  %v11010_v8 = vpop.permute.xlu2 %5055 }
 0x8f4   : > { %5988 = vset.pattern.permute.xlu2 %v12208_v40  ;;  %v4994_v23 = vperm.slane %v10746_v57, 3 }
 0x8f5   : > { %5375 = vperm.xlu2 %5988, %v5333_v53   ;;  %v5001_v55 = vadd.f32 %v4997_v45, %v4985_v52  ;;  %v5004_v22 = vadd.f32 %v5000_v13, %v4988_v60  ;;  %v4995_v52 = vperm.slane %v10749_v43, 3 }
 0x8f6   : > { %v5006_v61 = vpop.permute.xlu1 %5005  ;;  %v4998_v46 = vmul.f32 %v4994_v23, %v10990_v7 }
 0x8f7   : > { %v5013_v56 = vsel %vm806_vm12, %v5006_v61, %v10963_v39  ;;  %v5021_v11 = vsel %vm806_vm12, %v10987_v26, %v5006_v61  ;;  %5989 = vset.pattern.permute.xlu1 %v12209_v32  ;;  %v4999_v38 = vmul.f32 %v4995_v52, %v10990_v7 }
 0x8f8   : > { %v5026_v40 = vperm.slane %v5013_v56, 0  ;;  %v5029_v25 = vperm.slane %v5021_v11, 0  ;;  %5391 = vperm.xlu1 %5989, %v5333_v53   ;;  %v5042_v12 = vperm.slane %v5013_v56, 1  ;;  %v5058_v32 = vperm.slane %v5013_v56, 2 }
 0x8f9   : > { %v5045_v35 = vperm.slane %v5021_v11, 1  ;;  %v5061_v6 = vperm.slane %v5021_v11, 2  ;;  %v5074_v53 = vperm.slane %v5013_v56, 3  ;;  %v5077_v2 = vperm.slane %v5021_v11, 3  ;;  %v5105_v24 = vpop.permute.xlu0 %5104 }
 0x8fa   : > { %v5030_v58 = vmul.f32 %v5026_v40, %v5024_v20  ;;  %v5033_v29 = vmul.f32 %v5029_v25, %v5024_v20  ;;  %v5062_v18 = vmul.f32 %v5058_v32, %v11010_v8  ;;  %v5003_v45 = vadd.f32 %v4999_v38, %v10998_v49 }
 0x8fb   : > { %v5087_v3 = vpop.permute.xlu2 %5086  ;;  %v5065_v37 = vmul.f32 %v5061_v6, %v11010_v8 }
 0x8fc   : > { %v5034_v27 = vadd.f32 %v5030_v58, %v5001_v55  ;;  %v5037_v10 = vadd.f32 %v5033_v29, %v5004_v22  ;;  %v11044_v7 = vsel %vm941_vm15, %v5087_v3, %v5089_v59 }
 0x8fd   : > { %v5107_v32 = vperm.slane %v11044_v7, 0 }
 0x8fe   : > { %v5010_v62 = vpop.permute.xlu1 %5009 }
 0x8ff   : > { %v5014_v36 = vsel %vm806_vm12, %v10963_v39, %v5010_v62  ;;  %v5015_v15 = vsel %vm806_vm12, %v5010_v62, %v10987_v26  ;;  %v5002_v39 = vadd.f32 %v4998_v46, %v10996_v34 }
 0x900   : > { %v5027_v4 = vperm.slane %v5014_v36, 0  ;;  %v5028_v42 = vperm.slane %v5015_v15, 0  ;;  %v5043_v63 = vperm.slane %v5014_v36, 1  ;;  %v5044_v26 = vperm.slane %v5015_v15, 1 }
 0x901   : > { %v5059_v56 = vperm.slane %v5014_v36, 2  ;;  %v5075_v40 = vperm.slane %v5014_v36, 3  ;;  %v5172_v29 = vpop.permute.xlu0 %5171 }
 0x902   : > { %v5031_v48 = vmul.f32 %v5027_v4, %v5024_v20  ;;  %v5032_v44 = vmul.f32 %v5028_v42, %v5024_v20  ;;  %v5060_v20 = vperm.slane %v5015_v15, 2 }
 0x903   : > { %v5093_v41 = vpop.permute.xlu2 %5092  ;;  %v5063_v55 = vmul.f32 %v5059_v56, %v11010_v8 }
 0x904   : > { %v5035_v11 = vadd.f32 %v5031_v48, %v5002_v39  ;;  %v5036_v58 = vadd.f32 %v5032_v44, %v5003_v45  ;;  %v11048_v22 = vsel %vm941_vm15, %v5093_v41, %v5087_v3  ;;  %v5123_v3 = vperm.slane %v11044_v7, 1 }
 0x905   : > { %v5142_v4 = vperm.slane %v11048_v22, 2 }
 0x906   : > { %v5040_v14 = vpop.permute.xlu1 %5039 }
 0x907   : > { %v5046_v47 = vmul.f32 %v5042_v12, %v5040_v14  ;;  %v5049_v16 = vmul.f32 %v5045_v35, %v5040_v14  ;;  %v5047_v60 = vmul.f32 %v5043_v63, %v5040_v14  ;;  %v5048_v13 = vmul.f32 %v5044_v26, %v5040_v14 }
 0x909   : > { %v5050_v31 = vadd.f32 %v5046_v47, %v5034_v27  ;;  %v5053_v1 = vadd.f32 %v5049_v16, %v5037_v10  ;;  %v5051_v25 = vadd.f32 %v5047_v60, %v5035_v11  ;;  %v5076_v10 = vperm.slane %v5015_v15, 3  ;;  %v5186_v39 = vpop.permute.xlu0 %5185 }
 0x90a   : > { %v5052_v62 = vadd.f32 %v5048_v13, %v5036_v58  ;;  %v5064_v47 = vmul.f32 %v5060_v20, %v11010_v8  ;;  %v5110_v16 = vperm.slane %v11048_v22, 0  ;;  %v5139_v15 = vperm.slane %v11044_v7, 2 }
 0x90b   : > { %v5066_v30 = vadd.f32 %v5062_v18, %v5050_v31  ;;  %v5069_v17 = vadd.f32 %v5065_v37, %v5053_v1  ;;  %v11018_v9 = vpop.permute.xlu2 %5136  ;;  %v5067_v35 = vadd.f32 %v5063_v55, %v5051_v25  ;;  %v5126_v1 = vperm.slane %v11048_v22, 1 }
 0x90c   : > { %v5158_v20 = vperm.slane %v11048_v22, 3 }
 0x90f   : > { %v5072_v21 = vpop.permute.xlu1 %5071 }
 0x910   : > { %v5078_v28 = vmul.f32 %v5074_v53, %v5072_v21  ;;  %v5081_v19 = vmul.f32 %v5077_v2, %v5072_v21  ;;  %v5079_v49 = vmul.f32 %v5075_v40, %v5072_v21  ;;  %v5080_v18 = vmul.f32 %v5076_v10, %v5072_v21 }
 0x911   : > { %v5111_v2 = vmul.f32 %v5107_v32, %v5105_v24  ;;  %v5143_v40 = vmul.f32 %v5139_v15, %v11018_v9 }
 0x912   : > { %v11014_v54 = vadd.f32 %v5078_v28, %v5066_v30  ;;  %v11016_v0 = vadd.f32 %v5081_v19, %v5069_v17  ;;  %v5083_v31 = vadd.f32 %v5079_v49, %v5067_v35  ;;  %v5068_v30 = vadd.f32 %v5064_v47, %v5052_v62 }
 0x913   : > { %v11022_v51 = vpop.permute.xlu2 %5169 }
 0x914   : > { %v5115_v23 = vadd.f32 %v5111_v2, %v11014_v54  ;;  %v11066_v48 = vsel %vm994_vm11, %v11022_v51, %v5172_v29 }
 0x915   : > { %v5189_v45 = vperm.slane %v11066_v48, 0 }
 0x917   : > { %v5091_v5 = vpop.permute.xlu1 %5090  ;;  %v5193_v10 = vmul.f32 %v5189_v45, %v5186_v39 }
 0x918   : > { %v11034_v61 = vsel %vm941_vm15, %v5089_v59, %v5091_v5  ;;  %v11040_v43 = vsel %vm941_vm15, %v5091_v5, %v5093_v41  ;;  %v5114_v5 = vmul.f32 %v5110_v16, %v5105_v24  ;;  %v5084_v59 = vadd.f32 %v5080_v18, %v5068_v30 }
 0x919   : > { %v5108_v34 = vperm.slane %v11034_v61, 0  ;;  %v5109_v12 = vperm.slane %v11040_v43, 0  ;;  %v5124_v14 = vperm.slane %v11034_v61, 1  ;;  %v5125_v17 = vperm.slane %v11040_v43, 1 }
 0x91a   : > { %v5140_v28 = vperm.slane %v11034_v61, 2  ;;  %v5141_v63 = vperm.slane %v11040_v43, 2  ;;  %v5156_v60 = vperm.slane %v11034_v61, 3  ;;  %v5157_v61 = vperm.slane %v11040_v43, 3 }
 0x91b   : > { %v11036_v57 = vpop.permute.xlu2 %5152  ;;  %v5112_v6 = vmul.f32 %v5108_v34, %v5105_v24  ;;  %v5113_v41 = vmul.f32 %v5109_v12, %v5105_v24  ;;  %v5118_v24 = vadd.f32 %v5114_v5, %v11016_v0  ;;  %v5155_v0 = vperm.slane %v11044_v7, 3 }
 0x91c   : > { %v5145_v25 = vmul.f32 %v5141_v63, %v11018_v9  ;;  %v5162_v22 = vmul.f32 %v5158_v20, %v11036_v57 }
 0x91d   : > { %v5116_v19 = vadd.f32 %v5112_v6, %v5083_v31  ;;  %v5117_v52 = vadd.f32 %v5113_v41, %v5084_v59  ;;  %v5159_v62 = vmul.f32 %v5155_v0, %v11036_v57  ;;  %v5221_v31 = vperm.slane %v11066_v48, 2  ;;  %v5253_v41 = vpop.permute.xlu0 %5252 }
 0x91f   : > { %v5121_v50 = vpop.permute.xlu1 %5120 }
 0x920   : > { %v5128_v37 = vmul.f32 %v5124_v14, %v5121_v50  ;;  %v5127_v8 = vmul.f32 %v5123_v3, %v5121_v50  ;;  %v5129_v21 = vmul.f32 %v5125_v17, %v5121_v50  ;;  %v5130_v36 = vmul.f32 %v5126_v1, %v5121_v50 }
 0x921   : > { %v5144_v50 = vmul.f32 %v5140_v28, %v11018_v9 }
 0x922   : > { %v5132_v42 = vadd.f32 %v5128_v37, %v5116_v19  ;;  %v5131_v38 = vadd.f32 %v5127_v8, %v5115_v23  ;;  %v5133_v44 = vadd.f32 %v5129_v21, %v5117_v52  ;;  %v5134_v26 = vadd.f32 %v5130_v36, %v5118_v24 }
 0x923   : > { %v5237_v23 = vperm.slane %v11066_v48, 3 }
 0x924   : > { %v11058_v53 = vpop.permute.xlu2 %5217  ;;  %v5148_v13 = vadd.f32 %v5144_v50, %v5132_v42  ;;  %v5147_v43 = vadd.f32 %v5143_v40, %v5131_v38  ;;  %v5149_v55 = vadd.f32 %v5145_v25, %v5133_v44 }
 0x925   : > { %v5225_v42 = vmul.f32 %v5221_v31, %v11058_v53 }
 0x926   : > { %v5163_v37 = vadd.f32 %v5159_v62, %v5147_v43 }
 0x927   : > { %v11028_v33 = vpop.permute.xlu1 %5167 }
 0x928   : > { %v11075_v54 = vsel %vm994_vm11, %v11028_v33, %v11022_v51  ;;  %v5146_v51 = vmul.f32 %v5142_v4, %v11018_v9  ;;  %v5161_v9 = vmul.f32 %v5157_v61, %v11036_v57 }
 0x929   : > { %v5188_v34 = vperm.slane %v11075_v54, 0  ;;  %v5204_v6 = vperm.slane %v11075_v54, 1  ;;  %v5220_v19 = vperm.slane %v11075_v54, 2 }
 0x92a   : > { %v5150_v49 = vadd.f32 %v5146_v51, %v5134_v26  ;;  %v5165_v1 = vadd.f32 %v5161_v9, %v5149_v55 }
 0x92b   : > { %v5192_v35 = vmul.f32 %v5188_v34, %v5186_v39 }
 0x92c   : > { %v5166_v30 = vadd.f32 %v5162_v22, %v5150_v49 }
 0x92d   : > { %v5196_v59 = vadd.f32 %v5192_v35, %v5163_v37 }
 0x92f   : > { %v5174_v27 = vpop.permute.xlu1 %5173 }
 0x930   : > { %v11078_v56 = vsel %vm994_vm11, %v5172_v29, %v5174_v27  ;;  %v11082_v11 = vsel %vm994_vm11, %v5174_v27, %v11028_v33  ;;  %v5160_v33 = vmul.f32 %v5156_v60, %v11036_v57  ;;  %v5205_v29 = vperm.slane %v11066_v48, 1  ;;  %v5251_v27 = vpop.permute.xlu2 %5250 }
 0x931   : > { %v5190_v58 = vperm.slane %v11078_v56, 0  ;;  %v5191_v7 = vperm.slane %v11082_v11, 0  ;;  %v5206_v14 = vperm.slane %v11078_v56, 1  ;;  %v5207_v18 = vperm.slane %v11082_v11, 1 }
 0x932   : > { %v5164_v12 = vadd.f32 %v5160_v33, %v5148_v13  ;;  %v11105_v8 = vsel %vm1047_vm10, %v5251_v27, %v5253_v41  ;;  %v5222_v5 = vperm.slane %v11078_v56, 2  ;;  %v5223_v21 = vperm.slane %v11082_v11, 2 }
 0x933   : > { %v5194_v47 = vmul.f32 %v5190_v58, %v5186_v39  ;;  %v5195_v16 = vmul.f32 %v5191_v7, %v5186_v39  ;;  %v5224_v60 = vmul.f32 %v5220_v19, %v11058_v53  ;;  %v5270_v38 = vperm.slane %v11105_v8, 0 }
 0x934   : > { %v5197_v17 = vadd.f32 %v5193_v10, %v5164_v12  ;;  %v5226_v0 = vmul.f32 %v5222_v5, %v11058_v53  ;;  %v5227_v45 = vmul.f32 %v5223_v21, %v11058_v53  ;;  %v5238_v13 = vperm.slane %v11078_v56, 3 }
 0x935   : > { %v5198_v36 = vadd.f32 %v5194_v47, %v5165_v1  ;;  %v5199_v15 = vadd.f32 %v5195_v16, %v5166_v30  ;;  %v5239_v40 = vperm.slane %v11082_v11, 3  ;;  %v5286_v7 = vperm.slane %v11105_v8, 1 }
 0x937   : > { %v5202_v46 = vpop.permute.xlu1 %5201 }
 0x938   : > { %v5209_v3 = vmul.f32 %v5205_v29, %v5202_v46  ;;  %v5208_v2 = vmul.f32 %v5204_v6, %v5202_v46  ;;  %v5210_v28 = vmul.f32 %v5206_v14, %v5202_v46  ;;  %v5211_v57 = vmul.f32 %v5207_v18, %v5202_v46  ;;  %v5234_v44 = vpop.permute.xlu2 %5233  ;;  %v5267_v29 = vpop.permute.xlu0 %5266 }
 0x939   : > { %v5236_v46 = vperm.slane %v11075_v54, 3  ;;  %v5241_v34 = vmul.f32 %v5237_v23, %v5234_v44  ;;  %v5242_v53 = vmul.f32 %v5238_v13, %v5234_v44  ;;  %v5243_v55 = vmul.f32 %v5239_v40, %v5234_v44 }
 0x93a   : > { %v5213_v4 = vadd.f32 %v5209_v3, %v5197_v17  ;;  %v5212_v52 = vadd.f32 %v5208_v2, %v5196_v59  ;;  %v5214_v24 = vadd.f32 %v5210_v28, %v5198_v36  ;;  %v5215_v39 = vadd.f32 %v5211_v57, %v5199_v15 }
 0x93b   : > { %v5240_v43 = vmul.f32 %v5236_v46, %v5234_v44  ;;  %v5274_v12 = vmul.f32 %v5270_v38, %v5267_v29  ;;  %v5302_v2 = vperm.slane %v11105_v8, 2  ;;  %v5318_v23 = vperm.slane %v11105_v8, 3 }
 0x93c   : > { %v5229_v54 = vadd.f32 %v5225_v42, %v5213_v4  ;;  %v5228_v20 = vadd.f32 %v5224_v60, %v5212_v52  ;;  %v5230_v33 = vadd.f32 %v5226_v0, %v5214_v24  ;;  %v5231_v58 = vadd.f32 %v5227_v45, %v5215_v39 }
 0x93e   : > { %v5245_v56 = vadd.f32 %v5241_v34, %v5229_v54  ;;  %v5244_v22 = vadd.f32 %v5240_v43, %v5228_v20  ;;  %v5246_v35 = vadd.f32 %v5242_v53, %v5230_v33  ;;  %v5247_v6 = vadd.f32 %v5243_v55, %v5231_v58 }
 0x93f   : > { %v5249_v32 = vpop.permute.xlu1 %5248 }
 0x940   : > { %v11112_v63 = vsel %vm1047_vm10, %v5249_v32, %v5251_v27  ;;  %v5278_v37 = vadd.f32 %v5274_v12, %v5245_v56  ;;  %v5299_v28 = vpop.permute.xlu2 %5298 }
 0x941   : > { %v5269_v61 = vperm.slane %v11112_v63, 0  ;;  %v5285_v27 = vperm.slane %v11112_v63, 1  ;;  %v5301_v3 = vperm.slane %v11112_v63, 2  ;;  %v5306_v21 = vmul.f32 %v5302_v2, %v5299_v28 }
 0x942   : > { %v5317_v42 = vperm.slane %v11112_v63, 3 }
 0x943   : > { %v5273_v49 = vmul.f32 %v5269_v61, %v5267_v29  ;;  %v5305_v36 = vmul.f32 %v5301_v3, %v5299_v28 }
 0x945   : > { %v5277_v31 = vadd.f32 %v5273_v49, %v5244_v22 }
 0x947   : > { %v5255_v50 = vpop.permute.xlu1 %5254 }
 0x948   : > { %v11118_v26 = vsel %vm1047_vm10, %v5253_v41, %v5255_v50  ;;  %v11121_v48 = vsel %vm1047_vm10, %v5255_v50, %v5249_v32  ;;  %v5344_v61 = vpop.permute.xlu2 %5343 }
 0x949   : > { %v5271_v51 = vperm.slane %v11118_v26, 0  ;;  %v5272_v25 = vperm.slane %v11121_v48, 0  ;;  %v5287_v62 = vperm.slane %v11118_v26, 1  ;;  %v5288_v9 = vperm.slane %v11121_v48, 1 }
 0x94a   : > { %v5303_v1 = vperm.slane %v11118_v26, 2  ;;  %v5304_v30 = vperm.slane %v11121_v48, 2  ;;  %v5319_v46 = vperm.slane %v11118_v26, 3  ;;  %v5320_v52 = vperm.slane %v11121_v48, 3 }
 0x94b   : > { %v5275_v10 = vmul.f32 %v5271_v51, %v5267_v29  ;;  %v5276_v11 = vmul.f32 %v5272_v25, %v5267_v29 }
 0x94c   : > { %v5307_v15 = vmul.f32 %v5303_v1, %v5299_v28  ;;  %v5308_v4 = vmul.f32 %v5304_v30, %v5299_v28 }
 0x94d   : > { %v5279_v41 = vadd.f32 %v5275_v10, %v5246_v35  ;;  %v5280_v17 = vadd.f32 %v5276_v11, %v5247_v6 }
 0x94f   : > { %v5283_v32 = vpop.permute.xlu1 %5282 }
 0x950   : > { %v5289_v14 = vmul.f32 %v5285_v27, %v5283_v32  ;;  %v5290_v47 = vmul.f32 %v5286_v7, %v5283_v32  ;;  %v5291_v16 = vmul.f32 %v5287_v62, %v5283_v32  ;;  %v5292_v18 = vmul.f32 %v5288_v9, %v5283_v32  ;;  %v5338_v32 = vpop.permute.xlu0 %5337  ;;  %v5376_v22 = vpop.permute.xlu2 %5375 }
 0x952   : > { %v5293_v57 = vadd.f32 %v5289_v14, %v5277_v31  ;;  %v5294_v19 = vadd.f32 %v5290_v47, %v5278_v37  ;;  %v5295_v5 = vadd.f32 %v5291_v16, %v5279_v41  ;;  %v5296_v59 = vadd.f32 %v5292_v18, %v5280_v17 }
 0x954   : > { %v5309_v39 = vadd.f32 %v5305_v36, %v5293_v57  ;;  %v5310_v50 = vadd.f32 %v5306_v21, %v5294_v19  ;;  %v5311_v60 = vadd.f32 %v5307_v15, %v5295_v5  ;;  %v5312_v38 = vadd.f32 %v5308_v4, %v5296_v59 }
 0x958   : > { %v5315_v24 = vpop.permute.xlu1 %5314 }
 0x959   : > { %v5321_v44 = vmul.f32 %v5317_v42, %v5315_v24  ;;  %v5322_v0 = vmul.f32 %v5318_v23, %v5315_v24  ;;  %v5323_v45 = vmul.f32 %v5319_v46, %v5315_v24  ;;  %v5324_v54 = vmul.f32 %v5320_v52, %v5315_v24 }
 0x95b   : > { %v5325_v13 = vadd.f32 %v5321_v44, %v5309_v39  ;;  %v5326_v40 = vadd.f32 %v5322_v0, %v5310_v50  ;;  %v5327_v51 = vadd.f32 %v5323_v45, %v5311_v60  ;;  %v5328_v8 = vadd.f32 %v5324_v54, %v5312_v38 }
 0x95d   : > { %v5329_v25 = vmax.f32 %v5325_v13, 0.0  ;;  %v5330_v63 = vmax.f32 %v5326_v40, 0.0  ;;  %v5331_v34 = vmax.f32 %v5327_v51, 0.0  ;;  %v5332_v26 = vmax.f32 %v5328_v8, 0.0  ;;  %v12272_v51 = vld [vmem:[#allocation35_spill] sm:$0xff] }
 0x95e   : > { %v5640_v8 = vadd.f32 -1.0, %v12272_v51 }
 0x95f   : > { %v5362_v20 = vperm.slane %v5329_v25, 1  ;;  %v5363_v48 = vperm.slane %v5330_v63, 1  ;;  %v5364_v33 = vperm.slane %v5331_v34, 1  ;;  %v5365_v58 = vperm.slane %v5332_v26, 1 }
 0x960   : > { %v5378_v29 = vperm.slane %v5329_v25, 2  ;;  %v5379_v43 = vperm.slane %v5330_v63, 2  ;;  %v5380_v53 = vperm.slane %v5331_v34, 2  ;;  %v5381_v55 = vperm.slane %v5332_v26, 2 }
 0x961   : > { %v5360_v7 = vpop.permute.xlu1 %5359  ;;  %v5346_v49 = vperm.slane %v5329_v25, 0  ;;  %v5347_v27 = vperm.slane %v5330_v63, 0  ;;  %v5349_v56 = vperm.slane %v5332_v26, 0  ;;  %v5348_v10 = vperm.slane %v5331_v34, 0 }
 0x962   : > { %v5366_v11 = vmul.f32 %v5362_v20, %v5360_v7  ;;  %v5367_v62 = vmul.f32 %v5363_v48, %v5360_v7  ;;  %v5368_v9 = vmul.f32 %v5364_v33, %v5360_v7  ;;  %v5369_v12 = vmul.f32 %v5365_v58, %v5360_v7  ;;  %v12274_v20 = vld [vmem:[#allocation14_spill] sm:$0xff]  ;;  %v12275_v58 = vld [vmem:[#allocation39_spill] sm:$0xff] }
 0x963   : > { %v5350_v35 = vmul.f32 %v5346_v49, %v5344_v61  ;;  %v5351_v6 = vmul.f32 %v5347_v27, %v5344_v61  ;;  %v5353_v14 = vmul.f32 %v5349_v56, %v5344_v61  ;;  %v5352_v47 = vmul.f32 %v5348_v10, %v5344_v61 }
 0x964   : > { %v5382_v37 = vmul.f32 %v5378_v29, %v5376_v22  ;;  %v5383_v1 = vmul.f32 %v5379_v43, %v5376_v22  ;;  %v5384_v30 = vmul.f32 %v5380_v53, %v5376_v22  ;;  %v5385_v41 = vmul.f32 %v5381_v55, %v5376_v22 }
 0x965   : > { %v5354_v16 = vadd.f32 %v5350_v35, %v5338_v32  ;;  %v5355_v18 = vadd.f32 %v5351_v6, %v5338_v32  ;;  %v5356_v3 = vadd.f32 %v5352_v47, %v5338_v32  ;;  %v5357_v31 = vadd.f32 %v5353_v14, %v5338_v32 }
 0x966   : > { %v5394_v5 = vperm.slane %v5329_v25, 3  ;;  %v5395_v59 = vperm.slane %v5330_v63, 3  ;;  %v5396_v21 = vperm.slane %v5331_v34, 3  ;;  %v5397_v36 = vperm.slane %v5332_v26, 3  ;;  %v12273_v25 = vld [vmem:[#allocation42_spill] sm:$0xff] }
 0x967   : > { %v5370_v17 = vadd.f32 %v5366_v11, %v5354_v16  ;;  %v5371_v2 = vadd.f32 %v5367_v62, %v5355_v18  ;;  %v5372_v28 = vadd.f32 %v5368_v9, %v5356_v3  ;;  %v5373_v57 = vadd.f32 %v5369_v12, %v5357_v31 }
 0x968   : > { %v5641_v63 = vadd.f32 -1.0, %v12273_v25  ;;  %v5642_v48 = vadd.f32 -1.0, %v12274_v20  ;;  %v5639_v7 = vadd.f32 -1.0, %v12275_v58  ;;  %v5491_v55 = vmax.f32 %v5640_v8, 0.0 }
 0x969   : > { %v5386_v15 = vadd.f32 %v5382_v37, %v5370_v17  ;;  %v5387_v4 = vadd.f32 %v5383_v1, %v5371_v2  ;;  %v5388_v23 = vadd.f32 %v5384_v30, %v5372_v28  ;;  %v5389_v42 = vadd.f32 %v5385_v41, %v5373_v57 }
 0x96a   : > { %v5392_v19 = vpop.permute.xlu1 %5391  ;;  %v5492_v49 = vmax.f32 %v5641_v63, 0.0  ;;  %v5493_v27 = vmax.f32 %v5642_v48, 0.0  ;;  %v5490_v56 = vmax.f32 %v5639_v7, 0.0  ;;  %v5483_v10 = vmax.f32 %v12272_v51, 0.0 }
 0x96b   : > { %v5398_v46 = vmul.f32 %v5394_v5, %v5392_v19  ;;  %v5399_v52 = vmul.f32 %v5395_v59, %v5392_v19  ;;  %v5400_v24 = vmul.f32 %v5396_v21, %v5392_v19  ;;  %v5401_v39 = vmul.f32 %v5397_v36, %v5392_v19 }
 0x96c   : > { %v5484_v11 = vmax.f32 %v12273_v25, 0.0  ;;  %v5485_v62 = vmax.f32 %v12274_v20, 0.0  ;;  %v5482_v32 = vmax.f32 %v12275_v58, 0.0  ;;  %v11156_v35 = vsub.f32 %v5483_v10, %v5491_v55 }
 0x96d   : > { %v5402_v50 = vadd.f32 %v5398_v46, %v5386_v15  ;;  %v5403_v60 = vadd.f32 %v5399_v52, %v5387_v4  ;;  %v5404_v38 = vadd.f32 %v5400_v24, %v5388_v23  ;;  %v5405_v44 = vadd.f32 %v5401_v39, %v5389_v42 }
 0x96e   : > { %v11158_v6 = vsub.f32 %v5484_v11, %v5492_v49  ;;  %v11160_v47 = vsub.f32 %v5485_v62, %v5493_v27  ;;  %v11162_v18 = vsub.f32 %v5482_v32, %v5490_v56 }
 0x96f   : > { %v5635_v0 = vmul.f32 -1.442695, %v5402_v50  ;;  %v5636_v45 = vmul.f32 -1.442695, %v5403_v60  ;;  %v5637_v54 = vmul.f32 -1.442695, %v5404_v38 }
 0x970   : > { %v5638_v61 = vmul.f32 -1.442695, %v5405_v44  ;;  %v5509_v49 = vsub.f32 1.0, %v11160_v47 }
 0x971   : > { %5991 = vpow2.f32 %v5635_v0 }
 0x972   : > { %5993 = vpow2.f32 %v5636_v45 }
 0x973   : > { %5995 = vpow2.f32 %v5637_v54 }
 0x974   : > { %5997 = vpow2.f32 %v5638_v61 }
 0x977   : > { %v5992_v13 = vpop.eup %5991 }
 0x978   : > { %v5994_v40 = vpop.eup %5993  ;;  %v5418_v34 = vadd.f32 1.0, %v5992_v13 }
 0x979   : > { %v5996_v26 = vpop.eup %5995  ;;  %v5419_v33 = vadd.f32 1.0, %v5994_v40 }
 0x97a   : > { %v5998_v29 = vpop.eup %5997  ;;  %v11146_v43 = vadd.f32 1.0, %v5996_v26  ;;  %5999 = vrcp.f32 %v5418_v34  ;;  %v5431_v9 = vand.u32 2147483647, %v5418_v34  ;;  %v5433_v12 = vand.u32 2147483648, %v5418_v34 }
 0x97b   : > { %v11148_v53 = vadd.f32 1.0, %v5998_v29  ;;  %6001 = vrcp.f32 %v5419_v33  ;;  %vm5427_vm10 = vweird.f32 %v5418_v34  ;;  %vm5442_vm11 = vweird.f32 %v5419_v33 }
 0x97c   : > { %6003 = vrcp.f32 %v11146_v43  ;;  %v5446_v37 = vand.u32 2147483647, %v5419_v33  ;;  %v5448_v1 = vand.u32 2147483648, %v5419_v33  ;;  %vm11164_vm12 = vcmp.eq.f32.partialorder %v5431_v9, 8.507059e+37 }
 0x97d   : > { %6005 = vrcp.f32 %v11148_v53  ;;  %v5434_v17 = vor.u32 1.1754944e-38, %v5433_v12  ;;  %vm5457_vm15 = vweird.f32 %v11146_v43  ;;  %v5461_v19 = vand.u32 2147483647, %v11146_v43 }
 0x97e   : > { %v5463_v5 = vand.u32 2147483648, %v11146_v43  ;;  %vm11173_vm7 = vcmp.eq.f32.partialorder %v5446_v37, 8.507059e+37  ;;  %v5449_v23 = vor.u32 1.1754944e-38, %v5448_v1  ;;  %vm5472_vm13 = vweird.f32 %v11148_v53 }
 0x97f   : > { %v5476_v39 = vand.u32 2147483647, %v11148_v53  ;;  %v5478_v50 = vand.u32 2147483648, %v11148_v53  ;;  %vm5462_vm4 = vcmp.eq.f32.partialorder %v5461_v19, 8.507059e+37  ;;  %v5508_v29 = vsub.f32 1.0, %v11158_v6 }
 0x980   : > { %v6000_v22 = vpop.eup %5999  ;;  %v5464_v54 = vor.u32 1.1754944e-38, %v5463_v5 }
 0x981   : > { %v6002_v14 = vpop.eup %6001  ;;  %v5423_v16 = vmul.f32 %v6000_v22, %v5418_v34  ;;  %vm5428_vm6 = vweird.f32 %v6000_v22  ;;  %v5479_v25 = vor.u32 1.1754944e-38, %v5478_v50  ;;  %v5506_v34 = vsub.f32 1.0, %v11162_v18 }
 0x982   : > { %v6004_v3 = vpop.eup %6003  ;;  %v5438_v31 = vmul.f32 %v6002_v14, %v5419_v33  ;;  %vm5443_vm5 = vweird.f32 %v6002_v14  ;;  %vm5429_vm9 = vmor %vm5427_vm10, %vm5428_vm6  ;;  %vm5477_vm1 = vcmp.eq.f32.partialorder %v5476_v39, 8.507059e+37  ;;  %v5507_v33 = vsub.f32 1.0, %v11156_v35 }
 0x983   : > { %v5424_v30 = vsub.f32 1.0, %v5423_v16  ;;  %v5453_v2 = vmul.f32 %v6004_v3, %v11146_v43  ;;  %v6006_v28 = vpop.eup %6005  ;;  %vm5458_vm8 = vweird.f32 %v6004_v3  ;;  %vm5444_vm14 = vmor %vm5442_vm11, %vm5443_vm5  ;;  %vm5564_vm10 = vcmask 1043456  }
 0x984   : > { %v5439_v57 = vsub.f32 1.0, %v5438_v31  ;;  %v5468_v36 = vmul.f32 %v6006_v28, %v11148_v53  ;;  %vm5473_vm0 = vweird.f32 %v6006_v28  ;;  %vm5459_vm2 = vmor %vm5457_vm15, %vm5458_vm8 }
 0x985   : > { %v5425_v59 = vmul.f32 %v6000_v22, %v5424_v30  ;;  %v5454_v21 = vsub.f32 1.0, %v5453_v2  ;;  %vm5474_vm3 = vmor %vm5472_vm13, %vm5473_vm0 }
 0x986   : > { %v5440_v15 = vmul.f32 %v6002_v14, %v5439_v57  ;;  %v5469_v52 = vsub.f32 1.0, %v5468_v36 }
 0x987   : > { %v5426_v42 = vadd.f32 %v6000_v22, %v5425_v59  ;;  %v5455_v46 = vmul.f32 %v6004_v3, %v5454_v21 }
 0x988   : > { %v5441_v24 = vadd.f32 %v6002_v14, %v5440_v15  ;;  %v5470_v44 = vmul.f32 %v6006_v28, %v5469_v52 }
 0x989   : > { %v5430_v60 = vsel %vm5429_vm9, %v6000_v22, %v5426_v42  ;;  %v5456_v38 = vadd.f32 %v6004_v3, %v5455_v46 }
 0x98a   : > { %v5435_v0 = vsel %vm11164_vm12, %v5434_v17, %v5430_v60  ;;  %v5445_v45 = vsel %vm5444_vm14, %v6002_v14, %v5441_v24  ;;  %v5471_v40 = vadd.f32 %v6006_v28, %v5470_v44 }
 0x98b   : > { %v5450_v61 = vsel %vm11173_vm7, %v5449_v23, %v5445_v45  ;;  %v5460_v13 = vsel %vm5459_vm2, %v6004_v3, %v5456_v38  ;;  %v5498_v51 = vperm.slane %v5435_v0, 0  ;;  %v5518_v62 = vperm.slane %v5435_v0, 1 }
 0x98c   : > { %v5465_v8 = vsel %vm5462_vm4, %v5464_v54, %v5460_v13  ;;  %v5499_v63 = vperm.slane %v5450_v61, 0  ;;  %v5475_v26 = vsel %vm5474_vm3, %v6006_v28, %v5471_v40  ;;  %v5519_v12 = vperm.slane %v5450_v61, 1 }
 0x98d   : > { %v5500_v20 = vperm.slane %v5465_v8, 0  ;;  %v5502_v48 = vmul.f32 %v5498_v51, %v11162_v18  ;;  %v5480_v58 = vsel %vm5477_vm1, %v5479_v25, %v5475_v26  ;;  %v5520_v32 = vperm.slane %v5465_v8, 1 }
 0x98e   : > { %v5503_v7 = vmul.f32 %v5499_v63, %v11156_v35  ;;  %v5501_v43 = vperm.slane %v5480_v58, 0  ;;  %v5521_v31 = vperm.slane %v5480_v58, 1  ;;  %v5539_v21 = vperm.slane %v5450_v61, 2 }
 0x98f   : > { %v5504_v53 = vmul.f32 %v5500_v20, %v11158_v6  ;;  %v5510_v55 = vmul.f32 %v5506_v34, %v5502_v48  ;;  %v5540_v36 = vperm.slane %v5465_v8, 2  ;;  %v5541_v52 = vperm.slane %v5480_v58, 2 }
 0x990   : > { %v5511_v27 = vmul.f32 %v5507_v33, %v5503_v7  ;;  %v5505_v56 = vmul.f32 %v5501_v43, %v11160_v47 }
 0x991   : > { %v5512_v10 = vmul.f32 %v5508_v29, %v5504_v53  ;;  %v5514_v11 = vadd.f32 %v5510_v55, %v11162_v18  ;;  %v5538_v18 = vperm.slane %v5435_v0, 2 }
 0x992   : > { %v5515_v9 = vadd.f32 %v5511_v27, %v11156_v35  ;;  %v5513_v22 = vmul.f32 %v5509_v49, %v5505_v56 }
 0x993   : > { %v5516_v14 = vadd.f32 %v5512_v10, %v11158_v6  ;;  %v5522_v16 = vmul.f32 %v5518_v62, %v5514_v11  ;;  %v5526_v3 = vsub.f32 1.0, %v5514_v11 }
 0x994   : > { %v5523_v37 = vmul.f32 %v5519_v12, %v5515_v9  ;;  %v5527_v1 = vsub.f32 1.0, %v5515_v9  ;;  %v5517_v30 = vadd.f32 %v5513_v22, %v11160_v47 }
 0x995   : > { %v5524_v41 = vmul.f32 %v5520_v32, %v5516_v14  ;;  %v5528_v17 = vsub.f32 1.0, %v5516_v14  ;;  %v5530_v2 = vmul.f32 %v5526_v3, %v5522_v16 }
 0x996   : > { %v5531_v28 = vmul.f32 %v5527_v1, %v5523_v37  ;;  %v5525_v57 = vmul.f32 %v5521_v31, %v5517_v30  ;;  %v5529_v19 = vsub.f32 1.0, %v5517_v30 }
 0x997   : > { %v5532_v35 = vmul.f32 %v5528_v17, %v5524_v41  ;;  %v5534_v5 = vadd.f32 %v5530_v2, %v5514_v11 }
 0x998   : > { %v5535_v59 = vadd.f32 %v5531_v28, %v5515_v9  ;;  %v5533_v6 = vmul.f32 %v5529_v19, %v5525_v57 }
 0x999   : > { %v5536_v15 = vadd.f32 %v5532_v35, %v5516_v14  ;;  %v5542_v4 = vmul.f32 %v5538_v18, %v5534_v5  ;;  %v5546_v23 = vsub.f32 1.0, %v5534_v5 }
 0x99a   : > { %v5543_v42 = vmul.f32 %v5539_v21, %v5535_v59  ;;  %v5547_v46 = vsub.f32 1.0, %v5535_v59  ;;  %v5537_v47 = vadd.f32 %v5533_v6, %v5517_v30 }
 0x99b   : > { %v5544_v24 = vmul.f32 %v5540_v36, %v5536_v15  ;;  %v5548_v39 = vsub.f32 1.0, %v5536_v15  ;;  %v5550_v50 = vmul.f32 %v5546_v23, %v5542_v4 }
 0x99c   : > { %v5551_v60 = vmul.f32 %v5547_v46, %v5543_v42  ;;  %v5545_v38 = vmul.f32 %v5541_v52, %v5537_v47  ;;  %v5549_v44 = vsub.f32 1.0, %v5537_v47 }
 0x99d   : > { %v5552_v45 = vmul.f32 %v5548_v39, %v5544_v24  ;;  %v5554_v61 = vadd.f32 %v5550_v50, %v5534_v5 }
 0x99e   : > { %v5555_v0 = vadd.f32 %v5551_v60, %v5535_v59  ;;  %v5553_v54 = vmul.f32 %v5549_v44, %v5545_v38 }
 0x99f   : > { %v5556_v8 = vadd.f32 %v5552_v45, %v5536_v15 }
 0x9a0   : > { %v5562_v13 = vrot.slane %v5555_v0, 4  ;;  %v5557_v40 = vadd.f32 %v5553_v54, %v5537_v47 }
 0x9a2   : > { %v5565_v51 = vsel %vm5564_vm10, %v5554_v61, %v5562_v13  ;;  %v5563_v25 = vrot.slane %v5557_v40, 4 }
 0x9a3   : > { %5569 = vst [vmem:[%s170_s28] sm:$0xff] %v5565_v51 }
 0x9a4   : > { %v5566_v63 = vsel %vm5564_vm10, %v5556_v8, %v5563_v25 }
 0x9a5   : > { %5570 = vst [vmem:[%s170_s28 + $0x8] sm:$0xff] %v5566_v63 }
 0x9a6 PF: > { %s13_s12 = sadd.s32 1, %s6017_s12  }
 0x9a7   : > { %p10_p4 = scmp.ge.s32.totalorder %s13_s12, 4  }
 0x9a9   :  { %12 = sbr.rel (!%p10_p4) target bundleno = 1 (0x1), region = 89 }

</bundles_post_ra>
